<compile_context>
chip_gen: v5e
topology: v5e:2x2
jax: 0.10.0
libtpu: 0.0.40
codegen_flags: <defaults>
</compile_context>

<pallas_src>
import math

import jax
import jax.numpy as jnp
from jax.experimental import pallas as pl
from jax.experimental.pallas import tpu as pltpu


def build_positional_encoding(d_model: int, max_len: int = 5000) -> jnp.ndarray:
    """Deterministic sinusoidal table, matching the PyTorch __init__ (f32)."""
    position = jnp.arange(max_len, dtype=jnp.float32)[:, None]            # (max_len, 1)
    div_term = jnp.exp(
        jnp.arange(0, d_model, 2, dtype=jnp.float32)
        * (-math.log(10000.0) / d_model)
    )                                                                     # (ceil(d/2),)
    angles = position * div_term                                          # (max_len, ceil(d/2))
    pe = jnp.zeros((max_len, d_model), dtype=jnp.float32)
    pe = pe.at[:, 0::2].set(jnp.sin(angles))
    # Slice so odd d_model also works (PyTorch impl would error there).
    pe = pe.at[:, 1::2].set(jnp.cos(angles[:, : d_model // 2]))
    return pe                                                             # (max_len, d_model)


def _add_pe_kernel(x_ref, pe_ref, o_ref):
    # x_ref, pe_ref, o_ref are all (tR, C) tiles -> plain VPU add, no broadcast.
    o_ref[...] = x_ref[...] + pe_ref[...]


def _choose_row_tile(R: int, C: int, itemsize: int, target_bytes: int = 4 << 20):
    """Rows per block targeting ~4 MiB tiles.

    Prefers a divisor of R (no ragged last block); rounds to a dtype-aware
    sublane multiple (8 f32, 16 bf16, 32 int8/fp8).
    """
    mult = max(8, (8 * 4) // max(1, itemsize))
    max_rows = max(1, target_bytes // (C * itemsize))
    if max_rows >= R:
        return R                                   # full extent -> always legal
    # Largest divisor of R that is <= max_rows and a multiple of `mult`.
    for d in range(min(max_rows, R), 0, -1):
        if R % d == 0 and d % mult == 0:
            return d
    # No good divisor: largest multiple of `mult` <= max_rows (ragged tail OK).
    return max(mult, (max_rows // mult) * mult)


def positional_encoding_forward(x: jnp.ndarray, pe: jnp.ndarray) -> jnp.ndarray:
    """x: (B, S, D); pe: (max_len, D). Returns x + pe[None, :S, :]."""
    B, S, D = x.shape
    max_len, d_model = pe.shape
    assert D == d_model, f"d_model mismatch: x has {D}, pe has {d_model}"
    assert S <= max_len, f"seq_len {S} exceeds max_len {max_len}"

    # Match input dtype (bf16-friendly). Note: differs from PyTorch's f32 pe
    # buffer by at most 1 ulp of x.dtype for sub-f32 inputs.
    pe_slice = pe[:S, :].astype(x.dtype)

    itemsize = jnp.dtype(x.dtype).itemsize
    total_bytes = B * S * D * itemsize

    # Tiny-shape bypass: launch + per-grid-step overhead dominates below ~1 MiB.
    if total_bytes < (1 << 20):
        return x + pe_slice[None, :, :]

    # Lane-dense flattened view of the per-batch (S*D) slab, padded up to a
    # multiple of 128 so the output last dim is always lane-dense.
    T = S * D
    T_pad = ((T + 127) // 128) * 128
    x_flat = x.reshape(B, T)
    pe_flat = pe_slice.reshape(T)
    if T_pad != T:
        x_flat = jnp.pad(x_flat, ((0, 0), (0, T_pad - T)))
        pe_flat = jnp.pad(pe_flat, (0, T_pad - T))

    C = 128
    for cand in (2048, 1024, 512, 256, 128):
        if T_pad % cand == 0:
            C = cand
            break
    R = T_pad // C
    x3 = x_flat.reshape(B, R, C)
    pe2 = pe_flat.reshape(R, C)

    tR = _choose_row_tile(R, C, itemsize, target_bytes=4 << 20)
    tile_bytes = tR * C * itemsize
    # 3 streams (x, pe, out) x 2 buffers x tile, plus headroom; also raises
    # v5e's 16 MiB scoped default.  Capped well under v7x's 64 MiB physical.
    vmem_limit = int(min(48 << 20, max(16 << 20, 6 * tile_bytes + (8 << 20))))

    grid = (pl.cdiv(R, tR), B)                    # batch innermost -> pe block reused

    out = pl.pallas_call(
        _add_pe_kernel,
        out_shape=jax.ShapeDtypeStruct((B, R, C), x.dtype),
        grid_spec=pltpu.PrefetchScalarGridSpec(
            num_scalar_prefetch=0,
            grid=grid,
            in_specs=[
                # x tile: (1, tR, C) with the batch dim squeezed -> kernel sees (tR, C)
                pl.BlockSpec((pl.Squeezed(), tR, C), lambda r, b: (b, r, 0)),
                # pe tile: same row tile for every batch step (no re-fetch across b)
                pl.BlockSpec((tR, C), lambda r, b: (r, 0)),
            ],
            out_specs=pl.BlockSpec((pl.Squeezed(), tR, C), lambda r, b: (b, r, 0)),
        ),
        compiler_params=pltpu.CompilerParams(
            dimension_semantics=("parallel", "parallel"),
            vmem_limit_bytes=vmem_limit,
        ),
    )(x3, pe2)

    out = out.reshape(B, T_pad)
    if T_pad != T:
        out = out[:, :T]
    return out.reshape(B, S, D)


def _check(B, S, D, max_len, key, dtype=jnp.float32, atol=1e-6):
    x = jax.random.normal(key, (B, S, D), dtype=jnp.float32).astype(dtype)
    pe = build_positional_encoding(D, max_len)
    out = jax.block_until_ready(positional_encoding_forward(x, pe))
    ref = x + pe[None, :S, :].astype(dtype)
    assert out.shape == (B, S, D)
    assert out.dtype == dtype
    assert jnp.allclose(out.astype(jnp.float32), ref.astype(jnp.float32), atol=atol), (
        f"mismatch vs reference for {(B, S, D, dtype)}"
    )
    return out


if __name__ == "__main__":
    key = jax.random.PRNGKey(0)
    k0, k1, k2, k3 = jax.random.split(key, 4)

    # Headline small case consistent with the module: batch=2, seq=8, d_model=32.
    # (takes the tiny-shape bypass — launch-overhead dominated otherwise)
    _check(2, 8, 32, 64, k0)

    # Lane-dense multi-tile Pallas path: several row tiles per batch.
    _check(2, 4096, 512, 4096, k1)

    # Pad path: S*D not a multiple of 128 (exercises the padded lane-dense layout).
    _check(4, 999, 129, 1024, k2)

    # bf16 path (dtype-aware sublane rounding, pe cast to bf16 in wrapper).
    _check(2, 1024, 512, 2048, k3, dtype=jnp.bfloat16, atol=1e-2)

    print("KERNEL_OK")
</pallas_src>

<mosaic_0001>
module attributes {stable_mosaic.version = 11 : i64} {
  func.func @_add_pe_kernel(%arg0: i32, %arg1: i32, %arg2: memref<1x512x2048xf32, #tpu.memory_space<vmem>>, %arg3: memref<512x2048xf32, #tpu.memory_space<vmem>>, %arg4: memref<1x512x2048xf32, #tpu.memory_space<vmem>>) attributes {dimension_semantics = [#tpu.dimension_semantics<parallel>, #tpu.dimension_semantics<parallel>], iteration_bounds = array<i64: 2, 2>, scalar_prefetch = 0 : i64, scratch_operands = 0 : i64, tpu.core_type = #tpu.core_type<tc>, window_params = [{transform_indices = @transform_0, window_bounds = array<i64: 1, 512, 2048>}, {transform_indices = @transform_1, window_bounds = array<i64: 512, 2048>}, {transform_indices = @transform_2, window_bounds = array<i64: 1, 512, 2048>}]} {
    %c0 = arith.constant 0 : index
    %c0_0 = arith.constant 0 : index
    %c0_1 = arith.constant 0 : index
    %0 = vector.load %arg2[%c0, %c0_0, %c0_1] : memref<1x512x2048xf32, #tpu.memory_space<vmem>>, vector<1x512x2048xf32>
    %1 = vector.shape_cast %0 : vector<1x512x2048xf32> to vector<512x2048xf32>
    %c0_2 = arith.constant 0 : index
    %c0_3 = arith.constant 0 : index
    %2 = vector.load %arg3[%c0_2, %c0_3] : memref<512x2048xf32, #tpu.memory_space<vmem>>, vector<512x2048xf32>
    %3 = arith.addf %1, %2 : vector<512x2048xf32>
    %c0_4 = arith.constant 0 : index
    %c0_5 = arith.constant 0 : index
    %c0_6 = arith.constant 0 : index
    %4 = vector.load %arg4[%c0_4, %c0_5, %c0_6] : memref<1x512x2048xf32, #tpu.memory_space<vmem>>, vector<1x512x2048xf32>
    %5 = vector.shape_cast %4 : vector<1x512x2048xf32> to vector<512x2048xf32>
    %6 = vector.shape_cast %3 : vector<512x2048xf32> to vector<1x512x2048xf32>
    tpu.vector_store %arg4[%c0_4, %c0_5, %c0_6], %6 {strides = array<i32>} : memref<1x512x2048xf32, #tpu.memory_space<vmem>>, vector<1x512x2048xf32>,
    return
  }
  func.func @transform_0(%arg0: i32, %arg1: i32) -> (i32, i32, i32) {
    %c0_i32 = arith.constant 0 : i32
    %c0_i32_0 = arith.constant 0 : i32
    return %arg1, %arg0, %c0_i32 : i32, i32, i32
  }
  func.func @transform_1(%arg0: i32, %arg1: i32) -> (i32, i32) {
    %c0_i32 = arith.constant 0 : i32
    %c0_i32_0 = arith.constant 0 : i32
    return %arg0, %c0_i32 : i32, i32
  }
  func.func @transform_2(%arg0: i32, %arg1: i32) -> (i32, i32, i32) {
    %c0_i32 = arith.constant 0 : i32
    %c0_i32_0 = arith.constant 0 : i32
    return %arg1, %arg0, %c0_i32 : i32, i32, i32
  }
}

</mosaic_0001>

<bundles_post_ra>
// kernel: tpu_custom_call.1
= control target key start
LH: loop header
LB: loop body
LE: loop exit
PB: predicated region body
PF: predicated region fallthrough
CT: control target
= control target key end

     0   :  { %s8098_s0 = inlined_call_operand.hbm [shape: f32[2,1024,2048], index: 0, kind: input, shape index: {}]   ;;  %s8099_s1 = inlined_call_operand.hbm [shape: f32[1024,2048], index: 1, kind: input, shape index: {}]   ;;  %s8100_s2 = inlined_call_operand.hbm [shape: f32[2,1024,2048], index: 2, kind: output, shape index: {}]  }
   0x1   :  { %8105 = sst [smem:[#allocation14_spill]] %s8098_s0 }
   0x2   :  { %7 = vsyncpa [#allocation3], 0 }
   0x3   :  { %9 = vsyncpa [#allocation3 + $0x1], 0 }
   0x4   :  { %10 = vsyncpa [#allocation6], 0 }
   0x5   :  { %12 = vsyncpa [#allocation6 + $0x1], 0 }
   0x6   :  { %13 = vsyncpa [#allocation4], 0 }
   0x7   :  { %15 = vsyncpa [#allocation4 + $0x1], 0  ;;  %s4803_s9 = smov 0   ;;  %s4805_s10 = smov 0  }
   0x8   :  { %s4807_s11 = smov 0   ;;  %s4809_s12 = smov 0  }
   0x9   :  { %s4811_s13 = smov 0   ;;  %s4813_s14 = smov 0  }
   0xa   :  { %s4815_s15 = smov 0   ;;  %s4817_s16 = smov 0  }
   0xb   :  { %s4819_s17 = smov 0   ;;  %s4821_s18 = smov 0  }
   0xc   :  { %s4823_s19 = smov 0  }
   0xd LB: > { %s4457_s20 = sadd.s32 4294967295, %s4782_s19   ;;  %s4458_s21 = sadd.s32 4294967294, %s4782_s19   ;;  %s4782_s19 = sphi %s4823_s19, %s21_s19   ;;  %s4778_s18 = sphi %s4821_s18, %s8130_s18   ;;  %s4774_s17 = sphi %s4819_s17, %s8129_s17   ;;  %s4770_s16 = sphi %s4817_s16, %s8128_s16   ;;  %s4766_s15 = sphi %s4815_s15, %s8127_s15   ;;  %s4762_s14 = sphi %s4813_s14, %s8126_s14   ;;  %s4758_s13 = sphi %s4811_s13, %s8125_s13   ;;  %s4754_s12 = sphi %s4809_s12, %s8124_s12   ;;  %s4750_s11 = sphi %s4807_s11, %s8123_s11   ;;  %s4746_s10 = sphi %s4805_s10, %s8122_s10   ;;  %s4742_s9 = sphi %s4803_s9, %s8121_s9  }
   0xe   : > { %s30_s22 = sadd.s32 1, %s4774_s17  ;;  %s33_s23 = sadd.s32 1, %s4778_s18 }
   0xf   : > { %p31_p0 = scmp.ge.s32.totalorder %s30_s22, 2  ;;  %s42_s24 = sadd.s32 1, %s4762_s14 }
  0x10   : > { %p49_p1 = scmp.ne.s32.totalorder %s4762_s14, %s4758_s13  ;;  %p50_p2 = scmp.eq.s32.totalorder %s4782_s19, 0 }
  0x11   : > { %s8132_s22 = smov (%p31_p0, %s30_s22), 0  ;;  %s8134_s23 = smov (!%p31_p0, %s33_s23), %s4778_s18 }
  0x12   : > { %8106 = sst [smem:[#allocation11_spill]] %s8132_s22  ;;  %s37_s25 = ssub.s32 %s4774_s17, %s8132_s22 }
  0x13   : > { %p4873_p3 = por %p50_p2, %p49_p1  ;;  %p35_p4 = scmp.ge.s32.totalorder %s8134_s23, 2 }
  0x14   : > { %p55_p5 = scmp.ne.s32.totalorder %s4758_s13, %s4754_s12  ;;  %p4879_p6 = scmp.eq.s32.totalorder %s4457_s20, 0 }
  0x15   : > { %p107_p7 = scmp.eq.s32.totalorder %s4457_s20, 3  ;;  %s8136_s23 = smov (%p35_p4, %s8134_s23), 0 }
  0x16   : > { %8109 = sst [smem:[#allocation12_spill]] %s8136_s23  ;;  %p4887_p8 = por %p4879_p6, %p55_p5 }
  0x17   : > { %p4891_p9 = por %p107_p7, %p49_p1  ;;  %s4897_s30 = ssub.s32 %s4778_s18, %s8136_s23 }
  0x18   : > { %p113_p10 = scmp.eq.s32.totalorder %s4458_s21, 3  ;;  %s39_s3 = sor.u32 %s4897_s30, %s37_s25 }
  0x19   : > { %p66_p11 = scmp.eq.s32.totalorder %s4897_s30, 0  ;;  %p40_p12 = scmp.eq.s32.totalorder %s39_s3, 0 }
  0x1a   : > { %p4901_p13 = por %p113_p10, %p55_p5  ;;  %p8104_p0 = scmp.lt.s32.totalorder %s4782_s19, 4 }
  0x1b   : > { %s4907_s5 = scalar_select %p40_p12, %s4762_s14, %s42_s24  }
  0x1c   : > { %s8112_s4 = scalar_select %p4901_p13, 1, 0 }
  0x1d   : > { %s133_s6 = sand.u32 1, %s4762_s14   ;;  %s4481_s7 = sshll.u32 %s4778_s18, 10 }
  0x1e   : > { %8113 = sst [smem:[#allocation13_spill]] %s8112_s4  ;;  %s4461_s8 = sshll.u32 %s133_s6, 13 }
  0x1f   : > { %s4464_s20 = sshll.u32 %s4774_s17, 11  ;;  %s137_s21 = scalar_lea.vmem [#allocation2], %s4461_s8 }
  0x20   : > { %s143_s23 = sadd.s32 %s4481_s7, %s4464_s20  ;;  %s148_s25 = sshll.u32 %s137_s21, 4  ;;  %s149_s25 = int_to_ptr.vmem [resolvable:$true] %s148_s25 }
  0x21   : > { %s4465_s3 = sshll.u32 %s143_s23, 3  ;;  %s8114_s0 = sld [smem:[#allocation14_spill]] }
  0x22   : > { %p4492_p1 = pnand %p8104_p0, %p4873_p3  ;;  %p4470_p4 = scmp.ge.s32.totalorder %s4782_s19, 1 }
  0x23   : > { %s134_s8 = scalar_lea.sflag [#allocation3], %s133_s6  ;;  %s4784_s20 = smov 2048  }
  0x24   : > { %s4785_s23 = smov 128   ;;  %p179_p5 = scmp.lt.s32.totalorder %s4782_s19, 5 }
  0x25   : > { %s68_s22 = sadd.s32 1, %s4750_s11  ;;  %p75_p10 = scmp.ne.s32.totalorder %s4750_s11, %s4746_s10 }
  0x26   : > { %p4921_p7 = pnand %p4470_p4, %p179_p5  ;;  %p81_p12 = scmp.ne.s32.totalorder %s4746_s10, %s4742_s9 }
  0x27   : > { %s145_s24 = scalar_lea.hbm %s8114_s0, %s4465_s3  ;;  %p77_p3 = por %p75_p10, %p50_p2 }
  0x28   : > { %s146_s7 = sshll.u32 %s145_s24, 4  ;;  %s158_s4 = sand.u32 1, %s4750_s11   ;;  %s147_s7 = int_to_ptr.hbm [resolvable:$true] %s146_s7 }
  0x29   : > { %4494 = dma.hbm_to_vmem [thread:$0]  (!%p4492_p1), %s147_s7, 131072, %s149_s25, %s134_s8, %s4784_s20, %s4784_s20, %s4785_s23  }
  0x2a   : > { %s4931_s26 = scalar_select %p66_p11, %s4750_s11, %s68_s22  }
  0x2b   : > { %s4483_s3 = sshll.u32 %s4778_s18, 13  ;;  %p4941_p0 = por %p81_p12, %p4879_p6 }
  0x2c   : > { %s4466_s25 = sshll.u32 %s158_s4, 13  ;;  %s168_s8 = scalar_lea.hbm %s8099_s1, %s4483_s3 }
  0x2d   : > { %s169_s0 = sshll.u32 %s168_s8, 4  ;;  %s162_s30 = scalar_lea.vmem [#allocation5], %s4466_s25  ;;  %s170_s0 = int_to_ptr.hbm [resolvable:$true] %s169_s0 }
  0x2e   : > { %s171_s22 = sshll.u32 %s162_s30, 4  ;;  %p8117_p11 = scmp.lt.s32.totalorder %s4782_s19, 4  ;;  %s172_s22 = int_to_ptr.vmem [resolvable:$true] %s171_s22 }
  0x2f   : > { %s159_s9 = scalar_lea.sflag [#allocation6], %s158_s4  ;;  %183 = sbr.rel (%p4921_p7) target bundleno = 1088 (0x440), region = 28 }
  0x30   : > { %p4495_p2 = pnand %p8117_p11, %p77_p3  ;;  %s4953_s27 = sand.u32 (!%p4921_p7), 1, %s4758_s13  }
  0x31   : > { %s4471_s24 = sshll.u32 (!%p4921_p7), %s4953_s27, 13  ;;  %s186_s3 = scalar_lea.sflag (!%p4921_p7), [#allocation3], %s4953_s27 }
  0x32   : > { %4497 = dma.hbm_to_vmem [thread:$0]  (!%p4495_p2), %s170_s0, 131072, %s172_s22, %s159_s9, %s4784_s20, %s4784_s20, %s4785_s23  }
  0x33   : > { %s4957_s7 = scalar_lea.vmem (!%p4921_p7), [#allocation2], %s4471_s24 }
  0x34   : > { %4729 = dma.done.wait (%p4887_p8), %s186_s3, 131072  }
  0x35   : > { %4731 = vsyncadd (%p4887_p8), %s186_s3, 4294836224  ;;  %s195_s0 = sand.u32 1, %s4746_s10  }
  0x36   : > { %s4472_s20 = sshll.u32 %s195_s0, 13  ;;  %s196_s23 = scalar_lea.sflag [#allocation6], %s195_s0 }
  0x37   : > { %s4964_s21 = scalar_lea.vmem [#allocation5], %s4472_s20 }
  0x38   : > { %4733 = dma.done.wait (%p4941_p0), %s196_s23, 131072  }
  0x39   : > { %4735 = vsyncadd (%p4941_p0), %s196_s23, 4294836224  ;;  %v229_v0 = vld [vmem:[%s4957_s7] sm:$0xff]  ;;  %v230_v2 = vld [vmem:[%s4957_s7 + $0x8] sm:$0xff]  ;;  %s4979_s28 = scalar_lea.vmem [#allocation7], %s4471_s24  ;;  %s4484_s4 = sshll.u32 %s4770_s16, 10 }
  0x3a   : > { %v1253_v1 = vld [vmem:[%s4964_s21] sm:$0xff]  ;;  %v1254_v4 = vld [vmem:[%s4964_s21 + $0x8] sm:$0xff]  ;;  %v231_v5 = vld [vmem:[%s4957_s7 + $0x10] sm:$0xff]  ;;  %s4477_s6 = sshll.u32 %s4766_s15, 11  ;;  %s4341_s22 = sshll.u32 %s4979_s28, 4  ;;  %s4342_s22 = int_to_ptr.vmem [resolvable:$true] %s4341_s22 }
  0x3b   : > { %v2277_v3 = vadd.f32 %v1253_v1, %v229_v0  ;;  %v1255_v6 = vld [vmem:[%s4964_s21 + $0x10] sm:$0xff]  ;;  %v2278_v7 = vadd.f32 %v1254_v4, %v230_v2  ;;  %v232_v9 = vld [vmem:[%s4957_s7 + $0x18] sm:$0xff]  ;;  %v233_v11 = vld [vmem:[%s4957_s7 + $0x20] sm:$0xff]  ;;  %s4338_s15 = sadd.s32 %s4484_s4, %s4477_s6  ;;  %s4326_s24 = scalar_lea.sflag [#allocation4], %s4953_s27 }
  0x3c   : > { %v2279_v8 = vadd.f32 %v1255_v6, %v231_v5  ;;  %v1256_v10 = vld [vmem:[%s4964_s21 + $0x18] sm:$0xff]  ;;  %v1257_v13 = vld [vmem:[%s4964_s21 + $0x20] sm:$0xff]  ;;  %v234_v14 = vld [vmem:[%s4957_s7 + $0x28] sm:$0xff]  ;;  %s4478_s16 = sshll.u32 %s4338_s15, 3  ;;  %s4676_s23 = scalar_lea.hbm %s8100_s2, 32768 }
  0x3d   : > { %3301 = vst [vmem:[%s4979_s28] sm:$0xff] %v2277_v3  ;;  %v2280_v12 = vadd.f32 %v1256_v10, %v232_v9  ;;  %v1258_v15 = vld [vmem:[%s4964_s21 + $0x28] sm:$0xff]  ;;  %v2281_v16 = vadd.f32 %v1257_v13, %v233_v11  ;;  %v235_v18 = vld [vmem:[%s4957_s7 + $0x30] sm:$0xff]  ;;  %v236_v20 = vld [vmem:[%s4957_s7 + $0x38] sm:$0xff]  ;;  %s4340_s30 = scalar_lea.hbm %s8100_s2, %s4478_s16 }
  0x3e   : > { %3302 = vst [vmem:[%s4979_s28 + $0x8] sm:$0xff] %v2278_v7  ;;  %v2282_v17 = vadd.f32 %v1258_v15, %v234_v14  ;;  %v1259_v19 = vld [vmem:[%s4964_s21 + $0x30] sm:$0xff]  ;;  %v1260_v22 = vld [vmem:[%s4964_s21 + $0x38] sm:$0xff]  ;;  %v237_v23 = vld [vmem:[%s4957_s7 + $0x40] sm:$0xff]  ;;  %s4343_s9 = sshll.u32 %s4340_s30, 4  ;;  %s4344_s9 = int_to_ptr.hbm [resolvable:$true] %s4343_s9 }
  0x3f   : > { %3303 = vst [vmem:[%s4979_s28 + $0x10] sm:$0xff] %v2279_v8  ;;  %v2283_v21 = vadd.f32 %v1259_v19, %v235_v18  ;;  %v1261_v24 = vld [vmem:[%s4964_s21 + $0x40] sm:$0xff]  ;;  %v2284_v25 = vadd.f32 %v1260_v22, %v236_v20  ;;  %v238_v26 = vld [vmem:[%s4957_s7 + $0x48] sm:$0xff]  ;;  %v239_v28 = vld [vmem:[%s4957_s7 + $0x50] sm:$0xff]  ;;  %s4670_s3 = sshra.s32 %s4344_s9, 4  ;;  %s4671_s3 = int_to_ptr.hbm [resolvable:$true] %s4670_s3 }
  0x40   : > { %3304 = vst [vmem:[%s4979_s28 + $0x18] sm:$0xff] %v2280_v12  ;;  %v1262_v27 = vld [vmem:[%s4964_s21 + $0x48] sm:$0xff]  ;;  %v2285_v29 = vadd.f32 %v1261_v24, %v237_v23  ;;  %v1263_v30 = vld [vmem:[%s4964_s21 + $0x50] sm:$0xff]  ;;  %v240_v31 = vld [vmem:[%s4957_s7 + $0x58] sm:$0xff]  ;;  %p4677_p1 = scmp.lt.s32.totalorder %s4671_s3, %s8100_s2 }
  0x41   : > { %3305 = vst [vmem:[%s4979_s28 + $0x20] sm:$0xff] %v2281_v16  ;;  %v1264_v32 = vld [vmem:[%s4964_s21 + $0x58] sm:$0xff]  ;;  %v2286_v33 = vadd.f32 %v1262_v27, %v238_v26  ;;  %v241_v34 = vld [vmem:[%s4957_s7 + $0x60] sm:$0xff]  ;;  %v2287_v36 = vadd.f32 %v1263_v30, %v239_v28  ;;  %v242_v37 = vld [vmem:[%s4957_s7 + $0x68] sm:$0xff] }
  0x42   : > { %3306 = vst [vmem:[%s4979_s28 + $0x28] sm:$0xff] %v2282_v17  ;;  %v1265_v35 = vld [vmem:[%s4964_s21 + $0x60] sm:$0xff]  ;;  %v1266_v38 = vld [vmem:[%s4964_s21 + $0x68] sm:$0xff]  ;;  %v2288_v39 = vadd.f32 %v1264_v32, %v240_v31  ;;  %v243_v40 = vld [vmem:[%s4957_s7 + $0x70] sm:$0xff] }
  0x43   : > { %3307 = vst [vmem:[%s4979_s28 + $0x30] sm:$0xff] %v2283_v21  ;;  %v1267_v41 = vld [vmem:[%s4964_s21 + $0x70] sm:$0xff]  ;;  %v2289_v42 = vadd.f32 %v1265_v35, %v241_v34  ;;  %v244_v43 = vld [vmem:[%s4957_s7 + $0x78] sm:$0xff]  ;;  %v2290_v45 = vadd.f32 %v1266_v38, %v242_v37  ;;  %v245_v46 = vld [vmem:[%s4957_s7 + $0x80] sm:$0xff] }
  0x44   : > { %3308 = vst [vmem:[%s4979_s28 + $0x38] sm:$0xff] %v2284_v25  ;;  %v1268_v44 = vld [vmem:[%s4964_s21 + $0x78] sm:$0xff]  ;;  %v1269_v47 = vld [vmem:[%s4964_s21 + $0x80] sm:$0xff]  ;;  %v2291_v48 = vadd.f32 %v1267_v41, %v243_v40  ;;  %v246_v49 = vld [vmem:[%s4957_s7 + $0x88] sm:$0xff] }
  0x45   : > { %3309 = vst [vmem:[%s4979_s28 + $0x40] sm:$0xff] %v2285_v29  ;;  %v1270_v50 = vld [vmem:[%s4964_s21 + $0x88] sm:$0xff]  ;;  %v2292_v51 = vadd.f32 %v1268_v44, %v244_v43  ;;  %v247_v52 = vld [vmem:[%s4957_s7 + $0x90] sm:$0xff]  ;;  %v2293_v54 = vadd.f32 %v1269_v47, %v245_v46  ;;  %v248_v55 = vld [vmem:[%s4957_s7 + $0x98] sm:$0xff] }
  0x46   : > { %3310 = vst [vmem:[%s4979_s28 + $0x48] sm:$0xff] %v2286_v33  ;;  %v1271_v53 = vld [vmem:[%s4964_s21 + $0x90] sm:$0xff]  ;;  %v1272_v56 = vld [vmem:[%s4964_s21 + $0x98] sm:$0xff]  ;;  %v2294_v57 = vadd.f32 %v1270_v50, %v246_v49  ;;  %v249_v58 = vld [vmem:[%s4957_s7 + $0xa0] sm:$0xff] }
  0x47   : > { %3311 = vst [vmem:[%s4979_s28 + $0x50] sm:$0xff] %v2287_v36  ;;  %v1273_v59 = vld [vmem:[%s4964_s21 + $0xa0] sm:$0xff]  ;;  %v2295_v60 = vadd.f32 %v1271_v53, %v247_v52  ;;  %v250_v61 = vld [vmem:[%s4957_s7 + $0xa8] sm:$0xff]  ;;  %v2296_v63 = vadd.f32 %v1272_v56, %v248_v55  ;;  %v251_v0 = vld [vmem:[%s4957_s7 + $0xb0] sm:$0xff] }
  0x48   : > { %3312 = vst [vmem:[%s4979_s28 + $0x58] sm:$0xff] %v2288_v39  ;;  %v1274_v62 = vld [vmem:[%s4964_s21 + $0xa8] sm:$0xff]  ;;  %v1275_v1 = vld [vmem:[%s4964_s21 + $0xb0] sm:$0xff]  ;;  %v2297_v2 = vadd.f32 %v1273_v59, %v249_v58  ;;  %v252_v3 = vld [vmem:[%s4957_s7 + $0xb8] sm:$0xff] }
  0x49   : > { %3313 = vst [vmem:[%s4979_s28 + $0x60] sm:$0xff] %v2289_v42  ;;  %v1276_v4 = vld [vmem:[%s4964_s21 + $0xb8] sm:$0xff]  ;;  %v2298_v5 = vadd.f32 %v1274_v62, %v250_v61  ;;  %v253_v6 = vld [vmem:[%s4957_s7 + $0xc0] sm:$0xff]  ;;  %v2299_v8 = vadd.f32 %v1275_v1, %v251_v0  ;;  %v254_v9 = vld [vmem:[%s4957_s7 + $0xc8] sm:$0xff] }
  0x4a   : > { %3314 = vst [vmem:[%s4979_s28 + $0x68] sm:$0xff] %v2290_v45  ;;  %v1277_v7 = vld [vmem:[%s4964_s21 + $0xc0] sm:$0xff]  ;;  %v1278_v10 = vld [vmem:[%s4964_s21 + $0xc8] sm:$0xff]  ;;  %v2300_v11 = vadd.f32 %v1276_v4, %v252_v3  ;;  %v255_v12 = vld [vmem:[%s4957_s7 + $0xd0] sm:$0xff] }
  0x4b   : > { %3315 = vst [vmem:[%s4979_s28 + $0x70] sm:$0xff] %v2291_v48  ;;  %v1279_v13 = vld [vmem:[%s4964_s21 + $0xd0] sm:$0xff]  ;;  %v2301_v14 = vadd.f32 %v1277_v7, %v253_v6  ;;  %v256_v15 = vld [vmem:[%s4957_s7 + $0xd8] sm:$0xff]  ;;  %v2302_v17 = vadd.f32 %v1278_v10, %v254_v9  ;;  %v257_v18 = vld [vmem:[%s4957_s7 + $0xe0] sm:$0xff] }
  0x4c   : > { %3316 = vst [vmem:[%s4979_s28 + $0x78] sm:$0xff] %v2292_v51  ;;  %v1280_v16 = vld [vmem:[%s4964_s21 + $0xd8] sm:$0xff]  ;;  %v1281_v19 = vld [vmem:[%s4964_s21 + $0xe0] sm:$0xff]  ;;  %v2303_v20 = vadd.f32 %v1279_v13, %v255_v12  ;;  %v258_v21 = vld [vmem:[%s4957_s7 + $0xe8] sm:$0xff] }
  0x4d   : > { %3317 = vst [vmem:[%s4979_s28 + $0x80] sm:$0xff] %v2293_v54  ;;  %v1282_v22 = vld [vmem:[%s4964_s21 + $0xe8] sm:$0xff]  ;;  %v2304_v23 = vadd.f32 %v1280_v16, %v256_v15  ;;  %v259_v24 = vld [vmem:[%s4957_s7 + $0xf0] sm:$0xff]  ;;  %v2305_v26 = vadd.f32 %v1281_v19, %v257_v18  ;;  %v260_v27 = vld [vmem:[%s4957_s7 + $0xf8] sm:$0xff] }
  0x4e   : > { %3318 = vst [vmem:[%s4979_s28 + $0x88] sm:$0xff] %v2294_v57  ;;  %v1283_v25 = vld [vmem:[%s4964_s21 + $0xf0] sm:$0xff]  ;;  %v1284_v28 = vld [vmem:[%s4964_s21 + $0xf8] sm:$0xff]  ;;  %v2306_v29 = vadd.f32 %v1282_v22, %v258_v21  ;;  %v261_v30 = vld [vmem:[%s4957_s7 + $0x100] sm:$0xff] }
  0x4f   : > { %3319 = vst [vmem:[%s4979_s28 + $0x90] sm:$0xff] %v2295_v60  ;;  %v1285_v31 = vld [vmem:[%s4964_s21 + $0x100] sm:$0xff]  ;;  %v2307_v32 = vadd.f32 %v1283_v25, %v259_v24  ;;  %v262_v33 = vld [vmem:[%s4957_s7 + $0x108] sm:$0xff]  ;;  %v2308_v35 = vadd.f32 %v1284_v28, %v260_v27  ;;  %v263_v36 = vld [vmem:[%s4957_s7 + $0x110] sm:$0xff] }
  0x50   : > { %3320 = vst [vmem:[%s4979_s28 + $0x98] sm:$0xff] %v2296_v63  ;;  %v1286_v34 = vld [vmem:[%s4964_s21 + $0x108] sm:$0xff]  ;;  %v1287_v37 = vld [vmem:[%s4964_s21 + $0x110] sm:$0xff]  ;;  %v2309_v38 = vadd.f32 %v1285_v31, %v261_v30  ;;  %v264_v39 = vld [vmem:[%s4957_s7 + $0x118] sm:$0xff] }
  0x51   : > { %3321 = vst [vmem:[%s4979_s28 + $0xa0] sm:$0xff] %v2297_v2  ;;  %v1288_v40 = vld [vmem:[%s4964_s21 + $0x118] sm:$0xff]  ;;  %v2310_v41 = vadd.f32 %v1286_v34, %v262_v33  ;;  %v265_v42 = vld [vmem:[%s4957_s7 + $0x120] sm:$0xff]  ;;  %v2311_v44 = vadd.f32 %v1287_v37, %v263_v36  ;;  %v266_v45 = vld [vmem:[%s4957_s7 + $0x128] sm:$0xff] }
  0x52   : > { %3322 = vst [vmem:[%s4979_s28 + $0xa8] sm:$0xff] %v2298_v5  ;;  %v1289_v43 = vld [vmem:[%s4964_s21 + $0x120] sm:$0xff]  ;;  %v1290_v46 = vld [vmem:[%s4964_s21 + $0x128] sm:$0xff]  ;;  %v2312_v47 = vadd.f32 %v1288_v40, %v264_v39  ;;  %v267_v48 = vld [vmem:[%s4957_s7 + $0x130] sm:$0xff] }
  0x53   : > { %3323 = vst [vmem:[%s4979_s28 + $0xb0] sm:$0xff] %v2299_v8  ;;  %v1291_v49 = vld [vmem:[%s4964_s21 + $0x130] sm:$0xff]  ;;  %v2313_v50 = vadd.f32 %v1289_v43, %v265_v42  ;;  %v268_v51 = vld [vmem:[%s4957_s7 + $0x138] sm:$0xff]  ;;  %v2314_v53 = vadd.f32 %v1290_v46, %v266_v45  ;;  %v269_v54 = vld [vmem:[%s4957_s7 + $0x140] sm:$0xff] }
  0x54   : > { %3324 = vst [vmem:[%s4979_s28 + $0xb8] sm:$0xff] %v2300_v11  ;;  %v1292_v52 = vld [vmem:[%s4964_s21 + $0x138] sm:$0xff]  ;;  %v1293_v55 = vld [vmem:[%s4964_s21 + $0x140] sm:$0xff]  ;;  %v2315_v56 = vadd.f32 %v1291_v49, %v267_v48  ;;  %v270_v57 = vld [vmem:[%s4957_s7 + $0x148] sm:$0xff] }
  0x55   : > { %3325 = vst [vmem:[%s4979_s28 + $0xc0] sm:$0xff] %v2301_v14  ;;  %v1294_v58 = vld [vmem:[%s4964_s21 + $0x148] sm:$0xff]  ;;  %v2316_v59 = vadd.f32 %v1292_v52, %v268_v51  ;;  %v271_v60 = vld [vmem:[%s4957_s7 + $0x150] sm:$0xff]  ;;  %v2317_v62 = vadd.f32 %v1293_v55, %v269_v54  ;;  %v272_v63 = vld [vmem:[%s4957_s7 + $0x158] sm:$0xff] }
  0x56   : > { %3326 = vst [vmem:[%s4979_s28 + $0xc8] sm:$0xff] %v2302_v17  ;;  %v1295_v61 = vld [vmem:[%s4964_s21 + $0x150] sm:$0xff]  ;;  %v1296_v0 = vld [vmem:[%s4964_s21 + $0x158] sm:$0xff]  ;;  %v2318_v1 = vadd.f32 %v1294_v58, %v270_v57  ;;  %v273_v2 = vld [vmem:[%s4957_s7 + $0x160] sm:$0xff] }
  0x57   : > { %3327 = vst [vmem:[%s4979_s28 + $0xd0] sm:$0xff] %v2303_v20  ;;  %v1297_v3 = vld [vmem:[%s4964_s21 + $0x160] sm:$0xff]  ;;  %v2319_v4 = vadd.f32 %v1295_v61, %v271_v60  ;;  %v274_v5 = vld [vmem:[%s4957_s7 + $0x168] sm:$0xff]  ;;  %v2320_v7 = vadd.f32 %v1296_v0, %v272_v63  ;;  %v275_v8 = vld [vmem:[%s4957_s7 + $0x170] sm:$0xff] }
  0x58   : > { %3328 = vst [vmem:[%s4979_s28 + $0xd8] sm:$0xff] %v2304_v23  ;;  %v1298_v6 = vld [vmem:[%s4964_s21 + $0x168] sm:$0xff]  ;;  %v1299_v9 = vld [vmem:[%s4964_s21 + $0x170] sm:$0xff]  ;;  %v2321_v10 = vadd.f32 %v1297_v3, %v273_v2  ;;  %v276_v11 = vld [vmem:[%s4957_s7 + $0x178] sm:$0xff] }
  0x59   : > { %3329 = vst [vmem:[%s4979_s28 + $0xe0] sm:$0xff] %v2305_v26  ;;  %v1300_v12 = vld [vmem:[%s4964_s21 + $0x178] sm:$0xff]  ;;  %v2322_v13 = vadd.f32 %v1298_v6, %v274_v5  ;;  %v277_v14 = vld [vmem:[%s4957_s7 + $0x180] sm:$0xff]  ;;  %v2323_v16 = vadd.f32 %v1299_v9, %v275_v8  ;;  %v278_v17 = vld [vmem:[%s4957_s7 + $0x188] sm:$0xff] }
  0x5a   : > { %3330 = vst [vmem:[%s4979_s28 + $0xe8] sm:$0xff] %v2306_v29  ;;  %v1301_v15 = vld [vmem:[%s4964_s21 + $0x180] sm:$0xff]  ;;  %v1302_v18 = vld [vmem:[%s4964_s21 + $0x188] sm:$0xff]  ;;  %v2324_v19 = vadd.f32 %v1300_v12, %v276_v11  ;;  %v279_v20 = vld [vmem:[%s4957_s7 + $0x190] sm:$0xff] }
  0x5b   : > { %3331 = vst [vmem:[%s4979_s28 + $0xf0] sm:$0xff] %v2307_v32  ;;  %v1303_v21 = vld [vmem:[%s4964_s21 + $0x190] sm:$0xff]  ;;  %v2325_v22 = vadd.f32 %v1301_v15, %v277_v14  ;;  %v280_v23 = vld [vmem:[%s4957_s7 + $0x198] sm:$0xff]  ;;  %v2326_v25 = vadd.f32 %v1302_v18, %v278_v17  ;;  %v281_v26 = vld [vmem:[%s4957_s7 + $0x1a0] sm:$0xff] }
  0x5c   : > { %3332 = vst [vmem:[%s4979_s28 + $0xf8] sm:$0xff] %v2308_v35  ;;  %v1304_v24 = vld [vmem:[%s4964_s21 + $0x198] sm:$0xff]  ;;  %v1305_v27 = vld [vmem:[%s4964_s21 + $0x1a0] sm:$0xff]  ;;  %v2327_v28 = vadd.f32 %v1303_v21, %v279_v20  ;;  %v282_v29 = vld [vmem:[%s4957_s7 + $0x1a8] sm:$0xff] }
  0x5d   : > { %3333 = vst [vmem:[%s4979_s28 + $0x100] sm:$0xff] %v2309_v38  ;;  %v1306_v30 = vld [vmem:[%s4964_s21 + $0x1a8] sm:$0xff]  ;;  %v2328_v31 = vadd.f32 %v1304_v24, %v280_v23  ;;  %v283_v32 = vld [vmem:[%s4957_s7 + $0x1b0] sm:$0xff]  ;;  %v2329_v34 = vadd.f32 %v1305_v27, %v281_v26  ;;  %v284_v35 = vld [vmem:[%s4957_s7 + $0x1b8] sm:$0xff] }
  0x5e   : > { %3334 = vst [vmem:[%s4979_s28 + $0x108] sm:$0xff] %v2310_v41  ;;  %v1307_v33 = vld [vmem:[%s4964_s21 + $0x1b0] sm:$0xff]  ;;  %v1308_v36 = vld [vmem:[%s4964_s21 + $0x1b8] sm:$0xff]  ;;  %v2330_v37 = vadd.f32 %v1306_v30, %v282_v29  ;;  %v285_v38 = vld [vmem:[%s4957_s7 + $0x1c0] sm:$0xff] }
  0x5f   : > { %3335 = vst [vmem:[%s4979_s28 + $0x110] sm:$0xff] %v2311_v44  ;;  %v1309_v39 = vld [vmem:[%s4964_s21 + $0x1c0] sm:$0xff]  ;;  %v2331_v40 = vadd.f32 %v1307_v33, %v283_v32  ;;  %v286_v41 = vld [vmem:[%s4957_s7 + $0x1c8] sm:$0xff]  ;;  %v2332_v43 = vadd.f32 %v1308_v36, %v284_v35  ;;  %v287_v44 = vld [vmem:[%s4957_s7 + $0x1d0] sm:$0xff] }
  0x60   : > { %3336 = vst [vmem:[%s4979_s28 + $0x118] sm:$0xff] %v2312_v47  ;;  %v1310_v42 = vld [vmem:[%s4964_s21 + $0x1c8] sm:$0xff]  ;;  %v1311_v45 = vld [vmem:[%s4964_s21 + $0x1d0] sm:$0xff]  ;;  %v2333_v46 = vadd.f32 %v1309_v39, %v285_v38  ;;  %v288_v47 = vld [vmem:[%s4957_s7 + $0x1d8] sm:$0xff] }
  0x61   : > { %3337 = vst [vmem:[%s4979_s28 + $0x120] sm:$0xff] %v2313_v50  ;;  %v1312_v48 = vld [vmem:[%s4964_s21 + $0x1d8] sm:$0xff]  ;;  %v2334_v49 = vadd.f32 %v1310_v42, %v286_v41  ;;  %v289_v50 = vld [vmem:[%s4957_s7 + $0x1e0] sm:$0xff]  ;;  %v2335_v52 = vadd.f32 %v1311_v45, %v287_v44  ;;  %v1314_v54 = vld [vmem:[%s4964_s21 + $0x1e8] sm:$0xff] }
  0x62   : > { %3338 = vst [vmem:[%s4979_s28 + $0x128] sm:$0xff] %v2314_v53  ;;  %v1313_v51 = vld [vmem:[%s4964_s21 + $0x1e0] sm:$0xff]  ;;  %v290_v53 = vld [vmem:[%s4957_s7 + $0x1e8] sm:$0xff]  ;;  %v2336_v55 = vadd.f32 %v1312_v48, %v288_v47  ;;  %v1315_v57 = vld [vmem:[%s4964_s21 + $0x1f0] sm:$0xff] }
  0x63   : > { %3339 = vst [vmem:[%s4979_s28 + $0x130] sm:$0xff] %v2315_v56  ;;  %v291_v56 = vld [vmem:[%s4957_s7 + $0x1f0] sm:$0xff]  ;;  %v2337_v58 = vadd.f32 %v1313_v51, %v289_v50  ;;  %v1316_v60 = vld [vmem:[%s4964_s21 + $0x1f8] sm:$0xff]  ;;  %v2338_v61 = vadd.f32 %v1314_v54, %v290_v53  ;;  %v1317_v63 = vld [vmem:[%s4964_s21 + $0x200] sm:$0xff] }
  0x64   : > { %3340 = vst [vmem:[%s4979_s28 + $0x138] sm:$0xff] %v2316_v59  ;;  %v292_v59 = vld [vmem:[%s4957_s7 + $0x1f8] sm:$0xff]  ;;  %v2339_v0 = vadd.f32 %v1315_v57, %v291_v56  ;;  %v1318_v2 = vld [vmem:[%s4964_s21 + $0x208] sm:$0xff]  ;;  %v1319_v5 = vld [vmem:[%s4964_s21 + $0x210] sm:$0xff] }
  0x65   : > { %3341 = vst [vmem:[%s4979_s28 + $0x140] sm:$0xff] %v2317_v62  ;;  %v293_v62 = vld [vmem:[%s4957_s7 + $0x200] sm:$0xff]  ;;  %v2340_v3 = vadd.f32 %v1316_v60, %v292_v59  ;;  %v1320_v8 = vld [vmem:[%s4964_s21 + $0x218] sm:$0xff]  ;;  %v1322_v14 = vld [vmem:[%s4964_s21 + $0x228] sm:$0xff] }
  0x66   : > { %3342 = vst [vmem:[%s4979_s28 + $0x148] sm:$0xff] %v2318_v1  ;;  %v294_v1 = vld [vmem:[%s4957_s7 + $0x208] sm:$0xff]  ;;  %v2341_v6 = vadd.f32 %v1317_v63, %v293_v62  ;;  %v1321_v11 = vld [vmem:[%s4964_s21 + $0x220] sm:$0xff]  ;;  %v1323_v17 = vld [vmem:[%s4964_s21 + $0x230] sm:$0xff] }
  0x67   : > { %3343 = vst [vmem:[%s4979_s28 + $0x150] sm:$0xff] %v2319_v4  ;;  %v295_v4 = vld [vmem:[%s4957_s7 + $0x210] sm:$0xff]  ;;  %v2342_v9 = vadd.f32 %v1318_v2, %v294_v1  ;;  %v1324_v20 = vld [vmem:[%s4964_s21 + $0x238] sm:$0xff]  ;;  %v1325_v23 = vld [vmem:[%s4964_s21 + $0x240] sm:$0xff] }
  0x68   : > { %3344 = vst [vmem:[%s4979_s28 + $0x158] sm:$0xff] %v2320_v7  ;;  %v296_v7 = vld [vmem:[%s4957_s7 + $0x218] sm:$0xff]  ;;  %v2343_v12 = vadd.f32 %v1319_v5, %v295_v4  ;;  %v1326_v26 = vld [vmem:[%s4964_s21 + $0x248] sm:$0xff]  ;;  %v1327_v29 = vld [vmem:[%s4964_s21 + $0x250] sm:$0xff] }
  0x69   : > { %3345 = vst [vmem:[%s4979_s28 + $0x160] sm:$0xff] %v2321_v10  ;;  %v297_v10 = vld [vmem:[%s4957_s7 + $0x220] sm:$0xff]  ;;  %v2344_v15 = vadd.f32 %v1320_v8, %v296_v7  ;;  %v1328_v32 = vld [vmem:[%s4964_s21 + $0x258] sm:$0xff]  ;;  %v1330_v38 = vld [vmem:[%s4964_s21 + $0x268] sm:$0xff] }
  0x6a   : > { %3346 = vst [vmem:[%s4979_s28 + $0x168] sm:$0xff] %v2322_v13  ;;  %v298_v13 = vld [vmem:[%s4957_s7 + $0x228] sm:$0xff]  ;;  %v2345_v18 = vadd.f32 %v1321_v11, %v297_v10  ;;  %v1329_v35 = vld [vmem:[%s4964_s21 + $0x260] sm:$0xff]  ;;  %v1331_v41 = vld [vmem:[%s4964_s21 + $0x270] sm:$0xff] }
  0x6b   : > { %3347 = vst [vmem:[%s4979_s28 + $0x170] sm:$0xff] %v2323_v16  ;;  %v299_v16 = vld [vmem:[%s4957_s7 + $0x230] sm:$0xff]  ;;  %v2346_v21 = vadd.f32 %v1322_v14, %v298_v13  ;;  %v1332_v44 = vld [vmem:[%s4964_s21 + $0x278] sm:$0xff]  ;;  %v1333_v47 = vld [vmem:[%s4964_s21 + $0x280] sm:$0xff] }
  0x6c   : > { %3348 = vst [vmem:[%s4979_s28 + $0x178] sm:$0xff] %v2324_v19  ;;  %v300_v19 = vld [vmem:[%s4957_s7 + $0x238] sm:$0xff]  ;;  %v2347_v24 = vadd.f32 %v1323_v17, %v299_v16  ;;  %v1334_v50 = vld [vmem:[%s4964_s21 + $0x288] sm:$0xff]  ;;  %v1335_v53 = vld [vmem:[%s4964_s21 + $0x290] sm:$0xff] }
  0x6d   : > { %3349 = vst [vmem:[%s4979_s28 + $0x180] sm:$0xff] %v2325_v22  ;;  %v301_v22 = vld [vmem:[%s4957_s7 + $0x240] sm:$0xff]  ;;  %v2348_v27 = vadd.f32 %v1324_v20, %v300_v19  ;;  %v1336_v56 = vld [vmem:[%s4964_s21 + $0x298] sm:$0xff]  ;;  %v1338_v62 = vld [vmem:[%s4964_s21 + $0x2a8] sm:$0xff] }
  0x6e   : > { %3350 = vst [vmem:[%s4979_s28 + $0x188] sm:$0xff] %v2326_v25  ;;  %v302_v25 = vld [vmem:[%s4957_s7 + $0x248] sm:$0xff]  ;;  %v2349_v30 = vadd.f32 %v1325_v23, %v301_v22  ;;  %v1337_v59 = vld [vmem:[%s4964_s21 + $0x2a0] sm:$0xff]  ;;  %v1339_v1 = vld [vmem:[%s4964_s21 + $0x2b0] sm:$0xff] }
  0x6f   : > { %3351 = vst [vmem:[%s4979_s28 + $0x190] sm:$0xff] %v2327_v28  ;;  %v303_v28 = vld [vmem:[%s4957_s7 + $0x250] sm:$0xff]  ;;  %v2350_v33 = vadd.f32 %v1326_v26, %v302_v25  ;;  %v1340_v4 = vld [vmem:[%s4964_s21 + $0x2b8] sm:$0xff]  ;;  %v1341_v7 = vld [vmem:[%s4964_s21 + $0x2c0] sm:$0xff] }
  0x70   : > { %3352 = vst [vmem:[%s4979_s28 + $0x198] sm:$0xff] %v2328_v31  ;;  %v304_v31 = vld [vmem:[%s4957_s7 + $0x258] sm:$0xff]  ;;  %v2351_v36 = vadd.f32 %v1327_v29, %v303_v28  ;;  %v1342_v10 = vld [vmem:[%s4964_s21 + $0x2c8] sm:$0xff]  ;;  %v1343_v13 = vld [vmem:[%s4964_s21 + $0x2d0] sm:$0xff] }
  0x71   : > { %3353 = vst [vmem:[%s4979_s28 + $0x1a0] sm:$0xff] %v2329_v34  ;;  %v305_v34 = vld [vmem:[%s4957_s7 + $0x260] sm:$0xff]  ;;  %v2352_v39 = vadd.f32 %v1328_v32, %v304_v31  ;;  %v1344_v16 = vld [vmem:[%s4964_s21 + $0x2d8] sm:$0xff]  ;;  %v1346_v22 = vld [vmem:[%s4964_s21 + $0x2e8] sm:$0xff] }
  0x72   : > { %3354 = vst [vmem:[%s4979_s28 + $0x1a8] sm:$0xff] %v2330_v37  ;;  %v306_v37 = vld [vmem:[%s4957_s7 + $0x268] sm:$0xff]  ;;  %v2353_v42 = vadd.f32 %v1329_v35, %v305_v34  ;;  %v1345_v19 = vld [vmem:[%s4964_s21 + $0x2e0] sm:$0xff]  ;;  %v1347_v25 = vld [vmem:[%s4964_s21 + $0x2f0] sm:$0xff] }
  0x73   : > { %3355 = vst [vmem:[%s4979_s28 + $0x1b0] sm:$0xff] %v2331_v40  ;;  %v307_v40 = vld [vmem:[%s4957_s7 + $0x270] sm:$0xff]  ;;  %v2354_v45 = vadd.f32 %v1330_v38, %v306_v37  ;;  %v1348_v28 = vld [vmem:[%s4964_s21 + $0x2f8] sm:$0xff]  ;;  %v1349_v31 = vld [vmem:[%s4964_s21 + $0x300] sm:$0xff] }
  0x74   : > { %3356 = vst [vmem:[%s4979_s28 + $0x1b8] sm:$0xff] %v2332_v43  ;;  %v308_v43 = vld [vmem:[%s4957_s7 + $0x278] sm:$0xff]  ;;  %v2355_v48 = vadd.f32 %v1331_v41, %v307_v40  ;;  %v1350_v34 = vld [vmem:[%s4964_s21 + $0x308] sm:$0xff]  ;;  %v1351_v37 = vld [vmem:[%s4964_s21 + $0x310] sm:$0xff] }
  0x75   : > { %3357 = vst [vmem:[%s4979_s28 + $0x1c0] sm:$0xff] %v2333_v46  ;;  %v309_v46 = vld [vmem:[%s4957_s7 + $0x280] sm:$0xff]  ;;  %v2356_v51 = vadd.f32 %v1332_v44, %v308_v43  ;;  %v1352_v40 = vld [vmem:[%s4964_s21 + $0x318] sm:$0xff] }
  0x76   : > { %3358 = vst [vmem:[%s4979_s28 + $0x1c8] sm:$0xff] %v2334_v49  ;;  %v310_v49 = vld [vmem:[%s4957_s7 + $0x288] sm:$0xff]  ;;  %v2357_v54 = vadd.f32 %v1333_v47, %v309_v46  ;;  %v1353_v43 = vld [vmem:[%s4964_s21 + $0x320] sm:$0xff] }
  0x77   : > { %3359 = vst [vmem:[%s4979_s28 + $0x1d0] sm:$0xff] %v2335_v52  ;;  %v311_v52 = vld [vmem:[%s4957_s7 + $0x290] sm:$0xff]  ;;  %v2358_v57 = vadd.f32 %v1334_v50, %v310_v49  ;;  %v1354_v46 = vld [vmem:[%s4964_s21 + $0x328] sm:$0xff] }
  0x78   : > { %3360 = vst [vmem:[%s4979_s28 + $0x1d8] sm:$0xff] %v2336_v55  ;;  %v312_v55 = vld [vmem:[%s4957_s7 + $0x298] sm:$0xff]  ;;  %v2359_v60 = vadd.f32 %v1335_v53, %v311_v52  ;;  %v1355_v49 = vld [vmem:[%s4964_s21 + $0x330] sm:$0xff] }
  0x79   : > { %3361 = vst [vmem:[%s4979_s28 + $0x1e0] sm:$0xff] %v2337_v58  ;;  %v313_v58 = vld [vmem:[%s4957_s7 + $0x2a0] sm:$0xff]  ;;  %v2360_v63 = vadd.f32 %v1336_v56, %v312_v55  ;;  %v1356_v52 = vld [vmem:[%s4964_s21 + $0x338] sm:$0xff] }
  0x7a   : > { %3362 = vst [vmem:[%s4979_s28 + $0x1e8] sm:$0xff] %v2338_v61  ;;  %v314_v61 = vld [vmem:[%s4957_s7 + $0x2a8] sm:$0xff]  ;;  %v2361_v2 = vadd.f32 %v1337_v59, %v313_v58  ;;  %v1357_v55 = vld [vmem:[%s4964_s21 + $0x340] sm:$0xff] }
  0x7b   : > { %3363 = vst [vmem:[%s4979_s28 + $0x1f0] sm:$0xff] %v2339_v0  ;;  %v315_v0 = vld [vmem:[%s4957_s7 + $0x2b0] sm:$0xff]  ;;  %v2362_v5 = vadd.f32 %v1338_v62, %v314_v61  ;;  %v1358_v58 = vld [vmem:[%s4964_s21 + $0x348] sm:$0xff] }
  0x7c   : > { %3364 = vst [vmem:[%s4979_s28 + $0x1f8] sm:$0xff] %v2340_v3  ;;  %v316_v3 = vld [vmem:[%s4957_s7 + $0x2b8] sm:$0xff]  ;;  %v2363_v8 = vadd.f32 %v1339_v1, %v315_v0  ;;  %v1359_v61 = vld [vmem:[%s4964_s21 + $0x350] sm:$0xff] }
  0x7d   : > { %3365 = vst [vmem:[%s4979_s28 + $0x200] sm:$0xff] %v2341_v6  ;;  %v317_v6 = vld [vmem:[%s4957_s7 + $0x2c0] sm:$0xff]  ;;  %v2364_v11 = vadd.f32 %v1340_v4, %v316_v3  ;;  %v1360_v0 = vld [vmem:[%s4964_s21 + $0x358] sm:$0xff] }
  0x7e   : > { %3366 = vst [vmem:[%s4979_s28 + $0x208] sm:$0xff] %v2342_v9  ;;  %v318_v9 = vld [vmem:[%s4957_s7 + $0x2c8] sm:$0xff]  ;;  %v2365_v14 = vadd.f32 %v1341_v7, %v317_v6  ;;  %v1361_v3 = vld [vmem:[%s4964_s21 + $0x360] sm:$0xff] }
  0x7f   : > { %3367 = vst [vmem:[%s4979_s28 + $0x210] sm:$0xff] %v2343_v12  ;;  %v319_v12 = vld [vmem:[%s4957_s7 + $0x2d0] sm:$0xff]  ;;  %v2366_v17 = vadd.f32 %v1342_v10, %v318_v9  ;;  %v1362_v6 = vld [vmem:[%s4964_s21 + $0x368] sm:$0xff] }
  0x80   : > { %3368 = vst [vmem:[%s4979_s28 + $0x218] sm:$0xff] %v2344_v15  ;;  %v320_v15 = vld [vmem:[%s4957_s7 + $0x2d8] sm:$0xff]  ;;  %v2367_v20 = vadd.f32 %v1343_v13, %v319_v12  ;;  %v1363_v9 = vld [vmem:[%s4964_s21 + $0x370] sm:$0xff] }
  0x81   : > { %3369 = vst [vmem:[%s4979_s28 + $0x220] sm:$0xff] %v2345_v18  ;;  %v321_v18 = vld [vmem:[%s4957_s7 + $0x2e0] sm:$0xff]  ;;  %v2368_v23 = vadd.f32 %v1344_v16, %v320_v15  ;;  %v1364_v12 = vld [vmem:[%s4964_s21 + $0x378] sm:$0xff] }
  0x82   : > { %3370 = vst [vmem:[%s4979_s28 + $0x228] sm:$0xff] %v2346_v21  ;;  %v322_v21 = vld [vmem:[%s4957_s7 + $0x2e8] sm:$0xff]  ;;  %v2369_v26 = vadd.f32 %v1345_v19, %v321_v18  ;;  %v1365_v15 = vld [vmem:[%s4964_s21 + $0x380] sm:$0xff] }
  0x83   : > { %3371 = vst [vmem:[%s4979_s28 + $0x230] sm:$0xff] %v2347_v24  ;;  %v323_v24 = vld [vmem:[%s4957_s7 + $0x2f0] sm:$0xff]  ;;  %v2370_v29 = vadd.f32 %v1346_v22, %v322_v21  ;;  %v1366_v18 = vld [vmem:[%s4964_s21 + $0x388] sm:$0xff] }
  0x84   : > { %3372 = vst [vmem:[%s4979_s28 + $0x238] sm:$0xff] %v2348_v27  ;;  %v324_v27 = vld [vmem:[%s4957_s7 + $0x2f8] sm:$0xff]  ;;  %v2371_v32 = vadd.f32 %v1347_v25, %v323_v24  ;;  %v1367_v21 = vld [vmem:[%s4964_s21 + $0x390] sm:$0xff] }
  0x85   : > { %3373 = vst [vmem:[%s4979_s28 + $0x240] sm:$0xff] %v2349_v30  ;;  %v325_v30 = vld [vmem:[%s4957_s7 + $0x300] sm:$0xff]  ;;  %v2372_v35 = vadd.f32 %v1348_v28, %v324_v27  ;;  %v1368_v24 = vld [vmem:[%s4964_s21 + $0x398] sm:$0xff] }
  0x86   : > { %3374 = vst [vmem:[%s4979_s28 + $0x248] sm:$0xff] %v2350_v33  ;;  %v326_v33 = vld [vmem:[%s4957_s7 + $0x308] sm:$0xff]  ;;  %v2373_v38 = vadd.f32 %v1349_v31, %v325_v30  ;;  %v1369_v27 = vld [vmem:[%s4964_s21 + $0x3a0] sm:$0xff] }
  0x87   : > { %3375 = vst [vmem:[%s4979_s28 + $0x250] sm:$0xff] %v2351_v36  ;;  %v327_v36 = vld [vmem:[%s4957_s7 + $0x310] sm:$0xff]  ;;  %v2374_v41 = vadd.f32 %v1350_v34, %v326_v33  ;;  %v1370_v30 = vld [vmem:[%s4964_s21 + $0x3a8] sm:$0xff] }
  0x88   : > { %3376 = vst [vmem:[%s4979_s28 + $0x258] sm:$0xff] %v2352_v39  ;;  %v328_v39 = vld [vmem:[%s4957_s7 + $0x318] sm:$0xff]  ;;  %v2375_v44 = vadd.f32 %v1351_v37, %v327_v36  ;;  %v1371_v33 = vld [vmem:[%s4964_s21 + $0x3b0] sm:$0xff] }
  0x89   : > { %3377 = vst [vmem:[%s4979_s28 + $0x260] sm:$0xff] %v2353_v42  ;;  %v329_v42 = vld [vmem:[%s4957_s7 + $0x320] sm:$0xff]  ;;  %v2376_v47 = vadd.f32 %v1352_v40, %v328_v39  ;;  %v1372_v36 = vld [vmem:[%s4964_s21 + $0x3b8] sm:$0xff] }
  0x8a   : > { %3378 = vst [vmem:[%s4979_s28 + $0x268] sm:$0xff] %v2354_v45  ;;  %v330_v45 = vld [vmem:[%s4957_s7 + $0x328] sm:$0xff]  ;;  %v2377_v50 = vadd.f32 %v1353_v43, %v329_v42  ;;  %v1373_v39 = vld [vmem:[%s4964_s21 + $0x3c0] sm:$0xff] }
  0x8b   : > { %3379 = vst [vmem:[%s4979_s28 + $0x270] sm:$0xff] %v2355_v48  ;;  %v331_v48 = vld [vmem:[%s4957_s7 + $0x330] sm:$0xff]  ;;  %v2378_v53 = vadd.f32 %v1354_v46, %v330_v45  ;;  %v1374_v42 = vld [vmem:[%s4964_s21 + $0x3c8] sm:$0xff] }
  0x8c   : > { %3380 = vst [vmem:[%s4979_s28 + $0x278] sm:$0xff] %v2356_v51  ;;  %v332_v51 = vld [vmem:[%s4957_s7 + $0x338] sm:$0xff]  ;;  %v2379_v56 = vadd.f32 %v1355_v49, %v331_v48  ;;  %v1375_v45 = vld [vmem:[%s4964_s21 + $0x3d0] sm:$0xff] }
  0x8d   : > { %3381 = vst [vmem:[%s4979_s28 + $0x280] sm:$0xff] %v2357_v54  ;;  %v333_v54 = vld [vmem:[%s4957_s7 + $0x340] sm:$0xff]  ;;  %v2380_v59 = vadd.f32 %v1356_v52, %v332_v51  ;;  %v1376_v48 = vld [vmem:[%s4964_s21 + $0x3d8] sm:$0xff] }
  0x8e   : > { %3382 = vst [vmem:[%s4979_s28 + $0x288] sm:$0xff] %v2358_v57  ;;  %v334_v57 = vld [vmem:[%s4957_s7 + $0x348] sm:$0xff]  ;;  %v2381_v62 = vadd.f32 %v1357_v55, %v333_v54  ;;  %v1377_v51 = vld [vmem:[%s4964_s21 + $0x3e0] sm:$0xff] }
  0x8f   : > { %3383 = vst [vmem:[%s4979_s28 + $0x290] sm:$0xff] %v2359_v60  ;;  %v335_v60 = vld [vmem:[%s4957_s7 + $0x350] sm:$0xff]  ;;  %v2382_v1 = vadd.f32 %v1358_v58, %v334_v57  ;;  %v1378_v54 = vld [vmem:[%s4964_s21 + $0x3e8] sm:$0xff] }
  0x90   : > { %3384 = vst [vmem:[%s4979_s28 + $0x298] sm:$0xff] %v2360_v63  ;;  %v336_v63 = vld [vmem:[%s4957_s7 + $0x358] sm:$0xff]  ;;  %v2383_v4 = vadd.f32 %v1359_v61, %v335_v60  ;;  %v1379_v57 = vld [vmem:[%s4964_s21 + $0x3f0] sm:$0xff] }
  0x91   : > { %3385 = vst [vmem:[%s4979_s28 + $0x2a0] sm:$0xff] %v2361_v2  ;;  %v337_v2 = vld [vmem:[%s4957_s7 + $0x360] sm:$0xff]  ;;  %v2384_v7 = vadd.f32 %v1360_v0, %v336_v63  ;;  %v1380_v60 = vld [vmem:[%s4964_s21 + $0x3f8] sm:$0xff] }
  0x92   : > { %3386 = vst [vmem:[%s4979_s28 + $0x2a8] sm:$0xff] %v2362_v5  ;;  %v338_v5 = vld [vmem:[%s4957_s7 + $0x368] sm:$0xff]  ;;  %v2385_v10 = vadd.f32 %v1361_v3, %v337_v2  ;;  %v1381_v63 = vld [vmem:[%s4964_s21 + $0x400] sm:$0xff] }
  0x93   : > { %3387 = vst [vmem:[%s4979_s28 + $0x2b0] sm:$0xff] %v2363_v8  ;;  %v339_v8 = vld [vmem:[%s4957_s7 + $0x370] sm:$0xff]  ;;  %v2386_v13 = vadd.f32 %v1362_v6, %v338_v5  ;;  %v1382_v2 = vld [vmem:[%s4964_s21 + $0x408] sm:$0xff] }
  0x94   : > { %3388 = vst [vmem:[%s4979_s28 + $0x2b8] sm:$0xff] %v2364_v11  ;;  %v340_v11 = vld [vmem:[%s4957_s7 + $0x378] sm:$0xff]  ;;  %v2387_v16 = vadd.f32 %v1363_v9, %v339_v8  ;;  %v1383_v5 = vld [vmem:[%s4964_s21 + $0x410] sm:$0xff] }
  0x95   : > { %3389 = vst [vmem:[%s4979_s28 + $0x2c0] sm:$0xff] %v2365_v14  ;;  %v341_v14 = vld [vmem:[%s4957_s7 + $0x380] sm:$0xff]  ;;  %v2388_v19 = vadd.f32 %v1364_v12, %v340_v11  ;;  %v1384_v8 = vld [vmem:[%s4964_s21 + $0x418] sm:$0xff] }
  0x96   : > { %3390 = vst [vmem:[%s4979_s28 + $0x2c8] sm:$0xff] %v2366_v17  ;;  %v342_v17 = vld [vmem:[%s4957_s7 + $0x388] sm:$0xff]  ;;  %v2389_v22 = vadd.f32 %v1365_v15, %v341_v14  ;;  %v1385_v11 = vld [vmem:[%s4964_s21 + $0x420] sm:$0xff] }
  0x97   : > { %3391 = vst [vmem:[%s4979_s28 + $0x2d0] sm:$0xff] %v2367_v20  ;;  %v343_v20 = vld [vmem:[%s4957_s7 + $0x390] sm:$0xff]  ;;  %v2390_v25 = vadd.f32 %v1366_v18, %v342_v17  ;;  %v1386_v14 = vld [vmem:[%s4964_s21 + $0x428] sm:$0xff] }
  0x98   : > { %3392 = vst [vmem:[%s4979_s28 + $0x2d8] sm:$0xff] %v2368_v23  ;;  %v344_v23 = vld [vmem:[%s4957_s7 + $0x398] sm:$0xff]  ;;  %v2391_v28 = vadd.f32 %v1367_v21, %v343_v20  ;;  %v1387_v17 = vld [vmem:[%s4964_s21 + $0x430] sm:$0xff] }
  0x99   : > { %3393 = vst [vmem:[%s4979_s28 + $0x2e0] sm:$0xff] %v2369_v26  ;;  %v345_v26 = vld [vmem:[%s4957_s7 + $0x3a0] sm:$0xff]  ;;  %v2392_v31 = vadd.f32 %v1368_v24, %v344_v23  ;;  %v1388_v20 = vld [vmem:[%s4964_s21 + $0x438] sm:$0xff] }
  0x9a   : > { %3394 = vst [vmem:[%s4979_s28 + $0x2e8] sm:$0xff] %v2370_v29  ;;  %v346_v29 = vld [vmem:[%s4957_s7 + $0x3a8] sm:$0xff]  ;;  %v2393_v34 = vadd.f32 %v1369_v27, %v345_v26  ;;  %v1389_v23 = vld [vmem:[%s4964_s21 + $0x440] sm:$0xff] }
  0x9b   : > { %3395 = vst [vmem:[%s4979_s28 + $0x2f0] sm:$0xff] %v2371_v32  ;;  %v347_v32 = vld [vmem:[%s4957_s7 + $0x3b0] sm:$0xff]  ;;  %v2394_v37 = vadd.f32 %v1370_v30, %v346_v29  ;;  %v1390_v26 = vld [vmem:[%s4964_s21 + $0x448] sm:$0xff] }
  0x9c   : > { %3396 = vst [vmem:[%s4979_s28 + $0x2f8] sm:$0xff] %v2372_v35  ;;  %v348_v35 = vld [vmem:[%s4957_s7 + $0x3b8] sm:$0xff]  ;;  %v2395_v40 = vadd.f32 %v1371_v33, %v347_v32  ;;  %v1391_v29 = vld [vmem:[%s4964_s21 + $0x450] sm:$0xff] }
  0x9d   : > { %3397 = vst [vmem:[%s4979_s28 + $0x300] sm:$0xff] %v2373_v38  ;;  %v349_v38 = vld [vmem:[%s4957_s7 + $0x3c0] sm:$0xff]  ;;  %v2396_v43 = vadd.f32 %v1372_v36, %v348_v35  ;;  %v1392_v32 = vld [vmem:[%s4964_s21 + $0x458] sm:$0xff] }
  0x9e   : > { %3398 = vst [vmem:[%s4979_s28 + $0x308] sm:$0xff] %v2374_v41  ;;  %v350_v41 = vld [vmem:[%s4957_s7 + $0x3c8] sm:$0xff]  ;;  %v2397_v46 = vadd.f32 %v1373_v39, %v349_v38  ;;  %v1393_v35 = vld [vmem:[%s4964_s21 + $0x460] sm:$0xff] }
  0x9f   : > { %3399 = vst [vmem:[%s4979_s28 + $0x310] sm:$0xff] %v2375_v44  ;;  %v351_v44 = vld [vmem:[%s4957_s7 + $0x3d0] sm:$0xff]  ;;  %v2398_v49 = vadd.f32 %v1374_v42, %v350_v41  ;;  %v1394_v38 = vld [vmem:[%s4964_s21 + $0x468] sm:$0xff] }
  0xa0   : > { %3400 = vst [vmem:[%s4979_s28 + $0x318] sm:$0xff] %v2376_v47  ;;  %v352_v47 = vld [vmem:[%s4957_s7 + $0x3d8] sm:$0xff]  ;;  %v2399_v52 = vadd.f32 %v1375_v45, %v351_v44  ;;  %v1395_v41 = vld [vmem:[%s4964_s21 + $0x470] sm:$0xff] }
  0xa1   : > { %3401 = vst [vmem:[%s4979_s28 + $0x320] sm:$0xff] %v2377_v50  ;;  %v353_v50 = vld [vmem:[%s4957_s7 + $0x3e0] sm:$0xff]  ;;  %v2400_v55 = vadd.f32 %v1376_v48, %v352_v47  ;;  %v1396_v44 = vld [vmem:[%s4964_s21 + $0x478] sm:$0xff] }
  0xa2   : > { %3402 = vst [vmem:[%s4979_s28 + $0x328] sm:$0xff] %v2378_v53  ;;  %v354_v53 = vld [vmem:[%s4957_s7 + $0x3e8] sm:$0xff]  ;;  %v2401_v58 = vadd.f32 %v1377_v51, %v353_v50  ;;  %v1397_v47 = vld [vmem:[%s4964_s21 + $0x480] sm:$0xff] }
  0xa3   : > { %3403 = vst [vmem:[%s4979_s28 + $0x330] sm:$0xff] %v2379_v56  ;;  %v355_v56 = vld [vmem:[%s4957_s7 + $0x3f0] sm:$0xff]  ;;  %v2402_v61 = vadd.f32 %v1378_v54, %v354_v53  ;;  %v1398_v50 = vld [vmem:[%s4964_s21 + $0x488] sm:$0xff] }
  0xa4   : > { %3404 = vst [vmem:[%s4979_s28 + $0x338] sm:$0xff] %v2380_v59  ;;  %v356_v59 = vld [vmem:[%s4957_s7 + $0x3f8] sm:$0xff]  ;;  %v2403_v0 = vadd.f32 %v1379_v57, %v355_v56  ;;  %v1399_v53 = vld [vmem:[%s4964_s21 + $0x490] sm:$0xff] }
  0xa5   : > { %3405 = vst [vmem:[%s4979_s28 + $0x340] sm:$0xff] %v2381_v62  ;;  %v357_v62 = vld [vmem:[%s4957_s7 + $0x400] sm:$0xff]  ;;  %v2404_v3 = vadd.f32 %v1380_v60, %v356_v59  ;;  %v1400_v56 = vld [vmem:[%s4964_s21 + $0x498] sm:$0xff] }
  0xa6   : > { %3406 = vst [vmem:[%s4979_s28 + $0x348] sm:$0xff] %v2382_v1  ;;  %v358_v1 = vld [vmem:[%s4957_s7 + $0x408] sm:$0xff]  ;;  %v2405_v6 = vadd.f32 %v1381_v63, %v357_v62  ;;  %v1401_v59 = vld [vmem:[%s4964_s21 + $0x4a0] sm:$0xff] }
  0xa7   : > { %3407 = vst [vmem:[%s4979_s28 + $0x350] sm:$0xff] %v2383_v4  ;;  %v359_v4 = vld [vmem:[%s4957_s7 + $0x410] sm:$0xff]  ;;  %v2406_v9 = vadd.f32 %v1382_v2, %v358_v1  ;;  %v1402_v62 = vld [vmem:[%s4964_s21 + $0x4a8] sm:$0xff] }
  0xa8   : > { %3408 = vst [vmem:[%s4979_s28 + $0x358] sm:$0xff] %v2384_v7  ;;  %v360_v7 = vld [vmem:[%s4957_s7 + $0x418] sm:$0xff]  ;;  %v2407_v12 = vadd.f32 %v1383_v5, %v359_v4  ;;  %v1403_v1 = vld [vmem:[%s4964_s21 + $0x4b0] sm:$0xff] }
  0xa9   : > { %3409 = vst [vmem:[%s4979_s28 + $0x360] sm:$0xff] %v2385_v10  ;;  %v361_v10 = vld [vmem:[%s4957_s7 + $0x420] sm:$0xff]  ;;  %v2408_v15 = vadd.f32 %v1384_v8, %v360_v7  ;;  %v1404_v4 = vld [vmem:[%s4964_s21 + $0x4b8] sm:$0xff] }
  0xaa   : > { %3410 = vst [vmem:[%s4979_s28 + $0x368] sm:$0xff] %v2386_v13  ;;  %v362_v13 = vld [vmem:[%s4957_s7 + $0x428] sm:$0xff]  ;;  %v2409_v18 = vadd.f32 %v1385_v11, %v361_v10  ;;  %v1405_v7 = vld [vmem:[%s4964_s21 + $0x4c0] sm:$0xff] }
  0xab   : > { %3411 = vst [vmem:[%s4979_s28 + $0x370] sm:$0xff] %v2387_v16  ;;  %v363_v16 = vld [vmem:[%s4957_s7 + $0x430] sm:$0xff]  ;;  %v2410_v21 = vadd.f32 %v1386_v14, %v362_v13  ;;  %v1406_v10 = vld [vmem:[%s4964_s21 + $0x4c8] sm:$0xff] }
  0xac   : > { %3412 = vst [vmem:[%s4979_s28 + $0x378] sm:$0xff] %v2388_v19  ;;  %v364_v19 = vld [vmem:[%s4957_s7 + $0x438] sm:$0xff]  ;;  %v2411_v24 = vadd.f32 %v1387_v17, %v363_v16  ;;  %v1407_v13 = vld [vmem:[%s4964_s21 + $0x4d0] sm:$0xff] }
  0xad   : > { %3413 = vst [vmem:[%s4979_s28 + $0x380] sm:$0xff] %v2389_v22  ;;  %v365_v22 = vld [vmem:[%s4957_s7 + $0x440] sm:$0xff]  ;;  %v2412_v27 = vadd.f32 %v1388_v20, %v364_v19  ;;  %v1408_v16 = vld [vmem:[%s4964_s21 + $0x4d8] sm:$0xff] }
  0xae   : > { %3414 = vst [vmem:[%s4979_s28 + $0x388] sm:$0xff] %v2390_v25  ;;  %v366_v25 = vld [vmem:[%s4957_s7 + $0x448] sm:$0xff]  ;;  %v2413_v30 = vadd.f32 %v1389_v23, %v365_v22  ;;  %v1409_v19 = vld [vmem:[%s4964_s21 + $0x4e0] sm:$0xff] }
  0xaf   : > { %3415 = vst [vmem:[%s4979_s28 + $0x390] sm:$0xff] %v2391_v28  ;;  %v367_v28 = vld [vmem:[%s4957_s7 + $0x450] sm:$0xff]  ;;  %v2414_v33 = vadd.f32 %v1390_v26, %v366_v25  ;;  %v1410_v22 = vld [vmem:[%s4964_s21 + $0x4e8] sm:$0xff] }
  0xb0   : > { %3416 = vst [vmem:[%s4979_s28 + $0x398] sm:$0xff] %v2392_v31  ;;  %v368_v31 = vld [vmem:[%s4957_s7 + $0x458] sm:$0xff]  ;;  %v2415_v36 = vadd.f32 %v1391_v29, %v367_v28  ;;  %v1411_v25 = vld [vmem:[%s4964_s21 + $0x4f0] sm:$0xff] }
  0xb1   : > { %3417 = vst [vmem:[%s4979_s28 + $0x3a0] sm:$0xff] %v2393_v34  ;;  %v369_v34 = vld [vmem:[%s4957_s7 + $0x460] sm:$0xff]  ;;  %v2416_v39 = vadd.f32 %v1392_v32, %v368_v31  ;;  %v1412_v28 = vld [vmem:[%s4964_s21 + $0x4f8] sm:$0xff] }
  0xb2   : > { %3418 = vst [vmem:[%s4979_s28 + $0x3a8] sm:$0xff] %v2394_v37  ;;  %v370_v37 = vld [vmem:[%s4957_s7 + $0x468] sm:$0xff]  ;;  %v2417_v42 = vadd.f32 %v1393_v35, %v369_v34  ;;  %v1413_v31 = vld [vmem:[%s4964_s21 + $0x500] sm:$0xff] }
  0xb3   : > { %3419 = vst [vmem:[%s4979_s28 + $0x3b0] sm:$0xff] %v2395_v40  ;;  %v371_v40 = vld [vmem:[%s4957_s7 + $0x470] sm:$0xff]  ;;  %v2418_v45 = vadd.f32 %v1394_v38, %v370_v37  ;;  %v1414_v34 = vld [vmem:[%s4964_s21 + $0x508] sm:$0xff] }
  0xb4   : > { %3420 = vst [vmem:[%s4979_s28 + $0x3b8] sm:$0xff] %v2396_v43  ;;  %v372_v43 = vld [vmem:[%s4957_s7 + $0x478] sm:$0xff]  ;;  %v2419_v48 = vadd.f32 %v1395_v41, %v371_v40  ;;  %v1415_v37 = vld [vmem:[%s4964_s21 + $0x510] sm:$0xff] }
  0xb5   : > { %3421 = vst [vmem:[%s4979_s28 + $0x3c0] sm:$0xff] %v2397_v46  ;;  %v373_v46 = vld [vmem:[%s4957_s7 + $0x480] sm:$0xff]  ;;  %v2420_v51 = vadd.f32 %v1396_v44, %v372_v43  ;;  %v1416_v40 = vld [vmem:[%s4964_s21 + $0x518] sm:$0xff] }
  0xb6   : > { %3422 = vst [vmem:[%s4979_s28 + $0x3c8] sm:$0xff] %v2398_v49  ;;  %v374_v49 = vld [vmem:[%s4957_s7 + $0x488] sm:$0xff]  ;;  %v2421_v54 = vadd.f32 %v1397_v47, %v373_v46  ;;  %v1417_v43 = vld [vmem:[%s4964_s21 + $0x520] sm:$0xff] }
  0xb7   : > { %3423 = vst [vmem:[%s4979_s28 + $0x3d0] sm:$0xff] %v2399_v52  ;;  %v375_v52 = vld [vmem:[%s4957_s7 + $0x490] sm:$0xff]  ;;  %v2422_v57 = vadd.f32 %v1398_v50, %v374_v49  ;;  %v1418_v46 = vld [vmem:[%s4964_s21 + $0x528] sm:$0xff] }
  0xb8   : > { %3424 = vst [vmem:[%s4979_s28 + $0x3d8] sm:$0xff] %v2400_v55  ;;  %v376_v55 = vld [vmem:[%s4957_s7 + $0x498] sm:$0xff]  ;;  %v2423_v60 = vadd.f32 %v1399_v53, %v375_v52  ;;  %v1419_v49 = vld [vmem:[%s4964_s21 + $0x530] sm:$0xff] }
  0xb9   : > { %3425 = vst [vmem:[%s4979_s28 + $0x3e0] sm:$0xff] %v2401_v58  ;;  %v377_v58 = vld [vmem:[%s4957_s7 + $0x4a0] sm:$0xff]  ;;  %v2424_v63 = vadd.f32 %v1400_v56, %v376_v55  ;;  %v1420_v52 = vld [vmem:[%s4964_s21 + $0x538] sm:$0xff] }
  0xba   : > { %3426 = vst [vmem:[%s4979_s28 + $0x3e8] sm:$0xff] %v2402_v61  ;;  %v378_v61 = vld [vmem:[%s4957_s7 + $0x4a8] sm:$0xff]  ;;  %v2425_v2 = vadd.f32 %v1401_v59, %v377_v58  ;;  %v1421_v55 = vld [vmem:[%s4964_s21 + $0x540] sm:$0xff] }
  0xbb   : > { %3427 = vst [vmem:[%s4979_s28 + $0x3f0] sm:$0xff] %v2403_v0  ;;  %v379_v0 = vld [vmem:[%s4957_s7 + $0x4b0] sm:$0xff]  ;;  %v2426_v5 = vadd.f32 %v1402_v62, %v378_v61  ;;  %v1422_v58 = vld [vmem:[%s4964_s21 + $0x548] sm:$0xff] }
  0xbc   : > { %3428 = vst [vmem:[%s4979_s28 + $0x3f8] sm:$0xff] %v2404_v3  ;;  %v380_v3 = vld [vmem:[%s4957_s7 + $0x4b8] sm:$0xff]  ;;  %v2427_v8 = vadd.f32 %v1403_v1, %v379_v0  ;;  %v1423_v61 = vld [vmem:[%s4964_s21 + $0x550] sm:$0xff] }
  0xbd   : > { %3429 = vst [vmem:[%s4979_s28 + $0x400] sm:$0xff] %v2405_v6  ;;  %v381_v6 = vld [vmem:[%s4957_s7 + $0x4c0] sm:$0xff]  ;;  %v2428_v11 = vadd.f32 %v1404_v4, %v380_v3  ;;  %v1424_v0 = vld [vmem:[%s4964_s21 + $0x558] sm:$0xff] }
  0xbe   : > { %3430 = vst [vmem:[%s4979_s28 + $0x408] sm:$0xff] %v2406_v9  ;;  %v382_v9 = vld [vmem:[%s4957_s7 + $0x4c8] sm:$0xff]  ;;  %v2429_v14 = vadd.f32 %v1405_v7, %v381_v6  ;;  %v1425_v3 = vld [vmem:[%s4964_s21 + $0x560] sm:$0xff] }
  0xbf   : > { %3431 = vst [vmem:[%s4979_s28 + $0x410] sm:$0xff] %v2407_v12  ;;  %v383_v12 = vld [vmem:[%s4957_s7 + $0x4d0] sm:$0xff]  ;;  %v2430_v17 = vadd.f32 %v1406_v10, %v382_v9  ;;  %v1426_v6 = vld [vmem:[%s4964_s21 + $0x568] sm:$0xff] }
  0xc0   : > { %3432 = vst [vmem:[%s4979_s28 + $0x418] sm:$0xff] %v2408_v15  ;;  %v384_v15 = vld [vmem:[%s4957_s7 + $0x4d8] sm:$0xff]  ;;  %v2431_v20 = vadd.f32 %v1407_v13, %v383_v12  ;;  %v1427_v9 = vld [vmem:[%s4964_s21 + $0x570] sm:$0xff] }
  0xc1   : > { %3433 = vst [vmem:[%s4979_s28 + $0x420] sm:$0xff] %v2409_v18  ;;  %v385_v18 = vld [vmem:[%s4957_s7 + $0x4e0] sm:$0xff]  ;;  %v2432_v23 = vadd.f32 %v1408_v16, %v384_v15  ;;  %v1428_v12 = vld [vmem:[%s4964_s21 + $0x578] sm:$0xff] }
  0xc2   : > { %3434 = vst [vmem:[%s4979_s28 + $0x428] sm:$0xff] %v2410_v21  ;;  %v386_v21 = vld [vmem:[%s4957_s7 + $0x4e8] sm:$0xff]  ;;  %v2433_v26 = vadd.f32 %v1409_v19, %v385_v18  ;;  %v1429_v15 = vld [vmem:[%s4964_s21 + $0x580] sm:$0xff] }
  0xc3   : > { %3435 = vst [vmem:[%s4979_s28 + $0x430] sm:$0xff] %v2411_v24  ;;  %v387_v24 = vld [vmem:[%s4957_s7 + $0x4f0] sm:$0xff]  ;;  %v2434_v29 = vadd.f32 %v1410_v22, %v386_v21  ;;  %v1430_v18 = vld [vmem:[%s4964_s21 + $0x588] sm:$0xff] }
  0xc4   : > { %3436 = vst [vmem:[%s4979_s28 + $0x438] sm:$0xff] %v2412_v27  ;;  %v388_v27 = vld [vmem:[%s4957_s7 + $0x4f8] sm:$0xff]  ;;  %v2435_v32 = vadd.f32 %v1411_v25, %v387_v24  ;;  %v1431_v21 = vld [vmem:[%s4964_s21 + $0x590] sm:$0xff] }
  0xc5   : > { %3437 = vst [vmem:[%s4979_s28 + $0x440] sm:$0xff] %v2413_v30  ;;  %v389_v30 = vld [vmem:[%s4957_s7 + $0x500] sm:$0xff]  ;;  %v2436_v35 = vadd.f32 %v1412_v28, %v388_v27  ;;  %v1432_v24 = vld [vmem:[%s4964_s21 + $0x598] sm:$0xff] }
  0xc6   : > { %3438 = vst [vmem:[%s4979_s28 + $0x448] sm:$0xff] %v2414_v33  ;;  %v390_v33 = vld [vmem:[%s4957_s7 + $0x508] sm:$0xff]  ;;  %v2437_v38 = vadd.f32 %v1413_v31, %v389_v30  ;;  %v1433_v27 = vld [vmem:[%s4964_s21 + $0x5a0] sm:$0xff] }
  0xc7   : > { %3439 = vst [vmem:[%s4979_s28 + $0x450] sm:$0xff] %v2415_v36  ;;  %v391_v36 = vld [vmem:[%s4957_s7 + $0x510] sm:$0xff]  ;;  %v2438_v41 = vadd.f32 %v1414_v34, %v390_v33  ;;  %v1434_v30 = vld [vmem:[%s4964_s21 + $0x5a8] sm:$0xff] }
  0xc8   : > { %3440 = vst [vmem:[%s4979_s28 + $0x458] sm:$0xff] %v2416_v39  ;;  %v392_v39 = vld [vmem:[%s4957_s7 + $0x518] sm:$0xff]  ;;  %v2439_v44 = vadd.f32 %v1415_v37, %v391_v36  ;;  %v1435_v33 = vld [vmem:[%s4964_s21 + $0x5b0] sm:$0xff] }
  0xc9   : > { %3441 = vst [vmem:[%s4979_s28 + $0x460] sm:$0xff] %v2417_v42  ;;  %v393_v42 = vld [vmem:[%s4957_s7 + $0x520] sm:$0xff]  ;;  %v2440_v47 = vadd.f32 %v1416_v40, %v392_v39  ;;  %v1436_v36 = vld [vmem:[%s4964_s21 + $0x5b8] sm:$0xff] }
  0xca   : > { %3442 = vst [vmem:[%s4979_s28 + $0x468] sm:$0xff] %v2418_v45  ;;  %v394_v45 = vld [vmem:[%s4957_s7 + $0x528] sm:$0xff]  ;;  %v2441_v50 = vadd.f32 %v1417_v43, %v393_v42  ;;  %v1437_v39 = vld [vmem:[%s4964_s21 + $0x5c0] sm:$0xff] }
  0xcb   : > { %3443 = vst [vmem:[%s4979_s28 + $0x470] sm:$0xff] %v2419_v48  ;;  %v395_v48 = vld [vmem:[%s4957_s7 + $0x530] sm:$0xff]  ;;  %v2442_v53 = vadd.f32 %v1418_v46, %v394_v45  ;;  %v1438_v42 = vld [vmem:[%s4964_s21 + $0x5c8] sm:$0xff] }
  0xcc   : > { %3444 = vst [vmem:[%s4979_s28 + $0x478] sm:$0xff] %v2420_v51  ;;  %v396_v51 = vld [vmem:[%s4957_s7 + $0x538] sm:$0xff]  ;;  %v2443_v56 = vadd.f32 %v1419_v49, %v395_v48  ;;  %v1439_v45 = vld [vmem:[%s4964_s21 + $0x5d0] sm:$0xff] }
  0xcd   : > { %3445 = vst [vmem:[%s4979_s28 + $0x480] sm:$0xff] %v2421_v54  ;;  %v397_v54 = vld [vmem:[%s4957_s7 + $0x540] sm:$0xff]  ;;  %v2444_v59 = vadd.f32 %v1420_v52, %v396_v51  ;;  %v1440_v48 = vld [vmem:[%s4964_s21 + $0x5d8] sm:$0xff] }
  0xce   : > { %3446 = vst [vmem:[%s4979_s28 + $0x488] sm:$0xff] %v2422_v57  ;;  %v398_v57 = vld [vmem:[%s4957_s7 + $0x548] sm:$0xff]  ;;  %v2445_v62 = vadd.f32 %v1421_v55, %v397_v54  ;;  %v1441_v51 = vld [vmem:[%s4964_s21 + $0x5e0] sm:$0xff] }
  0xcf   : > { %3447 = vst [vmem:[%s4979_s28 + $0x490] sm:$0xff] %v2423_v60  ;;  %v399_v60 = vld [vmem:[%s4957_s7 + $0x550] sm:$0xff]  ;;  %v2446_v1 = vadd.f32 %v1422_v58, %v398_v57  ;;  %v1442_v54 = vld [vmem:[%s4964_s21 + $0x5e8] sm:$0xff] }
  0xd0   : > { %3448 = vst [vmem:[%s4979_s28 + $0x498] sm:$0xff] %v2424_v63  ;;  %v400_v63 = vld [vmem:[%s4957_s7 + $0x558] sm:$0xff]  ;;  %v2447_v4 = vadd.f32 %v1423_v61, %v399_v60  ;;  %v1443_v57 = vld [vmem:[%s4964_s21 + $0x5f0] sm:$0xff] }
  0xd1   : > { %3449 = vst [vmem:[%s4979_s28 + $0x4a0] sm:$0xff] %v2425_v2  ;;  %v401_v2 = vld [vmem:[%s4957_s7 + $0x560] sm:$0xff]  ;;  %v2448_v7 = vadd.f32 %v1424_v0, %v400_v63  ;;  %v1444_v60 = vld [vmem:[%s4964_s21 + $0x5f8] sm:$0xff] }
  0xd2   : > { %3450 = vst [vmem:[%s4979_s28 + $0x4a8] sm:$0xff] %v2426_v5  ;;  %v402_v5 = vld [vmem:[%s4957_s7 + $0x568] sm:$0xff]  ;;  %v2449_v10 = vadd.f32 %v1425_v3, %v401_v2  ;;  %v1445_v63 = vld [vmem:[%s4964_s21 + $0x600] sm:$0xff] }
  0xd3   : > { %3451 = vst [vmem:[%s4979_s28 + $0x4b0] sm:$0xff] %v2427_v8  ;;  %v403_v8 = vld [vmem:[%s4957_s7 + $0x570] sm:$0xff]  ;;  %v2450_v13 = vadd.f32 %v1426_v6, %v402_v5  ;;  %v1446_v2 = vld [vmem:[%s4964_s21 + $0x608] sm:$0xff] }
  0xd4   : > { %3452 = vst [vmem:[%s4979_s28 + $0x4b8] sm:$0xff] %v2428_v11  ;;  %v404_v11 = vld [vmem:[%s4957_s7 + $0x578] sm:$0xff]  ;;  %v2451_v16 = vadd.f32 %v1427_v9, %v403_v8  ;;  %v1447_v5 = vld [vmem:[%s4964_s21 + $0x610] sm:$0xff] }
  0xd5   : > { %3453 = vst [vmem:[%s4979_s28 + $0x4c0] sm:$0xff] %v2429_v14  ;;  %v405_v14 = vld [vmem:[%s4957_s7 + $0x580] sm:$0xff]  ;;  %v2452_v19 = vadd.f32 %v1428_v12, %v404_v11  ;;  %v1448_v8 = vld [vmem:[%s4964_s21 + $0x618] sm:$0xff] }
  0xd6   : > { %3454 = vst [vmem:[%s4979_s28 + $0x4c8] sm:$0xff] %v2430_v17  ;;  %v406_v17 = vld [vmem:[%s4957_s7 + $0x588] sm:$0xff]  ;;  %v2453_v22 = vadd.f32 %v1429_v15, %v405_v14  ;;  %v1449_v11 = vld [vmem:[%s4964_s21 + $0x620] sm:$0xff] }
  0xd7   : > { %3455 = vst [vmem:[%s4979_s28 + $0x4d0] sm:$0xff] %v2431_v20  ;;  %v407_v20 = vld [vmem:[%s4957_s7 + $0x590] sm:$0xff]  ;;  %v2454_v25 = vadd.f32 %v1430_v18, %v406_v17  ;;  %v1450_v14 = vld [vmem:[%s4964_s21 + $0x628] sm:$0xff] }
  0xd8   : > { %3456 = vst [vmem:[%s4979_s28 + $0x4d8] sm:$0xff] %v2432_v23  ;;  %v408_v23 = vld [vmem:[%s4957_s7 + $0x598] sm:$0xff]  ;;  %v2455_v28 = vadd.f32 %v1431_v21, %v407_v20  ;;  %v1451_v17 = vld [vmem:[%s4964_s21 + $0x630] sm:$0xff] }
  0xd9   : > { %3457 = vst [vmem:[%s4979_s28 + $0x4e0] sm:$0xff] %v2433_v26  ;;  %v409_v26 = vld [vmem:[%s4957_s7 + $0x5a0] sm:$0xff]  ;;  %v2456_v31 = vadd.f32 %v1432_v24, %v408_v23  ;;  %v1452_v20 = vld [vmem:[%s4964_s21 + $0x638] sm:$0xff] }
  0xda   : > { %3458 = vst [vmem:[%s4979_s28 + $0x4e8] sm:$0xff] %v2434_v29  ;;  %v410_v29 = vld [vmem:[%s4957_s7 + $0x5a8] sm:$0xff]  ;;  %v2457_v34 = vadd.f32 %v1433_v27, %v409_v26  ;;  %v1453_v23 = vld [vmem:[%s4964_s21 + $0x640] sm:$0xff] }
  0xdb   : > { %3459 = vst [vmem:[%s4979_s28 + $0x4f0] sm:$0xff] %v2435_v32  ;;  %v411_v32 = vld [vmem:[%s4957_s7 + $0x5b0] sm:$0xff]  ;;  %v2458_v37 = vadd.f32 %v1434_v30, %v410_v29  ;;  %v1454_v26 = vld [vmem:[%s4964_s21 + $0x648] sm:$0xff] }
  0xdc   : > { %3460 = vst [vmem:[%s4979_s28 + $0x4f8] sm:$0xff] %v2436_v35  ;;  %v412_v35 = vld [vmem:[%s4957_s7 + $0x5b8] sm:$0xff]  ;;  %v2459_v40 = vadd.f32 %v1435_v33, %v411_v32  ;;  %v1455_v29 = vld [vmem:[%s4964_s21 + $0x650] sm:$0xff] }
  0xdd   : > { %3461 = vst [vmem:[%s4979_s28 + $0x500] sm:$0xff] %v2437_v38  ;;  %v413_v38 = vld [vmem:[%s4957_s7 + $0x5c0] sm:$0xff]  ;;  %v2460_v43 = vadd.f32 %v1436_v36, %v412_v35  ;;  %v1456_v32 = vld [vmem:[%s4964_s21 + $0x658] sm:$0xff] }
  0xde   : > { %3462 = vst [vmem:[%s4979_s28 + $0x508] sm:$0xff] %v2438_v41  ;;  %v414_v41 = vld [vmem:[%s4957_s7 + $0x5c8] sm:$0xff]  ;;  %v2461_v46 = vadd.f32 %v1437_v39, %v413_v38  ;;  %v1457_v35 = vld [vmem:[%s4964_s21 + $0x660] sm:$0xff] }
  0xdf   : > { %3463 = vst [vmem:[%s4979_s28 + $0x510] sm:$0xff] %v2439_v44  ;;  %v415_v44 = vld [vmem:[%s4957_s7 + $0x5d0] sm:$0xff]  ;;  %v2462_v49 = vadd.f32 %v1438_v42, %v414_v41  ;;  %v1458_v38 = vld [vmem:[%s4964_s21 + $0x668] sm:$0xff] }
  0xe0   : > { %3464 = vst [vmem:[%s4979_s28 + $0x518] sm:$0xff] %v2440_v47  ;;  %v416_v47 = vld [vmem:[%s4957_s7 + $0x5d8] sm:$0xff]  ;;  %v2463_v52 = vadd.f32 %v1439_v45, %v415_v44  ;;  %v1459_v41 = vld [vmem:[%s4964_s21 + $0x670] sm:$0xff] }
  0xe1   : > { %3465 = vst [vmem:[%s4979_s28 + $0x520] sm:$0xff] %v2441_v50  ;;  %v417_v50 = vld [vmem:[%s4957_s7 + $0x5e0] sm:$0xff]  ;;  %v2464_v55 = vadd.f32 %v1440_v48, %v416_v47  ;;  %v1460_v44 = vld [vmem:[%s4964_s21 + $0x678] sm:$0xff] }
  0xe2   : > { %3466 = vst [vmem:[%s4979_s28 + $0x528] sm:$0xff] %v2442_v53  ;;  %v418_v53 = vld [vmem:[%s4957_s7 + $0x5e8] sm:$0xff]  ;;  %v2465_v58 = vadd.f32 %v1441_v51, %v417_v50  ;;  %v1461_v47 = vld [vmem:[%s4964_s21 + $0x680] sm:$0xff] }
  0xe3   : > { %3467 = vst [vmem:[%s4979_s28 + $0x530] sm:$0xff] %v2443_v56  ;;  %v419_v56 = vld [vmem:[%s4957_s7 + $0x5f0] sm:$0xff]  ;;  %v2466_v61 = vadd.f32 %v1442_v54, %v418_v53  ;;  %v1462_v50 = vld [vmem:[%s4964_s21 + $0x688] sm:$0xff] }
  0xe4   : > { %3468 = vst [vmem:[%s4979_s28 + $0x538] sm:$0xff] %v2444_v59  ;;  %v420_v59 = vld [vmem:[%s4957_s7 + $0x5f8] sm:$0xff]  ;;  %v2467_v0 = vadd.f32 %v1443_v57, %v419_v56  ;;  %v1463_v53 = vld [vmem:[%s4964_s21 + $0x690] sm:$0xff] }
  0xe5   : > { %3469 = vst [vmem:[%s4979_s28 + $0x540] sm:$0xff] %v2445_v62  ;;  %v421_v62 = vld [vmem:[%s4957_s7 + $0x600] sm:$0xff]  ;;  %v2468_v3 = vadd.f32 %v1444_v60, %v420_v59  ;;  %v1464_v56 = vld [vmem:[%s4964_s21 + $0x698] sm:$0xff] }
  0xe6   : > { %3470 = vst [vmem:[%s4979_s28 + $0x548] sm:$0xff] %v2446_v1  ;;  %v422_v1 = vld [vmem:[%s4957_s7 + $0x608] sm:$0xff]  ;;  %v2469_v6 = vadd.f32 %v1445_v63, %v421_v62  ;;  %v1465_v59 = vld [vmem:[%s4964_s21 + $0x6a0] sm:$0xff] }
  0xe7   : > { %3471 = vst [vmem:[%s4979_s28 + $0x550] sm:$0xff] %v2447_v4  ;;  %v423_v4 = vld [vmem:[%s4957_s7 + $0x610] sm:$0xff]  ;;  %v2470_v9 = vadd.f32 %v1446_v2, %v422_v1  ;;  %v1466_v62 = vld [vmem:[%s4964_s21 + $0x6a8] sm:$0xff] }
  0xe8   : > { %3472 = vst [vmem:[%s4979_s28 + $0x558] sm:$0xff] %v2448_v7  ;;  %v424_v7 = vld [vmem:[%s4957_s7 + $0x618] sm:$0xff]  ;;  %v2471_v12 = vadd.f32 %v1447_v5, %v423_v4  ;;  %v1467_v1 = vld [vmem:[%s4964_s21 + $0x6b0] sm:$0xff] }
  0xe9   : > { %3473 = vst [vmem:[%s4979_s28 + $0x560] sm:$0xff] %v2449_v10  ;;  %v425_v10 = vld [vmem:[%s4957_s7 + $0x620] sm:$0xff]  ;;  %v2472_v15 = vadd.f32 %v1448_v8, %v424_v7  ;;  %v1468_v4 = vld [vmem:[%s4964_s21 + $0x6b8] sm:$0xff] }
  0xea   : > { %3474 = vst [vmem:[%s4979_s28 + $0x568] sm:$0xff] %v2450_v13  ;;  %v426_v13 = vld [vmem:[%s4957_s7 + $0x628] sm:$0xff]  ;;  %v2473_v18 = vadd.f32 %v1449_v11, %v425_v10  ;;  %v1469_v7 = vld [vmem:[%s4964_s21 + $0x6c0] sm:$0xff] }
  0xeb   : > { %3475 = vst [vmem:[%s4979_s28 + $0x570] sm:$0xff] %v2451_v16  ;;  %v427_v16 = vld [vmem:[%s4957_s7 + $0x630] sm:$0xff]  ;;  %v2474_v21 = vadd.f32 %v1450_v14, %v426_v13  ;;  %v1470_v10 = vld [vmem:[%s4964_s21 + $0x6c8] sm:$0xff] }
  0xec   : > { %3476 = vst [vmem:[%s4979_s28 + $0x578] sm:$0xff] %v2452_v19  ;;  %v428_v19 = vld [vmem:[%s4957_s7 + $0x638] sm:$0xff]  ;;  %v2475_v24 = vadd.f32 %v1451_v17, %v427_v16  ;;  %v1471_v13 = vld [vmem:[%s4964_s21 + $0x6d0] sm:$0xff] }
  0xed   : > { %3477 = vst [vmem:[%s4979_s28 + $0x580] sm:$0xff] %v2453_v22  ;;  %v429_v22 = vld [vmem:[%s4957_s7 + $0x640] sm:$0xff]  ;;  %v2476_v27 = vadd.f32 %v1452_v20, %v428_v19  ;;  %v1472_v16 = vld [vmem:[%s4964_s21 + $0x6d8] sm:$0xff] }
  0xee   : > { %3478 = vst [vmem:[%s4979_s28 + $0x588] sm:$0xff] %v2454_v25  ;;  %v430_v25 = vld [vmem:[%s4957_s7 + $0x648] sm:$0xff]  ;;  %v2477_v30 = vadd.f32 %v1453_v23, %v429_v22  ;;  %v1473_v19 = vld [vmem:[%s4964_s21 + $0x6e0] sm:$0xff] }
  0xef   : > { %3479 = vst [vmem:[%s4979_s28 + $0x590] sm:$0xff] %v2455_v28  ;;  %v431_v28 = vld [vmem:[%s4957_s7 + $0x650] sm:$0xff]  ;;  %v2478_v33 = vadd.f32 %v1454_v26, %v430_v25  ;;  %v1474_v22 = vld [vmem:[%s4964_s21 + $0x6e8] sm:$0xff] }
  0xf0   : > { %3480 = vst [vmem:[%s4979_s28 + $0x598] sm:$0xff] %v2456_v31  ;;  %v432_v31 = vld [vmem:[%s4957_s7 + $0x658] sm:$0xff]  ;;  %v2479_v36 = vadd.f32 %v1455_v29, %v431_v28  ;;  %v1475_v25 = vld [vmem:[%s4964_s21 + $0x6f0] sm:$0xff] }
  0xf1   : > { %3481 = vst [vmem:[%s4979_s28 + $0x5a0] sm:$0xff] %v2457_v34  ;;  %v433_v34 = vld [vmem:[%s4957_s7 + $0x660] sm:$0xff]  ;;  %v2480_v39 = vadd.f32 %v1456_v32, %v432_v31  ;;  %v1476_v28 = vld [vmem:[%s4964_s21 + $0x6f8] sm:$0xff] }
  0xf2   : > { %3482 = vst [vmem:[%s4979_s28 + $0x5a8] sm:$0xff] %v2458_v37  ;;  %v434_v37 = vld [vmem:[%s4957_s7 + $0x668] sm:$0xff]  ;;  %v2481_v42 = vadd.f32 %v1457_v35, %v433_v34  ;;  %v1477_v31 = vld [vmem:[%s4964_s21 + $0x700] sm:$0xff] }
  0xf3   : > { %3483 = vst [vmem:[%s4979_s28 + $0x5b0] sm:$0xff] %v2459_v40  ;;  %v435_v40 = vld [vmem:[%s4957_s7 + $0x670] sm:$0xff]  ;;  %v2482_v45 = vadd.f32 %v1458_v38, %v434_v37  ;;  %v1478_v34 = vld [vmem:[%s4964_s21 + $0x708] sm:$0xff] }
  0xf4   : > { %3484 = vst [vmem:[%s4979_s28 + $0x5b8] sm:$0xff] %v2460_v43  ;;  %v436_v43 = vld [vmem:[%s4957_s7 + $0x678] sm:$0xff]  ;;  %v2483_v48 = vadd.f32 %v1459_v41, %v435_v40  ;;  %v1479_v37 = vld [vmem:[%s4964_s21 + $0x710] sm:$0xff] }
  0xf5   : > { %3485 = vst [vmem:[%s4979_s28 + $0x5c0] sm:$0xff] %v2461_v46  ;;  %v437_v46 = vld [vmem:[%s4957_s7 + $0x680] sm:$0xff]  ;;  %v2484_v51 = vadd.f32 %v1460_v44, %v436_v43  ;;  %v1480_v40 = vld [vmem:[%s4964_s21 + $0x718] sm:$0xff] }
  0xf6   : > { %3486 = vst [vmem:[%s4979_s28 + $0x5c8] sm:$0xff] %v2462_v49  ;;  %v438_v49 = vld [vmem:[%s4957_s7 + $0x688] sm:$0xff]  ;;  %v2485_v54 = vadd.f32 %v1461_v47, %v437_v46  ;;  %v1481_v43 = vld [vmem:[%s4964_s21 + $0x720] sm:$0xff] }
  0xf7   : > { %3487 = vst [vmem:[%s4979_s28 + $0x5d0] sm:$0xff] %v2463_v52  ;;  %v439_v52 = vld [vmem:[%s4957_s7 + $0x690] sm:$0xff]  ;;  %v2486_v57 = vadd.f32 %v1462_v50, %v438_v49  ;;  %v1482_v46 = vld [vmem:[%s4964_s21 + $0x728] sm:$0xff] }
  0xf8   : > { %3488 = vst [vmem:[%s4979_s28 + $0x5d8] sm:$0xff] %v2464_v55  ;;  %v440_v55 = vld [vmem:[%s4957_s7 + $0x698] sm:$0xff]  ;;  %v2487_v60 = vadd.f32 %v1463_v53, %v439_v52  ;;  %v1483_v49 = vld [vmem:[%s4964_s21 + $0x730] sm:$0xff] }
  0xf9   : > { %3489 = vst [vmem:[%s4979_s28 + $0x5e0] sm:$0xff] %v2465_v58  ;;  %v441_v58 = vld [vmem:[%s4957_s7 + $0x6a0] sm:$0xff]  ;;  %v2488_v63 = vadd.f32 %v1464_v56, %v440_v55  ;;  %v1484_v52 = vld [vmem:[%s4964_s21 + $0x738] sm:$0xff] }
  0xfa   : > { %3490 = vst [vmem:[%s4979_s28 + $0x5e8] sm:$0xff] %v2466_v61  ;;  %v442_v61 = vld [vmem:[%s4957_s7 + $0x6a8] sm:$0xff]  ;;  %v2489_v2 = vadd.f32 %v1465_v59, %v441_v58  ;;  %v1485_v55 = vld [vmem:[%s4964_s21 + $0x740] sm:$0xff] }
  0xfb   : > { %3491 = vst [vmem:[%s4979_s28 + $0x5f0] sm:$0xff] %v2467_v0  ;;  %v443_v0 = vld [vmem:[%s4957_s7 + $0x6b0] sm:$0xff]  ;;  %v2490_v5 = vadd.f32 %v1466_v62, %v442_v61  ;;  %v1486_v58 = vld [vmem:[%s4964_s21 + $0x748] sm:$0xff] }
  0xfc   : > { %3492 = vst [vmem:[%s4979_s28 + $0x5f8] sm:$0xff] %v2468_v3  ;;  %v444_v3 = vld [vmem:[%s4957_s7 + $0x6b8] sm:$0xff]  ;;  %v2491_v8 = vadd.f32 %v1467_v1, %v443_v0  ;;  %v1487_v61 = vld [vmem:[%s4964_s21 + $0x750] sm:$0xff] }
  0xfd   : > { %3493 = vst [vmem:[%s4979_s28 + $0x600] sm:$0xff] %v2469_v6  ;;  %v445_v6 = vld [vmem:[%s4957_s7 + $0x6c0] sm:$0xff]  ;;  %v2492_v11 = vadd.f32 %v1468_v4, %v444_v3  ;;  %v1488_v0 = vld [vmem:[%s4964_s21 + $0x758] sm:$0xff] }
  0xfe   : > { %3494 = vst [vmem:[%s4979_s28 + $0x608] sm:$0xff] %v2470_v9  ;;  %v446_v9 = vld [vmem:[%s4957_s7 + $0x6c8] sm:$0xff]  ;;  %v2493_v14 = vadd.f32 %v1469_v7, %v445_v6  ;;  %v1489_v3 = vld [vmem:[%s4964_s21 + $0x760] sm:$0xff] }
  0xff   : > { %3495 = vst [vmem:[%s4979_s28 + $0x610] sm:$0xff] %v2471_v12  ;;  %v447_v12 = vld [vmem:[%s4957_s7 + $0x6d0] sm:$0xff]  ;;  %v2494_v17 = vadd.f32 %v1470_v10, %v446_v9  ;;  %v1490_v6 = vld [vmem:[%s4964_s21 + $0x768] sm:$0xff] }
 0x100   : > { %3496 = vst [vmem:[%s4979_s28 + $0x618] sm:$0xff] %v2472_v15  ;;  %v448_v15 = vld [vmem:[%s4957_s7 + $0x6d8] sm:$0xff]  ;;  %v2495_v20 = vadd.f32 %v1471_v13, %v447_v12  ;;  %v1491_v9 = vld [vmem:[%s4964_s21 + $0x770] sm:$0xff] }
 0x101   : > { %3497 = vst [vmem:[%s4979_s28 + $0x620] sm:$0xff] %v2473_v18  ;;  %v449_v18 = vld [vmem:[%s4957_s7 + $0x6e0] sm:$0xff]  ;;  %v2496_v23 = vadd.f32 %v1472_v16, %v448_v15  ;;  %v1492_v12 = vld [vmem:[%s4964_s21 + $0x778] sm:$0xff] }
 0x102   : > { %3498 = vst [vmem:[%s4979_s28 + $0x628] sm:$0xff] %v2474_v21  ;;  %v450_v21 = vld [vmem:[%s4957_s7 + $0x6e8] sm:$0xff]  ;;  %v2497_v26 = vadd.f32 %v1473_v19, %v449_v18  ;;  %v1493_v15 = vld [vmem:[%s4964_s21 + $0x780] sm:$0xff] }
 0x103   : > { %3499 = vst [vmem:[%s4979_s28 + $0x630] sm:$0xff] %v2475_v24  ;;  %v451_v24 = vld [vmem:[%s4957_s7 + $0x6f0] sm:$0xff]  ;;  %v2498_v29 = vadd.f32 %v1474_v22, %v450_v21  ;;  %v1494_v18 = vld [vmem:[%s4964_s21 + $0x788] sm:$0xff] }
 0x104   : > { %3500 = vst [vmem:[%s4979_s28 + $0x638] sm:$0xff] %v2476_v27  ;;  %v452_v27 = vld [vmem:[%s4957_s7 + $0x6f8] sm:$0xff]  ;;  %v2499_v32 = vadd.f32 %v1475_v25, %v451_v24  ;;  %v1495_v21 = vld [vmem:[%s4964_s21 + $0x790] sm:$0xff] }
 0x105   : > { %3501 = vst [vmem:[%s4979_s28 + $0x640] sm:$0xff] %v2477_v30  ;;  %v453_v30 = vld [vmem:[%s4957_s7 + $0x700] sm:$0xff]  ;;  %v2500_v35 = vadd.f32 %v1476_v28, %v452_v27  ;;  %v1496_v24 = vld [vmem:[%s4964_s21 + $0x798] sm:$0xff] }
 0x106   : > { %3502 = vst [vmem:[%s4979_s28 + $0x648] sm:$0xff] %v2478_v33  ;;  %v454_v33 = vld [vmem:[%s4957_s7 + $0x708] sm:$0xff]  ;;  %v2501_v38 = vadd.f32 %v1477_v31, %v453_v30  ;;  %v1497_v27 = vld [vmem:[%s4964_s21 + $0x7a0] sm:$0xff] }
 0x107   : > { %3503 = vst [vmem:[%s4979_s28 + $0x650] sm:$0xff] %v2479_v36  ;;  %v455_v36 = vld [vmem:[%s4957_s7 + $0x710] sm:$0xff]  ;;  %v2502_v41 = vadd.f32 %v1478_v34, %v454_v33  ;;  %v1498_v30 = vld [vmem:[%s4964_s21 + $0x7a8] sm:$0xff] }
 0x108   : > { %3504 = vst [vmem:[%s4979_s28 + $0x658] sm:$0xff] %v2480_v39  ;;  %v456_v39 = vld [vmem:[%s4957_s7 + $0x718] sm:$0xff]  ;;  %v2503_v44 = vadd.f32 %v1479_v37, %v455_v36  ;;  %v1499_v33 = vld [vmem:[%s4964_s21 + $0x7b0] sm:$0xff] }
 0x109   : > { %3505 = vst [vmem:[%s4979_s28 + $0x660] sm:$0xff] %v2481_v42  ;;  %v457_v42 = vld [vmem:[%s4957_s7 + $0x720] sm:$0xff]  ;;  %v2504_v47 = vadd.f32 %v1480_v40, %v456_v39  ;;  %v1500_v36 = vld [vmem:[%s4964_s21 + $0x7b8] sm:$0xff] }
 0x10a   : > { %3506 = vst [vmem:[%s4979_s28 + $0x668] sm:$0xff] %v2482_v45  ;;  %v458_v45 = vld [vmem:[%s4957_s7 + $0x728] sm:$0xff]  ;;  %v2505_v50 = vadd.f32 %v1481_v43, %v457_v42  ;;  %v1501_v39 = vld [vmem:[%s4964_s21 + $0x7c0] sm:$0xff] }
 0x10b   : > { %3507 = vst [vmem:[%s4979_s28 + $0x670] sm:$0xff] %v2483_v48  ;;  %v459_v48 = vld [vmem:[%s4957_s7 + $0x730] sm:$0xff]  ;;  %v2506_v53 = vadd.f32 %v1482_v46, %v458_v45  ;;  %v1502_v42 = vld [vmem:[%s4964_s21 + $0x7c8] sm:$0xff] }
 0x10c   : > { %3508 = vst [vmem:[%s4979_s28 + $0x678] sm:$0xff] %v2484_v51  ;;  %v460_v51 = vld [vmem:[%s4957_s7 + $0x738] sm:$0xff]  ;;  %v2507_v56 = vadd.f32 %v1483_v49, %v459_v48  ;;  %v1503_v45 = vld [vmem:[%s4964_s21 + $0x7d0] sm:$0xff] }
 0x10d   : > { %3509 = vst [vmem:[%s4979_s28 + $0x680] sm:$0xff] %v2485_v54  ;;  %v461_v54 = vld [vmem:[%s4957_s7 + $0x740] sm:$0xff]  ;;  %v2508_v59 = vadd.f32 %v1484_v52, %v460_v51  ;;  %v1504_v48 = vld [vmem:[%s4964_s21 + $0x7d8] sm:$0xff] }
 0x10e   : > { %3510 = vst [vmem:[%s4979_s28 + $0x688] sm:$0xff] %v2486_v57  ;;  %v462_v57 = vld [vmem:[%s4957_s7 + $0x748] sm:$0xff]  ;;  %v2509_v62 = vadd.f32 %v1485_v55, %v461_v54  ;;  %v1505_v51 = vld [vmem:[%s4964_s21 + $0x7e0] sm:$0xff] }
 0x10f   : > { %3511 = vst [vmem:[%s4979_s28 + $0x690] sm:$0xff] %v2487_v60  ;;  %v463_v60 = vld [vmem:[%s4957_s7 + $0x750] sm:$0xff]  ;;  %v2510_v1 = vadd.f32 %v1486_v58, %v462_v57  ;;  %v1506_v54 = vld [vmem:[%s4964_s21 + $0x7e8] sm:$0xff] }
 0x110   : > { %3512 = vst [vmem:[%s4979_s28 + $0x698] sm:$0xff] %v2488_v63  ;;  %v464_v63 = vld [vmem:[%s4957_s7 + $0x758] sm:$0xff]  ;;  %v2511_v4 = vadd.f32 %v1487_v61, %v463_v60  ;;  %v1507_v57 = vld [vmem:[%s4964_s21 + $0x7f0] sm:$0xff] }
 0x111   : > { %3513 = vst [vmem:[%s4979_s28 + $0x6a0] sm:$0xff] %v2489_v2  ;;  %v465_v2 = vld [vmem:[%s4957_s7 + $0x760] sm:$0xff]  ;;  %v2512_v7 = vadd.f32 %v1488_v0, %v464_v63  ;;  %v1508_v60 = vld [vmem:[%s4964_s21 + $0x7f8] sm:$0xff] }
 0x112   : > { %3514 = vst [vmem:[%s4979_s28 + $0x6a8] sm:$0xff] %v2490_v5  ;;  %v466_v5 = vld [vmem:[%s4957_s7 + $0x768] sm:$0xff]  ;;  %v2513_v10 = vadd.f32 %v1489_v3, %v465_v2  ;;  %v1509_v63 = vld [vmem:[%s4964_s21 + $0x800] sm:$0xff] }
 0x113   : > { %3515 = vst [vmem:[%s4979_s28 + $0x6b0] sm:$0xff] %v2491_v8  ;;  %v467_v8 = vld [vmem:[%s4957_s7 + $0x770] sm:$0xff]  ;;  %v2514_v13 = vadd.f32 %v1490_v6, %v466_v5  ;;  %v1510_v2 = vld [vmem:[%s4964_s21 + $0x808] sm:$0xff] }
 0x114   : > { %3516 = vst [vmem:[%s4979_s28 + $0x6b8] sm:$0xff] %v2492_v11  ;;  %v468_v11 = vld [vmem:[%s4957_s7 + $0x778] sm:$0xff]  ;;  %v2515_v16 = vadd.f32 %v1491_v9, %v467_v8  ;;  %v1511_v5 = vld [vmem:[%s4964_s21 + $0x810] sm:$0xff] }
 0x115   : > { %3517 = vst [vmem:[%s4979_s28 + $0x6c0] sm:$0xff] %v2493_v14  ;;  %v469_v14 = vld [vmem:[%s4957_s7 + $0x780] sm:$0xff]  ;;  %v2516_v19 = vadd.f32 %v1492_v12, %v468_v11  ;;  %v1512_v8 = vld [vmem:[%s4964_s21 + $0x818] sm:$0xff] }
 0x116   : > { %3518 = vst [vmem:[%s4979_s28 + $0x6c8] sm:$0xff] %v2494_v17  ;;  %v470_v17 = vld [vmem:[%s4957_s7 + $0x788] sm:$0xff]  ;;  %v2517_v22 = vadd.f32 %v1493_v15, %v469_v14  ;;  %v1513_v11 = vld [vmem:[%s4964_s21 + $0x820] sm:$0xff] }
 0x117   : > { %3519 = vst [vmem:[%s4979_s28 + $0x6d0] sm:$0xff] %v2495_v20  ;;  %v471_v20 = vld [vmem:[%s4957_s7 + $0x790] sm:$0xff]  ;;  %v2518_v25 = vadd.f32 %v1494_v18, %v470_v17  ;;  %v1514_v14 = vld [vmem:[%s4964_s21 + $0x828] sm:$0xff] }
 0x118   : > { %3520 = vst [vmem:[%s4979_s28 + $0x6d8] sm:$0xff] %v2496_v23  ;;  %v472_v23 = vld [vmem:[%s4957_s7 + $0x798] sm:$0xff]  ;;  %v2519_v28 = vadd.f32 %v1495_v21, %v471_v20  ;;  %v1515_v17 = vld [vmem:[%s4964_s21 + $0x830] sm:$0xff] }
 0x119   : > { %3521 = vst [vmem:[%s4979_s28 + $0x6e0] sm:$0xff] %v2497_v26  ;;  %v473_v26 = vld [vmem:[%s4957_s7 + $0x7a0] sm:$0xff]  ;;  %v2520_v31 = vadd.f32 %v1496_v24, %v472_v23  ;;  %v1516_v20 = vld [vmem:[%s4964_s21 + $0x838] sm:$0xff] }
 0x11a   : > { %3522 = vst [vmem:[%s4979_s28 + $0x6e8] sm:$0xff] %v2498_v29  ;;  %v474_v29 = vld [vmem:[%s4957_s7 + $0x7a8] sm:$0xff]  ;;  %v2521_v34 = vadd.f32 %v1497_v27, %v473_v26  ;;  %v1517_v23 = vld [vmem:[%s4964_s21 + $0x840] sm:$0xff] }
 0x11b   : > { %3523 = vst [vmem:[%s4979_s28 + $0x6f0] sm:$0xff] %v2499_v32  ;;  %v475_v32 = vld [vmem:[%s4957_s7 + $0x7b0] sm:$0xff]  ;;  %v2522_v37 = vadd.f32 %v1498_v30, %v474_v29  ;;  %v1518_v26 = vld [vmem:[%s4964_s21 + $0x848] sm:$0xff] }
 0x11c   : > { %3524 = vst [vmem:[%s4979_s28 + $0x6f8] sm:$0xff] %v2500_v35  ;;  %v476_v35 = vld [vmem:[%s4957_s7 + $0x7b8] sm:$0xff]  ;;  %v2523_v40 = vadd.f32 %v1499_v33, %v475_v32  ;;  %v1519_v29 = vld [vmem:[%s4964_s21 + $0x850] sm:$0xff] }
 0x11d   : > { %3525 = vst [vmem:[%s4979_s28 + $0x700] sm:$0xff] %v2501_v38  ;;  %v477_v38 = vld [vmem:[%s4957_s7 + $0x7c0] sm:$0xff]  ;;  %v2524_v43 = vadd.f32 %v1500_v36, %v476_v35  ;;  %v1520_v32 = vld [vmem:[%s4964_s21 + $0x858] sm:$0xff] }
 0x11e   : > { %3526 = vst [vmem:[%s4979_s28 + $0x708] sm:$0xff] %v2502_v41  ;;  %v478_v41 = vld [vmem:[%s4957_s7 + $0x7c8] sm:$0xff]  ;;  %v2525_v46 = vadd.f32 %v1501_v39, %v477_v38  ;;  %v1521_v35 = vld [vmem:[%s4964_s21 + $0x860] sm:$0xff] }
 0x11f   : > { %3527 = vst [vmem:[%s4979_s28 + $0x710] sm:$0xff] %v2503_v44  ;;  %v479_v44 = vld [vmem:[%s4957_s7 + $0x7d0] sm:$0xff]  ;;  %v2526_v49 = vadd.f32 %v1502_v42, %v478_v41  ;;  %v1522_v38 = vld [vmem:[%s4964_s21 + $0x868] sm:$0xff] }
 0x120   : > { %3528 = vst [vmem:[%s4979_s28 + $0x718] sm:$0xff] %v2504_v47  ;;  %v480_v47 = vld [vmem:[%s4957_s7 + $0x7d8] sm:$0xff]  ;;  %v2527_v52 = vadd.f32 %v1503_v45, %v479_v44  ;;  %v1523_v41 = vld [vmem:[%s4964_s21 + $0x870] sm:$0xff] }
 0x121   : > { %3529 = vst [vmem:[%s4979_s28 + $0x720] sm:$0xff] %v2505_v50  ;;  %v481_v50 = vld [vmem:[%s4957_s7 + $0x7e0] sm:$0xff]  ;;  %v2528_v55 = vadd.f32 %v1504_v48, %v480_v47  ;;  %v1524_v44 = vld [vmem:[%s4964_s21 + $0x878] sm:$0xff] }
 0x122   : > { %3530 = vst [vmem:[%s4979_s28 + $0x728] sm:$0xff] %v2506_v53  ;;  %v482_v53 = vld [vmem:[%s4957_s7 + $0x7e8] sm:$0xff]  ;;  %v2529_v58 = vadd.f32 %v1505_v51, %v481_v50  ;;  %v1525_v47 = vld [vmem:[%s4964_s21 + $0x880] sm:$0xff] }
 0x123   : > { %3531 = vst [vmem:[%s4979_s28 + $0x730] sm:$0xff] %v2507_v56  ;;  %v483_v56 = vld [vmem:[%s4957_s7 + $0x7f0] sm:$0xff]  ;;  %v2530_v61 = vadd.f32 %v1506_v54, %v482_v53  ;;  %v1526_v50 = vld [vmem:[%s4964_s21 + $0x888] sm:$0xff] }
 0x124   : > { %3532 = vst [vmem:[%s4979_s28 + $0x738] sm:$0xff] %v2508_v59  ;;  %v484_v59 = vld [vmem:[%s4957_s7 + $0x7f8] sm:$0xff]  ;;  %v2531_v0 = vadd.f32 %v1507_v57, %v483_v56  ;;  %v1527_v53 = vld [vmem:[%s4964_s21 + $0x890] sm:$0xff] }
 0x125   : > { %3533 = vst [vmem:[%s4979_s28 + $0x740] sm:$0xff] %v2509_v62  ;;  %v485_v62 = vld [vmem:[%s4957_s7 + $0x800] sm:$0xff]  ;;  %v2532_v3 = vadd.f32 %v1508_v60, %v484_v59  ;;  %v1528_v56 = vld [vmem:[%s4964_s21 + $0x898] sm:$0xff] }
 0x126   : > { %3534 = vst [vmem:[%s4979_s28 + $0x748] sm:$0xff] %v2510_v1  ;;  %v486_v1 = vld [vmem:[%s4957_s7 + $0x808] sm:$0xff]  ;;  %v2533_v6 = vadd.f32 %v1509_v63, %v485_v62  ;;  %v1529_v59 = vld [vmem:[%s4964_s21 + $0x8a0] sm:$0xff] }
 0x127   : > { %3535 = vst [vmem:[%s4979_s28 + $0x750] sm:$0xff] %v2511_v4  ;;  %v487_v4 = vld [vmem:[%s4957_s7 + $0x810] sm:$0xff]  ;;  %v2534_v9 = vadd.f32 %v1510_v2, %v486_v1  ;;  %v1530_v62 = vld [vmem:[%s4964_s21 + $0x8a8] sm:$0xff] }
 0x128   : > { %3536 = vst [vmem:[%s4979_s28 + $0x758] sm:$0xff] %v2512_v7  ;;  %v488_v7 = vld [vmem:[%s4957_s7 + $0x818] sm:$0xff]  ;;  %v2535_v12 = vadd.f32 %v1511_v5, %v487_v4  ;;  %v1531_v1 = vld [vmem:[%s4964_s21 + $0x8b0] sm:$0xff] }
 0x129   : > { %3537 = vst [vmem:[%s4979_s28 + $0x760] sm:$0xff] %v2513_v10  ;;  %v489_v10 = vld [vmem:[%s4957_s7 + $0x820] sm:$0xff]  ;;  %v2536_v15 = vadd.f32 %v1512_v8, %v488_v7  ;;  %v1532_v4 = vld [vmem:[%s4964_s21 + $0x8b8] sm:$0xff] }
 0x12a   : > { %3538 = vst [vmem:[%s4979_s28 + $0x768] sm:$0xff] %v2514_v13  ;;  %v490_v13 = vld [vmem:[%s4957_s7 + $0x828] sm:$0xff]  ;;  %v2537_v18 = vadd.f32 %v1513_v11, %v489_v10  ;;  %v1533_v7 = vld [vmem:[%s4964_s21 + $0x8c0] sm:$0xff] }
 0x12b   : > { %3539 = vst [vmem:[%s4979_s28 + $0x770] sm:$0xff] %v2515_v16  ;;  %v491_v16 = vld [vmem:[%s4957_s7 + $0x830] sm:$0xff]  ;;  %v2538_v21 = vadd.f32 %v1514_v14, %v490_v13  ;;  %v1534_v10 = vld [vmem:[%s4964_s21 + $0x8c8] sm:$0xff] }
 0x12c   : > { %3540 = vst [vmem:[%s4979_s28 + $0x778] sm:$0xff] %v2516_v19  ;;  %v492_v19 = vld [vmem:[%s4957_s7 + $0x838] sm:$0xff]  ;;  %v2539_v24 = vadd.f32 %v1515_v17, %v491_v16  ;;  %v1535_v13 = vld [vmem:[%s4964_s21 + $0x8d0] sm:$0xff] }
 0x12d   : > { %3541 = vst [vmem:[%s4979_s28 + $0x780] sm:$0xff] %v2517_v22  ;;  %v493_v22 = vld [vmem:[%s4957_s7 + $0x840] sm:$0xff]  ;;  %v2540_v27 = vadd.f32 %v1516_v20, %v492_v19  ;;  %v1536_v16 = vld [vmem:[%s4964_s21 + $0x8d8] sm:$0xff] }
 0x12e   : > { %3542 = vst [vmem:[%s4979_s28 + $0x788] sm:$0xff] %v2518_v25  ;;  %v494_v25 = vld [vmem:[%s4957_s7 + $0x848] sm:$0xff]  ;;  %v2541_v30 = vadd.f32 %v1517_v23, %v493_v22  ;;  %v1537_v19 = vld [vmem:[%s4964_s21 + $0x8e0] sm:$0xff] }
 0x12f   : > { %3543 = vst [vmem:[%s4979_s28 + $0x790] sm:$0xff] %v2519_v28  ;;  %v495_v28 = vld [vmem:[%s4957_s7 + $0x850] sm:$0xff]  ;;  %v2542_v33 = vadd.f32 %v1518_v26, %v494_v25  ;;  %v1538_v22 = vld [vmem:[%s4964_s21 + $0x8e8] sm:$0xff] }
 0x130   : > { %3544 = vst [vmem:[%s4979_s28 + $0x798] sm:$0xff] %v2520_v31  ;;  %v496_v31 = vld [vmem:[%s4957_s7 + $0x858] sm:$0xff]  ;;  %v2543_v36 = vadd.f32 %v1519_v29, %v495_v28  ;;  %v1539_v25 = vld [vmem:[%s4964_s21 + $0x8f0] sm:$0xff] }
 0x131   : > { %3545 = vst [vmem:[%s4979_s28 + $0x7a0] sm:$0xff] %v2521_v34  ;;  %v497_v34 = vld [vmem:[%s4957_s7 + $0x860] sm:$0xff]  ;;  %v2544_v39 = vadd.f32 %v1520_v32, %v496_v31  ;;  %v1540_v28 = vld [vmem:[%s4964_s21 + $0x8f8] sm:$0xff] }
 0x132   : > { %3546 = vst [vmem:[%s4979_s28 + $0x7a8] sm:$0xff] %v2522_v37  ;;  %v498_v37 = vld [vmem:[%s4957_s7 + $0x868] sm:$0xff]  ;;  %v2545_v42 = vadd.f32 %v1521_v35, %v497_v34  ;;  %v1541_v31 = vld [vmem:[%s4964_s21 + $0x900] sm:$0xff] }
 0x133   : > { %3547 = vst [vmem:[%s4979_s28 + $0x7b0] sm:$0xff] %v2523_v40  ;;  %v499_v40 = vld [vmem:[%s4957_s7 + $0x870] sm:$0xff]  ;;  %v2546_v45 = vadd.f32 %v1522_v38, %v498_v37  ;;  %v1542_v34 = vld [vmem:[%s4964_s21 + $0x908] sm:$0xff] }
 0x134   : > { %3548 = vst [vmem:[%s4979_s28 + $0x7b8] sm:$0xff] %v2524_v43  ;;  %v500_v43 = vld [vmem:[%s4957_s7 + $0x878] sm:$0xff]  ;;  %v2547_v48 = vadd.f32 %v1523_v41, %v499_v40  ;;  %v1543_v37 = vld [vmem:[%s4964_s21 + $0x910] sm:$0xff] }
 0x135   : > { %3549 = vst [vmem:[%s4979_s28 + $0x7c0] sm:$0xff] %v2525_v46  ;;  %v501_v46 = vld [vmem:[%s4957_s7 + $0x880] sm:$0xff]  ;;  %v2548_v51 = vadd.f32 %v1524_v44, %v500_v43  ;;  %v1544_v40 = vld [vmem:[%s4964_s21 + $0x918] sm:$0xff] }
 0x136   : > { %3550 = vst [vmem:[%s4979_s28 + $0x7c8] sm:$0xff] %v2526_v49  ;;  %v502_v49 = vld [vmem:[%s4957_s7 + $0x888] sm:$0xff]  ;;  %v2549_v54 = vadd.f32 %v1525_v47, %v501_v46  ;;  %v1545_v43 = vld [vmem:[%s4964_s21 + $0x920] sm:$0xff] }
 0x137   : > { %3551 = vst [vmem:[%s4979_s28 + $0x7d0] sm:$0xff] %v2527_v52  ;;  %v503_v52 = vld [vmem:[%s4957_s7 + $0x890] sm:$0xff]  ;;  %v2550_v57 = vadd.f32 %v1526_v50, %v502_v49  ;;  %v1546_v46 = vld [vmem:[%s4964_s21 + $0x928] sm:$0xff] }
 0x138   : > { %3552 = vst [vmem:[%s4979_s28 + $0x7d8] sm:$0xff] %v2528_v55  ;;  %v504_v55 = vld [vmem:[%s4957_s7 + $0x898] sm:$0xff]  ;;  %v2551_v60 = vadd.f32 %v1527_v53, %v503_v52  ;;  %v1547_v49 = vld [vmem:[%s4964_s21 + $0x930] sm:$0xff] }
 0x139   : > { %3553 = vst [vmem:[%s4979_s28 + $0x7e0] sm:$0xff] %v2529_v58  ;;  %v505_v58 = vld [vmem:[%s4957_s7 + $0x8a0] sm:$0xff]  ;;  %v2552_v63 = vadd.f32 %v1528_v56, %v504_v55  ;;  %v1548_v52 = vld [vmem:[%s4964_s21 + $0x938] sm:$0xff] }
 0x13a   : > { %3554 = vst [vmem:[%s4979_s28 + $0x7e8] sm:$0xff] %v2530_v61  ;;  %v506_v61 = vld [vmem:[%s4957_s7 + $0x8a8] sm:$0xff]  ;;  %v2553_v2 = vadd.f32 %v1529_v59, %v505_v58  ;;  %v1549_v55 = vld [vmem:[%s4964_s21 + $0x940] sm:$0xff] }
 0x13b   : > { %3555 = vst [vmem:[%s4979_s28 + $0x7f0] sm:$0xff] %v2531_v0  ;;  %v507_v0 = vld [vmem:[%s4957_s7 + $0x8b0] sm:$0xff]  ;;  %v2554_v5 = vadd.f32 %v1530_v62, %v506_v61  ;;  %v1550_v58 = vld [vmem:[%s4964_s21 + $0x948] sm:$0xff] }
 0x13c   : > { %3556 = vst [vmem:[%s4979_s28 + $0x7f8] sm:$0xff] %v2532_v3  ;;  %v508_v3 = vld [vmem:[%s4957_s7 + $0x8b8] sm:$0xff]  ;;  %v2555_v8 = vadd.f32 %v1531_v1, %v507_v0  ;;  %v1551_v61 = vld [vmem:[%s4964_s21 + $0x950] sm:$0xff] }
 0x13d   : > { %3557 = vst [vmem:[%s4979_s28 + $0x800] sm:$0xff] %v2533_v6  ;;  %v509_v6 = vld [vmem:[%s4957_s7 + $0x8c0] sm:$0xff]  ;;  %v2556_v11 = vadd.f32 %v1532_v4, %v508_v3  ;;  %v1552_v0 = vld [vmem:[%s4964_s21 + $0x958] sm:$0xff] }
 0x13e   : > { %3558 = vst [vmem:[%s4979_s28 + $0x808] sm:$0xff] %v2534_v9  ;;  %v510_v9 = vld [vmem:[%s4957_s7 + $0x8c8] sm:$0xff]  ;;  %v2557_v14 = vadd.f32 %v1533_v7, %v509_v6  ;;  %v1553_v3 = vld [vmem:[%s4964_s21 + $0x960] sm:$0xff] }
 0x13f   : > { %3559 = vst [vmem:[%s4979_s28 + $0x810] sm:$0xff] %v2535_v12  ;;  %v511_v12 = vld [vmem:[%s4957_s7 + $0x8d0] sm:$0xff]  ;;  %v2558_v17 = vadd.f32 %v1534_v10, %v510_v9  ;;  %v1554_v6 = vld [vmem:[%s4964_s21 + $0x968] sm:$0xff] }
 0x140   : > { %3560 = vst [vmem:[%s4979_s28 + $0x818] sm:$0xff] %v2536_v15  ;;  %v512_v15 = vld [vmem:[%s4957_s7 + $0x8d8] sm:$0xff]  ;;  %v2559_v20 = vadd.f32 %v1535_v13, %v511_v12  ;;  %v1555_v9 = vld [vmem:[%s4964_s21 + $0x970] sm:$0xff] }
 0x141   : > { %3561 = vst [vmem:[%s4979_s28 + $0x820] sm:$0xff] %v2537_v18  ;;  %v513_v18 = vld [vmem:[%s4957_s7 + $0x8e0] sm:$0xff]  ;;  %v2560_v23 = vadd.f32 %v1536_v16, %v512_v15  ;;  %v1556_v12 = vld [vmem:[%s4964_s21 + $0x978] sm:$0xff] }
 0x142   : > { %3562 = vst [vmem:[%s4979_s28 + $0x828] sm:$0xff] %v2538_v21  ;;  %v514_v21 = vld [vmem:[%s4957_s7 + $0x8e8] sm:$0xff]  ;;  %v2561_v26 = vadd.f32 %v1537_v19, %v513_v18  ;;  %v1557_v15 = vld [vmem:[%s4964_s21 + $0x980] sm:$0xff] }
 0x143   : > { %3563 = vst [vmem:[%s4979_s28 + $0x830] sm:$0xff] %v2539_v24  ;;  %v515_v24 = vld [vmem:[%s4957_s7 + $0x8f0] sm:$0xff]  ;;  %v2562_v29 = vadd.f32 %v1538_v22, %v514_v21  ;;  %v1558_v18 = vld [vmem:[%s4964_s21 + $0x988] sm:$0xff] }
 0x144   : > { %3564 = vst [vmem:[%s4979_s28 + $0x838] sm:$0xff] %v2540_v27  ;;  %v516_v27 = vld [vmem:[%s4957_s7 + $0x8f8] sm:$0xff]  ;;  %v2563_v32 = vadd.f32 %v1539_v25, %v515_v24  ;;  %v1559_v21 = vld [vmem:[%s4964_s21 + $0x990] sm:$0xff] }
 0x145   : > { %3565 = vst [vmem:[%s4979_s28 + $0x840] sm:$0xff] %v2541_v30  ;;  %v517_v30 = vld [vmem:[%s4957_s7 + $0x900] sm:$0xff]  ;;  %v2564_v35 = vadd.f32 %v1540_v28, %v516_v27  ;;  %v1560_v24 = vld [vmem:[%s4964_s21 + $0x998] sm:$0xff] }
 0x146   : > { %3566 = vst [vmem:[%s4979_s28 + $0x848] sm:$0xff] %v2542_v33  ;;  %v518_v33 = vld [vmem:[%s4957_s7 + $0x908] sm:$0xff]  ;;  %v2565_v38 = vadd.f32 %v1541_v31, %v517_v30  ;;  %v1561_v27 = vld [vmem:[%s4964_s21 + $0x9a0] sm:$0xff] }
 0x147   : > { %3567 = vst [vmem:[%s4979_s28 + $0x850] sm:$0xff] %v2543_v36  ;;  %v519_v36 = vld [vmem:[%s4957_s7 + $0x910] sm:$0xff]  ;;  %v2566_v41 = vadd.f32 %v1542_v34, %v518_v33  ;;  %v1562_v30 = vld [vmem:[%s4964_s21 + $0x9a8] sm:$0xff] }
 0x148   : > { %3568 = vst [vmem:[%s4979_s28 + $0x858] sm:$0xff] %v2544_v39  ;;  %v520_v39 = vld [vmem:[%s4957_s7 + $0x918] sm:$0xff]  ;;  %v2567_v44 = vadd.f32 %v1543_v37, %v519_v36  ;;  %v1563_v33 = vld [vmem:[%s4964_s21 + $0x9b0] sm:$0xff] }
 0x149   : > { %3569 = vst [vmem:[%s4979_s28 + $0x860] sm:$0xff] %v2545_v42  ;;  %v521_v42 = vld [vmem:[%s4957_s7 + $0x920] sm:$0xff]  ;;  %v2568_v47 = vadd.f32 %v1544_v40, %v520_v39  ;;  %v1564_v36 = vld [vmem:[%s4964_s21 + $0x9b8] sm:$0xff] }
 0x14a   : > { %3570 = vst [vmem:[%s4979_s28 + $0x868] sm:$0xff] %v2546_v45  ;;  %v522_v45 = vld [vmem:[%s4957_s7 + $0x928] sm:$0xff]  ;;  %v2569_v50 = vadd.f32 %v1545_v43, %v521_v42  ;;  %v1565_v39 = vld [vmem:[%s4964_s21 + $0x9c0] sm:$0xff] }
 0x14b   : > { %3571 = vst [vmem:[%s4979_s28 + $0x870] sm:$0xff] %v2547_v48  ;;  %v523_v48 = vld [vmem:[%s4957_s7 + $0x930] sm:$0xff]  ;;  %v2570_v53 = vadd.f32 %v1546_v46, %v522_v45  ;;  %v1566_v42 = vld [vmem:[%s4964_s21 + $0x9c8] sm:$0xff] }
 0x14c   : > { %3572 = vst [vmem:[%s4979_s28 + $0x878] sm:$0xff] %v2548_v51  ;;  %v524_v51 = vld [vmem:[%s4957_s7 + $0x938] sm:$0xff]  ;;  %v2571_v56 = vadd.f32 %v1547_v49, %v523_v48  ;;  %v1567_v45 = vld [vmem:[%s4964_s21 + $0x9d0] sm:$0xff] }
 0x14d   : > { %3573 = vst [vmem:[%s4979_s28 + $0x880] sm:$0xff] %v2549_v54  ;;  %v525_v54 = vld [vmem:[%s4957_s7 + $0x940] sm:$0xff]  ;;  %v2572_v59 = vadd.f32 %v1548_v52, %v524_v51  ;;  %v1568_v48 = vld [vmem:[%s4964_s21 + $0x9d8] sm:$0xff] }
 0x14e   : > { %3574 = vst [vmem:[%s4979_s28 + $0x888] sm:$0xff] %v2550_v57  ;;  %v526_v57 = vld [vmem:[%s4957_s7 + $0x948] sm:$0xff]  ;;  %v2573_v62 = vadd.f32 %v1549_v55, %v525_v54  ;;  %v1569_v51 = vld [vmem:[%s4964_s21 + $0x9e0] sm:$0xff] }
 0x14f   : > { %3575 = vst [vmem:[%s4979_s28 + $0x890] sm:$0xff] %v2551_v60  ;;  %v527_v60 = vld [vmem:[%s4957_s7 + $0x950] sm:$0xff]  ;;  %v2574_v1 = vadd.f32 %v1550_v58, %v526_v57  ;;  %v1570_v54 = vld [vmem:[%s4964_s21 + $0x9e8] sm:$0xff] }
 0x150   : > { %3576 = vst [vmem:[%s4979_s28 + $0x898] sm:$0xff] %v2552_v63  ;;  %v528_v63 = vld [vmem:[%s4957_s7 + $0x958] sm:$0xff]  ;;  %v2575_v4 = vadd.f32 %v1551_v61, %v527_v60  ;;  %v1571_v57 = vld [vmem:[%s4964_s21 + $0x9f0] sm:$0xff] }
 0x151   : > { %3577 = vst [vmem:[%s4979_s28 + $0x8a0] sm:$0xff] %v2553_v2  ;;  %v529_v2 = vld [vmem:[%s4957_s7 + $0x960] sm:$0xff]  ;;  %v2576_v7 = vadd.f32 %v1552_v0, %v528_v63  ;;  %v1572_v60 = vld [vmem:[%s4964_s21 + $0x9f8] sm:$0xff] }
 0x152   : > { %3578 = vst [vmem:[%s4979_s28 + $0x8a8] sm:$0xff] %v2554_v5  ;;  %v530_v5 = vld [vmem:[%s4957_s7 + $0x968] sm:$0xff]  ;;  %v2577_v10 = vadd.f32 %v1553_v3, %v529_v2  ;;  %v1573_v63 = vld [vmem:[%s4964_s21 + $0xa00] sm:$0xff] }
 0x153   : > { %3579 = vst [vmem:[%s4979_s28 + $0x8b0] sm:$0xff] %v2555_v8  ;;  %v531_v8 = vld [vmem:[%s4957_s7 + $0x970] sm:$0xff]  ;;  %v2578_v13 = vadd.f32 %v1554_v6, %v530_v5  ;;  %v1574_v2 = vld [vmem:[%s4964_s21 + $0xa08] sm:$0xff] }
 0x154   : > { %3580 = vst [vmem:[%s4979_s28 + $0x8b8] sm:$0xff] %v2556_v11  ;;  %v532_v11 = vld [vmem:[%s4957_s7 + $0x978] sm:$0xff]  ;;  %v2579_v16 = vadd.f32 %v1555_v9, %v531_v8  ;;  %v1575_v5 = vld [vmem:[%s4964_s21 + $0xa10] sm:$0xff] }
 0x155   : > { %3581 = vst [vmem:[%s4979_s28 + $0x8c0] sm:$0xff] %v2557_v14  ;;  %v533_v14 = vld [vmem:[%s4957_s7 + $0x980] sm:$0xff]  ;;  %v2580_v19 = vadd.f32 %v1556_v12, %v532_v11  ;;  %v1576_v8 = vld [vmem:[%s4964_s21 + $0xa18] sm:$0xff] }
 0x156   : > { %3582 = vst [vmem:[%s4979_s28 + $0x8c8] sm:$0xff] %v2558_v17  ;;  %v534_v17 = vld [vmem:[%s4957_s7 + $0x988] sm:$0xff]  ;;  %v2581_v22 = vadd.f32 %v1557_v15, %v533_v14  ;;  %v1577_v11 = vld [vmem:[%s4964_s21 + $0xa20] sm:$0xff] }
 0x157   : > { %3583 = vst [vmem:[%s4979_s28 + $0x8d0] sm:$0xff] %v2559_v20  ;;  %v535_v20 = vld [vmem:[%s4957_s7 + $0x990] sm:$0xff]  ;;  %v2582_v25 = vadd.f32 %v1558_v18, %v534_v17  ;;  %v1578_v14 = vld [vmem:[%s4964_s21 + $0xa28] sm:$0xff] }
 0x158   : > { %3584 = vst [vmem:[%s4979_s28 + $0x8d8] sm:$0xff] %v2560_v23  ;;  %v536_v23 = vld [vmem:[%s4957_s7 + $0x998] sm:$0xff]  ;;  %v2583_v28 = vadd.f32 %v1559_v21, %v535_v20  ;;  %v1579_v17 = vld [vmem:[%s4964_s21 + $0xa30] sm:$0xff] }
 0x159   : > { %3585 = vst [vmem:[%s4979_s28 + $0x8e0] sm:$0xff] %v2561_v26  ;;  %v537_v26 = vld [vmem:[%s4957_s7 + $0x9a0] sm:$0xff]  ;;  %v2584_v31 = vadd.f32 %v1560_v24, %v536_v23  ;;  %v1580_v20 = vld [vmem:[%s4964_s21 + $0xa38] sm:$0xff] }
 0x15a   : > { %3586 = vst [vmem:[%s4979_s28 + $0x8e8] sm:$0xff] %v2562_v29  ;;  %v538_v29 = vld [vmem:[%s4957_s7 + $0x9a8] sm:$0xff]  ;;  %v2585_v34 = vadd.f32 %v1561_v27, %v537_v26  ;;  %v1581_v23 = vld [vmem:[%s4964_s21 + $0xa40] sm:$0xff] }
 0x15b   : > { %3587 = vst [vmem:[%s4979_s28 + $0x8f0] sm:$0xff] %v2563_v32  ;;  %v539_v32 = vld [vmem:[%s4957_s7 + $0x9b0] sm:$0xff]  ;;  %v2586_v37 = vadd.f32 %v1562_v30, %v538_v29  ;;  %v1582_v26 = vld [vmem:[%s4964_s21 + $0xa48] sm:$0xff] }
 0x15c   : > { %3588 = vst [vmem:[%s4979_s28 + $0x8f8] sm:$0xff] %v2564_v35  ;;  %v540_v35 = vld [vmem:[%s4957_s7 + $0x9b8] sm:$0xff]  ;;  %v2587_v40 = vadd.f32 %v1563_v33, %v539_v32  ;;  %v1583_v29 = vld [vmem:[%s4964_s21 + $0xa50] sm:$0xff] }
 0x15d   : > { %3589 = vst [vmem:[%s4979_s28 + $0x900] sm:$0xff] %v2565_v38  ;;  %v541_v38 = vld [vmem:[%s4957_s7 + $0x9c0] sm:$0xff]  ;;  %v2588_v43 = vadd.f32 %v1564_v36, %v540_v35  ;;  %v1584_v32 = vld [vmem:[%s4964_s21 + $0xa58] sm:$0xff] }
 0x15e   : > { %3590 = vst [vmem:[%s4979_s28 + $0x908] sm:$0xff] %v2566_v41  ;;  %v542_v41 = vld [vmem:[%s4957_s7 + $0x9c8] sm:$0xff]  ;;  %v2589_v46 = vadd.f32 %v1565_v39, %v541_v38  ;;  %v1585_v35 = vld [vmem:[%s4964_s21 + $0xa60] sm:$0xff] }
 0x15f   : > { %3591 = vst [vmem:[%s4979_s28 + $0x910] sm:$0xff] %v2567_v44  ;;  %v543_v44 = vld [vmem:[%s4957_s7 + $0x9d0] sm:$0xff]  ;;  %v2590_v49 = vadd.f32 %v1566_v42, %v542_v41  ;;  %v1586_v38 = vld [vmem:[%s4964_s21 + $0xa68] sm:$0xff] }
 0x160   : > { %3592 = vst [vmem:[%s4979_s28 + $0x918] sm:$0xff] %v2568_v47  ;;  %v544_v47 = vld [vmem:[%s4957_s7 + $0x9d8] sm:$0xff]  ;;  %v2591_v52 = vadd.f32 %v1567_v45, %v543_v44  ;;  %v1587_v41 = vld [vmem:[%s4964_s21 + $0xa70] sm:$0xff] }
 0x161   : > { %3593 = vst [vmem:[%s4979_s28 + $0x920] sm:$0xff] %v2569_v50  ;;  %v545_v50 = vld [vmem:[%s4957_s7 + $0x9e0] sm:$0xff]  ;;  %v2592_v55 = vadd.f32 %v1568_v48, %v544_v47  ;;  %v1588_v44 = vld [vmem:[%s4964_s21 + $0xa78] sm:$0xff] }
 0x162   : > { %3594 = vst [vmem:[%s4979_s28 + $0x928] sm:$0xff] %v2570_v53  ;;  %v546_v53 = vld [vmem:[%s4957_s7 + $0x9e8] sm:$0xff]  ;;  %v2593_v58 = vadd.f32 %v1569_v51, %v545_v50  ;;  %v1589_v47 = vld [vmem:[%s4964_s21 + $0xa80] sm:$0xff] }
 0x163   : > { %3595 = vst [vmem:[%s4979_s28 + $0x930] sm:$0xff] %v2571_v56  ;;  %v547_v56 = vld [vmem:[%s4957_s7 + $0x9f0] sm:$0xff]  ;;  %v2594_v61 = vadd.f32 %v1570_v54, %v546_v53  ;;  %v1590_v50 = vld [vmem:[%s4964_s21 + $0xa88] sm:$0xff] }
 0x164   : > { %3596 = vst [vmem:[%s4979_s28 + $0x938] sm:$0xff] %v2572_v59  ;;  %v548_v59 = vld [vmem:[%s4957_s7 + $0x9f8] sm:$0xff]  ;;  %v2595_v0 = vadd.f32 %v1571_v57, %v547_v56  ;;  %v1591_v53 = vld [vmem:[%s4964_s21 + $0xa90] sm:$0xff] }
 0x165   : > { %3597 = vst [vmem:[%s4979_s28 + $0x940] sm:$0xff] %v2573_v62  ;;  %v549_v62 = vld [vmem:[%s4957_s7 + $0xa00] sm:$0xff]  ;;  %v2596_v3 = vadd.f32 %v1572_v60, %v548_v59  ;;  %v1592_v56 = vld [vmem:[%s4964_s21 + $0xa98] sm:$0xff] }
 0x166   : > { %3598 = vst [vmem:[%s4979_s28 + $0x948] sm:$0xff] %v2574_v1  ;;  %v550_v1 = vld [vmem:[%s4957_s7 + $0xa08] sm:$0xff]  ;;  %v2597_v6 = vadd.f32 %v1573_v63, %v549_v62  ;;  %v1593_v59 = vld [vmem:[%s4964_s21 + $0xaa0] sm:$0xff] }
 0x167   : > { %3599 = vst [vmem:[%s4979_s28 + $0x950] sm:$0xff] %v2575_v4  ;;  %v551_v4 = vld [vmem:[%s4957_s7 + $0xa10] sm:$0xff]  ;;  %v2598_v9 = vadd.f32 %v1574_v2, %v550_v1  ;;  %v1594_v62 = vld [vmem:[%s4964_s21 + $0xaa8] sm:$0xff] }
 0x168   : > { %3600 = vst [vmem:[%s4979_s28 + $0x958] sm:$0xff] %v2576_v7  ;;  %v552_v7 = vld [vmem:[%s4957_s7 + $0xa18] sm:$0xff]  ;;  %v2599_v12 = vadd.f32 %v1575_v5, %v551_v4  ;;  %v1595_v1 = vld [vmem:[%s4964_s21 + $0xab0] sm:$0xff] }
 0x169   : > { %3601 = vst [vmem:[%s4979_s28 + $0x960] sm:$0xff] %v2577_v10  ;;  %v553_v10 = vld [vmem:[%s4957_s7 + $0xa20] sm:$0xff]  ;;  %v2600_v15 = vadd.f32 %v1576_v8, %v552_v7  ;;  %v1596_v4 = vld [vmem:[%s4964_s21 + $0xab8] sm:$0xff] }
 0x16a   : > { %3602 = vst [vmem:[%s4979_s28 + $0x968] sm:$0xff] %v2578_v13  ;;  %v554_v13 = vld [vmem:[%s4957_s7 + $0xa28] sm:$0xff]  ;;  %v2601_v18 = vadd.f32 %v1577_v11, %v553_v10  ;;  %v1597_v7 = vld [vmem:[%s4964_s21 + $0xac0] sm:$0xff] }
 0x16b   : > { %3603 = vst [vmem:[%s4979_s28 + $0x970] sm:$0xff] %v2579_v16  ;;  %v555_v16 = vld [vmem:[%s4957_s7 + $0xa30] sm:$0xff]  ;;  %v2602_v21 = vadd.f32 %v1578_v14, %v554_v13  ;;  %v1598_v10 = vld [vmem:[%s4964_s21 + $0xac8] sm:$0xff] }
 0x16c   : > { %3604 = vst [vmem:[%s4979_s28 + $0x978] sm:$0xff] %v2580_v19  ;;  %v556_v19 = vld [vmem:[%s4957_s7 + $0xa38] sm:$0xff]  ;;  %v2603_v24 = vadd.f32 %v1579_v17, %v555_v16  ;;  %v1599_v13 = vld [vmem:[%s4964_s21 + $0xad0] sm:$0xff] }
 0x16d   : > { %3605 = vst [vmem:[%s4979_s28 + $0x980] sm:$0xff] %v2581_v22  ;;  %v557_v22 = vld [vmem:[%s4957_s7 + $0xa40] sm:$0xff]  ;;  %v2604_v27 = vadd.f32 %v1580_v20, %v556_v19  ;;  %v1600_v16 = vld [vmem:[%s4964_s21 + $0xad8] sm:$0xff] }
 0x16e   : > { %3606 = vst [vmem:[%s4979_s28 + $0x988] sm:$0xff] %v2582_v25  ;;  %v558_v25 = vld [vmem:[%s4957_s7 + $0xa48] sm:$0xff]  ;;  %v2605_v30 = vadd.f32 %v1581_v23, %v557_v22  ;;  %v1601_v19 = vld [vmem:[%s4964_s21 + $0xae0] sm:$0xff] }
 0x16f   : > { %3607 = vst [vmem:[%s4979_s28 + $0x990] sm:$0xff] %v2583_v28  ;;  %v559_v28 = vld [vmem:[%s4957_s7 + $0xa50] sm:$0xff]  ;;  %v2606_v33 = vadd.f32 %v1582_v26, %v558_v25  ;;  %v1602_v22 = vld [vmem:[%s4964_s21 + $0xae8] sm:$0xff] }
 0x170   : > { %3608 = vst [vmem:[%s4979_s28 + $0x998] sm:$0xff] %v2584_v31  ;;  %v560_v31 = vld [vmem:[%s4957_s7 + $0xa58] sm:$0xff]  ;;  %v2607_v36 = vadd.f32 %v1583_v29, %v559_v28  ;;  %v1603_v25 = vld [vmem:[%s4964_s21 + $0xaf0] sm:$0xff] }
 0x171   : > { %3609 = vst [vmem:[%s4979_s28 + $0x9a0] sm:$0xff] %v2585_v34  ;;  %v561_v34 = vld [vmem:[%s4957_s7 + $0xa60] sm:$0xff]  ;;  %v2608_v39 = vadd.f32 %v1584_v32, %v560_v31  ;;  %v1604_v28 = vld [vmem:[%s4964_s21 + $0xaf8] sm:$0xff] }
 0x172   : > { %3610 = vst [vmem:[%s4979_s28 + $0x9a8] sm:$0xff] %v2586_v37  ;;  %v562_v37 = vld [vmem:[%s4957_s7 + $0xa68] sm:$0xff]  ;;  %v2609_v42 = vadd.f32 %v1585_v35, %v561_v34  ;;  %v1605_v31 = vld [vmem:[%s4964_s21 + $0xb00] sm:$0xff] }
 0x173   : > { %3611 = vst [vmem:[%s4979_s28 + $0x9b0] sm:$0xff] %v2587_v40  ;;  %v563_v40 = vld [vmem:[%s4957_s7 + $0xa70] sm:$0xff]  ;;  %v2610_v45 = vadd.f32 %v1586_v38, %v562_v37  ;;  %v1606_v34 = vld [vmem:[%s4964_s21 + $0xb08] sm:$0xff] }
 0x174   : > { %3612 = vst [vmem:[%s4979_s28 + $0x9b8] sm:$0xff] %v2588_v43  ;;  %v564_v43 = vld [vmem:[%s4957_s7 + $0xa78] sm:$0xff]  ;;  %v2611_v48 = vadd.f32 %v1587_v41, %v563_v40  ;;  %v1607_v37 = vld [vmem:[%s4964_s21 + $0xb10] sm:$0xff] }
 0x175   : > { %3613 = vst [vmem:[%s4979_s28 + $0x9c0] sm:$0xff] %v2589_v46  ;;  %v565_v46 = vld [vmem:[%s4957_s7 + $0xa80] sm:$0xff]  ;;  %v2612_v51 = vadd.f32 %v1588_v44, %v564_v43  ;;  %v1608_v40 = vld [vmem:[%s4964_s21 + $0xb18] sm:$0xff] }
 0x176   : > { %3614 = vst [vmem:[%s4979_s28 + $0x9c8] sm:$0xff] %v2590_v49  ;;  %v566_v49 = vld [vmem:[%s4957_s7 + $0xa88] sm:$0xff]  ;;  %v2613_v54 = vadd.f32 %v1589_v47, %v565_v46  ;;  %v1609_v43 = vld [vmem:[%s4964_s21 + $0xb20] sm:$0xff] }
 0x177   : > { %3615 = vst [vmem:[%s4979_s28 + $0x9d0] sm:$0xff] %v2591_v52  ;;  %v567_v52 = vld [vmem:[%s4957_s7 + $0xa90] sm:$0xff]  ;;  %v2614_v57 = vadd.f32 %v1590_v50, %v566_v49  ;;  %v1610_v46 = vld [vmem:[%s4964_s21 + $0xb28] sm:$0xff] }
 0x178   : > { %3616 = vst [vmem:[%s4979_s28 + $0x9d8] sm:$0xff] %v2592_v55  ;;  %v568_v55 = vld [vmem:[%s4957_s7 + $0xa98] sm:$0xff]  ;;  %v2615_v60 = vadd.f32 %v1591_v53, %v567_v52  ;;  %v1611_v49 = vld [vmem:[%s4964_s21 + $0xb30] sm:$0xff] }
 0x179   : > { %3617 = vst [vmem:[%s4979_s28 + $0x9e0] sm:$0xff] %v2593_v58  ;;  %v569_v58 = vld [vmem:[%s4957_s7 + $0xaa0] sm:$0xff]  ;;  %v2616_v63 = vadd.f32 %v1592_v56, %v568_v55  ;;  %v1612_v52 = vld [vmem:[%s4964_s21 + $0xb38] sm:$0xff] }
 0x17a   : > { %3618 = vst [vmem:[%s4979_s28 + $0x9e8] sm:$0xff] %v2594_v61  ;;  %v570_v61 = vld [vmem:[%s4957_s7 + $0xaa8] sm:$0xff]  ;;  %v2617_v2 = vadd.f32 %v1593_v59, %v569_v58  ;;  %v1613_v55 = vld [vmem:[%s4964_s21 + $0xb40] sm:$0xff] }
 0x17b   : > { %3619 = vst [vmem:[%s4979_s28 + $0x9f0] sm:$0xff] %v2595_v0  ;;  %v571_v0 = vld [vmem:[%s4957_s7 + $0xab0] sm:$0xff]  ;;  %v2618_v5 = vadd.f32 %v1594_v62, %v570_v61  ;;  %v1614_v58 = vld [vmem:[%s4964_s21 + $0xb48] sm:$0xff] }
 0x17c   : > { %3620 = vst [vmem:[%s4979_s28 + $0x9f8] sm:$0xff] %v2596_v3  ;;  %v572_v3 = vld [vmem:[%s4957_s7 + $0xab8] sm:$0xff]  ;;  %v2619_v8 = vadd.f32 %v1595_v1, %v571_v0  ;;  %v1615_v61 = vld [vmem:[%s4964_s21 + $0xb50] sm:$0xff] }
 0x17d   : > { %3621 = vst [vmem:[%s4979_s28 + $0xa00] sm:$0xff] %v2597_v6  ;;  %v573_v6 = vld [vmem:[%s4957_s7 + $0xac0] sm:$0xff]  ;;  %v2620_v11 = vadd.f32 %v1596_v4, %v572_v3  ;;  %v1616_v0 = vld [vmem:[%s4964_s21 + $0xb58] sm:$0xff] }
 0x17e   : > { %3622 = vst [vmem:[%s4979_s28 + $0xa08] sm:$0xff] %v2598_v9  ;;  %v574_v9 = vld [vmem:[%s4957_s7 + $0xac8] sm:$0xff]  ;;  %v2621_v14 = vadd.f32 %v1597_v7, %v573_v6  ;;  %v1617_v3 = vld [vmem:[%s4964_s21 + $0xb60] sm:$0xff] }
 0x17f   : > { %3623 = vst [vmem:[%s4979_s28 + $0xa10] sm:$0xff] %v2599_v12  ;;  %v575_v12 = vld [vmem:[%s4957_s7 + $0xad0] sm:$0xff]  ;;  %v2622_v17 = vadd.f32 %v1598_v10, %v574_v9  ;;  %v1618_v6 = vld [vmem:[%s4964_s21 + $0xb68] sm:$0xff] }
 0x180   : > { %3624 = vst [vmem:[%s4979_s28 + $0xa18] sm:$0xff] %v2600_v15  ;;  %v576_v15 = vld [vmem:[%s4957_s7 + $0xad8] sm:$0xff]  ;;  %v2623_v20 = vadd.f32 %v1599_v13, %v575_v12  ;;  %v1619_v9 = vld [vmem:[%s4964_s21 + $0xb70] sm:$0xff] }
 0x181   : > { %3625 = vst [vmem:[%s4979_s28 + $0xa20] sm:$0xff] %v2601_v18  ;;  %v577_v18 = vld [vmem:[%s4957_s7 + $0xae0] sm:$0xff]  ;;  %v2624_v23 = vadd.f32 %v1600_v16, %v576_v15  ;;  %v1620_v12 = vld [vmem:[%s4964_s21 + $0xb78] sm:$0xff] }
 0x182   : > { %3626 = vst [vmem:[%s4979_s28 + $0xa28] sm:$0xff] %v2602_v21  ;;  %v578_v21 = vld [vmem:[%s4957_s7 + $0xae8] sm:$0xff]  ;;  %v2625_v26 = vadd.f32 %v1601_v19, %v577_v18  ;;  %v1621_v15 = vld [vmem:[%s4964_s21 + $0xb80] sm:$0xff] }
 0x183   : > { %3627 = vst [vmem:[%s4979_s28 + $0xa30] sm:$0xff] %v2603_v24  ;;  %v579_v24 = vld [vmem:[%s4957_s7 + $0xaf0] sm:$0xff]  ;;  %v2626_v29 = vadd.f32 %v1602_v22, %v578_v21  ;;  %v1622_v18 = vld [vmem:[%s4964_s21 + $0xb88] sm:$0xff] }
 0x184   : > { %3628 = vst [vmem:[%s4979_s28 + $0xa38] sm:$0xff] %v2604_v27  ;;  %v580_v27 = vld [vmem:[%s4957_s7 + $0xaf8] sm:$0xff]  ;;  %v2627_v32 = vadd.f32 %v1603_v25, %v579_v24  ;;  %v1623_v21 = vld [vmem:[%s4964_s21 + $0xb90] sm:$0xff] }
 0x185   : > { %3629 = vst [vmem:[%s4979_s28 + $0xa40] sm:$0xff] %v2605_v30  ;;  %v581_v30 = vld [vmem:[%s4957_s7 + $0xb00] sm:$0xff]  ;;  %v2628_v35 = vadd.f32 %v1604_v28, %v580_v27  ;;  %v1624_v24 = vld [vmem:[%s4964_s21 + $0xb98] sm:$0xff] }
 0x186   : > { %3630 = vst [vmem:[%s4979_s28 + $0xa48] sm:$0xff] %v2606_v33  ;;  %v582_v33 = vld [vmem:[%s4957_s7 + $0xb08] sm:$0xff]  ;;  %v2629_v38 = vadd.f32 %v1605_v31, %v581_v30  ;;  %v1625_v27 = vld [vmem:[%s4964_s21 + $0xba0] sm:$0xff] }
 0x187   : > { %3631 = vst [vmem:[%s4979_s28 + $0xa50] sm:$0xff] %v2607_v36  ;;  %v583_v36 = vld [vmem:[%s4957_s7 + $0xb10] sm:$0xff]  ;;  %v2630_v41 = vadd.f32 %v1606_v34, %v582_v33  ;;  %v1626_v30 = vld [vmem:[%s4964_s21 + $0xba8] sm:$0xff] }
 0x188   : > { %3632 = vst [vmem:[%s4979_s28 + $0xa58] sm:$0xff] %v2608_v39  ;;  %v584_v39 = vld [vmem:[%s4957_s7 + $0xb18] sm:$0xff]  ;;  %v2631_v44 = vadd.f32 %v1607_v37, %v583_v36  ;;  %v1627_v33 = vld [vmem:[%s4964_s21 + $0xbb0] sm:$0xff] }
 0x189   : > { %3633 = vst [vmem:[%s4979_s28 + $0xa60] sm:$0xff] %v2609_v42  ;;  %v585_v42 = vld [vmem:[%s4957_s7 + $0xb20] sm:$0xff]  ;;  %v2632_v47 = vadd.f32 %v1608_v40, %v584_v39  ;;  %v1628_v36 = vld [vmem:[%s4964_s21 + $0xbb8] sm:$0xff] }
 0x18a   : > { %3634 = vst [vmem:[%s4979_s28 + $0xa68] sm:$0xff] %v2610_v45  ;;  %v586_v45 = vld [vmem:[%s4957_s7 + $0xb28] sm:$0xff]  ;;  %v2633_v50 = vadd.f32 %v1609_v43, %v585_v42  ;;  %v1629_v39 = vld [vmem:[%s4964_s21 + $0xbc0] sm:$0xff] }
 0x18b   : > { %3635 = vst [vmem:[%s4979_s28 + $0xa70] sm:$0xff] %v2611_v48  ;;  %v587_v48 = vld [vmem:[%s4957_s7 + $0xb30] sm:$0xff]  ;;  %v2634_v53 = vadd.f32 %v1610_v46, %v586_v45  ;;  %v1630_v42 = vld [vmem:[%s4964_s21 + $0xbc8] sm:$0xff] }
 0x18c   : > { %3636 = vst [vmem:[%s4979_s28 + $0xa78] sm:$0xff] %v2612_v51  ;;  %v588_v51 = vld [vmem:[%s4957_s7 + $0xb38] sm:$0xff]  ;;  %v2635_v56 = vadd.f32 %v1611_v49, %v587_v48  ;;  %v1631_v45 = vld [vmem:[%s4964_s21 + $0xbd0] sm:$0xff] }
 0x18d   : > { %3637 = vst [vmem:[%s4979_s28 + $0xa80] sm:$0xff] %v2613_v54  ;;  %v589_v54 = vld [vmem:[%s4957_s7 + $0xb40] sm:$0xff]  ;;  %v2636_v59 = vadd.f32 %v1612_v52, %v588_v51  ;;  %v1632_v48 = vld [vmem:[%s4964_s21 + $0xbd8] sm:$0xff] }
 0x18e   : > { %3638 = vst [vmem:[%s4979_s28 + $0xa88] sm:$0xff] %v2614_v57  ;;  %v590_v57 = vld [vmem:[%s4957_s7 + $0xb48] sm:$0xff]  ;;  %v2637_v62 = vadd.f32 %v1613_v55, %v589_v54  ;;  %v1633_v51 = vld [vmem:[%s4964_s21 + $0xbe0] sm:$0xff] }
 0x18f   : > { %3639 = vst [vmem:[%s4979_s28 + $0xa90] sm:$0xff] %v2615_v60  ;;  %v591_v60 = vld [vmem:[%s4957_s7 + $0xb50] sm:$0xff]  ;;  %v2638_v1 = vadd.f32 %v1614_v58, %v590_v57  ;;  %v1634_v54 = vld [vmem:[%s4964_s21 + $0xbe8] sm:$0xff] }
 0x190   : > { %3640 = vst [vmem:[%s4979_s28 + $0xa98] sm:$0xff] %v2616_v63  ;;  %v592_v63 = vld [vmem:[%s4957_s7 + $0xb58] sm:$0xff]  ;;  %v2639_v4 = vadd.f32 %v1615_v61, %v591_v60  ;;  %v1635_v57 = vld [vmem:[%s4964_s21 + $0xbf0] sm:$0xff] }
 0x191   : > { %3641 = vst [vmem:[%s4979_s28 + $0xaa0] sm:$0xff] %v2617_v2  ;;  %v593_v2 = vld [vmem:[%s4957_s7 + $0xb60] sm:$0xff]  ;;  %v2640_v7 = vadd.f32 %v1616_v0, %v592_v63  ;;  %v1636_v60 = vld [vmem:[%s4964_s21 + $0xbf8] sm:$0xff] }
 0x192   : > { %3642 = vst [vmem:[%s4979_s28 + $0xaa8] sm:$0xff] %v2618_v5  ;;  %v594_v5 = vld [vmem:[%s4957_s7 + $0xb68] sm:$0xff]  ;;  %v2641_v10 = vadd.f32 %v1617_v3, %v593_v2  ;;  %v1637_v63 = vld [vmem:[%s4964_s21 + $0xc00] sm:$0xff] }
 0x193   : > { %3643 = vst [vmem:[%s4979_s28 + $0xab0] sm:$0xff] %v2619_v8  ;;  %v595_v8 = vld [vmem:[%s4957_s7 + $0xb70] sm:$0xff]  ;;  %v2642_v13 = vadd.f32 %v1618_v6, %v594_v5  ;;  %v1638_v2 = vld [vmem:[%s4964_s21 + $0xc08] sm:$0xff] }
 0x194   : > { %3644 = vst [vmem:[%s4979_s28 + $0xab8] sm:$0xff] %v2620_v11  ;;  %v596_v11 = vld [vmem:[%s4957_s7 + $0xb78] sm:$0xff]  ;;  %v2643_v16 = vadd.f32 %v1619_v9, %v595_v8  ;;  %v1639_v5 = vld [vmem:[%s4964_s21 + $0xc10] sm:$0xff] }
 0x195   : > { %3645 = vst [vmem:[%s4979_s28 + $0xac0] sm:$0xff] %v2621_v14  ;;  %v597_v14 = vld [vmem:[%s4957_s7 + $0xb80] sm:$0xff]  ;;  %v2644_v19 = vadd.f32 %v1620_v12, %v596_v11  ;;  %v1640_v8 = vld [vmem:[%s4964_s21 + $0xc18] sm:$0xff] }
 0x196   : > { %3646 = vst [vmem:[%s4979_s28 + $0xac8] sm:$0xff] %v2622_v17  ;;  %v598_v17 = vld [vmem:[%s4957_s7 + $0xb88] sm:$0xff]  ;;  %v2645_v22 = vadd.f32 %v1621_v15, %v597_v14  ;;  %v1641_v11 = vld [vmem:[%s4964_s21 + $0xc20] sm:$0xff] }
 0x197   : > { %3647 = vst [vmem:[%s4979_s28 + $0xad0] sm:$0xff] %v2623_v20  ;;  %v599_v20 = vld [vmem:[%s4957_s7 + $0xb90] sm:$0xff]  ;;  %v2646_v25 = vadd.f32 %v1622_v18, %v598_v17  ;;  %v1642_v14 = vld [vmem:[%s4964_s21 + $0xc28] sm:$0xff] }
 0x198   : > { %3648 = vst [vmem:[%s4979_s28 + $0xad8] sm:$0xff] %v2624_v23  ;;  %v600_v23 = vld [vmem:[%s4957_s7 + $0xb98] sm:$0xff]  ;;  %v2647_v28 = vadd.f32 %v1623_v21, %v599_v20  ;;  %v1643_v17 = vld [vmem:[%s4964_s21 + $0xc30] sm:$0xff] }
 0x199   : > { %3649 = vst [vmem:[%s4979_s28 + $0xae0] sm:$0xff] %v2625_v26  ;;  %v601_v26 = vld [vmem:[%s4957_s7 + $0xba0] sm:$0xff]  ;;  %v2648_v31 = vadd.f32 %v1624_v24, %v600_v23  ;;  %v1644_v20 = vld [vmem:[%s4964_s21 + $0xc38] sm:$0xff] }
 0x19a   : > { %3650 = vst [vmem:[%s4979_s28 + $0xae8] sm:$0xff] %v2626_v29  ;;  %v602_v29 = vld [vmem:[%s4957_s7 + $0xba8] sm:$0xff]  ;;  %v2649_v34 = vadd.f32 %v1625_v27, %v601_v26  ;;  %v1645_v23 = vld [vmem:[%s4964_s21 + $0xc40] sm:$0xff] }
 0x19b   : > { %3651 = vst [vmem:[%s4979_s28 + $0xaf0] sm:$0xff] %v2627_v32  ;;  %v603_v32 = vld [vmem:[%s4957_s7 + $0xbb0] sm:$0xff]  ;;  %v2650_v37 = vadd.f32 %v1626_v30, %v602_v29  ;;  %v1646_v26 = vld [vmem:[%s4964_s21 + $0xc48] sm:$0xff] }
 0x19c   : > { %3652 = vst [vmem:[%s4979_s28 + $0xaf8] sm:$0xff] %v2628_v35  ;;  %v604_v35 = vld [vmem:[%s4957_s7 + $0xbb8] sm:$0xff]  ;;  %v2651_v40 = vadd.f32 %v1627_v33, %v603_v32  ;;  %v1647_v29 = vld [vmem:[%s4964_s21 + $0xc50] sm:$0xff] }
 0x19d   : > { %3653 = vst [vmem:[%s4979_s28 + $0xb00] sm:$0xff] %v2629_v38  ;;  %v605_v38 = vld [vmem:[%s4957_s7 + $0xbc0] sm:$0xff]  ;;  %v2652_v43 = vadd.f32 %v1628_v36, %v604_v35  ;;  %v1648_v32 = vld [vmem:[%s4964_s21 + $0xc58] sm:$0xff] }
 0x19e   : > { %3654 = vst [vmem:[%s4979_s28 + $0xb08] sm:$0xff] %v2630_v41  ;;  %v606_v41 = vld [vmem:[%s4957_s7 + $0xbc8] sm:$0xff]  ;;  %v2653_v46 = vadd.f32 %v1629_v39, %v605_v38  ;;  %v1649_v35 = vld [vmem:[%s4964_s21 + $0xc60] sm:$0xff] }
 0x19f   : > { %3655 = vst [vmem:[%s4979_s28 + $0xb10] sm:$0xff] %v2631_v44  ;;  %v607_v44 = vld [vmem:[%s4957_s7 + $0xbd0] sm:$0xff]  ;;  %v2654_v49 = vadd.f32 %v1630_v42, %v606_v41  ;;  %v1650_v38 = vld [vmem:[%s4964_s21 + $0xc68] sm:$0xff] }
 0x1a0   : > { %3656 = vst [vmem:[%s4979_s28 + $0xb18] sm:$0xff] %v2632_v47  ;;  %v608_v47 = vld [vmem:[%s4957_s7 + $0xbd8] sm:$0xff]  ;;  %v2655_v52 = vadd.f32 %v1631_v45, %v607_v44  ;;  %v1651_v41 = vld [vmem:[%s4964_s21 + $0xc70] sm:$0xff] }
 0x1a1   : > { %3657 = vst [vmem:[%s4979_s28 + $0xb20] sm:$0xff] %v2633_v50  ;;  %v609_v50 = vld [vmem:[%s4957_s7 + $0xbe0] sm:$0xff]  ;;  %v2656_v55 = vadd.f32 %v1632_v48, %v608_v47  ;;  %v1652_v44 = vld [vmem:[%s4964_s21 + $0xc78] sm:$0xff] }
 0x1a2   : > { %3658 = vst [vmem:[%s4979_s28 + $0xb28] sm:$0xff] %v2634_v53  ;;  %v610_v53 = vld [vmem:[%s4957_s7 + $0xbe8] sm:$0xff]  ;;  %v2657_v58 = vadd.f32 %v1633_v51, %v609_v50  ;;  %v1653_v47 = vld [vmem:[%s4964_s21 + $0xc80] sm:$0xff] }
 0x1a3   : > { %3659 = vst [vmem:[%s4979_s28 + $0xb30] sm:$0xff] %v2635_v56  ;;  %v611_v56 = vld [vmem:[%s4957_s7 + $0xbf0] sm:$0xff]  ;;  %v2658_v61 = vadd.f32 %v1634_v54, %v610_v53  ;;  %v1654_v50 = vld [vmem:[%s4964_s21 + $0xc88] sm:$0xff] }
 0x1a4   : > { %3660 = vst [vmem:[%s4979_s28 + $0xb38] sm:$0xff] %v2636_v59  ;;  %v612_v59 = vld [vmem:[%s4957_s7 + $0xbf8] sm:$0xff]  ;;  %v2659_v0 = vadd.f32 %v1635_v57, %v611_v56  ;;  %v1655_v53 = vld [vmem:[%s4964_s21 + $0xc90] sm:$0xff] }
 0x1a5   : > { %3661 = vst [vmem:[%s4979_s28 + $0xb40] sm:$0xff] %v2637_v62  ;;  %v613_v62 = vld [vmem:[%s4957_s7 + $0xc00] sm:$0xff]  ;;  %v2660_v3 = vadd.f32 %v1636_v60, %v612_v59  ;;  %v1656_v56 = vld [vmem:[%s4964_s21 + $0xc98] sm:$0xff] }
 0x1a6   : > { %3662 = vst [vmem:[%s4979_s28 + $0xb48] sm:$0xff] %v2638_v1  ;;  %v614_v1 = vld [vmem:[%s4957_s7 + $0xc08] sm:$0xff]  ;;  %v2661_v6 = vadd.f32 %v1637_v63, %v613_v62  ;;  %v1657_v59 = vld [vmem:[%s4964_s21 + $0xca0] sm:$0xff] }
 0x1a7   : > { %3663 = vst [vmem:[%s4979_s28 + $0xb50] sm:$0xff] %v2639_v4  ;;  %v615_v4 = vld [vmem:[%s4957_s7 + $0xc10] sm:$0xff]  ;;  %v2662_v9 = vadd.f32 %v1638_v2, %v614_v1  ;;  %v1658_v62 = vld [vmem:[%s4964_s21 + $0xca8] sm:$0xff] }
 0x1a8   : > { %3664 = vst [vmem:[%s4979_s28 + $0xb58] sm:$0xff] %v2640_v7  ;;  %v616_v7 = vld [vmem:[%s4957_s7 + $0xc18] sm:$0xff]  ;;  %v2663_v12 = vadd.f32 %v1639_v5, %v615_v4  ;;  %v1659_v1 = vld [vmem:[%s4964_s21 + $0xcb0] sm:$0xff] }
 0x1a9   : > { %3665 = vst [vmem:[%s4979_s28 + $0xb60] sm:$0xff] %v2641_v10  ;;  %v617_v10 = vld [vmem:[%s4957_s7 + $0xc20] sm:$0xff]  ;;  %v2664_v15 = vadd.f32 %v1640_v8, %v616_v7  ;;  %v1660_v4 = vld [vmem:[%s4964_s21 + $0xcb8] sm:$0xff] }
 0x1aa   : > { %3666 = vst [vmem:[%s4979_s28 + $0xb68] sm:$0xff] %v2642_v13  ;;  %v618_v13 = vld [vmem:[%s4957_s7 + $0xc28] sm:$0xff]  ;;  %v2665_v18 = vadd.f32 %v1641_v11, %v617_v10  ;;  %v1661_v7 = vld [vmem:[%s4964_s21 + $0xcc0] sm:$0xff] }
 0x1ab   : > { %3667 = vst [vmem:[%s4979_s28 + $0xb70] sm:$0xff] %v2643_v16  ;;  %v619_v16 = vld [vmem:[%s4957_s7 + $0xc30] sm:$0xff]  ;;  %v2666_v21 = vadd.f32 %v1642_v14, %v618_v13  ;;  %v1662_v10 = vld [vmem:[%s4964_s21 + $0xcc8] sm:$0xff] }
 0x1ac   : > { %3668 = vst [vmem:[%s4979_s28 + $0xb78] sm:$0xff] %v2644_v19  ;;  %v620_v19 = vld [vmem:[%s4957_s7 + $0xc38] sm:$0xff]  ;;  %v2667_v24 = vadd.f32 %v1643_v17, %v619_v16  ;;  %v1663_v13 = vld [vmem:[%s4964_s21 + $0xcd0] sm:$0xff] }
 0x1ad   : > { %3669 = vst [vmem:[%s4979_s28 + $0xb80] sm:$0xff] %v2645_v22  ;;  %v621_v22 = vld [vmem:[%s4957_s7 + $0xc40] sm:$0xff]  ;;  %v2668_v27 = vadd.f32 %v1644_v20, %v620_v19  ;;  %v1664_v16 = vld [vmem:[%s4964_s21 + $0xcd8] sm:$0xff] }
 0x1ae   : > { %3670 = vst [vmem:[%s4979_s28 + $0xb88] sm:$0xff] %v2646_v25  ;;  %v622_v25 = vld [vmem:[%s4957_s7 + $0xc48] sm:$0xff]  ;;  %v2669_v30 = vadd.f32 %v1645_v23, %v621_v22  ;;  %v1665_v19 = vld [vmem:[%s4964_s21 + $0xce0] sm:$0xff] }
 0x1af   : > { %3671 = vst [vmem:[%s4979_s28 + $0xb90] sm:$0xff] %v2647_v28  ;;  %v623_v28 = vld [vmem:[%s4957_s7 + $0xc50] sm:$0xff]  ;;  %v2670_v33 = vadd.f32 %v1646_v26, %v622_v25  ;;  %v1666_v22 = vld [vmem:[%s4964_s21 + $0xce8] sm:$0xff] }
 0x1b0   : > { %3672 = vst [vmem:[%s4979_s28 + $0xb98] sm:$0xff] %v2648_v31  ;;  %v624_v31 = vld [vmem:[%s4957_s7 + $0xc58] sm:$0xff]  ;;  %v2671_v36 = vadd.f32 %v1647_v29, %v623_v28  ;;  %v1667_v25 = vld [vmem:[%s4964_s21 + $0xcf0] sm:$0xff] }
 0x1b1   : > { %3673 = vst [vmem:[%s4979_s28 + $0xba0] sm:$0xff] %v2649_v34  ;;  %v625_v34 = vld [vmem:[%s4957_s7 + $0xc60] sm:$0xff]  ;;  %v2672_v39 = vadd.f32 %v1648_v32, %v624_v31  ;;  %v1668_v28 = vld [vmem:[%s4964_s21 + $0xcf8] sm:$0xff] }
 0x1b2   : > { %3674 = vst [vmem:[%s4979_s28 + $0xba8] sm:$0xff] %v2650_v37  ;;  %v626_v37 = vld [vmem:[%s4957_s7 + $0xc68] sm:$0xff]  ;;  %v2673_v42 = vadd.f32 %v1649_v35, %v625_v34  ;;  %v1669_v31 = vld [vmem:[%s4964_s21 + $0xd00] sm:$0xff] }
 0x1b3   : > { %3675 = vst [vmem:[%s4979_s28 + $0xbb0] sm:$0xff] %v2651_v40  ;;  %v627_v40 = vld [vmem:[%s4957_s7 + $0xc70] sm:$0xff]  ;;  %v2674_v45 = vadd.f32 %v1650_v38, %v626_v37  ;;  %v1670_v34 = vld [vmem:[%s4964_s21 + $0xd08] sm:$0xff] }
 0x1b4   : > { %3676 = vst [vmem:[%s4979_s28 + $0xbb8] sm:$0xff] %v2652_v43  ;;  %v628_v43 = vld [vmem:[%s4957_s7 + $0xc78] sm:$0xff]  ;;  %v2675_v48 = vadd.f32 %v1651_v41, %v627_v40  ;;  %v1671_v37 = vld [vmem:[%s4964_s21 + $0xd10] sm:$0xff] }
 0x1b5   : > { %3677 = vst [vmem:[%s4979_s28 + $0xbc0] sm:$0xff] %v2653_v46  ;;  %v629_v46 = vld [vmem:[%s4957_s7 + $0xc80] sm:$0xff]  ;;  %v2676_v51 = vadd.f32 %v1652_v44, %v628_v43  ;;  %v1672_v40 = vld [vmem:[%s4964_s21 + $0xd18] sm:$0xff] }
 0x1b6   : > { %3678 = vst [vmem:[%s4979_s28 + $0xbc8] sm:$0xff] %v2654_v49  ;;  %v630_v49 = vld [vmem:[%s4957_s7 + $0xc88] sm:$0xff]  ;;  %v2677_v54 = vadd.f32 %v1653_v47, %v629_v46  ;;  %v1673_v43 = vld [vmem:[%s4964_s21 + $0xd20] sm:$0xff] }
 0x1b7   : > { %3679 = vst [vmem:[%s4979_s28 + $0xbd0] sm:$0xff] %v2655_v52  ;;  %v631_v52 = vld [vmem:[%s4957_s7 + $0xc90] sm:$0xff]  ;;  %v2678_v57 = vadd.f32 %v1654_v50, %v630_v49  ;;  %v1674_v46 = vld [vmem:[%s4964_s21 + $0xd28] sm:$0xff] }
 0x1b8   : > { %3680 = vst [vmem:[%s4979_s28 + $0xbd8] sm:$0xff] %v2656_v55  ;;  %v632_v55 = vld [vmem:[%s4957_s7 + $0xc98] sm:$0xff]  ;;  %v2679_v60 = vadd.f32 %v1655_v53, %v631_v52  ;;  %v1675_v49 = vld [vmem:[%s4964_s21 + $0xd30] sm:$0xff] }
 0x1b9   : > { %3681 = vst [vmem:[%s4979_s28 + $0xbe0] sm:$0xff] %v2657_v58  ;;  %v633_v58 = vld [vmem:[%s4957_s7 + $0xca0] sm:$0xff]  ;;  %v2680_v63 = vadd.f32 %v1656_v56, %v632_v55  ;;  %v1676_v52 = vld [vmem:[%s4964_s21 + $0xd38] sm:$0xff] }
 0x1ba   : > { %3682 = vst [vmem:[%s4979_s28 + $0xbe8] sm:$0xff] %v2658_v61  ;;  %v634_v61 = vld [vmem:[%s4957_s7 + $0xca8] sm:$0xff]  ;;  %v2681_v2 = vadd.f32 %v1657_v59, %v633_v58  ;;  %v1677_v55 = vld [vmem:[%s4964_s21 + $0xd40] sm:$0xff] }
 0x1bb   : > { %3683 = vst [vmem:[%s4979_s28 + $0xbf0] sm:$0xff] %v2659_v0  ;;  %v635_v0 = vld [vmem:[%s4957_s7 + $0xcb0] sm:$0xff]  ;;  %v2682_v5 = vadd.f32 %v1658_v62, %v634_v61  ;;  %v1678_v58 = vld [vmem:[%s4964_s21 + $0xd48] sm:$0xff] }
 0x1bc   : > { %3684 = vst [vmem:[%s4979_s28 + $0xbf8] sm:$0xff] %v2660_v3  ;;  %v636_v3 = vld [vmem:[%s4957_s7 + $0xcb8] sm:$0xff]  ;;  %v2683_v8 = vadd.f32 %v1659_v1, %v635_v0  ;;  %v1679_v61 = vld [vmem:[%s4964_s21 + $0xd50] sm:$0xff] }
 0x1bd   : > { %3685 = vst [vmem:[%s4979_s28 + $0xc00] sm:$0xff] %v2661_v6  ;;  %v637_v6 = vld [vmem:[%s4957_s7 + $0xcc0] sm:$0xff]  ;;  %v2684_v11 = vadd.f32 %v1660_v4, %v636_v3  ;;  %v1680_v0 = vld [vmem:[%s4964_s21 + $0xd58] sm:$0xff] }
 0x1be   : > { %3686 = vst [vmem:[%s4979_s28 + $0xc08] sm:$0xff] %v2662_v9  ;;  %v638_v9 = vld [vmem:[%s4957_s7 + $0xcc8] sm:$0xff]  ;;  %v2685_v14 = vadd.f32 %v1661_v7, %v637_v6  ;;  %v1681_v3 = vld [vmem:[%s4964_s21 + $0xd60] sm:$0xff] }
 0x1bf   : > { %3687 = vst [vmem:[%s4979_s28 + $0xc10] sm:$0xff] %v2663_v12  ;;  %v639_v12 = vld [vmem:[%s4957_s7 + $0xcd0] sm:$0xff]  ;;  %v2686_v17 = vadd.f32 %v1662_v10, %v638_v9  ;;  %v1682_v6 = vld [vmem:[%s4964_s21 + $0xd68] sm:$0xff] }
 0x1c0   : > { %3688 = vst [vmem:[%s4979_s28 + $0xc18] sm:$0xff] %v2664_v15  ;;  %v640_v15 = vld [vmem:[%s4957_s7 + $0xcd8] sm:$0xff]  ;;  %v2687_v20 = vadd.f32 %v1663_v13, %v639_v12  ;;  %v1683_v9 = vld [vmem:[%s4964_s21 + $0xd70] sm:$0xff] }
 0x1c1   : > { %3689 = vst [vmem:[%s4979_s28 + $0xc20] sm:$0xff] %v2665_v18  ;;  %v641_v18 = vld [vmem:[%s4957_s7 + $0xce0] sm:$0xff]  ;;  %v2688_v23 = vadd.f32 %v1664_v16, %v640_v15  ;;  %v1684_v12 = vld [vmem:[%s4964_s21 + $0xd78] sm:$0xff] }
 0x1c2   : > { %3690 = vst [vmem:[%s4979_s28 + $0xc28] sm:$0xff] %v2666_v21  ;;  %v642_v21 = vld [vmem:[%s4957_s7 + $0xce8] sm:$0xff]  ;;  %v2689_v26 = vadd.f32 %v1665_v19, %v641_v18  ;;  %v1685_v15 = vld [vmem:[%s4964_s21 + $0xd80] sm:$0xff] }
 0x1c3   : > { %3691 = vst [vmem:[%s4979_s28 + $0xc30] sm:$0xff] %v2667_v24  ;;  %v643_v24 = vld [vmem:[%s4957_s7 + $0xcf0] sm:$0xff]  ;;  %v2690_v29 = vadd.f32 %v1666_v22, %v642_v21  ;;  %v1686_v18 = vld [vmem:[%s4964_s21 + $0xd88] sm:$0xff] }
 0x1c4   : > { %3692 = vst [vmem:[%s4979_s28 + $0xc38] sm:$0xff] %v2668_v27  ;;  %v644_v27 = vld [vmem:[%s4957_s7 + $0xcf8] sm:$0xff]  ;;  %v2691_v32 = vadd.f32 %v1667_v25, %v643_v24  ;;  %v1687_v21 = vld [vmem:[%s4964_s21 + $0xd90] sm:$0xff] }
 0x1c5   : > { %3693 = vst [vmem:[%s4979_s28 + $0xc40] sm:$0xff] %v2669_v30  ;;  %v645_v30 = vld [vmem:[%s4957_s7 + $0xd00] sm:$0xff]  ;;  %v2692_v35 = vadd.f32 %v1668_v28, %v644_v27  ;;  %v1688_v24 = vld [vmem:[%s4964_s21 + $0xd98] sm:$0xff] }
 0x1c6   : > { %3694 = vst [vmem:[%s4979_s28 + $0xc48] sm:$0xff] %v2670_v33  ;;  %v646_v33 = vld [vmem:[%s4957_s7 + $0xd08] sm:$0xff]  ;;  %v2693_v38 = vadd.f32 %v1669_v31, %v645_v30  ;;  %v1689_v27 = vld [vmem:[%s4964_s21 + $0xda0] sm:$0xff] }
 0x1c7   : > { %3695 = vst [vmem:[%s4979_s28 + $0xc50] sm:$0xff] %v2671_v36  ;;  %v647_v36 = vld [vmem:[%s4957_s7 + $0xd10] sm:$0xff]  ;;  %v2694_v41 = vadd.f32 %v1670_v34, %v646_v33  ;;  %v1690_v30 = vld [vmem:[%s4964_s21 + $0xda8] sm:$0xff] }
 0x1c8   : > { %3696 = vst [vmem:[%s4979_s28 + $0xc58] sm:$0xff] %v2672_v39  ;;  %v648_v39 = vld [vmem:[%s4957_s7 + $0xd18] sm:$0xff]  ;;  %v2695_v44 = vadd.f32 %v1671_v37, %v647_v36  ;;  %v1691_v33 = vld [vmem:[%s4964_s21 + $0xdb0] sm:$0xff] }
 0x1c9   : > { %3697 = vst [vmem:[%s4979_s28 + $0xc60] sm:$0xff] %v2673_v42  ;;  %v649_v42 = vld [vmem:[%s4957_s7 + $0xd20] sm:$0xff]  ;;  %v2696_v47 = vadd.f32 %v1672_v40, %v648_v39  ;;  %v1692_v36 = vld [vmem:[%s4964_s21 + $0xdb8] sm:$0xff] }
 0x1ca   : > { %3698 = vst [vmem:[%s4979_s28 + $0xc68] sm:$0xff] %v2674_v45  ;;  %v650_v45 = vld [vmem:[%s4957_s7 + $0xd28] sm:$0xff]  ;;  %v2697_v50 = vadd.f32 %v1673_v43, %v649_v42  ;;  %v1693_v39 = vld [vmem:[%s4964_s21 + $0xdc0] sm:$0xff] }
 0x1cb   : > { %3699 = vst [vmem:[%s4979_s28 + $0xc70] sm:$0xff] %v2675_v48  ;;  %v651_v48 = vld [vmem:[%s4957_s7 + $0xd30] sm:$0xff]  ;;  %v2698_v53 = vadd.f32 %v1674_v46, %v650_v45  ;;  %v1694_v42 = vld [vmem:[%s4964_s21 + $0xdc8] sm:$0xff] }
 0x1cc   : > { %3700 = vst [vmem:[%s4979_s28 + $0xc78] sm:$0xff] %v2676_v51  ;;  %v652_v51 = vld [vmem:[%s4957_s7 + $0xd38] sm:$0xff]  ;;  %v2699_v56 = vadd.f32 %v1675_v49, %v651_v48  ;;  %v1695_v45 = vld [vmem:[%s4964_s21 + $0xdd0] sm:$0xff] }
 0x1cd   : > { %3701 = vst [vmem:[%s4979_s28 + $0xc80] sm:$0xff] %v2677_v54  ;;  %v653_v54 = vld [vmem:[%s4957_s7 + $0xd40] sm:$0xff]  ;;  %v2700_v59 = vadd.f32 %v1676_v52, %v652_v51  ;;  %v1696_v48 = vld [vmem:[%s4964_s21 + $0xdd8] sm:$0xff] }
 0x1ce   : > { %3702 = vst [vmem:[%s4979_s28 + $0xc88] sm:$0xff] %v2678_v57  ;;  %v654_v57 = vld [vmem:[%s4957_s7 + $0xd48] sm:$0xff]  ;;  %v2701_v62 = vadd.f32 %v1677_v55, %v653_v54  ;;  %v1697_v51 = vld [vmem:[%s4964_s21 + $0xde0] sm:$0xff] }
 0x1cf   : > { %3703 = vst [vmem:[%s4979_s28 + $0xc90] sm:$0xff] %v2679_v60  ;;  %v655_v60 = vld [vmem:[%s4957_s7 + $0xd50] sm:$0xff]  ;;  %v2702_v1 = vadd.f32 %v1678_v58, %v654_v57  ;;  %v1698_v54 = vld [vmem:[%s4964_s21 + $0xde8] sm:$0xff] }
 0x1d0   : > { %3704 = vst [vmem:[%s4979_s28 + $0xc98] sm:$0xff] %v2680_v63  ;;  %v656_v63 = vld [vmem:[%s4957_s7 + $0xd58] sm:$0xff]  ;;  %v2703_v4 = vadd.f32 %v1679_v61, %v655_v60  ;;  %v1699_v57 = vld [vmem:[%s4964_s21 + $0xdf0] sm:$0xff] }
 0x1d1   : > { %3705 = vst [vmem:[%s4979_s28 + $0xca0] sm:$0xff] %v2681_v2  ;;  %v657_v2 = vld [vmem:[%s4957_s7 + $0xd60] sm:$0xff]  ;;  %v2704_v7 = vadd.f32 %v1680_v0, %v656_v63  ;;  %v1700_v60 = vld [vmem:[%s4964_s21 + $0xdf8] sm:$0xff] }
 0x1d2   : > { %3706 = vst [vmem:[%s4979_s28 + $0xca8] sm:$0xff] %v2682_v5  ;;  %v658_v5 = vld [vmem:[%s4957_s7 + $0xd68] sm:$0xff]  ;;  %v2705_v10 = vadd.f32 %v1681_v3, %v657_v2  ;;  %v1701_v63 = vld [vmem:[%s4964_s21 + $0xe00] sm:$0xff] }
 0x1d3   : > { %3707 = vst [vmem:[%s4979_s28 + $0xcb0] sm:$0xff] %v2683_v8  ;;  %v659_v8 = vld [vmem:[%s4957_s7 + $0xd70] sm:$0xff]  ;;  %v2706_v13 = vadd.f32 %v1682_v6, %v658_v5  ;;  %v1702_v2 = vld [vmem:[%s4964_s21 + $0xe08] sm:$0xff] }
 0x1d4   : > { %3708 = vst [vmem:[%s4979_s28 + $0xcb8] sm:$0xff] %v2684_v11  ;;  %v660_v11 = vld [vmem:[%s4957_s7 + $0xd78] sm:$0xff]  ;;  %v2707_v16 = vadd.f32 %v1683_v9, %v659_v8  ;;  %v1703_v5 = vld [vmem:[%s4964_s21 + $0xe10] sm:$0xff] }
 0x1d5   : > { %3709 = vst [vmem:[%s4979_s28 + $0xcc0] sm:$0xff] %v2685_v14  ;;  %v661_v14 = vld [vmem:[%s4957_s7 + $0xd80] sm:$0xff]  ;;  %v2708_v19 = vadd.f32 %v1684_v12, %v660_v11  ;;  %v1704_v8 = vld [vmem:[%s4964_s21 + $0xe18] sm:$0xff] }
 0x1d6   : > { %3710 = vst [vmem:[%s4979_s28 + $0xcc8] sm:$0xff] %v2686_v17  ;;  %v662_v17 = vld [vmem:[%s4957_s7 + $0xd88] sm:$0xff]  ;;  %v2709_v22 = vadd.f32 %v1685_v15, %v661_v14  ;;  %v1705_v11 = vld [vmem:[%s4964_s21 + $0xe20] sm:$0xff] }
 0x1d7   : > { %3711 = vst [vmem:[%s4979_s28 + $0xcd0] sm:$0xff] %v2687_v20  ;;  %v663_v20 = vld [vmem:[%s4957_s7 + $0xd90] sm:$0xff]  ;;  %v2710_v25 = vadd.f32 %v1686_v18, %v662_v17  ;;  %v1706_v14 = vld [vmem:[%s4964_s21 + $0xe28] sm:$0xff] }
 0x1d8   : > { %3712 = vst [vmem:[%s4979_s28 + $0xcd8] sm:$0xff] %v2688_v23  ;;  %v664_v23 = vld [vmem:[%s4957_s7 + $0xd98] sm:$0xff]  ;;  %v2711_v28 = vadd.f32 %v1687_v21, %v663_v20  ;;  %v1707_v17 = vld [vmem:[%s4964_s21 + $0xe30] sm:$0xff] }
 0x1d9   : > { %3713 = vst [vmem:[%s4979_s28 + $0xce0] sm:$0xff] %v2689_v26  ;;  %v665_v26 = vld [vmem:[%s4957_s7 + $0xda0] sm:$0xff]  ;;  %v2712_v31 = vadd.f32 %v1688_v24, %v664_v23  ;;  %v1708_v20 = vld [vmem:[%s4964_s21 + $0xe38] sm:$0xff] }
 0x1da   : > { %3714 = vst [vmem:[%s4979_s28 + $0xce8] sm:$0xff] %v2690_v29  ;;  %v666_v29 = vld [vmem:[%s4957_s7 + $0xda8] sm:$0xff]  ;;  %v2713_v34 = vadd.f32 %v1689_v27, %v665_v26  ;;  %v1709_v23 = vld [vmem:[%s4964_s21 + $0xe40] sm:$0xff] }
 0x1db   : > { %3715 = vst [vmem:[%s4979_s28 + $0xcf0] sm:$0xff] %v2691_v32  ;;  %v667_v32 = vld [vmem:[%s4957_s7 + $0xdb0] sm:$0xff]  ;;  %v2714_v37 = vadd.f32 %v1690_v30, %v666_v29  ;;  %v1710_v26 = vld [vmem:[%s4964_s21 + $0xe48] sm:$0xff] }
 0x1dc   : > { %3716 = vst [vmem:[%s4979_s28 + $0xcf8] sm:$0xff] %v2692_v35  ;;  %v668_v35 = vld [vmem:[%s4957_s7 + $0xdb8] sm:$0xff]  ;;  %v2715_v40 = vadd.f32 %v1691_v33, %v667_v32  ;;  %v1711_v29 = vld [vmem:[%s4964_s21 + $0xe50] sm:$0xff] }
 0x1dd   : > { %3717 = vst [vmem:[%s4979_s28 + $0xd00] sm:$0xff] %v2693_v38  ;;  %v669_v38 = vld [vmem:[%s4957_s7 + $0xdc0] sm:$0xff]  ;;  %v2716_v43 = vadd.f32 %v1692_v36, %v668_v35  ;;  %v1712_v32 = vld [vmem:[%s4964_s21 + $0xe58] sm:$0xff] }
 0x1de   : > { %3718 = vst [vmem:[%s4979_s28 + $0xd08] sm:$0xff] %v2694_v41  ;;  %v670_v41 = vld [vmem:[%s4957_s7 + $0xdc8] sm:$0xff]  ;;  %v2717_v46 = vadd.f32 %v1693_v39, %v669_v38  ;;  %v1713_v35 = vld [vmem:[%s4964_s21 + $0xe60] sm:$0xff] }
 0x1df   : > { %3719 = vst [vmem:[%s4979_s28 + $0xd10] sm:$0xff] %v2695_v44  ;;  %v671_v44 = vld [vmem:[%s4957_s7 + $0xdd0] sm:$0xff]  ;;  %v2718_v49 = vadd.f32 %v1694_v42, %v670_v41  ;;  %v1714_v38 = vld [vmem:[%s4964_s21 + $0xe68] sm:$0xff] }
 0x1e0   : > { %3720 = vst [vmem:[%s4979_s28 + $0xd18] sm:$0xff] %v2696_v47  ;;  %v672_v47 = vld [vmem:[%s4957_s7 + $0xdd8] sm:$0xff]  ;;  %v2719_v52 = vadd.f32 %v1695_v45, %v671_v44  ;;  %v1715_v41 = vld [vmem:[%s4964_s21 + $0xe70] sm:$0xff] }
 0x1e1   : > { %3721 = vst [vmem:[%s4979_s28 + $0xd20] sm:$0xff] %v2697_v50  ;;  %v673_v50 = vld [vmem:[%s4957_s7 + $0xde0] sm:$0xff]  ;;  %v2720_v55 = vadd.f32 %v1696_v48, %v672_v47  ;;  %v1716_v44 = vld [vmem:[%s4964_s21 + $0xe78] sm:$0xff] }
 0x1e2   : > { %3722 = vst [vmem:[%s4979_s28 + $0xd28] sm:$0xff] %v2698_v53  ;;  %v674_v53 = vld [vmem:[%s4957_s7 + $0xde8] sm:$0xff]  ;;  %v2721_v58 = vadd.f32 %v1697_v51, %v673_v50  ;;  %v1717_v47 = vld [vmem:[%s4964_s21 + $0xe80] sm:$0xff] }
 0x1e3   : > { %3723 = vst [vmem:[%s4979_s28 + $0xd30] sm:$0xff] %v2699_v56  ;;  %v675_v56 = vld [vmem:[%s4957_s7 + $0xdf0] sm:$0xff]  ;;  %v2722_v61 = vadd.f32 %v1698_v54, %v674_v53  ;;  %v1718_v50 = vld [vmem:[%s4964_s21 + $0xe88] sm:$0xff] }
 0x1e4   : > { %3724 = vst [vmem:[%s4979_s28 + $0xd38] sm:$0xff] %v2700_v59  ;;  %v676_v59 = vld [vmem:[%s4957_s7 + $0xdf8] sm:$0xff]  ;;  %v2723_v0 = vadd.f32 %v1699_v57, %v675_v56  ;;  %v1719_v53 = vld [vmem:[%s4964_s21 + $0xe90] sm:$0xff] }
 0x1e5   : > { %3725 = vst [vmem:[%s4979_s28 + $0xd40] sm:$0xff] %v2701_v62  ;;  %v677_v62 = vld [vmem:[%s4957_s7 + $0xe00] sm:$0xff]  ;;  %v2724_v3 = vadd.f32 %v1700_v60, %v676_v59  ;;  %v1720_v56 = vld [vmem:[%s4964_s21 + $0xe98] sm:$0xff] }
 0x1e6   : > { %3726 = vst [vmem:[%s4979_s28 + $0xd48] sm:$0xff] %v2702_v1  ;;  %v678_v1 = vld [vmem:[%s4957_s7 + $0xe08] sm:$0xff]  ;;  %v2725_v6 = vadd.f32 %v1701_v63, %v677_v62  ;;  %v1721_v59 = vld [vmem:[%s4964_s21 + $0xea0] sm:$0xff] }
 0x1e7   : > { %3727 = vst [vmem:[%s4979_s28 + $0xd50] sm:$0xff] %v2703_v4  ;;  %v679_v4 = vld [vmem:[%s4957_s7 + $0xe10] sm:$0xff]  ;;  %v2726_v9 = vadd.f32 %v1702_v2, %v678_v1  ;;  %v1722_v62 = vld [vmem:[%s4964_s21 + $0xea8] sm:$0xff] }
 0x1e8   : > { %3728 = vst [vmem:[%s4979_s28 + $0xd58] sm:$0xff] %v2704_v7  ;;  %v680_v7 = vld [vmem:[%s4957_s7 + $0xe18] sm:$0xff]  ;;  %v2727_v12 = vadd.f32 %v1703_v5, %v679_v4  ;;  %v1723_v1 = vld [vmem:[%s4964_s21 + $0xeb0] sm:$0xff] }
 0x1e9   : > { %3729 = vst [vmem:[%s4979_s28 + $0xd60] sm:$0xff] %v2705_v10  ;;  %v681_v10 = vld [vmem:[%s4957_s7 + $0xe20] sm:$0xff]  ;;  %v2728_v15 = vadd.f32 %v1704_v8, %v680_v7  ;;  %v1724_v4 = vld [vmem:[%s4964_s21 + $0xeb8] sm:$0xff] }
 0x1ea   : > { %3730 = vst [vmem:[%s4979_s28 + $0xd68] sm:$0xff] %v2706_v13  ;;  %v682_v13 = vld [vmem:[%s4957_s7 + $0xe28] sm:$0xff]  ;;  %v2729_v18 = vadd.f32 %v1705_v11, %v681_v10  ;;  %v1725_v7 = vld [vmem:[%s4964_s21 + $0xec0] sm:$0xff] }
 0x1eb   : > { %3731 = vst [vmem:[%s4979_s28 + $0xd70] sm:$0xff] %v2707_v16  ;;  %v683_v16 = vld [vmem:[%s4957_s7 + $0xe30] sm:$0xff]  ;;  %v2730_v21 = vadd.f32 %v1706_v14, %v682_v13  ;;  %v1726_v10 = vld [vmem:[%s4964_s21 + $0xec8] sm:$0xff] }
 0x1ec   : > { %3732 = vst [vmem:[%s4979_s28 + $0xd78] sm:$0xff] %v2708_v19  ;;  %v684_v19 = vld [vmem:[%s4957_s7 + $0xe38] sm:$0xff]  ;;  %v2731_v24 = vadd.f32 %v1707_v17, %v683_v16  ;;  %v1727_v13 = vld [vmem:[%s4964_s21 + $0xed0] sm:$0xff] }
 0x1ed   : > { %3733 = vst [vmem:[%s4979_s28 + $0xd80] sm:$0xff] %v2709_v22  ;;  %v685_v22 = vld [vmem:[%s4957_s7 + $0xe40] sm:$0xff]  ;;  %v2732_v27 = vadd.f32 %v1708_v20, %v684_v19  ;;  %v1728_v16 = vld [vmem:[%s4964_s21 + $0xed8] sm:$0xff] }
 0x1ee   : > { %3734 = vst [vmem:[%s4979_s28 + $0xd88] sm:$0xff] %v2710_v25  ;;  %v686_v25 = vld [vmem:[%s4957_s7 + $0xe48] sm:$0xff]  ;;  %v2733_v30 = vadd.f32 %v1709_v23, %v685_v22  ;;  %v1729_v19 = vld [vmem:[%s4964_s21 + $0xee0] sm:$0xff] }
 0x1ef   : > { %3735 = vst [vmem:[%s4979_s28 + $0xd90] sm:$0xff] %v2711_v28  ;;  %v687_v28 = vld [vmem:[%s4957_s7 + $0xe50] sm:$0xff]  ;;  %v2734_v33 = vadd.f32 %v1710_v26, %v686_v25  ;;  %v1730_v22 = vld [vmem:[%s4964_s21 + $0xee8] sm:$0xff] }
 0x1f0   : > { %3736 = vst [vmem:[%s4979_s28 + $0xd98] sm:$0xff] %v2712_v31  ;;  %v688_v31 = vld [vmem:[%s4957_s7 + $0xe58] sm:$0xff]  ;;  %v2735_v36 = vadd.f32 %v1711_v29, %v687_v28  ;;  %v1731_v25 = vld [vmem:[%s4964_s21 + $0xef0] sm:$0xff] }
 0x1f1   : > { %3737 = vst [vmem:[%s4979_s28 + $0xda0] sm:$0xff] %v2713_v34  ;;  %v689_v34 = vld [vmem:[%s4957_s7 + $0xe60] sm:$0xff]  ;;  %v2736_v39 = vadd.f32 %v1712_v32, %v688_v31  ;;  %v1732_v28 = vld [vmem:[%s4964_s21 + $0xef8] sm:$0xff] }
 0x1f2   : > { %3738 = vst [vmem:[%s4979_s28 + $0xda8] sm:$0xff] %v2714_v37  ;;  %v690_v37 = vld [vmem:[%s4957_s7 + $0xe68] sm:$0xff]  ;;  %v2737_v42 = vadd.f32 %v1713_v35, %v689_v34  ;;  %v1733_v31 = vld [vmem:[%s4964_s21 + $0xf00] sm:$0xff] }
 0x1f3   : > { %3739 = vst [vmem:[%s4979_s28 + $0xdb0] sm:$0xff] %v2715_v40  ;;  %v691_v40 = vld [vmem:[%s4957_s7 + $0xe70] sm:$0xff]  ;;  %v2738_v45 = vadd.f32 %v1714_v38, %v690_v37  ;;  %v1734_v34 = vld [vmem:[%s4964_s21 + $0xf08] sm:$0xff] }
 0x1f4   : > { %3740 = vst [vmem:[%s4979_s28 + $0xdb8] sm:$0xff] %v2716_v43  ;;  %v692_v43 = vld [vmem:[%s4957_s7 + $0xe78] sm:$0xff]  ;;  %v2739_v48 = vadd.f32 %v1715_v41, %v691_v40  ;;  %v1735_v37 = vld [vmem:[%s4964_s21 + $0xf10] sm:$0xff] }
 0x1f5   : > { %3741 = vst [vmem:[%s4979_s28 + $0xdc0] sm:$0xff] %v2717_v46  ;;  %v693_v46 = vld [vmem:[%s4957_s7 + $0xe80] sm:$0xff]  ;;  %v2740_v51 = vadd.f32 %v1716_v44, %v692_v43  ;;  %v1736_v40 = vld [vmem:[%s4964_s21 + $0xf18] sm:$0xff] }
 0x1f6   : > { %3742 = vst [vmem:[%s4979_s28 + $0xdc8] sm:$0xff] %v2718_v49  ;;  %v694_v49 = vld [vmem:[%s4957_s7 + $0xe88] sm:$0xff]  ;;  %v2741_v54 = vadd.f32 %v1717_v47, %v693_v46  ;;  %v1737_v43 = vld [vmem:[%s4964_s21 + $0xf20] sm:$0xff] }
 0x1f7   : > { %3743 = vst [vmem:[%s4979_s28 + $0xdd0] sm:$0xff] %v2719_v52  ;;  %v695_v52 = vld [vmem:[%s4957_s7 + $0xe90] sm:$0xff]  ;;  %v2742_v57 = vadd.f32 %v1718_v50, %v694_v49  ;;  %v1738_v46 = vld [vmem:[%s4964_s21 + $0xf28] sm:$0xff] }
 0x1f8   : > { %3744 = vst [vmem:[%s4979_s28 + $0xdd8] sm:$0xff] %v2720_v55  ;;  %v696_v55 = vld [vmem:[%s4957_s7 + $0xe98] sm:$0xff]  ;;  %v2743_v60 = vadd.f32 %v1719_v53, %v695_v52  ;;  %v1739_v49 = vld [vmem:[%s4964_s21 + $0xf30] sm:$0xff] }
 0x1f9   : > { %3745 = vst [vmem:[%s4979_s28 + $0xde0] sm:$0xff] %v2721_v58  ;;  %v697_v58 = vld [vmem:[%s4957_s7 + $0xea0] sm:$0xff]  ;;  %v2744_v63 = vadd.f32 %v1720_v56, %v696_v55  ;;  %v1740_v52 = vld [vmem:[%s4964_s21 + $0xf38] sm:$0xff] }
 0x1fa   : > { %3746 = vst [vmem:[%s4979_s28 + $0xde8] sm:$0xff] %v2722_v61  ;;  %v698_v61 = vld [vmem:[%s4957_s7 + $0xea8] sm:$0xff]  ;;  %v2745_v2 = vadd.f32 %v1721_v59, %v697_v58  ;;  %v1741_v55 = vld [vmem:[%s4964_s21 + $0xf40] sm:$0xff] }
 0x1fb   : > { %3747 = vst [vmem:[%s4979_s28 + $0xdf0] sm:$0xff] %v2723_v0  ;;  %v699_v0 = vld [vmem:[%s4957_s7 + $0xeb0] sm:$0xff]  ;;  %v2746_v5 = vadd.f32 %v1722_v62, %v698_v61  ;;  %v1742_v58 = vld [vmem:[%s4964_s21 + $0xf48] sm:$0xff] }
 0x1fc   : > { %3748 = vst [vmem:[%s4979_s28 + $0xdf8] sm:$0xff] %v2724_v3  ;;  %v700_v3 = vld [vmem:[%s4957_s7 + $0xeb8] sm:$0xff]  ;;  %v2747_v8 = vadd.f32 %v1723_v1, %v699_v0  ;;  %v1743_v61 = vld [vmem:[%s4964_s21 + $0xf50] sm:$0xff] }
 0x1fd   : > { %3749 = vst [vmem:[%s4979_s28 + $0xe00] sm:$0xff] %v2725_v6  ;;  %v701_v6 = vld [vmem:[%s4957_s7 + $0xec0] sm:$0xff]  ;;  %v2748_v11 = vadd.f32 %v1724_v4, %v700_v3  ;;  %v1744_v0 = vld [vmem:[%s4964_s21 + $0xf58] sm:$0xff] }
 0x1fe   : > { %3750 = vst [vmem:[%s4979_s28 + $0xe08] sm:$0xff] %v2726_v9  ;;  %v702_v9 = vld [vmem:[%s4957_s7 + $0xec8] sm:$0xff]  ;;  %v2749_v14 = vadd.f32 %v1725_v7, %v701_v6  ;;  %v1745_v3 = vld [vmem:[%s4964_s21 + $0xf60] sm:$0xff] }
 0x1ff   : > { %3751 = vst [vmem:[%s4979_s28 + $0xe10] sm:$0xff] %v2727_v12  ;;  %v703_v12 = vld [vmem:[%s4957_s7 + $0xed0] sm:$0xff]  ;;  %v2750_v17 = vadd.f32 %v1726_v10, %v702_v9  ;;  %v1746_v6 = vld [vmem:[%s4964_s21 + $0xf68] sm:$0xff] }
 0x200   : > { %3752 = vst [vmem:[%s4979_s28 + $0xe18] sm:$0xff] %v2728_v15  ;;  %v704_v15 = vld [vmem:[%s4957_s7 + $0xed8] sm:$0xff]  ;;  %v2751_v20 = vadd.f32 %v1727_v13, %v703_v12  ;;  %v1747_v9 = vld [vmem:[%s4964_s21 + $0xf70] sm:$0xff] }
 0x201   : > { %3753 = vst [vmem:[%s4979_s28 + $0xe20] sm:$0xff] %v2729_v18  ;;  %v705_v18 = vld [vmem:[%s4957_s7 + $0xee0] sm:$0xff]  ;;  %v2752_v23 = vadd.f32 %v1728_v16, %v704_v15  ;;  %v1748_v12 = vld [vmem:[%s4964_s21 + $0xf78] sm:$0xff] }
 0x202   : > { %3754 = vst [vmem:[%s4979_s28 + $0xe28] sm:$0xff] %v2730_v21  ;;  %v706_v21 = vld [vmem:[%s4957_s7 + $0xee8] sm:$0xff]  ;;  %v2753_v26 = vadd.f32 %v1729_v19, %v705_v18  ;;  %v1749_v15 = vld [vmem:[%s4964_s21 + $0xf80] sm:$0xff] }
 0x203   : > { %3755 = vst [vmem:[%s4979_s28 + $0xe30] sm:$0xff] %v2731_v24  ;;  %v707_v24 = vld [vmem:[%s4957_s7 + $0xef0] sm:$0xff]  ;;  %v2754_v29 = vadd.f32 %v1730_v22, %v706_v21  ;;  %v1750_v18 = vld [vmem:[%s4964_s21 + $0xf88] sm:$0xff] }
 0x204   : > { %3756 = vst [vmem:[%s4979_s28 + $0xe38] sm:$0xff] %v2732_v27  ;;  %v708_v27 = vld [vmem:[%s4957_s7 + $0xef8] sm:$0xff]  ;;  %v2755_v32 = vadd.f32 %v1731_v25, %v707_v24  ;;  %v1751_v21 = vld [vmem:[%s4964_s21 + $0xf90] sm:$0xff] }
 0x205   : > { %3757 = vst [vmem:[%s4979_s28 + $0xe40] sm:$0xff] %v2733_v30  ;;  %v709_v30 = vld [vmem:[%s4957_s7 + $0xf00] sm:$0xff]  ;;  %v2756_v35 = vadd.f32 %v1732_v28, %v708_v27  ;;  %v1752_v24 = vld [vmem:[%s4964_s21 + $0xf98] sm:$0xff] }
 0x206   : > { %3758 = vst [vmem:[%s4979_s28 + $0xe48] sm:$0xff] %v2734_v33  ;;  %v710_v33 = vld [vmem:[%s4957_s7 + $0xf08] sm:$0xff]  ;;  %v2757_v38 = vadd.f32 %v1733_v31, %v709_v30  ;;  %v1753_v27 = vld [vmem:[%s4964_s21 + $0xfa0] sm:$0xff] }
 0x207   : > { %3759 = vst [vmem:[%s4979_s28 + $0xe50] sm:$0xff] %v2735_v36  ;;  %v711_v36 = vld [vmem:[%s4957_s7 + $0xf10] sm:$0xff]  ;;  %v2758_v41 = vadd.f32 %v1734_v34, %v710_v33  ;;  %v1754_v30 = vld [vmem:[%s4964_s21 + $0xfa8] sm:$0xff] }
 0x208   : > { %3760 = vst [vmem:[%s4979_s28 + $0xe58] sm:$0xff] %v2736_v39  ;;  %v712_v39 = vld [vmem:[%s4957_s7 + $0xf18] sm:$0xff]  ;;  %v2759_v44 = vadd.f32 %v1735_v37, %v711_v36  ;;  %v1755_v33 = vld [vmem:[%s4964_s21 + $0xfb0] sm:$0xff] }
 0x209   : > { %3761 = vst [vmem:[%s4979_s28 + $0xe60] sm:$0xff] %v2737_v42  ;;  %v713_v42 = vld [vmem:[%s4957_s7 + $0xf20] sm:$0xff]  ;;  %v2760_v47 = vadd.f32 %v1736_v40, %v712_v39  ;;  %v1756_v36 = vld [vmem:[%s4964_s21 + $0xfb8] sm:$0xff] }
 0x20a   : > { %3762 = vst [vmem:[%s4979_s28 + $0xe68] sm:$0xff] %v2738_v45  ;;  %v714_v45 = vld [vmem:[%s4957_s7 + $0xf28] sm:$0xff]  ;;  %v2761_v50 = vadd.f32 %v1737_v43, %v713_v42  ;;  %v1757_v39 = vld [vmem:[%s4964_s21 + $0xfc0] sm:$0xff] }
 0x20b   : > { %3763 = vst [vmem:[%s4979_s28 + $0xe70] sm:$0xff] %v2739_v48  ;;  %v715_v48 = vld [vmem:[%s4957_s7 + $0xf30] sm:$0xff]  ;;  %v2762_v53 = vadd.f32 %v1738_v46, %v714_v45  ;;  %v1758_v42 = vld [vmem:[%s4964_s21 + $0xfc8] sm:$0xff] }
 0x20c   : > { %3764 = vst [vmem:[%s4979_s28 + $0xe78] sm:$0xff] %v2740_v51  ;;  %v716_v51 = vld [vmem:[%s4957_s7 + $0xf38] sm:$0xff]  ;;  %v2763_v56 = vadd.f32 %v1739_v49, %v715_v48  ;;  %v1759_v45 = vld [vmem:[%s4964_s21 + $0xfd0] sm:$0xff] }
 0x20d   : > { %3765 = vst [vmem:[%s4979_s28 + $0xe80] sm:$0xff] %v2741_v54  ;;  %v717_v54 = vld [vmem:[%s4957_s7 + $0xf40] sm:$0xff]  ;;  %v2764_v59 = vadd.f32 %v1740_v52, %v716_v51  ;;  %v1760_v48 = vld [vmem:[%s4964_s21 + $0xfd8] sm:$0xff] }
 0x20e   : > { %3766 = vst [vmem:[%s4979_s28 + $0xe88] sm:$0xff] %v2742_v57  ;;  %v718_v57 = vld [vmem:[%s4957_s7 + $0xf48] sm:$0xff]  ;;  %v2765_v62 = vadd.f32 %v1741_v55, %v717_v54  ;;  %v1761_v51 = vld [vmem:[%s4964_s21 + $0xfe0] sm:$0xff] }
 0x20f   : > { %3767 = vst [vmem:[%s4979_s28 + $0xe90] sm:$0xff] %v2743_v60  ;;  %v719_v60 = vld [vmem:[%s4957_s7 + $0xf50] sm:$0xff]  ;;  %v2766_v1 = vadd.f32 %v1742_v58, %v718_v57  ;;  %v1762_v54 = vld [vmem:[%s4964_s21 + $0xfe8] sm:$0xff] }
 0x210   : > { %3768 = vst [vmem:[%s4979_s28 + $0xe98] sm:$0xff] %v2744_v63  ;;  %v720_v63 = vld [vmem:[%s4957_s7 + $0xf58] sm:$0xff]  ;;  %v2767_v4 = vadd.f32 %v1743_v61, %v719_v60  ;;  %v1763_v57 = vld [vmem:[%s4964_s21 + $0xff0] sm:$0xff] }
 0x211   : > { %3769 = vst [vmem:[%s4979_s28 + $0xea0] sm:$0xff] %v2745_v2  ;;  %v721_v2 = vld [vmem:[%s4957_s7 + $0xf60] sm:$0xff]  ;;  %v2768_v7 = vadd.f32 %v1744_v0, %v720_v63  ;;  %v1764_v60 = vld [vmem:[%s4964_s21 + $0xff8] sm:$0xff] }
 0x212   : > { %3770 = vst [vmem:[%s4979_s28 + $0xea8] sm:$0xff] %v2746_v5  ;;  %v722_v5 = vld [vmem:[%s4957_s7 + $0xf68] sm:$0xff]  ;;  %v2769_v10 = vadd.f32 %v1745_v3, %v721_v2  ;;  %v1765_v63 = vld [vmem:[%s4964_s21 + $0x1000] sm:$0xff] }
 0x213   : > { %3771 = vst [vmem:[%s4979_s28 + $0xeb0] sm:$0xff] %v2747_v8  ;;  %v723_v8 = vld [vmem:[%s4957_s7 + $0xf70] sm:$0xff]  ;;  %v2770_v13 = vadd.f32 %v1746_v6, %v722_v5  ;;  %v1766_v2 = vld [vmem:[%s4964_s21 + $0x1008] sm:$0xff] }
 0x214   : > { %3772 = vst [vmem:[%s4979_s28 + $0xeb8] sm:$0xff] %v2748_v11  ;;  %v724_v11 = vld [vmem:[%s4957_s7 + $0xf78] sm:$0xff]  ;;  %v2771_v16 = vadd.f32 %v1747_v9, %v723_v8  ;;  %v1767_v5 = vld [vmem:[%s4964_s21 + $0x1010] sm:$0xff] }
 0x215   : > { %3773 = vst [vmem:[%s4979_s28 + $0xec0] sm:$0xff] %v2749_v14  ;;  %v725_v14 = vld [vmem:[%s4957_s7 + $0xf80] sm:$0xff]  ;;  %v2772_v19 = vadd.f32 %v1748_v12, %v724_v11  ;;  %v1768_v8 = vld [vmem:[%s4964_s21 + $0x1018] sm:$0xff] }
 0x216   : > { %3774 = vst [vmem:[%s4979_s28 + $0xec8] sm:$0xff] %v2750_v17  ;;  %v726_v17 = vld [vmem:[%s4957_s7 + $0xf88] sm:$0xff]  ;;  %v2773_v22 = vadd.f32 %v1749_v15, %v725_v14  ;;  %v1769_v11 = vld [vmem:[%s4964_s21 + $0x1020] sm:$0xff] }
 0x217   : > { %3775 = vst [vmem:[%s4979_s28 + $0xed0] sm:$0xff] %v2751_v20  ;;  %v727_v20 = vld [vmem:[%s4957_s7 + $0xf90] sm:$0xff]  ;;  %v2774_v25 = vadd.f32 %v1750_v18, %v726_v17  ;;  %v1770_v14 = vld [vmem:[%s4964_s21 + $0x1028] sm:$0xff] }
 0x218   : > { %3776 = vst [vmem:[%s4979_s28 + $0xed8] sm:$0xff] %v2752_v23  ;;  %v728_v23 = vld [vmem:[%s4957_s7 + $0xf98] sm:$0xff]  ;;  %v2775_v28 = vadd.f32 %v1751_v21, %v727_v20  ;;  %v1771_v17 = vld [vmem:[%s4964_s21 + $0x1030] sm:$0xff] }
 0x219   : > { %3777 = vst [vmem:[%s4979_s28 + $0xee0] sm:$0xff] %v2753_v26  ;;  %v729_v26 = vld [vmem:[%s4957_s7 + $0xfa0] sm:$0xff]  ;;  %v2776_v31 = vadd.f32 %v1752_v24, %v728_v23  ;;  %v1772_v20 = vld [vmem:[%s4964_s21 + $0x1038] sm:$0xff] }
 0x21a   : > { %3778 = vst [vmem:[%s4979_s28 + $0xee8] sm:$0xff] %v2754_v29  ;;  %v730_v29 = vld [vmem:[%s4957_s7 + $0xfa8] sm:$0xff]  ;;  %v2777_v34 = vadd.f32 %v1753_v27, %v729_v26  ;;  %v1773_v23 = vld [vmem:[%s4964_s21 + $0x1040] sm:$0xff] }
 0x21b   : > { %3779 = vst [vmem:[%s4979_s28 + $0xef0] sm:$0xff] %v2755_v32  ;;  %v731_v32 = vld [vmem:[%s4957_s7 + $0xfb0] sm:$0xff]  ;;  %v2778_v37 = vadd.f32 %v1754_v30, %v730_v29  ;;  %v1774_v26 = vld [vmem:[%s4964_s21 + $0x1048] sm:$0xff] }
 0x21c   : > { %3780 = vst [vmem:[%s4979_s28 + $0xef8] sm:$0xff] %v2756_v35  ;;  %v732_v35 = vld [vmem:[%s4957_s7 + $0xfb8] sm:$0xff]  ;;  %v2779_v40 = vadd.f32 %v1755_v33, %v731_v32  ;;  %v1775_v29 = vld [vmem:[%s4964_s21 + $0x1050] sm:$0xff] }
 0x21d   : > { %3781 = vst [vmem:[%s4979_s28 + $0xf00] sm:$0xff] %v2757_v38  ;;  %v733_v38 = vld [vmem:[%s4957_s7 + $0xfc0] sm:$0xff]  ;;  %v2780_v43 = vadd.f32 %v1756_v36, %v732_v35  ;;  %v1776_v32 = vld [vmem:[%s4964_s21 + $0x1058] sm:$0xff] }
 0x21e   : > { %3782 = vst [vmem:[%s4979_s28 + $0xf08] sm:$0xff] %v2758_v41  ;;  %v734_v41 = vld [vmem:[%s4957_s7 + $0xfc8] sm:$0xff]  ;;  %v2781_v46 = vadd.f32 %v1757_v39, %v733_v38  ;;  %v1777_v35 = vld [vmem:[%s4964_s21 + $0x1060] sm:$0xff] }
 0x21f   : > { %3783 = vst [vmem:[%s4979_s28 + $0xf10] sm:$0xff] %v2759_v44  ;;  %v735_v44 = vld [vmem:[%s4957_s7 + $0xfd0] sm:$0xff]  ;;  %v2782_v49 = vadd.f32 %v1758_v42, %v734_v41  ;;  %v1778_v38 = vld [vmem:[%s4964_s21 + $0x1068] sm:$0xff] }
 0x220   : > { %3784 = vst [vmem:[%s4979_s28 + $0xf18] sm:$0xff] %v2760_v47  ;;  %v736_v47 = vld [vmem:[%s4957_s7 + $0xfd8] sm:$0xff]  ;;  %v2783_v52 = vadd.f32 %v1759_v45, %v735_v44  ;;  %v1779_v41 = vld [vmem:[%s4964_s21 + $0x1070] sm:$0xff] }
 0x221   : > { %3785 = vst [vmem:[%s4979_s28 + $0xf20] sm:$0xff] %v2761_v50  ;;  %v737_v50 = vld [vmem:[%s4957_s7 + $0xfe0] sm:$0xff]  ;;  %v2784_v55 = vadd.f32 %v1760_v48, %v736_v47  ;;  %v1780_v44 = vld [vmem:[%s4964_s21 + $0x1078] sm:$0xff] }
 0x222   : > { %3786 = vst [vmem:[%s4979_s28 + $0xf28] sm:$0xff] %v2762_v53  ;;  %v738_v53 = vld [vmem:[%s4957_s7 + $0xfe8] sm:$0xff]  ;;  %v2785_v58 = vadd.f32 %v1761_v51, %v737_v50  ;;  %v1781_v47 = vld [vmem:[%s4964_s21 + $0x1080] sm:$0xff] }
 0x223   : > { %3787 = vst [vmem:[%s4979_s28 + $0xf30] sm:$0xff] %v2763_v56  ;;  %v739_v56 = vld [vmem:[%s4957_s7 + $0xff0] sm:$0xff]  ;;  %v2786_v61 = vadd.f32 %v1762_v54, %v738_v53  ;;  %v1782_v50 = vld [vmem:[%s4964_s21 + $0x1088] sm:$0xff] }
 0x224   : > { %3788 = vst [vmem:[%s4979_s28 + $0xf38] sm:$0xff] %v2764_v59  ;;  %v740_v59 = vld [vmem:[%s4957_s7 + $0xff8] sm:$0xff]  ;;  %v2787_v0 = vadd.f32 %v1763_v57, %v739_v56  ;;  %v1783_v53 = vld [vmem:[%s4964_s21 + $0x1090] sm:$0xff] }
 0x225   : > { %3789 = vst [vmem:[%s4979_s28 + $0xf40] sm:$0xff] %v2765_v62  ;;  %v741_v62 = vld [vmem:[%s4957_s7 + $0x1000] sm:$0xff]  ;;  %v2788_v3 = vadd.f32 %v1764_v60, %v740_v59  ;;  %v1784_v56 = vld [vmem:[%s4964_s21 + $0x1098] sm:$0xff] }
 0x226   : > { %3790 = vst [vmem:[%s4979_s28 + $0xf48] sm:$0xff] %v2766_v1  ;;  %v742_v1 = vld [vmem:[%s4957_s7 + $0x1008] sm:$0xff]  ;;  %v2789_v6 = vadd.f32 %v1765_v63, %v741_v62  ;;  %v1785_v59 = vld [vmem:[%s4964_s21 + $0x10a0] sm:$0xff] }
 0x227   : > { %3791 = vst [vmem:[%s4979_s28 + $0xf50] sm:$0xff] %v2767_v4  ;;  %v743_v4 = vld [vmem:[%s4957_s7 + $0x1010] sm:$0xff]  ;;  %v2790_v9 = vadd.f32 %v1766_v2, %v742_v1  ;;  %v1786_v62 = vld [vmem:[%s4964_s21 + $0x10a8] sm:$0xff] }
 0x228   : > { %3792 = vst [vmem:[%s4979_s28 + $0xf58] sm:$0xff] %v2768_v7  ;;  %v744_v7 = vld [vmem:[%s4957_s7 + $0x1018] sm:$0xff]  ;;  %v2791_v12 = vadd.f32 %v1767_v5, %v743_v4  ;;  %v1787_v1 = vld [vmem:[%s4964_s21 + $0x10b0] sm:$0xff] }
 0x229   : > { %3793 = vst [vmem:[%s4979_s28 + $0xf60] sm:$0xff] %v2769_v10  ;;  %v745_v10 = vld [vmem:[%s4957_s7 + $0x1020] sm:$0xff]  ;;  %v2792_v15 = vadd.f32 %v1768_v8, %v744_v7  ;;  %v1788_v4 = vld [vmem:[%s4964_s21 + $0x10b8] sm:$0xff] }
 0x22a   : > { %3794 = vst [vmem:[%s4979_s28 + $0xf68] sm:$0xff] %v2770_v13  ;;  %v746_v13 = vld [vmem:[%s4957_s7 + $0x1028] sm:$0xff]  ;;  %v2793_v18 = vadd.f32 %v1769_v11, %v745_v10  ;;  %v1789_v7 = vld [vmem:[%s4964_s21 + $0x10c0] sm:$0xff] }
 0x22b   : > { %3795 = vst [vmem:[%s4979_s28 + $0xf70] sm:$0xff] %v2771_v16  ;;  %v747_v16 = vld [vmem:[%s4957_s7 + $0x1030] sm:$0xff]  ;;  %v2794_v21 = vadd.f32 %v1770_v14, %v746_v13  ;;  %v1790_v10 = vld [vmem:[%s4964_s21 + $0x10c8] sm:$0xff] }
 0x22c   : > { %3796 = vst [vmem:[%s4979_s28 + $0xf78] sm:$0xff] %v2772_v19  ;;  %v748_v19 = vld [vmem:[%s4957_s7 + $0x1038] sm:$0xff]  ;;  %v2795_v24 = vadd.f32 %v1771_v17, %v747_v16  ;;  %v1791_v13 = vld [vmem:[%s4964_s21 + $0x10d0] sm:$0xff] }
 0x22d   : > { %3797 = vst [vmem:[%s4979_s28 + $0xf80] sm:$0xff] %v2773_v22  ;;  %v749_v22 = vld [vmem:[%s4957_s7 + $0x1040] sm:$0xff]  ;;  %v2796_v27 = vadd.f32 %v1772_v20, %v748_v19  ;;  %v1792_v16 = vld [vmem:[%s4964_s21 + $0x10d8] sm:$0xff] }
 0x22e   : > { %3798 = vst [vmem:[%s4979_s28 + $0xf88] sm:$0xff] %v2774_v25  ;;  %v750_v25 = vld [vmem:[%s4957_s7 + $0x1048] sm:$0xff]  ;;  %v2797_v30 = vadd.f32 %v1773_v23, %v749_v22  ;;  %v1793_v19 = vld [vmem:[%s4964_s21 + $0x10e0] sm:$0xff] }
 0x22f   : > { %3799 = vst [vmem:[%s4979_s28 + $0xf90] sm:$0xff] %v2775_v28  ;;  %v751_v28 = vld [vmem:[%s4957_s7 + $0x1050] sm:$0xff]  ;;  %v2798_v33 = vadd.f32 %v1774_v26, %v750_v25  ;;  %v1794_v22 = vld [vmem:[%s4964_s21 + $0x10e8] sm:$0xff] }
 0x230   : > { %3800 = vst [vmem:[%s4979_s28 + $0xf98] sm:$0xff] %v2776_v31  ;;  %v752_v31 = vld [vmem:[%s4957_s7 + $0x1058] sm:$0xff]  ;;  %v2799_v36 = vadd.f32 %v1775_v29, %v751_v28  ;;  %v1795_v25 = vld [vmem:[%s4964_s21 + $0x10f0] sm:$0xff] }
 0x231   : > { %3801 = vst [vmem:[%s4979_s28 + $0xfa0] sm:$0xff] %v2777_v34  ;;  %v753_v34 = vld [vmem:[%s4957_s7 + $0x1060] sm:$0xff]  ;;  %v2800_v39 = vadd.f32 %v1776_v32, %v752_v31  ;;  %v1796_v28 = vld [vmem:[%s4964_s21 + $0x10f8] sm:$0xff] }
 0x232   : > { %3802 = vst [vmem:[%s4979_s28 + $0xfa8] sm:$0xff] %v2778_v37  ;;  %v754_v37 = vld [vmem:[%s4957_s7 + $0x1068] sm:$0xff]  ;;  %v2801_v42 = vadd.f32 %v1777_v35, %v753_v34  ;;  %v1797_v31 = vld [vmem:[%s4964_s21 + $0x1100] sm:$0xff] }
 0x233   : > { %3803 = vst [vmem:[%s4979_s28 + $0xfb0] sm:$0xff] %v2779_v40  ;;  %v755_v40 = vld [vmem:[%s4957_s7 + $0x1070] sm:$0xff]  ;;  %v2802_v45 = vadd.f32 %v1778_v38, %v754_v37  ;;  %v1798_v34 = vld [vmem:[%s4964_s21 + $0x1108] sm:$0xff] }
 0x234   : > { %3804 = vst [vmem:[%s4979_s28 + $0xfb8] sm:$0xff] %v2780_v43  ;;  %v756_v43 = vld [vmem:[%s4957_s7 + $0x1078] sm:$0xff]  ;;  %v2803_v48 = vadd.f32 %v1779_v41, %v755_v40  ;;  %v1799_v37 = vld [vmem:[%s4964_s21 + $0x1110] sm:$0xff] }
 0x235   : > { %3805 = vst [vmem:[%s4979_s28 + $0xfc0] sm:$0xff] %v2781_v46  ;;  %v757_v46 = vld [vmem:[%s4957_s7 + $0x1080] sm:$0xff]  ;;  %v2804_v51 = vadd.f32 %v1780_v44, %v756_v43  ;;  %v1800_v40 = vld [vmem:[%s4964_s21 + $0x1118] sm:$0xff] }
 0x236   : > { %3806 = vst [vmem:[%s4979_s28 + $0xfc8] sm:$0xff] %v2782_v49  ;;  %v758_v49 = vld [vmem:[%s4957_s7 + $0x1088] sm:$0xff]  ;;  %v2805_v54 = vadd.f32 %v1781_v47, %v757_v46  ;;  %v1801_v43 = vld [vmem:[%s4964_s21 + $0x1120] sm:$0xff] }
 0x237   : > { %3807 = vst [vmem:[%s4979_s28 + $0xfd0] sm:$0xff] %v2783_v52  ;;  %v759_v52 = vld [vmem:[%s4957_s7 + $0x1090] sm:$0xff]  ;;  %v2806_v57 = vadd.f32 %v1782_v50, %v758_v49  ;;  %v1802_v46 = vld [vmem:[%s4964_s21 + $0x1128] sm:$0xff] }
 0x238   : > { %3808 = vst [vmem:[%s4979_s28 + $0xfd8] sm:$0xff] %v2784_v55  ;;  %v760_v55 = vld [vmem:[%s4957_s7 + $0x1098] sm:$0xff]  ;;  %v2807_v60 = vadd.f32 %v1783_v53, %v759_v52  ;;  %v1803_v49 = vld [vmem:[%s4964_s21 + $0x1130] sm:$0xff] }
 0x239   : > { %3809 = vst [vmem:[%s4979_s28 + $0xfe0] sm:$0xff] %v2785_v58  ;;  %v761_v58 = vld [vmem:[%s4957_s7 + $0x10a0] sm:$0xff]  ;;  %v2808_v63 = vadd.f32 %v1784_v56, %v760_v55  ;;  %v1804_v52 = vld [vmem:[%s4964_s21 + $0x1138] sm:$0xff] }
 0x23a   : > { %3810 = vst [vmem:[%s4979_s28 + $0xfe8] sm:$0xff] %v2786_v61  ;;  %v762_v61 = vld [vmem:[%s4957_s7 + $0x10a8] sm:$0xff]  ;;  %v2809_v2 = vadd.f32 %v1785_v59, %v761_v58  ;;  %v1805_v55 = vld [vmem:[%s4964_s21 + $0x1140] sm:$0xff] }
 0x23b   : > { %3811 = vst [vmem:[%s4979_s28 + $0xff0] sm:$0xff] %v2787_v0  ;;  %v763_v0 = vld [vmem:[%s4957_s7 + $0x10b0] sm:$0xff]  ;;  %v2810_v5 = vadd.f32 %v1786_v62, %v762_v61  ;;  %v1806_v58 = vld [vmem:[%s4964_s21 + $0x1148] sm:$0xff] }
 0x23c   : > { %3812 = vst [vmem:[%s4979_s28 + $0xff8] sm:$0xff] %v2788_v3  ;;  %v764_v3 = vld [vmem:[%s4957_s7 + $0x10b8] sm:$0xff]  ;;  %v2811_v8 = vadd.f32 %v1787_v1, %v763_v0  ;;  %v1807_v61 = vld [vmem:[%s4964_s21 + $0x1150] sm:$0xff] }
 0x23d   : > { %3813 = vst [vmem:[%s4979_s28 + $0x1000] sm:$0xff] %v2789_v6  ;;  %v765_v6 = vld [vmem:[%s4957_s7 + $0x10c0] sm:$0xff]  ;;  %v2812_v11 = vadd.f32 %v1788_v4, %v764_v3  ;;  %v1808_v0 = vld [vmem:[%s4964_s21 + $0x1158] sm:$0xff] }
 0x23e   : > { %3814 = vst [vmem:[%s4979_s28 + $0x1008] sm:$0xff] %v2790_v9  ;;  %v766_v9 = vld [vmem:[%s4957_s7 + $0x10c8] sm:$0xff]  ;;  %v2813_v14 = vadd.f32 %v1789_v7, %v765_v6  ;;  %v1809_v3 = vld [vmem:[%s4964_s21 + $0x1160] sm:$0xff] }
 0x23f   : > { %3815 = vst [vmem:[%s4979_s28 + $0x1010] sm:$0xff] %v2791_v12  ;;  %v767_v12 = vld [vmem:[%s4957_s7 + $0x10d0] sm:$0xff]  ;;  %v2814_v17 = vadd.f32 %v1790_v10, %v766_v9  ;;  %v1810_v6 = vld [vmem:[%s4964_s21 + $0x1168] sm:$0xff] }
 0x240   : > { %3816 = vst [vmem:[%s4979_s28 + $0x1018] sm:$0xff] %v2792_v15  ;;  %v768_v15 = vld [vmem:[%s4957_s7 + $0x10d8] sm:$0xff]  ;;  %v2815_v20 = vadd.f32 %v1791_v13, %v767_v12  ;;  %v1811_v9 = vld [vmem:[%s4964_s21 + $0x1170] sm:$0xff] }
 0x241   : > { %3817 = vst [vmem:[%s4979_s28 + $0x1020] sm:$0xff] %v2793_v18  ;;  %v769_v18 = vld [vmem:[%s4957_s7 + $0x10e0] sm:$0xff]  ;;  %v2816_v23 = vadd.f32 %v1792_v16, %v768_v15  ;;  %v1812_v12 = vld [vmem:[%s4964_s21 + $0x1178] sm:$0xff] }
 0x242   : > { %3818 = vst [vmem:[%s4979_s28 + $0x1028] sm:$0xff] %v2794_v21  ;;  %v770_v21 = vld [vmem:[%s4957_s7 + $0x10e8] sm:$0xff]  ;;  %v2817_v26 = vadd.f32 %v1793_v19, %v769_v18  ;;  %v1813_v15 = vld [vmem:[%s4964_s21 + $0x1180] sm:$0xff] }
 0x243   : > { %3819 = vst [vmem:[%s4979_s28 + $0x1030] sm:$0xff] %v2795_v24  ;;  %v771_v24 = vld [vmem:[%s4957_s7 + $0x10f0] sm:$0xff]  ;;  %v2818_v29 = vadd.f32 %v1794_v22, %v770_v21  ;;  %v1814_v18 = vld [vmem:[%s4964_s21 + $0x1188] sm:$0xff] }
 0x244   : > { %3820 = vst [vmem:[%s4979_s28 + $0x1038] sm:$0xff] %v2796_v27  ;;  %v772_v27 = vld [vmem:[%s4957_s7 + $0x10f8] sm:$0xff]  ;;  %v2819_v32 = vadd.f32 %v1795_v25, %v771_v24  ;;  %v1815_v21 = vld [vmem:[%s4964_s21 + $0x1190] sm:$0xff] }
 0x245   : > { %3821 = vst [vmem:[%s4979_s28 + $0x1040] sm:$0xff] %v2797_v30  ;;  %v773_v30 = vld [vmem:[%s4957_s7 + $0x1100] sm:$0xff]  ;;  %v2820_v35 = vadd.f32 %v1796_v28, %v772_v27  ;;  %v1816_v24 = vld [vmem:[%s4964_s21 + $0x1198] sm:$0xff] }
 0x246   : > { %3822 = vst [vmem:[%s4979_s28 + $0x1048] sm:$0xff] %v2798_v33  ;;  %v774_v33 = vld [vmem:[%s4957_s7 + $0x1108] sm:$0xff]  ;;  %v2821_v38 = vadd.f32 %v1797_v31, %v773_v30  ;;  %v1817_v27 = vld [vmem:[%s4964_s21 + $0x11a0] sm:$0xff] }
 0x247   : > { %3823 = vst [vmem:[%s4979_s28 + $0x1050] sm:$0xff] %v2799_v36  ;;  %v775_v36 = vld [vmem:[%s4957_s7 + $0x1110] sm:$0xff]  ;;  %v2822_v41 = vadd.f32 %v1798_v34, %v774_v33  ;;  %v1818_v30 = vld [vmem:[%s4964_s21 + $0x11a8] sm:$0xff] }
 0x248   : > { %3824 = vst [vmem:[%s4979_s28 + $0x1058] sm:$0xff] %v2800_v39  ;;  %v776_v39 = vld [vmem:[%s4957_s7 + $0x1118] sm:$0xff]  ;;  %v2823_v44 = vadd.f32 %v1799_v37, %v775_v36  ;;  %v1819_v33 = vld [vmem:[%s4964_s21 + $0x11b0] sm:$0xff] }
 0x249   : > { %3825 = vst [vmem:[%s4979_s28 + $0x1060] sm:$0xff] %v2801_v42  ;;  %v777_v42 = vld [vmem:[%s4957_s7 + $0x1120] sm:$0xff]  ;;  %v2824_v47 = vadd.f32 %v1800_v40, %v776_v39  ;;  %v1820_v36 = vld [vmem:[%s4964_s21 + $0x11b8] sm:$0xff] }
 0x24a   : > { %3826 = vst [vmem:[%s4979_s28 + $0x1068] sm:$0xff] %v2802_v45  ;;  %v778_v45 = vld [vmem:[%s4957_s7 + $0x1128] sm:$0xff]  ;;  %v2825_v50 = vadd.f32 %v1801_v43, %v777_v42  ;;  %v1821_v39 = vld [vmem:[%s4964_s21 + $0x11c0] sm:$0xff] }
 0x24b   : > { %3827 = vst [vmem:[%s4979_s28 + $0x1070] sm:$0xff] %v2803_v48  ;;  %v779_v48 = vld [vmem:[%s4957_s7 + $0x1130] sm:$0xff]  ;;  %v2826_v53 = vadd.f32 %v1802_v46, %v778_v45  ;;  %v1822_v42 = vld [vmem:[%s4964_s21 + $0x11c8] sm:$0xff] }
 0x24c   : > { %3828 = vst [vmem:[%s4979_s28 + $0x1078] sm:$0xff] %v2804_v51  ;;  %v780_v51 = vld [vmem:[%s4957_s7 + $0x1138] sm:$0xff]  ;;  %v2827_v56 = vadd.f32 %v1803_v49, %v779_v48  ;;  %v1823_v45 = vld [vmem:[%s4964_s21 + $0x11d0] sm:$0xff] }
 0x24d   : > { %3829 = vst [vmem:[%s4979_s28 + $0x1080] sm:$0xff] %v2805_v54  ;;  %v781_v54 = vld [vmem:[%s4957_s7 + $0x1140] sm:$0xff]  ;;  %v2828_v59 = vadd.f32 %v1804_v52, %v780_v51  ;;  %v1824_v48 = vld [vmem:[%s4964_s21 + $0x11d8] sm:$0xff] }
 0x24e   : > { %3830 = vst [vmem:[%s4979_s28 + $0x1088] sm:$0xff] %v2806_v57  ;;  %v782_v57 = vld [vmem:[%s4957_s7 + $0x1148] sm:$0xff]  ;;  %v2829_v62 = vadd.f32 %v1805_v55, %v781_v54  ;;  %v1825_v51 = vld [vmem:[%s4964_s21 + $0x11e0] sm:$0xff] }
 0x24f   : > { %3831 = vst [vmem:[%s4979_s28 + $0x1090] sm:$0xff] %v2807_v60  ;;  %v783_v60 = vld [vmem:[%s4957_s7 + $0x1150] sm:$0xff]  ;;  %v2830_v1 = vadd.f32 %v1806_v58, %v782_v57  ;;  %v1826_v54 = vld [vmem:[%s4964_s21 + $0x11e8] sm:$0xff] }
 0x250   : > { %3832 = vst [vmem:[%s4979_s28 + $0x1098] sm:$0xff] %v2808_v63  ;;  %v784_v63 = vld [vmem:[%s4957_s7 + $0x1158] sm:$0xff]  ;;  %v2831_v4 = vadd.f32 %v1807_v61, %v783_v60  ;;  %v1827_v57 = vld [vmem:[%s4964_s21 + $0x11f0] sm:$0xff] }
 0x251   : > { %3833 = vst [vmem:[%s4979_s28 + $0x10a0] sm:$0xff] %v2809_v2  ;;  %v785_v2 = vld [vmem:[%s4957_s7 + $0x1160] sm:$0xff]  ;;  %v2832_v7 = vadd.f32 %v1808_v0, %v784_v63  ;;  %v1828_v60 = vld [vmem:[%s4964_s21 + $0x11f8] sm:$0xff] }
 0x252   : > { %3834 = vst [vmem:[%s4979_s28 + $0x10a8] sm:$0xff] %v2810_v5  ;;  %v786_v5 = vld [vmem:[%s4957_s7 + $0x1168] sm:$0xff]  ;;  %v2833_v10 = vadd.f32 %v1809_v3, %v785_v2  ;;  %v1829_v63 = vld [vmem:[%s4964_s21 + $0x1200] sm:$0xff] }
 0x253   : > { %3835 = vst [vmem:[%s4979_s28 + $0x10b0] sm:$0xff] %v2811_v8  ;;  %v787_v8 = vld [vmem:[%s4957_s7 + $0x1170] sm:$0xff]  ;;  %v2834_v13 = vadd.f32 %v1810_v6, %v786_v5  ;;  %v1830_v2 = vld [vmem:[%s4964_s21 + $0x1208] sm:$0xff] }
 0x254   : > { %3836 = vst [vmem:[%s4979_s28 + $0x10b8] sm:$0xff] %v2812_v11  ;;  %v788_v11 = vld [vmem:[%s4957_s7 + $0x1178] sm:$0xff]  ;;  %v2835_v16 = vadd.f32 %v1811_v9, %v787_v8  ;;  %v1831_v5 = vld [vmem:[%s4964_s21 + $0x1210] sm:$0xff] }
 0x255   : > { %3837 = vst [vmem:[%s4979_s28 + $0x10c0] sm:$0xff] %v2813_v14  ;;  %v789_v14 = vld [vmem:[%s4957_s7 + $0x1180] sm:$0xff]  ;;  %v2836_v19 = vadd.f32 %v1812_v12, %v788_v11  ;;  %v1832_v8 = vld [vmem:[%s4964_s21 + $0x1218] sm:$0xff] }
 0x256   : > { %3838 = vst [vmem:[%s4979_s28 + $0x10c8] sm:$0xff] %v2814_v17  ;;  %v790_v17 = vld [vmem:[%s4957_s7 + $0x1188] sm:$0xff]  ;;  %v2837_v22 = vadd.f32 %v1813_v15, %v789_v14  ;;  %v1833_v11 = vld [vmem:[%s4964_s21 + $0x1220] sm:$0xff] }
 0x257   : > { %3839 = vst [vmem:[%s4979_s28 + $0x10d0] sm:$0xff] %v2815_v20  ;;  %v791_v20 = vld [vmem:[%s4957_s7 + $0x1190] sm:$0xff]  ;;  %v2838_v25 = vadd.f32 %v1814_v18, %v790_v17  ;;  %v1834_v14 = vld [vmem:[%s4964_s21 + $0x1228] sm:$0xff] }
 0x258   : > { %3840 = vst [vmem:[%s4979_s28 + $0x10d8] sm:$0xff] %v2816_v23  ;;  %v792_v23 = vld [vmem:[%s4957_s7 + $0x1198] sm:$0xff]  ;;  %v2839_v28 = vadd.f32 %v1815_v21, %v791_v20  ;;  %v1835_v17 = vld [vmem:[%s4964_s21 + $0x1230] sm:$0xff] }
 0x259   : > { %3841 = vst [vmem:[%s4979_s28 + $0x10e0] sm:$0xff] %v2817_v26  ;;  %v793_v26 = vld [vmem:[%s4957_s7 + $0x11a0] sm:$0xff]  ;;  %v2840_v31 = vadd.f32 %v1816_v24, %v792_v23  ;;  %v1836_v20 = vld [vmem:[%s4964_s21 + $0x1238] sm:$0xff] }
 0x25a   : > { %3842 = vst [vmem:[%s4979_s28 + $0x10e8] sm:$0xff] %v2818_v29  ;;  %v794_v29 = vld [vmem:[%s4957_s7 + $0x11a8] sm:$0xff]  ;;  %v2841_v34 = vadd.f32 %v1817_v27, %v793_v26  ;;  %v1837_v23 = vld [vmem:[%s4964_s21 + $0x1240] sm:$0xff] }
 0x25b   : > { %3843 = vst [vmem:[%s4979_s28 + $0x10f0] sm:$0xff] %v2819_v32  ;;  %v795_v32 = vld [vmem:[%s4957_s7 + $0x11b0] sm:$0xff]  ;;  %v2842_v37 = vadd.f32 %v1818_v30, %v794_v29  ;;  %v1838_v26 = vld [vmem:[%s4964_s21 + $0x1248] sm:$0xff] }
 0x25c   : > { %3844 = vst [vmem:[%s4979_s28 + $0x10f8] sm:$0xff] %v2820_v35  ;;  %v796_v35 = vld [vmem:[%s4957_s7 + $0x11b8] sm:$0xff]  ;;  %v2843_v40 = vadd.f32 %v1819_v33, %v795_v32  ;;  %v1839_v29 = vld [vmem:[%s4964_s21 + $0x1250] sm:$0xff] }
 0x25d   : > { %3845 = vst [vmem:[%s4979_s28 + $0x1100] sm:$0xff] %v2821_v38  ;;  %v797_v38 = vld [vmem:[%s4957_s7 + $0x11c0] sm:$0xff]  ;;  %v2844_v43 = vadd.f32 %v1820_v36, %v796_v35  ;;  %v1840_v32 = vld [vmem:[%s4964_s21 + $0x1258] sm:$0xff] }
 0x25e   : > { %3846 = vst [vmem:[%s4979_s28 + $0x1108] sm:$0xff] %v2822_v41  ;;  %v798_v41 = vld [vmem:[%s4957_s7 + $0x11c8] sm:$0xff]  ;;  %v2845_v46 = vadd.f32 %v1821_v39, %v797_v38  ;;  %v1841_v35 = vld [vmem:[%s4964_s21 + $0x1260] sm:$0xff] }
 0x25f   : > { %3847 = vst [vmem:[%s4979_s28 + $0x1110] sm:$0xff] %v2823_v44  ;;  %v799_v44 = vld [vmem:[%s4957_s7 + $0x11d0] sm:$0xff]  ;;  %v2846_v49 = vadd.f32 %v1822_v42, %v798_v41  ;;  %v1842_v38 = vld [vmem:[%s4964_s21 + $0x1268] sm:$0xff] }
 0x260   : > { %3848 = vst [vmem:[%s4979_s28 + $0x1118] sm:$0xff] %v2824_v47  ;;  %v800_v47 = vld [vmem:[%s4957_s7 + $0x11d8] sm:$0xff]  ;;  %v2847_v52 = vadd.f32 %v1823_v45, %v799_v44  ;;  %v1843_v41 = vld [vmem:[%s4964_s21 + $0x1270] sm:$0xff] }
 0x261   : > { %3849 = vst [vmem:[%s4979_s28 + $0x1120] sm:$0xff] %v2825_v50  ;;  %v801_v50 = vld [vmem:[%s4957_s7 + $0x11e0] sm:$0xff]  ;;  %v2848_v55 = vadd.f32 %v1824_v48, %v800_v47  ;;  %v1844_v44 = vld [vmem:[%s4964_s21 + $0x1278] sm:$0xff] }
 0x262   : > { %3850 = vst [vmem:[%s4979_s28 + $0x1128] sm:$0xff] %v2826_v53  ;;  %v802_v53 = vld [vmem:[%s4957_s7 + $0x11e8] sm:$0xff]  ;;  %v2849_v58 = vadd.f32 %v1825_v51, %v801_v50  ;;  %v1845_v47 = vld [vmem:[%s4964_s21 + $0x1280] sm:$0xff] }
 0x263   : > { %3851 = vst [vmem:[%s4979_s28 + $0x1130] sm:$0xff] %v2827_v56  ;;  %v803_v56 = vld [vmem:[%s4957_s7 + $0x11f0] sm:$0xff]  ;;  %v2850_v61 = vadd.f32 %v1826_v54, %v802_v53  ;;  %v1846_v50 = vld [vmem:[%s4964_s21 + $0x1288] sm:$0xff] }
 0x264   : > { %3852 = vst [vmem:[%s4979_s28 + $0x1138] sm:$0xff] %v2828_v59  ;;  %v804_v59 = vld [vmem:[%s4957_s7 + $0x11f8] sm:$0xff]  ;;  %v2851_v0 = vadd.f32 %v1827_v57, %v803_v56  ;;  %v1847_v53 = vld [vmem:[%s4964_s21 + $0x1290] sm:$0xff] }
 0x265   : > { %3853 = vst [vmem:[%s4979_s28 + $0x1140] sm:$0xff] %v2829_v62  ;;  %v805_v62 = vld [vmem:[%s4957_s7 + $0x1200] sm:$0xff]  ;;  %v2852_v3 = vadd.f32 %v1828_v60, %v804_v59  ;;  %v1848_v56 = vld [vmem:[%s4964_s21 + $0x1298] sm:$0xff] }
 0x266   : > { %3854 = vst [vmem:[%s4979_s28 + $0x1148] sm:$0xff] %v2830_v1  ;;  %v806_v1 = vld [vmem:[%s4957_s7 + $0x1208] sm:$0xff]  ;;  %v2853_v6 = vadd.f32 %v1829_v63, %v805_v62  ;;  %v1849_v59 = vld [vmem:[%s4964_s21 + $0x12a0] sm:$0xff] }
 0x267   : > { %3855 = vst [vmem:[%s4979_s28 + $0x1150] sm:$0xff] %v2831_v4  ;;  %v807_v4 = vld [vmem:[%s4957_s7 + $0x1210] sm:$0xff]  ;;  %v2854_v9 = vadd.f32 %v1830_v2, %v806_v1  ;;  %v1850_v62 = vld [vmem:[%s4964_s21 + $0x12a8] sm:$0xff] }
 0x268   : > { %3856 = vst [vmem:[%s4979_s28 + $0x1158] sm:$0xff] %v2832_v7  ;;  %v808_v7 = vld [vmem:[%s4957_s7 + $0x1218] sm:$0xff]  ;;  %v2855_v12 = vadd.f32 %v1831_v5, %v807_v4  ;;  %v1851_v1 = vld [vmem:[%s4964_s21 + $0x12b0] sm:$0xff] }
 0x269   : > { %3857 = vst [vmem:[%s4979_s28 + $0x1160] sm:$0xff] %v2833_v10  ;;  %v809_v10 = vld [vmem:[%s4957_s7 + $0x1220] sm:$0xff]  ;;  %v2856_v15 = vadd.f32 %v1832_v8, %v808_v7  ;;  %v1852_v4 = vld [vmem:[%s4964_s21 + $0x12b8] sm:$0xff] }
 0x26a   : > { %3858 = vst [vmem:[%s4979_s28 + $0x1168] sm:$0xff] %v2834_v13  ;;  %v810_v13 = vld [vmem:[%s4957_s7 + $0x1228] sm:$0xff]  ;;  %v2857_v18 = vadd.f32 %v1833_v11, %v809_v10  ;;  %v1853_v7 = vld [vmem:[%s4964_s21 + $0x12c0] sm:$0xff] }
 0x26b   : > { %3859 = vst [vmem:[%s4979_s28 + $0x1170] sm:$0xff] %v2835_v16  ;;  %v811_v16 = vld [vmem:[%s4957_s7 + $0x1230] sm:$0xff]  ;;  %v2858_v21 = vadd.f32 %v1834_v14, %v810_v13  ;;  %v1854_v10 = vld [vmem:[%s4964_s21 + $0x12c8] sm:$0xff] }
 0x26c   : > { %3860 = vst [vmem:[%s4979_s28 + $0x1178] sm:$0xff] %v2836_v19  ;;  %v812_v19 = vld [vmem:[%s4957_s7 + $0x1238] sm:$0xff]  ;;  %v2859_v24 = vadd.f32 %v1835_v17, %v811_v16  ;;  %v1855_v13 = vld [vmem:[%s4964_s21 + $0x12d0] sm:$0xff] }
 0x26d   : > { %3861 = vst [vmem:[%s4979_s28 + $0x1180] sm:$0xff] %v2837_v22  ;;  %v813_v22 = vld [vmem:[%s4957_s7 + $0x1240] sm:$0xff]  ;;  %v2860_v27 = vadd.f32 %v1836_v20, %v812_v19  ;;  %v1856_v16 = vld [vmem:[%s4964_s21 + $0x12d8] sm:$0xff] }
 0x26e   : > { %3862 = vst [vmem:[%s4979_s28 + $0x1188] sm:$0xff] %v2838_v25  ;;  %v814_v25 = vld [vmem:[%s4957_s7 + $0x1248] sm:$0xff]  ;;  %v2861_v30 = vadd.f32 %v1837_v23, %v813_v22  ;;  %v1857_v19 = vld [vmem:[%s4964_s21 + $0x12e0] sm:$0xff] }
 0x26f   : > { %3863 = vst [vmem:[%s4979_s28 + $0x1190] sm:$0xff] %v2839_v28  ;;  %v815_v28 = vld [vmem:[%s4957_s7 + $0x1250] sm:$0xff]  ;;  %v2862_v33 = vadd.f32 %v1838_v26, %v814_v25  ;;  %v1858_v22 = vld [vmem:[%s4964_s21 + $0x12e8] sm:$0xff] }
 0x270   : > { %3864 = vst [vmem:[%s4979_s28 + $0x1198] sm:$0xff] %v2840_v31  ;;  %v816_v31 = vld [vmem:[%s4957_s7 + $0x1258] sm:$0xff]  ;;  %v2863_v36 = vadd.f32 %v1839_v29, %v815_v28  ;;  %v1859_v25 = vld [vmem:[%s4964_s21 + $0x12f0] sm:$0xff] }
 0x271   : > { %3865 = vst [vmem:[%s4979_s28 + $0x11a0] sm:$0xff] %v2841_v34  ;;  %v817_v34 = vld [vmem:[%s4957_s7 + $0x1260] sm:$0xff]  ;;  %v2864_v39 = vadd.f32 %v1840_v32, %v816_v31  ;;  %v1860_v28 = vld [vmem:[%s4964_s21 + $0x12f8] sm:$0xff] }
 0x272   : > { %3866 = vst [vmem:[%s4979_s28 + $0x11a8] sm:$0xff] %v2842_v37  ;;  %v818_v37 = vld [vmem:[%s4957_s7 + $0x1268] sm:$0xff]  ;;  %v2865_v42 = vadd.f32 %v1841_v35, %v817_v34  ;;  %v1861_v31 = vld [vmem:[%s4964_s21 + $0x1300] sm:$0xff] }
 0x273   : > { %3867 = vst [vmem:[%s4979_s28 + $0x11b0] sm:$0xff] %v2843_v40  ;;  %v819_v40 = vld [vmem:[%s4957_s7 + $0x1270] sm:$0xff]  ;;  %v2866_v45 = vadd.f32 %v1842_v38, %v818_v37  ;;  %v1862_v34 = vld [vmem:[%s4964_s21 + $0x1308] sm:$0xff] }
 0x274   : > { %3868 = vst [vmem:[%s4979_s28 + $0x11b8] sm:$0xff] %v2844_v43  ;;  %v820_v43 = vld [vmem:[%s4957_s7 + $0x1278] sm:$0xff]  ;;  %v2867_v48 = vadd.f32 %v1843_v41, %v819_v40  ;;  %v1863_v37 = vld [vmem:[%s4964_s21 + $0x1310] sm:$0xff] }
 0x275   : > { %3869 = vst [vmem:[%s4979_s28 + $0x11c0] sm:$0xff] %v2845_v46  ;;  %v821_v46 = vld [vmem:[%s4957_s7 + $0x1280] sm:$0xff]  ;;  %v2868_v51 = vadd.f32 %v1844_v44, %v820_v43  ;;  %v1864_v40 = vld [vmem:[%s4964_s21 + $0x1318] sm:$0xff] }
 0x276   : > { %3870 = vst [vmem:[%s4979_s28 + $0x11c8] sm:$0xff] %v2846_v49  ;;  %v822_v49 = vld [vmem:[%s4957_s7 + $0x1288] sm:$0xff]  ;;  %v2869_v54 = vadd.f32 %v1845_v47, %v821_v46  ;;  %v1865_v43 = vld [vmem:[%s4964_s21 + $0x1320] sm:$0xff] }
 0x277   : > { %3871 = vst [vmem:[%s4979_s28 + $0x11d0] sm:$0xff] %v2847_v52  ;;  %v823_v52 = vld [vmem:[%s4957_s7 + $0x1290] sm:$0xff]  ;;  %v2870_v57 = vadd.f32 %v1846_v50, %v822_v49  ;;  %v1866_v46 = vld [vmem:[%s4964_s21 + $0x1328] sm:$0xff] }
 0x278   : > { %3872 = vst [vmem:[%s4979_s28 + $0x11d8] sm:$0xff] %v2848_v55  ;;  %v824_v55 = vld [vmem:[%s4957_s7 + $0x1298] sm:$0xff]  ;;  %v2871_v60 = vadd.f32 %v1847_v53, %v823_v52  ;;  %v1867_v49 = vld [vmem:[%s4964_s21 + $0x1330] sm:$0xff] }
 0x279   : > { %3873 = vst [vmem:[%s4979_s28 + $0x11e0] sm:$0xff] %v2849_v58  ;;  %v825_v58 = vld [vmem:[%s4957_s7 + $0x12a0] sm:$0xff]  ;;  %v2872_v63 = vadd.f32 %v1848_v56, %v824_v55  ;;  %v1868_v52 = vld [vmem:[%s4964_s21 + $0x1338] sm:$0xff] }
 0x27a   : > { %3874 = vst [vmem:[%s4979_s28 + $0x11e8] sm:$0xff] %v2850_v61  ;;  %v826_v61 = vld [vmem:[%s4957_s7 + $0x12a8] sm:$0xff]  ;;  %v2873_v2 = vadd.f32 %v1849_v59, %v825_v58  ;;  %v1869_v55 = vld [vmem:[%s4964_s21 + $0x1340] sm:$0xff] }
 0x27b   : > { %3875 = vst [vmem:[%s4979_s28 + $0x11f0] sm:$0xff] %v2851_v0  ;;  %v827_v0 = vld [vmem:[%s4957_s7 + $0x12b0] sm:$0xff]  ;;  %v2874_v5 = vadd.f32 %v1850_v62, %v826_v61  ;;  %v1870_v58 = vld [vmem:[%s4964_s21 + $0x1348] sm:$0xff] }
 0x27c   : > { %3876 = vst [vmem:[%s4979_s28 + $0x11f8] sm:$0xff] %v2852_v3  ;;  %v828_v3 = vld [vmem:[%s4957_s7 + $0x12b8] sm:$0xff]  ;;  %v2875_v8 = vadd.f32 %v1851_v1, %v827_v0  ;;  %v1871_v61 = vld [vmem:[%s4964_s21 + $0x1350] sm:$0xff] }
 0x27d   : > { %3877 = vst [vmem:[%s4979_s28 + $0x1200] sm:$0xff] %v2853_v6  ;;  %v829_v6 = vld [vmem:[%s4957_s7 + $0x12c0] sm:$0xff]  ;;  %v2876_v11 = vadd.f32 %v1852_v4, %v828_v3  ;;  %v1872_v0 = vld [vmem:[%s4964_s21 + $0x1358] sm:$0xff] }
 0x27e   : > { %3878 = vst [vmem:[%s4979_s28 + $0x1208] sm:$0xff] %v2854_v9  ;;  %v830_v9 = vld [vmem:[%s4957_s7 + $0x12c8] sm:$0xff]  ;;  %v2877_v14 = vadd.f32 %v1853_v7, %v829_v6  ;;  %v1873_v3 = vld [vmem:[%s4964_s21 + $0x1360] sm:$0xff] }
 0x27f   : > { %3879 = vst [vmem:[%s4979_s28 + $0x1210] sm:$0xff] %v2855_v12  ;;  %v831_v12 = vld [vmem:[%s4957_s7 + $0x12d0] sm:$0xff]  ;;  %v2878_v17 = vadd.f32 %v1854_v10, %v830_v9  ;;  %v1874_v6 = vld [vmem:[%s4964_s21 + $0x1368] sm:$0xff] }
 0x280   : > { %3880 = vst [vmem:[%s4979_s28 + $0x1218] sm:$0xff] %v2856_v15  ;;  %v832_v15 = vld [vmem:[%s4957_s7 + $0x12d8] sm:$0xff]  ;;  %v2879_v20 = vadd.f32 %v1855_v13, %v831_v12  ;;  %v1875_v9 = vld [vmem:[%s4964_s21 + $0x1370] sm:$0xff] }
 0x281   : > { %3881 = vst [vmem:[%s4979_s28 + $0x1220] sm:$0xff] %v2857_v18  ;;  %v833_v18 = vld [vmem:[%s4957_s7 + $0x12e0] sm:$0xff]  ;;  %v2880_v23 = vadd.f32 %v1856_v16, %v832_v15  ;;  %v1876_v12 = vld [vmem:[%s4964_s21 + $0x1378] sm:$0xff] }
 0x282   : > { %3882 = vst [vmem:[%s4979_s28 + $0x1228] sm:$0xff] %v2858_v21  ;;  %v834_v21 = vld [vmem:[%s4957_s7 + $0x12e8] sm:$0xff]  ;;  %v2881_v26 = vadd.f32 %v1857_v19, %v833_v18  ;;  %v1877_v15 = vld [vmem:[%s4964_s21 + $0x1380] sm:$0xff] }
 0x283   : > { %3883 = vst [vmem:[%s4979_s28 + $0x1230] sm:$0xff] %v2859_v24  ;;  %v835_v24 = vld [vmem:[%s4957_s7 + $0x12f0] sm:$0xff]  ;;  %v2882_v29 = vadd.f32 %v1858_v22, %v834_v21  ;;  %v1878_v18 = vld [vmem:[%s4964_s21 + $0x1388] sm:$0xff] }
 0x284   : > { %3884 = vst [vmem:[%s4979_s28 + $0x1238] sm:$0xff] %v2860_v27  ;;  %v836_v27 = vld [vmem:[%s4957_s7 + $0x12f8] sm:$0xff]  ;;  %v2883_v32 = vadd.f32 %v1859_v25, %v835_v24  ;;  %v1879_v21 = vld [vmem:[%s4964_s21 + $0x1390] sm:$0xff] }
 0x285   : > { %3885 = vst [vmem:[%s4979_s28 + $0x1240] sm:$0xff] %v2861_v30  ;;  %v837_v30 = vld [vmem:[%s4957_s7 + $0x1300] sm:$0xff]  ;;  %v2884_v35 = vadd.f32 %v1860_v28, %v836_v27  ;;  %v1880_v24 = vld [vmem:[%s4964_s21 + $0x1398] sm:$0xff] }
 0x286   : > { %3886 = vst [vmem:[%s4979_s28 + $0x1248] sm:$0xff] %v2862_v33  ;;  %v838_v33 = vld [vmem:[%s4957_s7 + $0x1308] sm:$0xff]  ;;  %v2885_v38 = vadd.f32 %v1861_v31, %v837_v30  ;;  %v1881_v27 = vld [vmem:[%s4964_s21 + $0x13a0] sm:$0xff] }
 0x287   : > { %3887 = vst [vmem:[%s4979_s28 + $0x1250] sm:$0xff] %v2863_v36  ;;  %v839_v36 = vld [vmem:[%s4957_s7 + $0x1310] sm:$0xff]  ;;  %v2886_v41 = vadd.f32 %v1862_v34, %v838_v33  ;;  %v1882_v30 = vld [vmem:[%s4964_s21 + $0x13a8] sm:$0xff] }
 0x288   : > { %3888 = vst [vmem:[%s4979_s28 + $0x1258] sm:$0xff] %v2864_v39  ;;  %v840_v39 = vld [vmem:[%s4957_s7 + $0x1318] sm:$0xff]  ;;  %v2887_v44 = vadd.f32 %v1863_v37, %v839_v36  ;;  %v1883_v33 = vld [vmem:[%s4964_s21 + $0x13b0] sm:$0xff] }
 0x289   : > { %3889 = vst [vmem:[%s4979_s28 + $0x1260] sm:$0xff] %v2865_v42  ;;  %v841_v42 = vld [vmem:[%s4957_s7 + $0x1320] sm:$0xff]  ;;  %v2888_v47 = vadd.f32 %v1864_v40, %v840_v39  ;;  %v1884_v36 = vld [vmem:[%s4964_s21 + $0x13b8] sm:$0xff] }
 0x28a   : > { %3890 = vst [vmem:[%s4979_s28 + $0x1268] sm:$0xff] %v2866_v45  ;;  %v842_v45 = vld [vmem:[%s4957_s7 + $0x1328] sm:$0xff]  ;;  %v2889_v50 = vadd.f32 %v1865_v43, %v841_v42  ;;  %v1885_v39 = vld [vmem:[%s4964_s21 + $0x13c0] sm:$0xff] }
 0x28b   : > { %3891 = vst [vmem:[%s4979_s28 + $0x1270] sm:$0xff] %v2867_v48  ;;  %v843_v48 = vld [vmem:[%s4957_s7 + $0x1330] sm:$0xff]  ;;  %v2890_v53 = vadd.f32 %v1866_v46, %v842_v45  ;;  %v1886_v42 = vld [vmem:[%s4964_s21 + $0x13c8] sm:$0xff] }
 0x28c   : > { %3892 = vst [vmem:[%s4979_s28 + $0x1278] sm:$0xff] %v2868_v51  ;;  %v844_v51 = vld [vmem:[%s4957_s7 + $0x1338] sm:$0xff]  ;;  %v2891_v56 = vadd.f32 %v1867_v49, %v843_v48  ;;  %v1887_v45 = vld [vmem:[%s4964_s21 + $0x13d0] sm:$0xff] }
 0x28d   : > { %3893 = vst [vmem:[%s4979_s28 + $0x1280] sm:$0xff] %v2869_v54  ;;  %v845_v54 = vld [vmem:[%s4957_s7 + $0x1340] sm:$0xff]  ;;  %v2892_v59 = vadd.f32 %v1868_v52, %v844_v51  ;;  %v1888_v48 = vld [vmem:[%s4964_s21 + $0x13d8] sm:$0xff] }
 0x28e   : > { %3894 = vst [vmem:[%s4979_s28 + $0x1288] sm:$0xff] %v2870_v57  ;;  %v846_v57 = vld [vmem:[%s4957_s7 + $0x1348] sm:$0xff]  ;;  %v2893_v62 = vadd.f32 %v1869_v55, %v845_v54  ;;  %v1889_v51 = vld [vmem:[%s4964_s21 + $0x13e0] sm:$0xff] }
 0x28f   : > { %3895 = vst [vmem:[%s4979_s28 + $0x1290] sm:$0xff] %v2871_v60  ;;  %v847_v60 = vld [vmem:[%s4957_s7 + $0x1350] sm:$0xff]  ;;  %v2894_v1 = vadd.f32 %v1870_v58, %v846_v57  ;;  %v1890_v54 = vld [vmem:[%s4964_s21 + $0x13e8] sm:$0xff] }
 0x290   : > { %3896 = vst [vmem:[%s4979_s28 + $0x1298] sm:$0xff] %v2872_v63  ;;  %v848_v63 = vld [vmem:[%s4957_s7 + $0x1358] sm:$0xff]  ;;  %v2895_v4 = vadd.f32 %v1871_v61, %v847_v60  ;;  %v1891_v57 = vld [vmem:[%s4964_s21 + $0x13f0] sm:$0xff] }
 0x291   : > { %3897 = vst [vmem:[%s4979_s28 + $0x12a0] sm:$0xff] %v2873_v2  ;;  %v849_v2 = vld [vmem:[%s4957_s7 + $0x1360] sm:$0xff]  ;;  %v2896_v7 = vadd.f32 %v1872_v0, %v848_v63  ;;  %v1892_v60 = vld [vmem:[%s4964_s21 + $0x13f8] sm:$0xff] }
 0x292   : > { %3898 = vst [vmem:[%s4979_s28 + $0x12a8] sm:$0xff] %v2874_v5  ;;  %v850_v5 = vld [vmem:[%s4957_s7 + $0x1368] sm:$0xff]  ;;  %v2897_v10 = vadd.f32 %v1873_v3, %v849_v2  ;;  %v1893_v63 = vld [vmem:[%s4964_s21 + $0x1400] sm:$0xff] }
 0x293   : > { %3899 = vst [vmem:[%s4979_s28 + $0x12b0] sm:$0xff] %v2875_v8  ;;  %v851_v8 = vld [vmem:[%s4957_s7 + $0x1370] sm:$0xff]  ;;  %v2898_v13 = vadd.f32 %v1874_v6, %v850_v5  ;;  %v1894_v2 = vld [vmem:[%s4964_s21 + $0x1408] sm:$0xff] }
 0x294   : > { %3900 = vst [vmem:[%s4979_s28 + $0x12b8] sm:$0xff] %v2876_v11  ;;  %v852_v11 = vld [vmem:[%s4957_s7 + $0x1378] sm:$0xff]  ;;  %v2899_v16 = vadd.f32 %v1875_v9, %v851_v8  ;;  %v1895_v5 = vld [vmem:[%s4964_s21 + $0x1410] sm:$0xff] }
 0x295   : > { %3901 = vst [vmem:[%s4979_s28 + $0x12c0] sm:$0xff] %v2877_v14  ;;  %v853_v14 = vld [vmem:[%s4957_s7 + $0x1380] sm:$0xff]  ;;  %v2900_v19 = vadd.f32 %v1876_v12, %v852_v11  ;;  %v1896_v8 = vld [vmem:[%s4964_s21 + $0x1418] sm:$0xff] }
 0x296   : > { %3902 = vst [vmem:[%s4979_s28 + $0x12c8] sm:$0xff] %v2878_v17  ;;  %v854_v17 = vld [vmem:[%s4957_s7 + $0x1388] sm:$0xff]  ;;  %v2901_v22 = vadd.f32 %v1877_v15, %v853_v14  ;;  %v1897_v11 = vld [vmem:[%s4964_s21 + $0x1420] sm:$0xff] }
 0x297   : > { %3903 = vst [vmem:[%s4979_s28 + $0x12d0] sm:$0xff] %v2879_v20  ;;  %v855_v20 = vld [vmem:[%s4957_s7 + $0x1390] sm:$0xff]  ;;  %v2902_v25 = vadd.f32 %v1878_v18, %v854_v17  ;;  %v1898_v14 = vld [vmem:[%s4964_s21 + $0x1428] sm:$0xff] }
 0x298   : > { %3904 = vst [vmem:[%s4979_s28 + $0x12d8] sm:$0xff] %v2880_v23  ;;  %v856_v23 = vld [vmem:[%s4957_s7 + $0x1398] sm:$0xff]  ;;  %v2903_v28 = vadd.f32 %v1879_v21, %v855_v20  ;;  %v1899_v17 = vld [vmem:[%s4964_s21 + $0x1430] sm:$0xff] }
 0x299   : > { %3905 = vst [vmem:[%s4979_s28 + $0x12e0] sm:$0xff] %v2881_v26  ;;  %v857_v26 = vld [vmem:[%s4957_s7 + $0x13a0] sm:$0xff]  ;;  %v2904_v31 = vadd.f32 %v1880_v24, %v856_v23  ;;  %v1900_v20 = vld [vmem:[%s4964_s21 + $0x1438] sm:$0xff] }
 0x29a   : > { %3906 = vst [vmem:[%s4979_s28 + $0x12e8] sm:$0xff] %v2882_v29  ;;  %v858_v29 = vld [vmem:[%s4957_s7 + $0x13a8] sm:$0xff]  ;;  %v2905_v34 = vadd.f32 %v1881_v27, %v857_v26  ;;  %v1901_v23 = vld [vmem:[%s4964_s21 + $0x1440] sm:$0xff] }
 0x29b   : > { %3907 = vst [vmem:[%s4979_s28 + $0x12f0] sm:$0xff] %v2883_v32  ;;  %v859_v32 = vld [vmem:[%s4957_s7 + $0x13b0] sm:$0xff]  ;;  %v2906_v37 = vadd.f32 %v1882_v30, %v858_v29  ;;  %v1902_v26 = vld [vmem:[%s4964_s21 + $0x1448] sm:$0xff] }
 0x29c   : > { %3908 = vst [vmem:[%s4979_s28 + $0x12f8] sm:$0xff] %v2884_v35  ;;  %v860_v35 = vld [vmem:[%s4957_s7 + $0x13b8] sm:$0xff]  ;;  %v2907_v40 = vadd.f32 %v1883_v33, %v859_v32  ;;  %v1903_v29 = vld [vmem:[%s4964_s21 + $0x1450] sm:$0xff] }
 0x29d   : > { %3909 = vst [vmem:[%s4979_s28 + $0x1300] sm:$0xff] %v2885_v38  ;;  %v861_v38 = vld [vmem:[%s4957_s7 + $0x13c0] sm:$0xff]  ;;  %v2908_v43 = vadd.f32 %v1884_v36, %v860_v35  ;;  %v1904_v32 = vld [vmem:[%s4964_s21 + $0x1458] sm:$0xff] }
 0x29e   : > { %3910 = vst [vmem:[%s4979_s28 + $0x1308] sm:$0xff] %v2886_v41  ;;  %v862_v41 = vld [vmem:[%s4957_s7 + $0x13c8] sm:$0xff]  ;;  %v2909_v46 = vadd.f32 %v1885_v39, %v861_v38  ;;  %v1905_v35 = vld [vmem:[%s4964_s21 + $0x1460] sm:$0xff] }
 0x29f   : > { %3911 = vst [vmem:[%s4979_s28 + $0x1310] sm:$0xff] %v2887_v44  ;;  %v863_v44 = vld [vmem:[%s4957_s7 + $0x13d0] sm:$0xff]  ;;  %v2910_v49 = vadd.f32 %v1886_v42, %v862_v41  ;;  %v1906_v38 = vld [vmem:[%s4964_s21 + $0x1468] sm:$0xff] }
 0x2a0   : > { %3912 = vst [vmem:[%s4979_s28 + $0x1318] sm:$0xff] %v2888_v47  ;;  %v864_v47 = vld [vmem:[%s4957_s7 + $0x13d8] sm:$0xff]  ;;  %v2911_v52 = vadd.f32 %v1887_v45, %v863_v44  ;;  %v1907_v41 = vld [vmem:[%s4964_s21 + $0x1470] sm:$0xff] }
 0x2a1   : > { %3913 = vst [vmem:[%s4979_s28 + $0x1320] sm:$0xff] %v2889_v50  ;;  %v865_v50 = vld [vmem:[%s4957_s7 + $0x13e0] sm:$0xff]  ;;  %v2912_v55 = vadd.f32 %v1888_v48, %v864_v47  ;;  %v1908_v44 = vld [vmem:[%s4964_s21 + $0x1478] sm:$0xff] }
 0x2a2   : > { %3914 = vst [vmem:[%s4979_s28 + $0x1328] sm:$0xff] %v2890_v53  ;;  %v866_v53 = vld [vmem:[%s4957_s7 + $0x13e8] sm:$0xff]  ;;  %v2913_v58 = vadd.f32 %v1889_v51, %v865_v50  ;;  %v1909_v47 = vld [vmem:[%s4964_s21 + $0x1480] sm:$0xff] }
 0x2a3   : > { %3915 = vst [vmem:[%s4979_s28 + $0x1330] sm:$0xff] %v2891_v56  ;;  %v867_v56 = vld [vmem:[%s4957_s7 + $0x13f0] sm:$0xff]  ;;  %v2914_v61 = vadd.f32 %v1890_v54, %v866_v53  ;;  %v1910_v50 = vld [vmem:[%s4964_s21 + $0x1488] sm:$0xff] }
 0x2a4   : > { %3916 = vst [vmem:[%s4979_s28 + $0x1338] sm:$0xff] %v2892_v59  ;;  %v868_v59 = vld [vmem:[%s4957_s7 + $0x13f8] sm:$0xff]  ;;  %v2915_v0 = vadd.f32 %v1891_v57, %v867_v56  ;;  %v1911_v53 = vld [vmem:[%s4964_s21 + $0x1490] sm:$0xff] }
 0x2a5   : > { %3917 = vst [vmem:[%s4979_s28 + $0x1340] sm:$0xff] %v2893_v62  ;;  %v869_v62 = vld [vmem:[%s4957_s7 + $0x1400] sm:$0xff]  ;;  %v2916_v3 = vadd.f32 %v1892_v60, %v868_v59  ;;  %v1912_v56 = vld [vmem:[%s4964_s21 + $0x1498] sm:$0xff] }
 0x2a6   : > { %3918 = vst [vmem:[%s4979_s28 + $0x1348] sm:$0xff] %v2894_v1  ;;  %v870_v1 = vld [vmem:[%s4957_s7 + $0x1408] sm:$0xff]  ;;  %v2917_v6 = vadd.f32 %v1893_v63, %v869_v62  ;;  %v1913_v59 = vld [vmem:[%s4964_s21 + $0x14a0] sm:$0xff] }
 0x2a7   : > { %3919 = vst [vmem:[%s4979_s28 + $0x1350] sm:$0xff] %v2895_v4  ;;  %v871_v4 = vld [vmem:[%s4957_s7 + $0x1410] sm:$0xff]  ;;  %v2918_v9 = vadd.f32 %v1894_v2, %v870_v1  ;;  %v1914_v62 = vld [vmem:[%s4964_s21 + $0x14a8] sm:$0xff] }
 0x2a8   : > { %3920 = vst [vmem:[%s4979_s28 + $0x1358] sm:$0xff] %v2896_v7  ;;  %v872_v7 = vld [vmem:[%s4957_s7 + $0x1418] sm:$0xff]  ;;  %v2919_v12 = vadd.f32 %v1895_v5, %v871_v4  ;;  %v1915_v1 = vld [vmem:[%s4964_s21 + $0x14b0] sm:$0xff] }
 0x2a9   : > { %3921 = vst [vmem:[%s4979_s28 + $0x1360] sm:$0xff] %v2897_v10  ;;  %v873_v10 = vld [vmem:[%s4957_s7 + $0x1420] sm:$0xff]  ;;  %v2920_v15 = vadd.f32 %v1896_v8, %v872_v7  ;;  %v1916_v4 = vld [vmem:[%s4964_s21 + $0x14b8] sm:$0xff] }
 0x2aa   : > { %3922 = vst [vmem:[%s4979_s28 + $0x1368] sm:$0xff] %v2898_v13  ;;  %v874_v13 = vld [vmem:[%s4957_s7 + $0x1428] sm:$0xff]  ;;  %v2921_v18 = vadd.f32 %v1897_v11, %v873_v10  ;;  %v1917_v7 = vld [vmem:[%s4964_s21 + $0x14c0] sm:$0xff] }
 0x2ab   : > { %3923 = vst [vmem:[%s4979_s28 + $0x1370] sm:$0xff] %v2899_v16  ;;  %v875_v16 = vld [vmem:[%s4957_s7 + $0x1430] sm:$0xff]  ;;  %v2922_v21 = vadd.f32 %v1898_v14, %v874_v13  ;;  %v1918_v10 = vld [vmem:[%s4964_s21 + $0x14c8] sm:$0xff] }
 0x2ac   : > { %3924 = vst [vmem:[%s4979_s28 + $0x1378] sm:$0xff] %v2900_v19  ;;  %v876_v19 = vld [vmem:[%s4957_s7 + $0x1438] sm:$0xff]  ;;  %v2923_v24 = vadd.f32 %v1899_v17, %v875_v16  ;;  %v1919_v13 = vld [vmem:[%s4964_s21 + $0x14d0] sm:$0xff] }
 0x2ad   : > { %3925 = vst [vmem:[%s4979_s28 + $0x1380] sm:$0xff] %v2901_v22  ;;  %v877_v22 = vld [vmem:[%s4957_s7 + $0x1440] sm:$0xff]  ;;  %v2924_v27 = vadd.f32 %v1900_v20, %v876_v19  ;;  %v1920_v16 = vld [vmem:[%s4964_s21 + $0x14d8] sm:$0xff] }
 0x2ae   : > { %3926 = vst [vmem:[%s4979_s28 + $0x1388] sm:$0xff] %v2902_v25  ;;  %v878_v25 = vld [vmem:[%s4957_s7 + $0x1448] sm:$0xff]  ;;  %v2925_v30 = vadd.f32 %v1901_v23, %v877_v22  ;;  %v1921_v19 = vld [vmem:[%s4964_s21 + $0x14e0] sm:$0xff] }
 0x2af   : > { %3927 = vst [vmem:[%s4979_s28 + $0x1390] sm:$0xff] %v2903_v28  ;;  %v879_v28 = vld [vmem:[%s4957_s7 + $0x1450] sm:$0xff]  ;;  %v2926_v33 = vadd.f32 %v1902_v26, %v878_v25  ;;  %v1922_v22 = vld [vmem:[%s4964_s21 + $0x14e8] sm:$0xff] }
 0x2b0   : > { %3928 = vst [vmem:[%s4979_s28 + $0x1398] sm:$0xff] %v2904_v31  ;;  %v880_v31 = vld [vmem:[%s4957_s7 + $0x1458] sm:$0xff]  ;;  %v2927_v36 = vadd.f32 %v1903_v29, %v879_v28  ;;  %v1923_v25 = vld [vmem:[%s4964_s21 + $0x14f0] sm:$0xff] }
 0x2b1   : > { %3929 = vst [vmem:[%s4979_s28 + $0x13a0] sm:$0xff] %v2905_v34  ;;  %v881_v34 = vld [vmem:[%s4957_s7 + $0x1460] sm:$0xff]  ;;  %v2928_v39 = vadd.f32 %v1904_v32, %v880_v31  ;;  %v1924_v28 = vld [vmem:[%s4964_s21 + $0x14f8] sm:$0xff] }
 0x2b2   : > { %3930 = vst [vmem:[%s4979_s28 + $0x13a8] sm:$0xff] %v2906_v37  ;;  %v882_v37 = vld [vmem:[%s4957_s7 + $0x1468] sm:$0xff]  ;;  %v2929_v42 = vadd.f32 %v1905_v35, %v881_v34  ;;  %v1925_v31 = vld [vmem:[%s4964_s21 + $0x1500] sm:$0xff] }
 0x2b3   : > { %3931 = vst [vmem:[%s4979_s28 + $0x13b0] sm:$0xff] %v2907_v40  ;;  %v883_v40 = vld [vmem:[%s4957_s7 + $0x1470] sm:$0xff]  ;;  %v2930_v45 = vadd.f32 %v1906_v38, %v882_v37  ;;  %v1926_v34 = vld [vmem:[%s4964_s21 + $0x1508] sm:$0xff] }
 0x2b4   : > { %3932 = vst [vmem:[%s4979_s28 + $0x13b8] sm:$0xff] %v2908_v43  ;;  %v884_v43 = vld [vmem:[%s4957_s7 + $0x1478] sm:$0xff]  ;;  %v2931_v48 = vadd.f32 %v1907_v41, %v883_v40  ;;  %v1927_v37 = vld [vmem:[%s4964_s21 + $0x1510] sm:$0xff] }
 0x2b5   : > { %3933 = vst [vmem:[%s4979_s28 + $0x13c0] sm:$0xff] %v2909_v46  ;;  %v885_v46 = vld [vmem:[%s4957_s7 + $0x1480] sm:$0xff]  ;;  %v2932_v51 = vadd.f32 %v1908_v44, %v884_v43  ;;  %v1928_v40 = vld [vmem:[%s4964_s21 + $0x1518] sm:$0xff] }
 0x2b6   : > { %3934 = vst [vmem:[%s4979_s28 + $0x13c8] sm:$0xff] %v2910_v49  ;;  %v886_v49 = vld [vmem:[%s4957_s7 + $0x1488] sm:$0xff]  ;;  %v2933_v54 = vadd.f32 %v1909_v47, %v885_v46  ;;  %v1929_v43 = vld [vmem:[%s4964_s21 + $0x1520] sm:$0xff] }
 0x2b7   : > { %3935 = vst [vmem:[%s4979_s28 + $0x13d0] sm:$0xff] %v2911_v52  ;;  %v887_v52 = vld [vmem:[%s4957_s7 + $0x1490] sm:$0xff]  ;;  %v2934_v57 = vadd.f32 %v1910_v50, %v886_v49  ;;  %v1930_v46 = vld [vmem:[%s4964_s21 + $0x1528] sm:$0xff] }
 0x2b8   : > { %3936 = vst [vmem:[%s4979_s28 + $0x13d8] sm:$0xff] %v2912_v55  ;;  %v888_v55 = vld [vmem:[%s4957_s7 + $0x1498] sm:$0xff]  ;;  %v2935_v60 = vadd.f32 %v1911_v53, %v887_v52  ;;  %v1931_v49 = vld [vmem:[%s4964_s21 + $0x1530] sm:$0xff] }
 0x2b9   : > { %3937 = vst [vmem:[%s4979_s28 + $0x13e0] sm:$0xff] %v2913_v58  ;;  %v889_v58 = vld [vmem:[%s4957_s7 + $0x14a0] sm:$0xff]  ;;  %v2936_v63 = vadd.f32 %v1912_v56, %v888_v55  ;;  %v1932_v52 = vld [vmem:[%s4964_s21 + $0x1538] sm:$0xff] }
 0x2ba   : > { %3938 = vst [vmem:[%s4979_s28 + $0x13e8] sm:$0xff] %v2914_v61  ;;  %v890_v61 = vld [vmem:[%s4957_s7 + $0x14a8] sm:$0xff]  ;;  %v2937_v2 = vadd.f32 %v1913_v59, %v889_v58  ;;  %v1933_v55 = vld [vmem:[%s4964_s21 + $0x1540] sm:$0xff] }
 0x2bb   : > { %3939 = vst [vmem:[%s4979_s28 + $0x13f0] sm:$0xff] %v2915_v0  ;;  %v891_v0 = vld [vmem:[%s4957_s7 + $0x14b0] sm:$0xff]  ;;  %v2938_v5 = vadd.f32 %v1914_v62, %v890_v61  ;;  %v1934_v58 = vld [vmem:[%s4964_s21 + $0x1548] sm:$0xff] }
 0x2bc   : > { %3940 = vst [vmem:[%s4979_s28 + $0x13f8] sm:$0xff] %v2916_v3  ;;  %v892_v3 = vld [vmem:[%s4957_s7 + $0x14b8] sm:$0xff]  ;;  %v2939_v8 = vadd.f32 %v1915_v1, %v891_v0  ;;  %v1935_v61 = vld [vmem:[%s4964_s21 + $0x1550] sm:$0xff] }
 0x2bd   : > { %3941 = vst [vmem:[%s4979_s28 + $0x1400] sm:$0xff] %v2917_v6  ;;  %v893_v6 = vld [vmem:[%s4957_s7 + $0x14c0] sm:$0xff]  ;;  %v2940_v11 = vadd.f32 %v1916_v4, %v892_v3  ;;  %v1936_v0 = vld [vmem:[%s4964_s21 + $0x1558] sm:$0xff] }
 0x2be   : > { %3942 = vst [vmem:[%s4979_s28 + $0x1408] sm:$0xff] %v2918_v9  ;;  %v894_v9 = vld [vmem:[%s4957_s7 + $0x14c8] sm:$0xff]  ;;  %v2941_v14 = vadd.f32 %v1917_v7, %v893_v6  ;;  %v1937_v3 = vld [vmem:[%s4964_s21 + $0x1560] sm:$0xff] }
 0x2bf   : > { %3943 = vst [vmem:[%s4979_s28 + $0x1410] sm:$0xff] %v2919_v12  ;;  %v895_v12 = vld [vmem:[%s4957_s7 + $0x14d0] sm:$0xff]  ;;  %v2942_v17 = vadd.f32 %v1918_v10, %v894_v9  ;;  %v1938_v6 = vld [vmem:[%s4964_s21 + $0x1568] sm:$0xff] }
 0x2c0   : > { %3944 = vst [vmem:[%s4979_s28 + $0x1418] sm:$0xff] %v2920_v15  ;;  %v896_v15 = vld [vmem:[%s4957_s7 + $0x14d8] sm:$0xff]  ;;  %v2943_v20 = vadd.f32 %v1919_v13, %v895_v12  ;;  %v1939_v9 = vld [vmem:[%s4964_s21 + $0x1570] sm:$0xff] }
 0x2c1   : > { %3945 = vst [vmem:[%s4979_s28 + $0x1420] sm:$0xff] %v2921_v18  ;;  %v897_v18 = vld [vmem:[%s4957_s7 + $0x14e0] sm:$0xff]  ;;  %v2944_v23 = vadd.f32 %v1920_v16, %v896_v15  ;;  %v1940_v12 = vld [vmem:[%s4964_s21 + $0x1578] sm:$0xff] }
 0x2c2   : > { %3946 = vst [vmem:[%s4979_s28 + $0x1428] sm:$0xff] %v2922_v21  ;;  %v898_v21 = vld [vmem:[%s4957_s7 + $0x14e8] sm:$0xff]  ;;  %v2945_v26 = vadd.f32 %v1921_v19, %v897_v18  ;;  %v1941_v15 = vld [vmem:[%s4964_s21 + $0x1580] sm:$0xff] }
 0x2c3   : > { %3947 = vst [vmem:[%s4979_s28 + $0x1430] sm:$0xff] %v2923_v24  ;;  %v899_v24 = vld [vmem:[%s4957_s7 + $0x14f0] sm:$0xff]  ;;  %v2946_v29 = vadd.f32 %v1922_v22, %v898_v21  ;;  %v1942_v18 = vld [vmem:[%s4964_s21 + $0x1588] sm:$0xff] }
 0x2c4   : > { %3948 = vst [vmem:[%s4979_s28 + $0x1438] sm:$0xff] %v2924_v27  ;;  %v900_v27 = vld [vmem:[%s4957_s7 + $0x14f8] sm:$0xff]  ;;  %v2947_v32 = vadd.f32 %v1923_v25, %v899_v24  ;;  %v1943_v21 = vld [vmem:[%s4964_s21 + $0x1590] sm:$0xff] }
 0x2c5   : > { %3949 = vst [vmem:[%s4979_s28 + $0x1440] sm:$0xff] %v2925_v30  ;;  %v901_v30 = vld [vmem:[%s4957_s7 + $0x1500] sm:$0xff]  ;;  %v2948_v35 = vadd.f32 %v1924_v28, %v900_v27  ;;  %v1944_v24 = vld [vmem:[%s4964_s21 + $0x1598] sm:$0xff] }
 0x2c6   : > { %3950 = vst [vmem:[%s4979_s28 + $0x1448] sm:$0xff] %v2926_v33  ;;  %v902_v33 = vld [vmem:[%s4957_s7 + $0x1508] sm:$0xff]  ;;  %v2949_v38 = vadd.f32 %v1925_v31, %v901_v30  ;;  %v1945_v27 = vld [vmem:[%s4964_s21 + $0x15a0] sm:$0xff] }
 0x2c7   : > { %3951 = vst [vmem:[%s4979_s28 + $0x1450] sm:$0xff] %v2927_v36  ;;  %v903_v36 = vld [vmem:[%s4957_s7 + $0x1510] sm:$0xff]  ;;  %v2950_v41 = vadd.f32 %v1926_v34, %v902_v33  ;;  %v1946_v30 = vld [vmem:[%s4964_s21 + $0x15a8] sm:$0xff] }
 0x2c8   : > { %3952 = vst [vmem:[%s4979_s28 + $0x1458] sm:$0xff] %v2928_v39  ;;  %v904_v39 = vld [vmem:[%s4957_s7 + $0x1518] sm:$0xff]  ;;  %v2951_v44 = vadd.f32 %v1927_v37, %v903_v36  ;;  %v1947_v33 = vld [vmem:[%s4964_s21 + $0x15b0] sm:$0xff] }
 0x2c9   : > { %3953 = vst [vmem:[%s4979_s28 + $0x1460] sm:$0xff] %v2929_v42  ;;  %v905_v42 = vld [vmem:[%s4957_s7 + $0x1520] sm:$0xff]  ;;  %v2952_v47 = vadd.f32 %v1928_v40, %v904_v39  ;;  %v1948_v36 = vld [vmem:[%s4964_s21 + $0x15b8] sm:$0xff] }
 0x2ca   : > { %3954 = vst [vmem:[%s4979_s28 + $0x1468] sm:$0xff] %v2930_v45  ;;  %v906_v45 = vld [vmem:[%s4957_s7 + $0x1528] sm:$0xff]  ;;  %v2953_v50 = vadd.f32 %v1929_v43, %v905_v42  ;;  %v1949_v39 = vld [vmem:[%s4964_s21 + $0x15c0] sm:$0xff] }
 0x2cb   : > { %3955 = vst [vmem:[%s4979_s28 + $0x1470] sm:$0xff] %v2931_v48  ;;  %v907_v48 = vld [vmem:[%s4957_s7 + $0x1530] sm:$0xff]  ;;  %v2954_v53 = vadd.f32 %v1930_v46, %v906_v45  ;;  %v1950_v42 = vld [vmem:[%s4964_s21 + $0x15c8] sm:$0xff] }
 0x2cc   : > { %3956 = vst [vmem:[%s4979_s28 + $0x1478] sm:$0xff] %v2932_v51  ;;  %v908_v51 = vld [vmem:[%s4957_s7 + $0x1538] sm:$0xff]  ;;  %v2955_v56 = vadd.f32 %v1931_v49, %v907_v48  ;;  %v1951_v45 = vld [vmem:[%s4964_s21 + $0x15d0] sm:$0xff] }
 0x2cd   : > { %3957 = vst [vmem:[%s4979_s28 + $0x1480] sm:$0xff] %v2933_v54  ;;  %v909_v54 = vld [vmem:[%s4957_s7 + $0x1540] sm:$0xff]  ;;  %v2956_v59 = vadd.f32 %v1932_v52, %v908_v51  ;;  %v1952_v48 = vld [vmem:[%s4964_s21 + $0x15d8] sm:$0xff] }
 0x2ce   : > { %3958 = vst [vmem:[%s4979_s28 + $0x1488] sm:$0xff] %v2934_v57  ;;  %v910_v57 = vld [vmem:[%s4957_s7 + $0x1548] sm:$0xff]  ;;  %v2957_v62 = vadd.f32 %v1933_v55, %v909_v54  ;;  %v1953_v51 = vld [vmem:[%s4964_s21 + $0x15e0] sm:$0xff] }
 0x2cf   : > { %3959 = vst [vmem:[%s4979_s28 + $0x1490] sm:$0xff] %v2935_v60  ;;  %v911_v60 = vld [vmem:[%s4957_s7 + $0x1550] sm:$0xff]  ;;  %v2958_v1 = vadd.f32 %v1934_v58, %v910_v57  ;;  %v1954_v54 = vld [vmem:[%s4964_s21 + $0x15e8] sm:$0xff] }
 0x2d0   : > { %3960 = vst [vmem:[%s4979_s28 + $0x1498] sm:$0xff] %v2936_v63  ;;  %v912_v63 = vld [vmem:[%s4957_s7 + $0x1558] sm:$0xff]  ;;  %v2959_v4 = vadd.f32 %v1935_v61, %v911_v60  ;;  %v1955_v57 = vld [vmem:[%s4964_s21 + $0x15f0] sm:$0xff] }
 0x2d1   : > { %3961 = vst [vmem:[%s4979_s28 + $0x14a0] sm:$0xff] %v2937_v2  ;;  %v913_v2 = vld [vmem:[%s4957_s7 + $0x1560] sm:$0xff]  ;;  %v2960_v7 = vadd.f32 %v1936_v0, %v912_v63  ;;  %v1956_v60 = vld [vmem:[%s4964_s21 + $0x15f8] sm:$0xff] }
 0x2d2   : > { %3962 = vst [vmem:[%s4979_s28 + $0x14a8] sm:$0xff] %v2938_v5  ;;  %v914_v5 = vld [vmem:[%s4957_s7 + $0x1568] sm:$0xff]  ;;  %v2961_v10 = vadd.f32 %v1937_v3, %v913_v2  ;;  %v1957_v63 = vld [vmem:[%s4964_s21 + $0x1600] sm:$0xff] }
 0x2d3   : > { %3963 = vst [vmem:[%s4979_s28 + $0x14b0] sm:$0xff] %v2939_v8  ;;  %v915_v8 = vld [vmem:[%s4957_s7 + $0x1570] sm:$0xff]  ;;  %v2962_v13 = vadd.f32 %v1938_v6, %v914_v5  ;;  %v1958_v2 = vld [vmem:[%s4964_s21 + $0x1608] sm:$0xff] }
 0x2d4   : > { %3964 = vst [vmem:[%s4979_s28 + $0x14b8] sm:$0xff] %v2940_v11  ;;  %v916_v11 = vld [vmem:[%s4957_s7 + $0x1578] sm:$0xff]  ;;  %v2963_v16 = vadd.f32 %v1939_v9, %v915_v8  ;;  %v1959_v5 = vld [vmem:[%s4964_s21 + $0x1610] sm:$0xff] }
 0x2d5   : > { %3965 = vst [vmem:[%s4979_s28 + $0x14c0] sm:$0xff] %v2941_v14  ;;  %v917_v14 = vld [vmem:[%s4957_s7 + $0x1580] sm:$0xff]  ;;  %v2964_v19 = vadd.f32 %v1940_v12, %v916_v11  ;;  %v1960_v8 = vld [vmem:[%s4964_s21 + $0x1618] sm:$0xff] }
 0x2d6   : > { %3966 = vst [vmem:[%s4979_s28 + $0x14c8] sm:$0xff] %v2942_v17  ;;  %v918_v17 = vld [vmem:[%s4957_s7 + $0x1588] sm:$0xff]  ;;  %v2965_v22 = vadd.f32 %v1941_v15, %v917_v14  ;;  %v1961_v11 = vld [vmem:[%s4964_s21 + $0x1620] sm:$0xff] }
 0x2d7   : > { %3967 = vst [vmem:[%s4979_s28 + $0x14d0] sm:$0xff] %v2943_v20  ;;  %v919_v20 = vld [vmem:[%s4957_s7 + $0x1590] sm:$0xff]  ;;  %v2966_v25 = vadd.f32 %v1942_v18, %v918_v17  ;;  %v1962_v14 = vld [vmem:[%s4964_s21 + $0x1628] sm:$0xff] }
 0x2d8   : > { %3968 = vst [vmem:[%s4979_s28 + $0x14d8] sm:$0xff] %v2944_v23  ;;  %v920_v23 = vld [vmem:[%s4957_s7 + $0x1598] sm:$0xff]  ;;  %v2967_v28 = vadd.f32 %v1943_v21, %v919_v20  ;;  %v1963_v17 = vld [vmem:[%s4964_s21 + $0x1630] sm:$0xff] }
 0x2d9   : > { %3969 = vst [vmem:[%s4979_s28 + $0x14e0] sm:$0xff] %v2945_v26  ;;  %v921_v26 = vld [vmem:[%s4957_s7 + $0x15a0] sm:$0xff]  ;;  %v2968_v31 = vadd.f32 %v1944_v24, %v920_v23  ;;  %v1964_v20 = vld [vmem:[%s4964_s21 + $0x1638] sm:$0xff] }
 0x2da   : > { %3970 = vst [vmem:[%s4979_s28 + $0x14e8] sm:$0xff] %v2946_v29  ;;  %v922_v29 = vld [vmem:[%s4957_s7 + $0x15a8] sm:$0xff]  ;;  %v2969_v34 = vadd.f32 %v1945_v27, %v921_v26  ;;  %v1965_v23 = vld [vmem:[%s4964_s21 + $0x1640] sm:$0xff] }
 0x2db   : > { %3971 = vst [vmem:[%s4979_s28 + $0x14f0] sm:$0xff] %v2947_v32  ;;  %v923_v32 = vld [vmem:[%s4957_s7 + $0x15b0] sm:$0xff]  ;;  %v2970_v37 = vadd.f32 %v1946_v30, %v922_v29  ;;  %v1966_v26 = vld [vmem:[%s4964_s21 + $0x1648] sm:$0xff] }
 0x2dc   : > { %3972 = vst [vmem:[%s4979_s28 + $0x14f8] sm:$0xff] %v2948_v35  ;;  %v924_v35 = vld [vmem:[%s4957_s7 + $0x15b8] sm:$0xff]  ;;  %v2971_v40 = vadd.f32 %v1947_v33, %v923_v32  ;;  %v1967_v29 = vld [vmem:[%s4964_s21 + $0x1650] sm:$0xff] }
 0x2dd   : > { %3973 = vst [vmem:[%s4979_s28 + $0x1500] sm:$0xff] %v2949_v38  ;;  %v925_v38 = vld [vmem:[%s4957_s7 + $0x15c0] sm:$0xff]  ;;  %v2972_v43 = vadd.f32 %v1948_v36, %v924_v35  ;;  %v1968_v32 = vld [vmem:[%s4964_s21 + $0x1658] sm:$0xff] }
 0x2de   : > { %3974 = vst [vmem:[%s4979_s28 + $0x1508] sm:$0xff] %v2950_v41  ;;  %v926_v41 = vld [vmem:[%s4957_s7 + $0x15c8] sm:$0xff]  ;;  %v2973_v46 = vadd.f32 %v1949_v39, %v925_v38  ;;  %v1969_v35 = vld [vmem:[%s4964_s21 + $0x1660] sm:$0xff] }
 0x2df   : > { %3975 = vst [vmem:[%s4979_s28 + $0x1510] sm:$0xff] %v2951_v44  ;;  %v927_v44 = vld [vmem:[%s4957_s7 + $0x15d0] sm:$0xff]  ;;  %v2974_v49 = vadd.f32 %v1950_v42, %v926_v41  ;;  %v1970_v38 = vld [vmem:[%s4964_s21 + $0x1668] sm:$0xff] }
 0x2e0   : > { %3976 = vst [vmem:[%s4979_s28 + $0x1518] sm:$0xff] %v2952_v47  ;;  %v928_v47 = vld [vmem:[%s4957_s7 + $0x15d8] sm:$0xff]  ;;  %v2975_v52 = vadd.f32 %v1951_v45, %v927_v44  ;;  %v1971_v41 = vld [vmem:[%s4964_s21 + $0x1670] sm:$0xff] }
 0x2e1   : > { %3977 = vst [vmem:[%s4979_s28 + $0x1520] sm:$0xff] %v2953_v50  ;;  %v929_v50 = vld [vmem:[%s4957_s7 + $0x15e0] sm:$0xff]  ;;  %v2976_v55 = vadd.f32 %v1952_v48, %v928_v47  ;;  %v1972_v44 = vld [vmem:[%s4964_s21 + $0x1678] sm:$0xff] }
 0x2e2   : > { %3978 = vst [vmem:[%s4979_s28 + $0x1528] sm:$0xff] %v2954_v53  ;;  %v930_v53 = vld [vmem:[%s4957_s7 + $0x15e8] sm:$0xff]  ;;  %v2977_v58 = vadd.f32 %v1953_v51, %v929_v50  ;;  %v1973_v47 = vld [vmem:[%s4964_s21 + $0x1680] sm:$0xff] }
 0x2e3   : > { %3979 = vst [vmem:[%s4979_s28 + $0x1530] sm:$0xff] %v2955_v56  ;;  %v931_v56 = vld [vmem:[%s4957_s7 + $0x15f0] sm:$0xff]  ;;  %v2978_v61 = vadd.f32 %v1954_v54, %v930_v53  ;;  %v1974_v50 = vld [vmem:[%s4964_s21 + $0x1688] sm:$0xff] }
 0x2e4   : > { %3980 = vst [vmem:[%s4979_s28 + $0x1538] sm:$0xff] %v2956_v59  ;;  %v932_v59 = vld [vmem:[%s4957_s7 + $0x15f8] sm:$0xff]  ;;  %v2979_v0 = vadd.f32 %v1955_v57, %v931_v56  ;;  %v1975_v53 = vld [vmem:[%s4964_s21 + $0x1690] sm:$0xff] }
 0x2e5   : > { %3981 = vst [vmem:[%s4979_s28 + $0x1540] sm:$0xff] %v2957_v62  ;;  %v933_v62 = vld [vmem:[%s4957_s7 + $0x1600] sm:$0xff]  ;;  %v2980_v3 = vadd.f32 %v1956_v60, %v932_v59  ;;  %v1976_v56 = vld [vmem:[%s4964_s21 + $0x1698] sm:$0xff] }
 0x2e6   : > { %3982 = vst [vmem:[%s4979_s28 + $0x1548] sm:$0xff] %v2958_v1  ;;  %v934_v1 = vld [vmem:[%s4957_s7 + $0x1608] sm:$0xff]  ;;  %v2981_v6 = vadd.f32 %v1957_v63, %v933_v62  ;;  %v1977_v59 = vld [vmem:[%s4964_s21 + $0x16a0] sm:$0xff] }
 0x2e7   : > { %3983 = vst [vmem:[%s4979_s28 + $0x1550] sm:$0xff] %v2959_v4  ;;  %v935_v4 = vld [vmem:[%s4957_s7 + $0x1610] sm:$0xff]  ;;  %v2982_v9 = vadd.f32 %v1958_v2, %v934_v1  ;;  %v1978_v62 = vld [vmem:[%s4964_s21 + $0x16a8] sm:$0xff] }
 0x2e8   : > { %3984 = vst [vmem:[%s4979_s28 + $0x1558] sm:$0xff] %v2960_v7  ;;  %v936_v7 = vld [vmem:[%s4957_s7 + $0x1618] sm:$0xff]  ;;  %v2983_v12 = vadd.f32 %v1959_v5, %v935_v4  ;;  %v1979_v1 = vld [vmem:[%s4964_s21 + $0x16b0] sm:$0xff] }
 0x2e9   : > { %3985 = vst [vmem:[%s4979_s28 + $0x1560] sm:$0xff] %v2961_v10  ;;  %v937_v10 = vld [vmem:[%s4957_s7 + $0x1620] sm:$0xff]  ;;  %v2984_v15 = vadd.f32 %v1960_v8, %v936_v7  ;;  %v1980_v4 = vld [vmem:[%s4964_s21 + $0x16b8] sm:$0xff] }
 0x2ea   : > { %3986 = vst [vmem:[%s4979_s28 + $0x1568] sm:$0xff] %v2962_v13  ;;  %v938_v13 = vld [vmem:[%s4957_s7 + $0x1628] sm:$0xff]  ;;  %v2985_v18 = vadd.f32 %v1961_v11, %v937_v10  ;;  %v1981_v7 = vld [vmem:[%s4964_s21 + $0x16c0] sm:$0xff] }
 0x2eb   : > { %3987 = vst [vmem:[%s4979_s28 + $0x1570] sm:$0xff] %v2963_v16  ;;  %v939_v16 = vld [vmem:[%s4957_s7 + $0x1630] sm:$0xff]  ;;  %v2986_v21 = vadd.f32 %v1962_v14, %v938_v13  ;;  %v1982_v10 = vld [vmem:[%s4964_s21 + $0x16c8] sm:$0xff] }
 0x2ec   : > { %3988 = vst [vmem:[%s4979_s28 + $0x1578] sm:$0xff] %v2964_v19  ;;  %v940_v19 = vld [vmem:[%s4957_s7 + $0x1638] sm:$0xff]  ;;  %v2987_v24 = vadd.f32 %v1963_v17, %v939_v16  ;;  %v1983_v13 = vld [vmem:[%s4964_s21 + $0x16d0] sm:$0xff] }
 0x2ed   : > { %3989 = vst [vmem:[%s4979_s28 + $0x1580] sm:$0xff] %v2965_v22  ;;  %v941_v22 = vld [vmem:[%s4957_s7 + $0x1640] sm:$0xff]  ;;  %v2988_v27 = vadd.f32 %v1964_v20, %v940_v19  ;;  %v1984_v16 = vld [vmem:[%s4964_s21 + $0x16d8] sm:$0xff] }
 0x2ee   : > { %3990 = vst [vmem:[%s4979_s28 + $0x1588] sm:$0xff] %v2966_v25  ;;  %v942_v25 = vld [vmem:[%s4957_s7 + $0x1648] sm:$0xff]  ;;  %v2989_v30 = vadd.f32 %v1965_v23, %v941_v22  ;;  %v1985_v19 = vld [vmem:[%s4964_s21 + $0x16e0] sm:$0xff] }
 0x2ef   : > { %3991 = vst [vmem:[%s4979_s28 + $0x1590] sm:$0xff] %v2967_v28  ;;  %v943_v28 = vld [vmem:[%s4957_s7 + $0x1650] sm:$0xff]  ;;  %v2990_v33 = vadd.f32 %v1966_v26, %v942_v25  ;;  %v1986_v22 = vld [vmem:[%s4964_s21 + $0x16e8] sm:$0xff] }
 0x2f0   : > { %3992 = vst [vmem:[%s4979_s28 + $0x1598] sm:$0xff] %v2968_v31  ;;  %v944_v31 = vld [vmem:[%s4957_s7 + $0x1658] sm:$0xff]  ;;  %v2991_v36 = vadd.f32 %v1967_v29, %v943_v28  ;;  %v1987_v25 = vld [vmem:[%s4964_s21 + $0x16f0] sm:$0xff] }
 0x2f1   : > { %3993 = vst [vmem:[%s4979_s28 + $0x15a0] sm:$0xff] %v2969_v34  ;;  %v945_v34 = vld [vmem:[%s4957_s7 + $0x1660] sm:$0xff]  ;;  %v2992_v39 = vadd.f32 %v1968_v32, %v944_v31  ;;  %v1988_v28 = vld [vmem:[%s4964_s21 + $0x16f8] sm:$0xff] }
 0x2f2   : > { %3994 = vst [vmem:[%s4979_s28 + $0x15a8] sm:$0xff] %v2970_v37  ;;  %v946_v37 = vld [vmem:[%s4957_s7 + $0x1668] sm:$0xff]  ;;  %v2993_v42 = vadd.f32 %v1969_v35, %v945_v34  ;;  %v1989_v31 = vld [vmem:[%s4964_s21 + $0x1700] sm:$0xff] }
 0x2f3   : > { %3995 = vst [vmem:[%s4979_s28 + $0x15b0] sm:$0xff] %v2971_v40  ;;  %v947_v40 = vld [vmem:[%s4957_s7 + $0x1670] sm:$0xff]  ;;  %v2994_v45 = vadd.f32 %v1970_v38, %v946_v37  ;;  %v1990_v34 = vld [vmem:[%s4964_s21 + $0x1708] sm:$0xff] }
 0x2f4   : > { %3996 = vst [vmem:[%s4979_s28 + $0x15b8] sm:$0xff] %v2972_v43  ;;  %v948_v43 = vld [vmem:[%s4957_s7 + $0x1678] sm:$0xff]  ;;  %v2995_v48 = vadd.f32 %v1971_v41, %v947_v40  ;;  %v1991_v37 = vld [vmem:[%s4964_s21 + $0x1710] sm:$0xff] }
 0x2f5   : > { %3997 = vst [vmem:[%s4979_s28 + $0x15c0] sm:$0xff] %v2973_v46  ;;  %v949_v46 = vld [vmem:[%s4957_s7 + $0x1680] sm:$0xff]  ;;  %v2996_v51 = vadd.f32 %v1972_v44, %v948_v43  ;;  %v1992_v40 = vld [vmem:[%s4964_s21 + $0x1718] sm:$0xff] }
 0x2f6   : > { %3998 = vst [vmem:[%s4979_s28 + $0x15c8] sm:$0xff] %v2974_v49  ;;  %v950_v49 = vld [vmem:[%s4957_s7 + $0x1688] sm:$0xff]  ;;  %v2997_v54 = vadd.f32 %v1973_v47, %v949_v46  ;;  %v1993_v43 = vld [vmem:[%s4964_s21 + $0x1720] sm:$0xff] }
 0x2f7   : > { %3999 = vst [vmem:[%s4979_s28 + $0x15d0] sm:$0xff] %v2975_v52  ;;  %v951_v52 = vld [vmem:[%s4957_s7 + $0x1690] sm:$0xff]  ;;  %v2998_v57 = vadd.f32 %v1974_v50, %v950_v49  ;;  %v1994_v46 = vld [vmem:[%s4964_s21 + $0x1728] sm:$0xff] }
 0x2f8   : > { %4000 = vst [vmem:[%s4979_s28 + $0x15d8] sm:$0xff] %v2976_v55  ;;  %v952_v55 = vld [vmem:[%s4957_s7 + $0x1698] sm:$0xff]  ;;  %v2999_v60 = vadd.f32 %v1975_v53, %v951_v52  ;;  %v1995_v49 = vld [vmem:[%s4964_s21 + $0x1730] sm:$0xff] }
 0x2f9   : > { %4001 = vst [vmem:[%s4979_s28 + $0x15e0] sm:$0xff] %v2977_v58  ;;  %v953_v58 = vld [vmem:[%s4957_s7 + $0x16a0] sm:$0xff]  ;;  %v3000_v63 = vadd.f32 %v1976_v56, %v952_v55  ;;  %v1996_v52 = vld [vmem:[%s4964_s21 + $0x1738] sm:$0xff] }
 0x2fa   : > { %4002 = vst [vmem:[%s4979_s28 + $0x15e8] sm:$0xff] %v2978_v61  ;;  %v954_v61 = vld [vmem:[%s4957_s7 + $0x16a8] sm:$0xff]  ;;  %v3001_v2 = vadd.f32 %v1977_v59, %v953_v58  ;;  %v1997_v55 = vld [vmem:[%s4964_s21 + $0x1740] sm:$0xff] }
 0x2fb   : > { %4003 = vst [vmem:[%s4979_s28 + $0x15f0] sm:$0xff] %v2979_v0  ;;  %v955_v0 = vld [vmem:[%s4957_s7 + $0x16b0] sm:$0xff]  ;;  %v3002_v5 = vadd.f32 %v1978_v62, %v954_v61  ;;  %v1998_v58 = vld [vmem:[%s4964_s21 + $0x1748] sm:$0xff] }
 0x2fc   : > { %4004 = vst [vmem:[%s4979_s28 + $0x15f8] sm:$0xff] %v2980_v3  ;;  %v956_v3 = vld [vmem:[%s4957_s7 + $0x16b8] sm:$0xff]  ;;  %v3003_v8 = vadd.f32 %v1979_v1, %v955_v0  ;;  %v1999_v61 = vld [vmem:[%s4964_s21 + $0x1750] sm:$0xff] }
 0x2fd   : > { %4005 = vst [vmem:[%s4979_s28 + $0x1600] sm:$0xff] %v2981_v6  ;;  %v957_v6 = vld [vmem:[%s4957_s7 + $0x16c0] sm:$0xff]  ;;  %v3004_v11 = vadd.f32 %v1980_v4, %v956_v3  ;;  %v2000_v0 = vld [vmem:[%s4964_s21 + $0x1758] sm:$0xff] }
 0x2fe   : > { %4006 = vst [vmem:[%s4979_s28 + $0x1608] sm:$0xff] %v2982_v9  ;;  %v958_v9 = vld [vmem:[%s4957_s7 + $0x16c8] sm:$0xff]  ;;  %v3005_v14 = vadd.f32 %v1981_v7, %v957_v6  ;;  %v2001_v3 = vld [vmem:[%s4964_s21 + $0x1760] sm:$0xff] }
 0x2ff   : > { %4007 = vst [vmem:[%s4979_s28 + $0x1610] sm:$0xff] %v2983_v12  ;;  %v959_v12 = vld [vmem:[%s4957_s7 + $0x16d0] sm:$0xff]  ;;  %v3006_v17 = vadd.f32 %v1982_v10, %v958_v9  ;;  %v2002_v6 = vld [vmem:[%s4964_s21 + $0x1768] sm:$0xff] }
 0x300   : > { %4008 = vst [vmem:[%s4979_s28 + $0x1618] sm:$0xff] %v2984_v15  ;;  %v960_v15 = vld [vmem:[%s4957_s7 + $0x16d8] sm:$0xff]  ;;  %v3007_v20 = vadd.f32 %v1983_v13, %v959_v12  ;;  %v2003_v9 = vld [vmem:[%s4964_s21 + $0x1770] sm:$0xff] }
 0x301   : > { %4009 = vst [vmem:[%s4979_s28 + $0x1620] sm:$0xff] %v2985_v18  ;;  %v961_v18 = vld [vmem:[%s4957_s7 + $0x16e0] sm:$0xff]  ;;  %v3008_v23 = vadd.f32 %v1984_v16, %v960_v15  ;;  %v2004_v12 = vld [vmem:[%s4964_s21 + $0x1778] sm:$0xff] }
 0x302   : > { %4010 = vst [vmem:[%s4979_s28 + $0x1628] sm:$0xff] %v2986_v21  ;;  %v962_v21 = vld [vmem:[%s4957_s7 + $0x16e8] sm:$0xff]  ;;  %v3009_v26 = vadd.f32 %v1985_v19, %v961_v18  ;;  %v2005_v15 = vld [vmem:[%s4964_s21 + $0x1780] sm:$0xff] }
 0x303   : > { %4011 = vst [vmem:[%s4979_s28 + $0x1630] sm:$0xff] %v2987_v24  ;;  %v963_v24 = vld [vmem:[%s4957_s7 + $0x16f0] sm:$0xff]  ;;  %v3010_v29 = vadd.f32 %v1986_v22, %v962_v21  ;;  %v2006_v18 = vld [vmem:[%s4964_s21 + $0x1788] sm:$0xff] }
 0x304   : > { %4012 = vst [vmem:[%s4979_s28 + $0x1638] sm:$0xff] %v2988_v27  ;;  %v964_v27 = vld [vmem:[%s4957_s7 + $0x16f8] sm:$0xff]  ;;  %v3011_v32 = vadd.f32 %v1987_v25, %v963_v24  ;;  %v2007_v21 = vld [vmem:[%s4964_s21 + $0x1790] sm:$0xff] }
 0x305   : > { %4013 = vst [vmem:[%s4979_s28 + $0x1640] sm:$0xff] %v2989_v30  ;;  %v965_v30 = vld [vmem:[%s4957_s7 + $0x1700] sm:$0xff]  ;;  %v3012_v35 = vadd.f32 %v1988_v28, %v964_v27  ;;  %v2008_v24 = vld [vmem:[%s4964_s21 + $0x1798] sm:$0xff] }
 0x306   : > { %4014 = vst [vmem:[%s4979_s28 + $0x1648] sm:$0xff] %v2990_v33  ;;  %v966_v33 = vld [vmem:[%s4957_s7 + $0x1708] sm:$0xff]  ;;  %v3013_v38 = vadd.f32 %v1989_v31, %v965_v30  ;;  %v2009_v27 = vld [vmem:[%s4964_s21 + $0x17a0] sm:$0xff] }
 0x307   : > { %4015 = vst [vmem:[%s4979_s28 + $0x1650] sm:$0xff] %v2991_v36  ;;  %v967_v36 = vld [vmem:[%s4957_s7 + $0x1710] sm:$0xff]  ;;  %v3014_v41 = vadd.f32 %v1990_v34, %v966_v33  ;;  %v2010_v30 = vld [vmem:[%s4964_s21 + $0x17a8] sm:$0xff] }
 0x308   : > { %4016 = vst [vmem:[%s4979_s28 + $0x1658] sm:$0xff] %v2992_v39  ;;  %v968_v39 = vld [vmem:[%s4957_s7 + $0x1718] sm:$0xff]  ;;  %v3015_v44 = vadd.f32 %v1991_v37, %v967_v36  ;;  %v2011_v33 = vld [vmem:[%s4964_s21 + $0x17b0] sm:$0xff] }
 0x309   : > { %4017 = vst [vmem:[%s4979_s28 + $0x1660] sm:$0xff] %v2993_v42  ;;  %v969_v42 = vld [vmem:[%s4957_s7 + $0x1720] sm:$0xff]  ;;  %v3016_v47 = vadd.f32 %v1992_v40, %v968_v39  ;;  %v2012_v36 = vld [vmem:[%s4964_s21 + $0x17b8] sm:$0xff] }
 0x30a   : > { %4018 = vst [vmem:[%s4979_s28 + $0x1668] sm:$0xff] %v2994_v45  ;;  %v970_v45 = vld [vmem:[%s4957_s7 + $0x1728] sm:$0xff]  ;;  %v3017_v50 = vadd.f32 %v1993_v43, %v969_v42  ;;  %v2013_v39 = vld [vmem:[%s4964_s21 + $0x17c0] sm:$0xff] }
 0x30b   : > { %4019 = vst [vmem:[%s4979_s28 + $0x1670] sm:$0xff] %v2995_v48  ;;  %v971_v48 = vld [vmem:[%s4957_s7 + $0x1730] sm:$0xff]  ;;  %v3018_v53 = vadd.f32 %v1994_v46, %v970_v45  ;;  %v2014_v42 = vld [vmem:[%s4964_s21 + $0x17c8] sm:$0xff] }
 0x30c   : > { %4020 = vst [vmem:[%s4979_s28 + $0x1678] sm:$0xff] %v2996_v51  ;;  %v972_v51 = vld [vmem:[%s4957_s7 + $0x1738] sm:$0xff]  ;;  %v3019_v56 = vadd.f32 %v1995_v49, %v971_v48  ;;  %v2015_v45 = vld [vmem:[%s4964_s21 + $0x17d0] sm:$0xff] }
 0x30d   : > { %4021 = vst [vmem:[%s4979_s28 + $0x1680] sm:$0xff] %v2997_v54  ;;  %v973_v54 = vld [vmem:[%s4957_s7 + $0x1740] sm:$0xff]  ;;  %v3020_v59 = vadd.f32 %v1996_v52, %v972_v51  ;;  %v2016_v48 = vld [vmem:[%s4964_s21 + $0x17d8] sm:$0xff] }
 0x30e   : > { %4022 = vst [vmem:[%s4979_s28 + $0x1688] sm:$0xff] %v2998_v57  ;;  %v974_v57 = vld [vmem:[%s4957_s7 + $0x1748] sm:$0xff]  ;;  %v3021_v62 = vadd.f32 %v1997_v55, %v973_v54  ;;  %v2017_v51 = vld [vmem:[%s4964_s21 + $0x17e0] sm:$0xff] }
 0x30f   : > { %4023 = vst [vmem:[%s4979_s28 + $0x1690] sm:$0xff] %v2999_v60  ;;  %v975_v60 = vld [vmem:[%s4957_s7 + $0x1750] sm:$0xff]  ;;  %v3022_v1 = vadd.f32 %v1998_v58, %v974_v57  ;;  %v2018_v54 = vld [vmem:[%s4964_s21 + $0x17e8] sm:$0xff] }
 0x310   : > { %4024 = vst [vmem:[%s4979_s28 + $0x1698] sm:$0xff] %v3000_v63  ;;  %v976_v63 = vld [vmem:[%s4957_s7 + $0x1758] sm:$0xff]  ;;  %v3023_v4 = vadd.f32 %v1999_v61, %v975_v60  ;;  %v2019_v57 = vld [vmem:[%s4964_s21 + $0x17f0] sm:$0xff] }
 0x311   : > { %4025 = vst [vmem:[%s4979_s28 + $0x16a0] sm:$0xff] %v3001_v2  ;;  %v977_v2 = vld [vmem:[%s4957_s7 + $0x1760] sm:$0xff]  ;;  %v3024_v7 = vadd.f32 %v2000_v0, %v976_v63  ;;  %v2020_v60 = vld [vmem:[%s4964_s21 + $0x17f8] sm:$0xff] }
 0x312   : > { %4026 = vst [vmem:[%s4979_s28 + $0x16a8] sm:$0xff] %v3002_v5  ;;  %v978_v5 = vld [vmem:[%s4957_s7 + $0x1768] sm:$0xff]  ;;  %v3025_v10 = vadd.f32 %v2001_v3, %v977_v2  ;;  %v2021_v63 = vld [vmem:[%s4964_s21 + $0x1800] sm:$0xff] }
 0x313   : > { %4027 = vst [vmem:[%s4979_s28 + $0x16b0] sm:$0xff] %v3003_v8  ;;  %v979_v8 = vld [vmem:[%s4957_s7 + $0x1770] sm:$0xff]  ;;  %v3026_v13 = vadd.f32 %v2002_v6, %v978_v5  ;;  %v2022_v2 = vld [vmem:[%s4964_s21 + $0x1808] sm:$0xff] }
 0x314   : > { %4028 = vst [vmem:[%s4979_s28 + $0x16b8] sm:$0xff] %v3004_v11  ;;  %v980_v11 = vld [vmem:[%s4957_s7 + $0x1778] sm:$0xff]  ;;  %v3027_v16 = vadd.f32 %v2003_v9, %v979_v8  ;;  %v2023_v5 = vld [vmem:[%s4964_s21 + $0x1810] sm:$0xff] }
 0x315   : > { %4029 = vst [vmem:[%s4979_s28 + $0x16c0] sm:$0xff] %v3005_v14  ;;  %v981_v14 = vld [vmem:[%s4957_s7 + $0x1780] sm:$0xff]  ;;  %v3028_v19 = vadd.f32 %v2004_v12, %v980_v11  ;;  %v2024_v8 = vld [vmem:[%s4964_s21 + $0x1818] sm:$0xff] }
 0x316   : > { %4030 = vst [vmem:[%s4979_s28 + $0x16c8] sm:$0xff] %v3006_v17  ;;  %v982_v17 = vld [vmem:[%s4957_s7 + $0x1788] sm:$0xff]  ;;  %v3029_v22 = vadd.f32 %v2005_v15, %v981_v14  ;;  %v2025_v11 = vld [vmem:[%s4964_s21 + $0x1820] sm:$0xff] }
 0x317   : > { %4031 = vst [vmem:[%s4979_s28 + $0x16d0] sm:$0xff] %v3007_v20  ;;  %v983_v20 = vld [vmem:[%s4957_s7 + $0x1790] sm:$0xff]  ;;  %v3030_v25 = vadd.f32 %v2006_v18, %v982_v17  ;;  %v2026_v14 = vld [vmem:[%s4964_s21 + $0x1828] sm:$0xff] }
 0x318   : > { %4032 = vst [vmem:[%s4979_s28 + $0x16d8] sm:$0xff] %v3008_v23  ;;  %v984_v23 = vld [vmem:[%s4957_s7 + $0x1798] sm:$0xff]  ;;  %v3031_v28 = vadd.f32 %v2007_v21, %v983_v20  ;;  %v2027_v17 = vld [vmem:[%s4964_s21 + $0x1830] sm:$0xff] }
 0x319   : > { %4033 = vst [vmem:[%s4979_s28 + $0x16e0] sm:$0xff] %v3009_v26  ;;  %v985_v26 = vld [vmem:[%s4957_s7 + $0x17a0] sm:$0xff]  ;;  %v3032_v31 = vadd.f32 %v2008_v24, %v984_v23  ;;  %v2028_v20 = vld [vmem:[%s4964_s21 + $0x1838] sm:$0xff] }
 0x31a   : > { %4034 = vst [vmem:[%s4979_s28 + $0x16e8] sm:$0xff] %v3010_v29  ;;  %v986_v29 = vld [vmem:[%s4957_s7 + $0x17a8] sm:$0xff]  ;;  %v3033_v34 = vadd.f32 %v2009_v27, %v985_v26  ;;  %v2029_v23 = vld [vmem:[%s4964_s21 + $0x1840] sm:$0xff] }
 0x31b   : > { %4035 = vst [vmem:[%s4979_s28 + $0x16f0] sm:$0xff] %v3011_v32  ;;  %v987_v32 = vld [vmem:[%s4957_s7 + $0x17b0] sm:$0xff]  ;;  %v3034_v37 = vadd.f32 %v2010_v30, %v986_v29  ;;  %v2030_v26 = vld [vmem:[%s4964_s21 + $0x1848] sm:$0xff] }
 0x31c   : > { %4036 = vst [vmem:[%s4979_s28 + $0x16f8] sm:$0xff] %v3012_v35  ;;  %v988_v35 = vld [vmem:[%s4957_s7 + $0x17b8] sm:$0xff]  ;;  %v3035_v40 = vadd.f32 %v2011_v33, %v987_v32  ;;  %v2031_v29 = vld [vmem:[%s4964_s21 + $0x1850] sm:$0xff] }
 0x31d   : > { %4037 = vst [vmem:[%s4979_s28 + $0x1700] sm:$0xff] %v3013_v38  ;;  %v989_v38 = vld [vmem:[%s4957_s7 + $0x17c0] sm:$0xff]  ;;  %v3036_v43 = vadd.f32 %v2012_v36, %v988_v35  ;;  %v2032_v32 = vld [vmem:[%s4964_s21 + $0x1858] sm:$0xff] }
 0x31e   : > { %4038 = vst [vmem:[%s4979_s28 + $0x1708] sm:$0xff] %v3014_v41  ;;  %v990_v41 = vld [vmem:[%s4957_s7 + $0x17c8] sm:$0xff]  ;;  %v3037_v46 = vadd.f32 %v2013_v39, %v989_v38  ;;  %v2033_v35 = vld [vmem:[%s4964_s21 + $0x1860] sm:$0xff] }
 0x31f   : > { %4039 = vst [vmem:[%s4979_s28 + $0x1710] sm:$0xff] %v3015_v44  ;;  %v991_v44 = vld [vmem:[%s4957_s7 + $0x17d0] sm:$0xff]  ;;  %v3038_v49 = vadd.f32 %v2014_v42, %v990_v41  ;;  %v2034_v38 = vld [vmem:[%s4964_s21 + $0x1868] sm:$0xff] }
 0x320   : > { %4040 = vst [vmem:[%s4979_s28 + $0x1718] sm:$0xff] %v3016_v47  ;;  %v992_v47 = vld [vmem:[%s4957_s7 + $0x17d8] sm:$0xff]  ;;  %v3039_v52 = vadd.f32 %v2015_v45, %v991_v44  ;;  %v2035_v41 = vld [vmem:[%s4964_s21 + $0x1870] sm:$0xff] }
 0x321   : > { %4041 = vst [vmem:[%s4979_s28 + $0x1720] sm:$0xff] %v3017_v50  ;;  %v993_v50 = vld [vmem:[%s4957_s7 + $0x17e0] sm:$0xff]  ;;  %v3040_v55 = vadd.f32 %v2016_v48, %v992_v47  ;;  %v2036_v44 = vld [vmem:[%s4964_s21 + $0x1878] sm:$0xff] }
 0x322   : > { %4042 = vst [vmem:[%s4979_s28 + $0x1728] sm:$0xff] %v3018_v53  ;;  %v994_v53 = vld [vmem:[%s4957_s7 + $0x17e8] sm:$0xff]  ;;  %v3041_v58 = vadd.f32 %v2017_v51, %v993_v50  ;;  %v2037_v47 = vld [vmem:[%s4964_s21 + $0x1880] sm:$0xff] }
 0x323   : > { %4043 = vst [vmem:[%s4979_s28 + $0x1730] sm:$0xff] %v3019_v56  ;;  %v995_v56 = vld [vmem:[%s4957_s7 + $0x17f0] sm:$0xff]  ;;  %v3042_v61 = vadd.f32 %v2018_v54, %v994_v53  ;;  %v2038_v50 = vld [vmem:[%s4964_s21 + $0x1888] sm:$0xff] }
 0x324   : > { %4044 = vst [vmem:[%s4979_s28 + $0x1738] sm:$0xff] %v3020_v59  ;;  %v996_v59 = vld [vmem:[%s4957_s7 + $0x17f8] sm:$0xff]  ;;  %v3043_v0 = vadd.f32 %v2019_v57, %v995_v56  ;;  %v2039_v53 = vld [vmem:[%s4964_s21 + $0x1890] sm:$0xff] }
 0x325   : > { %4045 = vst [vmem:[%s4979_s28 + $0x1740] sm:$0xff] %v3021_v62  ;;  %v997_v62 = vld [vmem:[%s4957_s7 + $0x1800] sm:$0xff]  ;;  %v3044_v3 = vadd.f32 %v2020_v60, %v996_v59  ;;  %v2040_v56 = vld [vmem:[%s4964_s21 + $0x1898] sm:$0xff] }
 0x326   : > { %4046 = vst [vmem:[%s4979_s28 + $0x1748] sm:$0xff] %v3022_v1  ;;  %v998_v1 = vld [vmem:[%s4957_s7 + $0x1808] sm:$0xff]  ;;  %v3045_v6 = vadd.f32 %v2021_v63, %v997_v62  ;;  %v2041_v59 = vld [vmem:[%s4964_s21 + $0x18a0] sm:$0xff] }
 0x327   : > { %4047 = vst [vmem:[%s4979_s28 + $0x1750] sm:$0xff] %v3023_v4  ;;  %v999_v4 = vld [vmem:[%s4957_s7 + $0x1810] sm:$0xff]  ;;  %v3046_v9 = vadd.f32 %v2022_v2, %v998_v1  ;;  %v2042_v62 = vld [vmem:[%s4964_s21 + $0x18a8] sm:$0xff] }
 0x328   : > { %4048 = vst [vmem:[%s4979_s28 + $0x1758] sm:$0xff] %v3024_v7  ;;  %v1000_v7 = vld [vmem:[%s4957_s7 + $0x1818] sm:$0xff]  ;;  %v3047_v12 = vadd.f32 %v2023_v5, %v999_v4  ;;  %v2043_v1 = vld [vmem:[%s4964_s21 + $0x18b0] sm:$0xff] }
 0x329   : > { %4049 = vst [vmem:[%s4979_s28 + $0x1760] sm:$0xff] %v3025_v10  ;;  %v1001_v10 = vld [vmem:[%s4957_s7 + $0x1820] sm:$0xff]  ;;  %v3048_v15 = vadd.f32 %v2024_v8, %v1000_v7  ;;  %v2044_v4 = vld [vmem:[%s4964_s21 + $0x18b8] sm:$0xff] }
 0x32a   : > { %4050 = vst [vmem:[%s4979_s28 + $0x1768] sm:$0xff] %v3026_v13  ;;  %v1002_v13 = vld [vmem:[%s4957_s7 + $0x1828] sm:$0xff]  ;;  %v3049_v18 = vadd.f32 %v2025_v11, %v1001_v10  ;;  %v2045_v7 = vld [vmem:[%s4964_s21 + $0x18c0] sm:$0xff] }
 0x32b   : > { %4051 = vst [vmem:[%s4979_s28 + $0x1770] sm:$0xff] %v3027_v16  ;;  %v1003_v16 = vld [vmem:[%s4957_s7 + $0x1830] sm:$0xff]  ;;  %v3050_v21 = vadd.f32 %v2026_v14, %v1002_v13  ;;  %v2046_v10 = vld [vmem:[%s4964_s21 + $0x18c8] sm:$0xff] }
 0x32c   : > { %4052 = vst [vmem:[%s4979_s28 + $0x1778] sm:$0xff] %v3028_v19  ;;  %v1004_v19 = vld [vmem:[%s4957_s7 + $0x1838] sm:$0xff]  ;;  %v3051_v24 = vadd.f32 %v2027_v17, %v1003_v16  ;;  %v2047_v13 = vld [vmem:[%s4964_s21 + $0x18d0] sm:$0xff] }
 0x32d   : > { %4053 = vst [vmem:[%s4979_s28 + $0x1780] sm:$0xff] %v3029_v22  ;;  %v1005_v22 = vld [vmem:[%s4957_s7 + $0x1840] sm:$0xff]  ;;  %v3052_v27 = vadd.f32 %v2028_v20, %v1004_v19  ;;  %v2048_v16 = vld [vmem:[%s4964_s21 + $0x18d8] sm:$0xff] }
 0x32e   : > { %4054 = vst [vmem:[%s4979_s28 + $0x1788] sm:$0xff] %v3030_v25  ;;  %v1006_v25 = vld [vmem:[%s4957_s7 + $0x1848] sm:$0xff]  ;;  %v3053_v30 = vadd.f32 %v2029_v23, %v1005_v22  ;;  %v2049_v19 = vld [vmem:[%s4964_s21 + $0x18e0] sm:$0xff] }
 0x32f   : > { %4055 = vst [vmem:[%s4979_s28 + $0x1790] sm:$0xff] %v3031_v28  ;;  %v1007_v28 = vld [vmem:[%s4957_s7 + $0x1850] sm:$0xff]  ;;  %v3054_v33 = vadd.f32 %v2030_v26, %v1006_v25  ;;  %v2050_v22 = vld [vmem:[%s4964_s21 + $0x18e8] sm:$0xff] }
 0x330   : > { %4056 = vst [vmem:[%s4979_s28 + $0x1798] sm:$0xff] %v3032_v31  ;;  %v1008_v31 = vld [vmem:[%s4957_s7 + $0x1858] sm:$0xff]  ;;  %v3055_v36 = vadd.f32 %v2031_v29, %v1007_v28  ;;  %v2051_v25 = vld [vmem:[%s4964_s21 + $0x18f0] sm:$0xff] }
 0x331   : > { %4057 = vst [vmem:[%s4979_s28 + $0x17a0] sm:$0xff] %v3033_v34  ;;  %v1009_v34 = vld [vmem:[%s4957_s7 + $0x1860] sm:$0xff]  ;;  %v3056_v39 = vadd.f32 %v2032_v32, %v1008_v31  ;;  %v2052_v28 = vld [vmem:[%s4964_s21 + $0x18f8] sm:$0xff] }
 0x332   : > { %4058 = vst [vmem:[%s4979_s28 + $0x17a8] sm:$0xff] %v3034_v37  ;;  %v1010_v37 = vld [vmem:[%s4957_s7 + $0x1868] sm:$0xff]  ;;  %v3057_v42 = vadd.f32 %v2033_v35, %v1009_v34  ;;  %v2053_v31 = vld [vmem:[%s4964_s21 + $0x1900] sm:$0xff] }
 0x333   : > { %4059 = vst [vmem:[%s4979_s28 + $0x17b0] sm:$0xff] %v3035_v40  ;;  %v1011_v40 = vld [vmem:[%s4957_s7 + $0x1870] sm:$0xff]  ;;  %v3058_v45 = vadd.f32 %v2034_v38, %v1010_v37  ;;  %v2054_v34 = vld [vmem:[%s4964_s21 + $0x1908] sm:$0xff] }
 0x334   : > { %4060 = vst [vmem:[%s4979_s28 + $0x17b8] sm:$0xff] %v3036_v43  ;;  %v1012_v43 = vld [vmem:[%s4957_s7 + $0x1878] sm:$0xff]  ;;  %v3059_v48 = vadd.f32 %v2035_v41, %v1011_v40  ;;  %v2055_v37 = vld [vmem:[%s4964_s21 + $0x1910] sm:$0xff] }
 0x335   : > { %4061 = vst [vmem:[%s4979_s28 + $0x17c0] sm:$0xff] %v3037_v46  ;;  %v1013_v46 = vld [vmem:[%s4957_s7 + $0x1880] sm:$0xff]  ;;  %v3060_v51 = vadd.f32 %v2036_v44, %v1012_v43  ;;  %v2056_v40 = vld [vmem:[%s4964_s21 + $0x1918] sm:$0xff] }
 0x336   : > { %4062 = vst [vmem:[%s4979_s28 + $0x17c8] sm:$0xff] %v3038_v49  ;;  %v1014_v49 = vld [vmem:[%s4957_s7 + $0x1888] sm:$0xff]  ;;  %v3061_v54 = vadd.f32 %v2037_v47, %v1013_v46  ;;  %v2057_v43 = vld [vmem:[%s4964_s21 + $0x1920] sm:$0xff] }
 0x337   : > { %4063 = vst [vmem:[%s4979_s28 + $0x17d0] sm:$0xff] %v3039_v52  ;;  %v1015_v52 = vld [vmem:[%s4957_s7 + $0x1890] sm:$0xff]  ;;  %v3062_v57 = vadd.f32 %v2038_v50, %v1014_v49  ;;  %v2058_v46 = vld [vmem:[%s4964_s21 + $0x1928] sm:$0xff] }
 0x338   : > { %4064 = vst [vmem:[%s4979_s28 + $0x17d8] sm:$0xff] %v3040_v55  ;;  %v1016_v55 = vld [vmem:[%s4957_s7 + $0x1898] sm:$0xff]  ;;  %v3063_v60 = vadd.f32 %v2039_v53, %v1015_v52  ;;  %v2059_v49 = vld [vmem:[%s4964_s21 + $0x1930] sm:$0xff] }
 0x339   : > { %4065 = vst [vmem:[%s4979_s28 + $0x17e0] sm:$0xff] %v3041_v58  ;;  %v1017_v58 = vld [vmem:[%s4957_s7 + $0x18a0] sm:$0xff]  ;;  %v3064_v63 = vadd.f32 %v2040_v56, %v1016_v55  ;;  %v2060_v52 = vld [vmem:[%s4964_s21 + $0x1938] sm:$0xff] }
 0x33a   : > { %4066 = vst [vmem:[%s4979_s28 + $0x17e8] sm:$0xff] %v3042_v61  ;;  %v1018_v61 = vld [vmem:[%s4957_s7 + $0x18a8] sm:$0xff]  ;;  %v3065_v2 = vadd.f32 %v2041_v59, %v1017_v58  ;;  %v2061_v55 = vld [vmem:[%s4964_s21 + $0x1940] sm:$0xff] }
 0x33b   : > { %4067 = vst [vmem:[%s4979_s28 + $0x17f0] sm:$0xff] %v3043_v0  ;;  %v1019_v0 = vld [vmem:[%s4957_s7 + $0x18b0] sm:$0xff]  ;;  %v3066_v5 = vadd.f32 %v2042_v62, %v1018_v61  ;;  %v2062_v58 = vld [vmem:[%s4964_s21 + $0x1948] sm:$0xff] }
 0x33c   : > { %4068 = vst [vmem:[%s4979_s28 + $0x17f8] sm:$0xff] %v3044_v3  ;;  %v1020_v3 = vld [vmem:[%s4957_s7 + $0x18b8] sm:$0xff]  ;;  %v3067_v8 = vadd.f32 %v2043_v1, %v1019_v0  ;;  %v2063_v61 = vld [vmem:[%s4964_s21 + $0x1950] sm:$0xff] }
 0x33d   : > { %4069 = vst [vmem:[%s4979_s28 + $0x1800] sm:$0xff] %v3045_v6  ;;  %v1021_v6 = vld [vmem:[%s4957_s7 + $0x18c0] sm:$0xff]  ;;  %v3068_v11 = vadd.f32 %v2044_v4, %v1020_v3  ;;  %v2064_v0 = vld [vmem:[%s4964_s21 + $0x1958] sm:$0xff] }
 0x33e   : > { %4070 = vst [vmem:[%s4979_s28 + $0x1808] sm:$0xff] %v3046_v9  ;;  %v1022_v9 = vld [vmem:[%s4957_s7 + $0x18c8] sm:$0xff]  ;;  %v3069_v14 = vadd.f32 %v2045_v7, %v1021_v6  ;;  %v2065_v3 = vld [vmem:[%s4964_s21 + $0x1960] sm:$0xff] }
 0x33f   : > { %4071 = vst [vmem:[%s4979_s28 + $0x1810] sm:$0xff] %v3047_v12  ;;  %v1023_v12 = vld [vmem:[%s4957_s7 + $0x18d0] sm:$0xff]  ;;  %v3070_v17 = vadd.f32 %v2046_v10, %v1022_v9  ;;  %v2066_v6 = vld [vmem:[%s4964_s21 + $0x1968] sm:$0xff] }
 0x340   : > { %4072 = vst [vmem:[%s4979_s28 + $0x1818] sm:$0xff] %v3048_v15  ;;  %v1024_v15 = vld [vmem:[%s4957_s7 + $0x18d8] sm:$0xff]  ;;  %v3071_v20 = vadd.f32 %v2047_v13, %v1023_v12  ;;  %v2067_v9 = vld [vmem:[%s4964_s21 + $0x1970] sm:$0xff] }
 0x341   : > { %4073 = vst [vmem:[%s4979_s28 + $0x1820] sm:$0xff] %v3049_v18  ;;  %v1025_v18 = vld [vmem:[%s4957_s7 + $0x18e0] sm:$0xff]  ;;  %v3072_v23 = vadd.f32 %v2048_v16, %v1024_v15  ;;  %v2068_v12 = vld [vmem:[%s4964_s21 + $0x1978] sm:$0xff] }
 0x342   : > { %4074 = vst [vmem:[%s4979_s28 + $0x1828] sm:$0xff] %v3050_v21  ;;  %v1026_v21 = vld [vmem:[%s4957_s7 + $0x18e8] sm:$0xff]  ;;  %v3073_v26 = vadd.f32 %v2049_v19, %v1025_v18  ;;  %v2069_v15 = vld [vmem:[%s4964_s21 + $0x1980] sm:$0xff] }
 0x343   : > { %4075 = vst [vmem:[%s4979_s28 + $0x1830] sm:$0xff] %v3051_v24  ;;  %v1027_v24 = vld [vmem:[%s4957_s7 + $0x18f0] sm:$0xff]  ;;  %v3074_v29 = vadd.f32 %v2050_v22, %v1026_v21  ;;  %v2070_v18 = vld [vmem:[%s4964_s21 + $0x1988] sm:$0xff] }
 0x344   : > { %4076 = vst [vmem:[%s4979_s28 + $0x1838] sm:$0xff] %v3052_v27  ;;  %v1028_v27 = vld [vmem:[%s4957_s7 + $0x18f8] sm:$0xff]  ;;  %v3075_v32 = vadd.f32 %v2051_v25, %v1027_v24  ;;  %v2071_v21 = vld [vmem:[%s4964_s21 + $0x1990] sm:$0xff] }
 0x345   : > { %4077 = vst [vmem:[%s4979_s28 + $0x1840] sm:$0xff] %v3053_v30  ;;  %v1029_v30 = vld [vmem:[%s4957_s7 + $0x1900] sm:$0xff]  ;;  %v3076_v35 = vadd.f32 %v2052_v28, %v1028_v27  ;;  %v2072_v24 = vld [vmem:[%s4964_s21 + $0x1998] sm:$0xff] }
 0x346   : > { %4078 = vst [vmem:[%s4979_s28 + $0x1848] sm:$0xff] %v3054_v33  ;;  %v1030_v33 = vld [vmem:[%s4957_s7 + $0x1908] sm:$0xff]  ;;  %v3077_v38 = vadd.f32 %v2053_v31, %v1029_v30  ;;  %v2073_v27 = vld [vmem:[%s4964_s21 + $0x19a0] sm:$0xff] }
 0x347   : > { %4079 = vst [vmem:[%s4979_s28 + $0x1850] sm:$0xff] %v3055_v36  ;;  %v1031_v36 = vld [vmem:[%s4957_s7 + $0x1910] sm:$0xff]  ;;  %v3078_v41 = vadd.f32 %v2054_v34, %v1030_v33  ;;  %v2074_v30 = vld [vmem:[%s4964_s21 + $0x19a8] sm:$0xff] }
 0x348   : > { %4080 = vst [vmem:[%s4979_s28 + $0x1858] sm:$0xff] %v3056_v39  ;;  %v1032_v39 = vld [vmem:[%s4957_s7 + $0x1918] sm:$0xff]  ;;  %v3079_v44 = vadd.f32 %v2055_v37, %v1031_v36  ;;  %v2075_v33 = vld [vmem:[%s4964_s21 + $0x19b0] sm:$0xff] }
 0x349   : > { %4081 = vst [vmem:[%s4979_s28 + $0x1860] sm:$0xff] %v3057_v42  ;;  %v1033_v42 = vld [vmem:[%s4957_s7 + $0x1920] sm:$0xff]  ;;  %v3080_v47 = vadd.f32 %v2056_v40, %v1032_v39  ;;  %v2076_v36 = vld [vmem:[%s4964_s21 + $0x19b8] sm:$0xff] }
 0x34a   : > { %4082 = vst [vmem:[%s4979_s28 + $0x1868] sm:$0xff] %v3058_v45  ;;  %v1034_v45 = vld [vmem:[%s4957_s7 + $0x1928] sm:$0xff]  ;;  %v3081_v50 = vadd.f32 %v2057_v43, %v1033_v42  ;;  %v2077_v39 = vld [vmem:[%s4964_s21 + $0x19c0] sm:$0xff] }
 0x34b   : > { %4083 = vst [vmem:[%s4979_s28 + $0x1870] sm:$0xff] %v3059_v48  ;;  %v1035_v48 = vld [vmem:[%s4957_s7 + $0x1930] sm:$0xff]  ;;  %v3082_v53 = vadd.f32 %v2058_v46, %v1034_v45  ;;  %v2078_v42 = vld [vmem:[%s4964_s21 + $0x19c8] sm:$0xff] }
 0x34c   : > { %4084 = vst [vmem:[%s4979_s28 + $0x1878] sm:$0xff] %v3060_v51  ;;  %v1036_v51 = vld [vmem:[%s4957_s7 + $0x1938] sm:$0xff]  ;;  %v3083_v56 = vadd.f32 %v2059_v49, %v1035_v48  ;;  %v2079_v45 = vld [vmem:[%s4964_s21 + $0x19d0] sm:$0xff] }
 0x34d   : > { %4085 = vst [vmem:[%s4979_s28 + $0x1880] sm:$0xff] %v3061_v54  ;;  %v1037_v54 = vld [vmem:[%s4957_s7 + $0x1940] sm:$0xff]  ;;  %v3084_v59 = vadd.f32 %v2060_v52, %v1036_v51  ;;  %v2080_v48 = vld [vmem:[%s4964_s21 + $0x19d8] sm:$0xff] }
 0x34e   : > { %4086 = vst [vmem:[%s4979_s28 + $0x1888] sm:$0xff] %v3062_v57  ;;  %v1038_v57 = vld [vmem:[%s4957_s7 + $0x1948] sm:$0xff]  ;;  %v3085_v62 = vadd.f32 %v2061_v55, %v1037_v54  ;;  %v2081_v51 = vld [vmem:[%s4964_s21 + $0x19e0] sm:$0xff] }
 0x34f   : > { %4087 = vst [vmem:[%s4979_s28 + $0x1890] sm:$0xff] %v3063_v60  ;;  %v1039_v60 = vld [vmem:[%s4957_s7 + $0x1950] sm:$0xff]  ;;  %v3086_v1 = vadd.f32 %v2062_v58, %v1038_v57  ;;  %v2082_v54 = vld [vmem:[%s4964_s21 + $0x19e8] sm:$0xff] }
 0x350   : > { %4088 = vst [vmem:[%s4979_s28 + $0x1898] sm:$0xff] %v3064_v63  ;;  %v1040_v63 = vld [vmem:[%s4957_s7 + $0x1958] sm:$0xff]  ;;  %v3087_v4 = vadd.f32 %v2063_v61, %v1039_v60  ;;  %v2083_v57 = vld [vmem:[%s4964_s21 + $0x19f0] sm:$0xff] }
 0x351   : > { %4089 = vst [vmem:[%s4979_s28 + $0x18a0] sm:$0xff] %v3065_v2  ;;  %v1041_v2 = vld [vmem:[%s4957_s7 + $0x1960] sm:$0xff]  ;;  %v3088_v7 = vadd.f32 %v2064_v0, %v1040_v63  ;;  %v2084_v60 = vld [vmem:[%s4964_s21 + $0x19f8] sm:$0xff] }
 0x352   : > { %4090 = vst [vmem:[%s4979_s28 + $0x18a8] sm:$0xff] %v3066_v5  ;;  %v1042_v5 = vld [vmem:[%s4957_s7 + $0x1968] sm:$0xff]  ;;  %v3089_v10 = vadd.f32 %v2065_v3, %v1041_v2  ;;  %v2085_v63 = vld [vmem:[%s4964_s21 + $0x1a00] sm:$0xff] }
 0x353   : > { %4091 = vst [vmem:[%s4979_s28 + $0x18b0] sm:$0xff] %v3067_v8  ;;  %v1043_v8 = vld [vmem:[%s4957_s7 + $0x1970] sm:$0xff]  ;;  %v3090_v13 = vadd.f32 %v2066_v6, %v1042_v5  ;;  %v2086_v2 = vld [vmem:[%s4964_s21 + $0x1a08] sm:$0xff] }
 0x354   : > { %4092 = vst [vmem:[%s4979_s28 + $0x18b8] sm:$0xff] %v3068_v11  ;;  %v1044_v11 = vld [vmem:[%s4957_s7 + $0x1978] sm:$0xff]  ;;  %v3091_v16 = vadd.f32 %v2067_v9, %v1043_v8  ;;  %v2087_v5 = vld [vmem:[%s4964_s21 + $0x1a10] sm:$0xff] }
 0x355   : > { %4093 = vst [vmem:[%s4979_s28 + $0x18c0] sm:$0xff] %v3069_v14  ;;  %v1045_v14 = vld [vmem:[%s4957_s7 + $0x1980] sm:$0xff]  ;;  %v3092_v19 = vadd.f32 %v2068_v12, %v1044_v11  ;;  %v2088_v8 = vld [vmem:[%s4964_s21 + $0x1a18] sm:$0xff] }
 0x356   : > { %4094 = vst [vmem:[%s4979_s28 + $0x18c8] sm:$0xff] %v3070_v17  ;;  %v1046_v17 = vld [vmem:[%s4957_s7 + $0x1988] sm:$0xff]  ;;  %v3093_v22 = vadd.f32 %v2069_v15, %v1045_v14  ;;  %v2089_v11 = vld [vmem:[%s4964_s21 + $0x1a20] sm:$0xff] }
 0x357   : > { %4095 = vst [vmem:[%s4979_s28 + $0x18d0] sm:$0xff] %v3071_v20  ;;  %v1047_v20 = vld [vmem:[%s4957_s7 + $0x1990] sm:$0xff]  ;;  %v3094_v25 = vadd.f32 %v2070_v18, %v1046_v17  ;;  %v2090_v14 = vld [vmem:[%s4964_s21 + $0x1a28] sm:$0xff] }
 0x358   : > { %4096 = vst [vmem:[%s4979_s28 + $0x18d8] sm:$0xff] %v3072_v23  ;;  %v1048_v23 = vld [vmem:[%s4957_s7 + $0x1998] sm:$0xff]  ;;  %v3095_v28 = vadd.f32 %v2071_v21, %v1047_v20  ;;  %v2091_v17 = vld [vmem:[%s4964_s21 + $0x1a30] sm:$0xff] }
 0x359   : > { %4097 = vst [vmem:[%s4979_s28 + $0x18e0] sm:$0xff] %v3073_v26  ;;  %v1049_v26 = vld [vmem:[%s4957_s7 + $0x19a0] sm:$0xff]  ;;  %v3096_v31 = vadd.f32 %v2072_v24, %v1048_v23  ;;  %v2092_v20 = vld [vmem:[%s4964_s21 + $0x1a38] sm:$0xff] }
 0x35a   : > { %4098 = vst [vmem:[%s4979_s28 + $0x18e8] sm:$0xff] %v3074_v29  ;;  %v1050_v29 = vld [vmem:[%s4957_s7 + $0x19a8] sm:$0xff]  ;;  %v3097_v34 = vadd.f32 %v2073_v27, %v1049_v26  ;;  %v2093_v23 = vld [vmem:[%s4964_s21 + $0x1a40] sm:$0xff] }
 0x35b   : > { %4099 = vst [vmem:[%s4979_s28 + $0x18f0] sm:$0xff] %v3075_v32  ;;  %v1051_v32 = vld [vmem:[%s4957_s7 + $0x19b0] sm:$0xff]  ;;  %v3098_v37 = vadd.f32 %v2074_v30, %v1050_v29  ;;  %v2094_v26 = vld [vmem:[%s4964_s21 + $0x1a48] sm:$0xff] }
 0x35c   : > { %4100 = vst [vmem:[%s4979_s28 + $0x18f8] sm:$0xff] %v3076_v35  ;;  %v1052_v35 = vld [vmem:[%s4957_s7 + $0x19b8] sm:$0xff]  ;;  %v3099_v40 = vadd.f32 %v2075_v33, %v1051_v32  ;;  %v2095_v29 = vld [vmem:[%s4964_s21 + $0x1a50] sm:$0xff] }
 0x35d   : > { %4101 = vst [vmem:[%s4979_s28 + $0x1900] sm:$0xff] %v3077_v38  ;;  %v1053_v38 = vld [vmem:[%s4957_s7 + $0x19c0] sm:$0xff]  ;;  %v3100_v43 = vadd.f32 %v2076_v36, %v1052_v35  ;;  %v2096_v32 = vld [vmem:[%s4964_s21 + $0x1a58] sm:$0xff] }
 0x35e   : > { %4102 = vst [vmem:[%s4979_s28 + $0x1908] sm:$0xff] %v3078_v41  ;;  %v1054_v41 = vld [vmem:[%s4957_s7 + $0x19c8] sm:$0xff]  ;;  %v3101_v46 = vadd.f32 %v2077_v39, %v1053_v38  ;;  %v2097_v35 = vld [vmem:[%s4964_s21 + $0x1a60] sm:$0xff] }
 0x35f   : > { %4103 = vst [vmem:[%s4979_s28 + $0x1910] sm:$0xff] %v3079_v44  ;;  %v1055_v44 = vld [vmem:[%s4957_s7 + $0x19d0] sm:$0xff]  ;;  %v3102_v49 = vadd.f32 %v2078_v42, %v1054_v41  ;;  %v2098_v38 = vld [vmem:[%s4964_s21 + $0x1a68] sm:$0xff] }
 0x360   : > { %4104 = vst [vmem:[%s4979_s28 + $0x1918] sm:$0xff] %v3080_v47  ;;  %v1056_v47 = vld [vmem:[%s4957_s7 + $0x19d8] sm:$0xff]  ;;  %v3103_v52 = vadd.f32 %v2079_v45, %v1055_v44  ;;  %v2099_v41 = vld [vmem:[%s4964_s21 + $0x1a70] sm:$0xff] }
 0x361   : > { %4105 = vst [vmem:[%s4979_s28 + $0x1920] sm:$0xff] %v3081_v50  ;;  %v1057_v50 = vld [vmem:[%s4957_s7 + $0x19e0] sm:$0xff]  ;;  %v3104_v55 = vadd.f32 %v2080_v48, %v1056_v47  ;;  %v2100_v44 = vld [vmem:[%s4964_s21 + $0x1a78] sm:$0xff] }
 0x362   : > { %4106 = vst [vmem:[%s4979_s28 + $0x1928] sm:$0xff] %v3082_v53  ;;  %v1058_v53 = vld [vmem:[%s4957_s7 + $0x19e8] sm:$0xff]  ;;  %v3105_v58 = vadd.f32 %v2081_v51, %v1057_v50  ;;  %v2101_v47 = vld [vmem:[%s4964_s21 + $0x1a80] sm:$0xff] }
 0x363   : > { %4107 = vst [vmem:[%s4979_s28 + $0x1930] sm:$0xff] %v3083_v56  ;;  %v1059_v56 = vld [vmem:[%s4957_s7 + $0x19f0] sm:$0xff]  ;;  %v3106_v61 = vadd.f32 %v2082_v54, %v1058_v53  ;;  %v2102_v50 = vld [vmem:[%s4964_s21 + $0x1a88] sm:$0xff] }
 0x364   : > { %4108 = vst [vmem:[%s4979_s28 + $0x1938] sm:$0xff] %v3084_v59  ;;  %v1060_v59 = vld [vmem:[%s4957_s7 + $0x19f8] sm:$0xff]  ;;  %v3107_v0 = vadd.f32 %v2083_v57, %v1059_v56  ;;  %v2103_v53 = vld [vmem:[%s4964_s21 + $0x1a90] sm:$0xff] }
 0x365   : > { %4109 = vst [vmem:[%s4979_s28 + $0x1940] sm:$0xff] %v3085_v62  ;;  %v1061_v62 = vld [vmem:[%s4957_s7 + $0x1a00] sm:$0xff]  ;;  %v3108_v3 = vadd.f32 %v2084_v60, %v1060_v59  ;;  %v2104_v56 = vld [vmem:[%s4964_s21 + $0x1a98] sm:$0xff] }
 0x366   : > { %4110 = vst [vmem:[%s4979_s28 + $0x1948] sm:$0xff] %v3086_v1  ;;  %v1062_v1 = vld [vmem:[%s4957_s7 + $0x1a08] sm:$0xff]  ;;  %v3109_v6 = vadd.f32 %v2085_v63, %v1061_v62  ;;  %v2105_v59 = vld [vmem:[%s4964_s21 + $0x1aa0] sm:$0xff] }
 0x367   : > { %4111 = vst [vmem:[%s4979_s28 + $0x1950] sm:$0xff] %v3087_v4  ;;  %v1063_v4 = vld [vmem:[%s4957_s7 + $0x1a10] sm:$0xff]  ;;  %v3110_v9 = vadd.f32 %v2086_v2, %v1062_v1  ;;  %v2106_v62 = vld [vmem:[%s4964_s21 + $0x1aa8] sm:$0xff] }
 0x368   : > { %4112 = vst [vmem:[%s4979_s28 + $0x1958] sm:$0xff] %v3088_v7  ;;  %v1064_v7 = vld [vmem:[%s4957_s7 + $0x1a18] sm:$0xff]  ;;  %v3111_v12 = vadd.f32 %v2087_v5, %v1063_v4  ;;  %v2107_v1 = vld [vmem:[%s4964_s21 + $0x1ab0] sm:$0xff] }
 0x369   : > { %4113 = vst [vmem:[%s4979_s28 + $0x1960] sm:$0xff] %v3089_v10  ;;  %v1065_v10 = vld [vmem:[%s4957_s7 + $0x1a20] sm:$0xff]  ;;  %v3112_v15 = vadd.f32 %v2088_v8, %v1064_v7  ;;  %v2108_v4 = vld [vmem:[%s4964_s21 + $0x1ab8] sm:$0xff] }
 0x36a   : > { %4114 = vst [vmem:[%s4979_s28 + $0x1968] sm:$0xff] %v3090_v13  ;;  %v1066_v13 = vld [vmem:[%s4957_s7 + $0x1a28] sm:$0xff]  ;;  %v3113_v18 = vadd.f32 %v2089_v11, %v1065_v10  ;;  %v2109_v7 = vld [vmem:[%s4964_s21 + $0x1ac0] sm:$0xff] }
 0x36b   : > { %4115 = vst [vmem:[%s4979_s28 + $0x1970] sm:$0xff] %v3091_v16  ;;  %v1067_v16 = vld [vmem:[%s4957_s7 + $0x1a30] sm:$0xff]  ;;  %v3114_v21 = vadd.f32 %v2090_v14, %v1066_v13  ;;  %v2110_v10 = vld [vmem:[%s4964_s21 + $0x1ac8] sm:$0xff] }
 0x36c   : > { %4116 = vst [vmem:[%s4979_s28 + $0x1978] sm:$0xff] %v3092_v19  ;;  %v1068_v19 = vld [vmem:[%s4957_s7 + $0x1a38] sm:$0xff]  ;;  %v3115_v24 = vadd.f32 %v2091_v17, %v1067_v16  ;;  %v2111_v13 = vld [vmem:[%s4964_s21 + $0x1ad0] sm:$0xff] }
 0x36d   : > { %4117 = vst [vmem:[%s4979_s28 + $0x1980] sm:$0xff] %v3093_v22  ;;  %v1069_v22 = vld [vmem:[%s4957_s7 + $0x1a40] sm:$0xff]  ;;  %v3116_v27 = vadd.f32 %v2092_v20, %v1068_v19  ;;  %v2112_v16 = vld [vmem:[%s4964_s21 + $0x1ad8] sm:$0xff] }
 0x36e   : > { %4118 = vst [vmem:[%s4979_s28 + $0x1988] sm:$0xff] %v3094_v25  ;;  %v1070_v25 = vld [vmem:[%s4957_s7 + $0x1a48] sm:$0xff]  ;;  %v3117_v30 = vadd.f32 %v2093_v23, %v1069_v22  ;;  %v2113_v19 = vld [vmem:[%s4964_s21 + $0x1ae0] sm:$0xff] }
 0x36f   : > { %4119 = vst [vmem:[%s4979_s28 + $0x1990] sm:$0xff] %v3095_v28  ;;  %v1071_v28 = vld [vmem:[%s4957_s7 + $0x1a50] sm:$0xff]  ;;  %v3118_v33 = vadd.f32 %v2094_v26, %v1070_v25  ;;  %v2114_v22 = vld [vmem:[%s4964_s21 + $0x1ae8] sm:$0xff] }
 0x370   : > { %4120 = vst [vmem:[%s4979_s28 + $0x1998] sm:$0xff] %v3096_v31  ;;  %v1072_v31 = vld [vmem:[%s4957_s7 + $0x1a58] sm:$0xff]  ;;  %v3119_v36 = vadd.f32 %v2095_v29, %v1071_v28  ;;  %v2115_v25 = vld [vmem:[%s4964_s21 + $0x1af0] sm:$0xff] }
 0x371   : > { %4121 = vst [vmem:[%s4979_s28 + $0x19a0] sm:$0xff] %v3097_v34  ;;  %v1073_v34 = vld [vmem:[%s4957_s7 + $0x1a60] sm:$0xff]  ;;  %v3120_v39 = vadd.f32 %v2096_v32, %v1072_v31  ;;  %v2116_v28 = vld [vmem:[%s4964_s21 + $0x1af8] sm:$0xff] }
 0x372   : > { %4122 = vst [vmem:[%s4979_s28 + $0x19a8] sm:$0xff] %v3098_v37  ;;  %v1074_v37 = vld [vmem:[%s4957_s7 + $0x1a68] sm:$0xff]  ;;  %v3121_v42 = vadd.f32 %v2097_v35, %v1073_v34  ;;  %v2117_v31 = vld [vmem:[%s4964_s21 + $0x1b00] sm:$0xff] }
 0x373   : > { %4123 = vst [vmem:[%s4979_s28 + $0x19b0] sm:$0xff] %v3099_v40  ;;  %v1075_v40 = vld [vmem:[%s4957_s7 + $0x1a70] sm:$0xff]  ;;  %v3122_v45 = vadd.f32 %v2098_v38, %v1074_v37  ;;  %v2118_v34 = vld [vmem:[%s4964_s21 + $0x1b08] sm:$0xff] }
 0x374   : > { %4124 = vst [vmem:[%s4979_s28 + $0x19b8] sm:$0xff] %v3100_v43  ;;  %v1076_v43 = vld [vmem:[%s4957_s7 + $0x1a78] sm:$0xff]  ;;  %v3123_v48 = vadd.f32 %v2099_v41, %v1075_v40  ;;  %v2119_v37 = vld [vmem:[%s4964_s21 + $0x1b10] sm:$0xff] }
 0x375   : > { %4125 = vst [vmem:[%s4979_s28 + $0x19c0] sm:$0xff] %v3101_v46  ;;  %v1077_v46 = vld [vmem:[%s4957_s7 + $0x1a80] sm:$0xff]  ;;  %v3124_v51 = vadd.f32 %v2100_v44, %v1076_v43  ;;  %v2120_v40 = vld [vmem:[%s4964_s21 + $0x1b18] sm:$0xff] }
 0x376   : > { %4126 = vst [vmem:[%s4979_s28 + $0x19c8] sm:$0xff] %v3102_v49  ;;  %v1078_v49 = vld [vmem:[%s4957_s7 + $0x1a88] sm:$0xff]  ;;  %v3125_v54 = vadd.f32 %v2101_v47, %v1077_v46  ;;  %v2121_v43 = vld [vmem:[%s4964_s21 + $0x1b20] sm:$0xff] }
 0x377   : > { %4127 = vst [vmem:[%s4979_s28 + $0x19d0] sm:$0xff] %v3103_v52  ;;  %v1079_v52 = vld [vmem:[%s4957_s7 + $0x1a90] sm:$0xff]  ;;  %v3126_v57 = vadd.f32 %v2102_v50, %v1078_v49  ;;  %v2122_v46 = vld [vmem:[%s4964_s21 + $0x1b28] sm:$0xff] }
 0x378   : > { %4128 = vst [vmem:[%s4979_s28 + $0x19d8] sm:$0xff] %v3104_v55  ;;  %v1080_v55 = vld [vmem:[%s4957_s7 + $0x1a98] sm:$0xff]  ;;  %v3127_v60 = vadd.f32 %v2103_v53, %v1079_v52  ;;  %v2123_v49 = vld [vmem:[%s4964_s21 + $0x1b30] sm:$0xff] }
 0x379   : > { %4129 = vst [vmem:[%s4979_s28 + $0x19e0] sm:$0xff] %v3105_v58  ;;  %v1081_v58 = vld [vmem:[%s4957_s7 + $0x1aa0] sm:$0xff]  ;;  %v3128_v63 = vadd.f32 %v2104_v56, %v1080_v55  ;;  %v2124_v52 = vld [vmem:[%s4964_s21 + $0x1b38] sm:$0xff] }
 0x37a   : > { %4130 = vst [vmem:[%s4979_s28 + $0x19e8] sm:$0xff] %v3106_v61  ;;  %v1082_v61 = vld [vmem:[%s4957_s7 + $0x1aa8] sm:$0xff]  ;;  %v3129_v2 = vadd.f32 %v2105_v59, %v1081_v58  ;;  %v2125_v55 = vld [vmem:[%s4964_s21 + $0x1b40] sm:$0xff] }
 0x37b   : > { %4131 = vst [vmem:[%s4979_s28 + $0x19f0] sm:$0xff] %v3107_v0  ;;  %v1083_v0 = vld [vmem:[%s4957_s7 + $0x1ab0] sm:$0xff]  ;;  %v3130_v5 = vadd.f32 %v2106_v62, %v1082_v61  ;;  %v2126_v58 = vld [vmem:[%s4964_s21 + $0x1b48] sm:$0xff] }
 0x37c   : > { %4132 = vst [vmem:[%s4979_s28 + $0x19f8] sm:$0xff] %v3108_v3  ;;  %v1084_v3 = vld [vmem:[%s4957_s7 + $0x1ab8] sm:$0xff]  ;;  %v3131_v8 = vadd.f32 %v2107_v1, %v1083_v0  ;;  %v2127_v61 = vld [vmem:[%s4964_s21 + $0x1b50] sm:$0xff] }
 0x37d   : > { %4133 = vst [vmem:[%s4979_s28 + $0x1a00] sm:$0xff] %v3109_v6  ;;  %v1085_v6 = vld [vmem:[%s4957_s7 + $0x1ac0] sm:$0xff]  ;;  %v3132_v11 = vadd.f32 %v2108_v4, %v1084_v3  ;;  %v2128_v0 = vld [vmem:[%s4964_s21 + $0x1b58] sm:$0xff] }
 0x37e   : > { %4134 = vst [vmem:[%s4979_s28 + $0x1a08] sm:$0xff] %v3110_v9  ;;  %v1086_v9 = vld [vmem:[%s4957_s7 + $0x1ac8] sm:$0xff]  ;;  %v3133_v14 = vadd.f32 %v2109_v7, %v1085_v6  ;;  %v2129_v3 = vld [vmem:[%s4964_s21 + $0x1b60] sm:$0xff] }
 0x37f   : > { %4135 = vst [vmem:[%s4979_s28 + $0x1a10] sm:$0xff] %v3111_v12  ;;  %v1087_v12 = vld [vmem:[%s4957_s7 + $0x1ad0] sm:$0xff]  ;;  %v3134_v17 = vadd.f32 %v2110_v10, %v1086_v9  ;;  %v2130_v6 = vld [vmem:[%s4964_s21 + $0x1b68] sm:$0xff] }
 0x380   : > { %4136 = vst [vmem:[%s4979_s28 + $0x1a18] sm:$0xff] %v3112_v15  ;;  %v1088_v15 = vld [vmem:[%s4957_s7 + $0x1ad8] sm:$0xff]  ;;  %v3135_v20 = vadd.f32 %v2111_v13, %v1087_v12  ;;  %v2131_v9 = vld [vmem:[%s4964_s21 + $0x1b70] sm:$0xff] }
 0x381   : > { %4137 = vst [vmem:[%s4979_s28 + $0x1a20] sm:$0xff] %v3113_v18  ;;  %v1089_v18 = vld [vmem:[%s4957_s7 + $0x1ae0] sm:$0xff]  ;;  %v3136_v23 = vadd.f32 %v2112_v16, %v1088_v15  ;;  %v2132_v12 = vld [vmem:[%s4964_s21 + $0x1b78] sm:$0xff] }
 0x382   : > { %4138 = vst [vmem:[%s4979_s28 + $0x1a28] sm:$0xff] %v3114_v21  ;;  %v1090_v21 = vld [vmem:[%s4957_s7 + $0x1ae8] sm:$0xff]  ;;  %v3137_v26 = vadd.f32 %v2113_v19, %v1089_v18  ;;  %v2133_v15 = vld [vmem:[%s4964_s21 + $0x1b80] sm:$0xff] }
 0x383   : > { %4139 = vst [vmem:[%s4979_s28 + $0x1a30] sm:$0xff] %v3115_v24  ;;  %v1091_v24 = vld [vmem:[%s4957_s7 + $0x1af0] sm:$0xff]  ;;  %v3138_v29 = vadd.f32 %v2114_v22, %v1090_v21  ;;  %v2134_v18 = vld [vmem:[%s4964_s21 + $0x1b88] sm:$0xff] }
 0x384   : > { %4140 = vst [vmem:[%s4979_s28 + $0x1a38] sm:$0xff] %v3116_v27  ;;  %v1092_v27 = vld [vmem:[%s4957_s7 + $0x1af8] sm:$0xff]  ;;  %v3139_v32 = vadd.f32 %v2115_v25, %v1091_v24  ;;  %v2135_v21 = vld [vmem:[%s4964_s21 + $0x1b90] sm:$0xff] }
 0x385   : > { %4141 = vst [vmem:[%s4979_s28 + $0x1a40] sm:$0xff] %v3117_v30  ;;  %v1093_v30 = vld [vmem:[%s4957_s7 + $0x1b00] sm:$0xff]  ;;  %v3140_v35 = vadd.f32 %v2116_v28, %v1092_v27  ;;  %v2136_v24 = vld [vmem:[%s4964_s21 + $0x1b98] sm:$0xff] }
 0x386   : > { %4142 = vst [vmem:[%s4979_s28 + $0x1a48] sm:$0xff] %v3118_v33  ;;  %v1094_v33 = vld [vmem:[%s4957_s7 + $0x1b08] sm:$0xff]  ;;  %v3141_v38 = vadd.f32 %v2117_v31, %v1093_v30  ;;  %v2137_v27 = vld [vmem:[%s4964_s21 + $0x1ba0] sm:$0xff] }
 0x387   : > { %4143 = vst [vmem:[%s4979_s28 + $0x1a50] sm:$0xff] %v3119_v36  ;;  %v1095_v36 = vld [vmem:[%s4957_s7 + $0x1b10] sm:$0xff]  ;;  %v3142_v41 = vadd.f32 %v2118_v34, %v1094_v33  ;;  %v2138_v30 = vld [vmem:[%s4964_s21 + $0x1ba8] sm:$0xff] }
 0x388   : > { %4144 = vst [vmem:[%s4979_s28 + $0x1a58] sm:$0xff] %v3120_v39  ;;  %v1096_v39 = vld [vmem:[%s4957_s7 + $0x1b18] sm:$0xff]  ;;  %v3143_v44 = vadd.f32 %v2119_v37, %v1095_v36  ;;  %v2139_v33 = vld [vmem:[%s4964_s21 + $0x1bb0] sm:$0xff] }
 0x389   : > { %4145 = vst [vmem:[%s4979_s28 + $0x1a60] sm:$0xff] %v3121_v42  ;;  %v1097_v42 = vld [vmem:[%s4957_s7 + $0x1b20] sm:$0xff]  ;;  %v3144_v47 = vadd.f32 %v2120_v40, %v1096_v39  ;;  %v2140_v36 = vld [vmem:[%s4964_s21 + $0x1bb8] sm:$0xff] }
 0x38a   : > { %4146 = vst [vmem:[%s4979_s28 + $0x1a68] sm:$0xff] %v3122_v45  ;;  %v1098_v45 = vld [vmem:[%s4957_s7 + $0x1b28] sm:$0xff]  ;;  %v3145_v50 = vadd.f32 %v2121_v43, %v1097_v42  ;;  %v2141_v39 = vld [vmem:[%s4964_s21 + $0x1bc0] sm:$0xff] }
 0x38b   : > { %4147 = vst [vmem:[%s4979_s28 + $0x1a70] sm:$0xff] %v3123_v48  ;;  %v1099_v48 = vld [vmem:[%s4957_s7 + $0x1b30] sm:$0xff]  ;;  %v3146_v53 = vadd.f32 %v2122_v46, %v1098_v45  ;;  %v2142_v42 = vld [vmem:[%s4964_s21 + $0x1bc8] sm:$0xff] }
 0x38c   : > { %4148 = vst [vmem:[%s4979_s28 + $0x1a78] sm:$0xff] %v3124_v51  ;;  %v1100_v51 = vld [vmem:[%s4957_s7 + $0x1b38] sm:$0xff]  ;;  %v3147_v56 = vadd.f32 %v2123_v49, %v1099_v48  ;;  %v2143_v45 = vld [vmem:[%s4964_s21 + $0x1bd0] sm:$0xff] }
 0x38d   : > { %4149 = vst [vmem:[%s4979_s28 + $0x1a80] sm:$0xff] %v3125_v54  ;;  %v1101_v54 = vld [vmem:[%s4957_s7 + $0x1b40] sm:$0xff]  ;;  %v3148_v59 = vadd.f32 %v2124_v52, %v1100_v51  ;;  %v2144_v48 = vld [vmem:[%s4964_s21 + $0x1bd8] sm:$0xff] }
 0x38e   : > { %4150 = vst [vmem:[%s4979_s28 + $0x1a88] sm:$0xff] %v3126_v57  ;;  %v1102_v57 = vld [vmem:[%s4957_s7 + $0x1b48] sm:$0xff]  ;;  %v3149_v62 = vadd.f32 %v2125_v55, %v1101_v54  ;;  %v2145_v51 = vld [vmem:[%s4964_s21 + $0x1be0] sm:$0xff] }
 0x38f   : > { %4151 = vst [vmem:[%s4979_s28 + $0x1a90] sm:$0xff] %v3127_v60  ;;  %v1103_v60 = vld [vmem:[%s4957_s7 + $0x1b50] sm:$0xff]  ;;  %v3150_v1 = vadd.f32 %v2126_v58, %v1102_v57  ;;  %v2146_v54 = vld [vmem:[%s4964_s21 + $0x1be8] sm:$0xff] }
 0x390   : > { %4152 = vst [vmem:[%s4979_s28 + $0x1a98] sm:$0xff] %v3128_v63  ;;  %v1104_v63 = vld [vmem:[%s4957_s7 + $0x1b58] sm:$0xff]  ;;  %v3151_v4 = vadd.f32 %v2127_v61, %v1103_v60  ;;  %v2147_v57 = vld [vmem:[%s4964_s21 + $0x1bf0] sm:$0xff] }
 0x391   : > { %4153 = vst [vmem:[%s4979_s28 + $0x1aa0] sm:$0xff] %v3129_v2  ;;  %v1105_v2 = vld [vmem:[%s4957_s7 + $0x1b60] sm:$0xff]  ;;  %v3152_v7 = vadd.f32 %v2128_v0, %v1104_v63  ;;  %v2148_v60 = vld [vmem:[%s4964_s21 + $0x1bf8] sm:$0xff] }
 0x392   : > { %4154 = vst [vmem:[%s4979_s28 + $0x1aa8] sm:$0xff] %v3130_v5  ;;  %v1106_v5 = vld [vmem:[%s4957_s7 + $0x1b68] sm:$0xff]  ;;  %v3153_v10 = vadd.f32 %v2129_v3, %v1105_v2  ;;  %v2149_v63 = vld [vmem:[%s4964_s21 + $0x1c00] sm:$0xff] }
 0x393   : > { %4155 = vst [vmem:[%s4979_s28 + $0x1ab0] sm:$0xff] %v3131_v8  ;;  %v1107_v8 = vld [vmem:[%s4957_s7 + $0x1b70] sm:$0xff]  ;;  %v3154_v13 = vadd.f32 %v2130_v6, %v1106_v5  ;;  %v2150_v2 = vld [vmem:[%s4964_s21 + $0x1c08] sm:$0xff] }
 0x394   : > { %4156 = vst [vmem:[%s4979_s28 + $0x1ab8] sm:$0xff] %v3132_v11  ;;  %v1108_v11 = vld [vmem:[%s4957_s7 + $0x1b78] sm:$0xff]  ;;  %v3155_v16 = vadd.f32 %v2131_v9, %v1107_v8  ;;  %v2151_v5 = vld [vmem:[%s4964_s21 + $0x1c10] sm:$0xff] }
 0x395   : > { %4157 = vst [vmem:[%s4979_s28 + $0x1ac0] sm:$0xff] %v3133_v14  ;;  %v1109_v14 = vld [vmem:[%s4957_s7 + $0x1b80] sm:$0xff]  ;;  %v3156_v19 = vadd.f32 %v2132_v12, %v1108_v11  ;;  %v2152_v8 = vld [vmem:[%s4964_s21 + $0x1c18] sm:$0xff] }
 0x396   : > { %4158 = vst [vmem:[%s4979_s28 + $0x1ac8] sm:$0xff] %v3134_v17  ;;  %v1110_v17 = vld [vmem:[%s4957_s7 + $0x1b88] sm:$0xff]  ;;  %v3157_v22 = vadd.f32 %v2133_v15, %v1109_v14  ;;  %v2153_v11 = vld [vmem:[%s4964_s21 + $0x1c20] sm:$0xff] }
 0x397   : > { %4159 = vst [vmem:[%s4979_s28 + $0x1ad0] sm:$0xff] %v3135_v20  ;;  %v1111_v20 = vld [vmem:[%s4957_s7 + $0x1b90] sm:$0xff]  ;;  %v3158_v25 = vadd.f32 %v2134_v18, %v1110_v17  ;;  %v2154_v14 = vld [vmem:[%s4964_s21 + $0x1c28] sm:$0xff] }
 0x398   : > { %4160 = vst [vmem:[%s4979_s28 + $0x1ad8] sm:$0xff] %v3136_v23  ;;  %v1112_v23 = vld [vmem:[%s4957_s7 + $0x1b98] sm:$0xff]  ;;  %v3159_v28 = vadd.f32 %v2135_v21, %v1111_v20  ;;  %v2155_v17 = vld [vmem:[%s4964_s21 + $0x1c30] sm:$0xff] }
 0x399   : > { %4161 = vst [vmem:[%s4979_s28 + $0x1ae0] sm:$0xff] %v3137_v26  ;;  %v1113_v26 = vld [vmem:[%s4957_s7 + $0x1ba0] sm:$0xff]  ;;  %v3160_v31 = vadd.f32 %v2136_v24, %v1112_v23  ;;  %v2156_v20 = vld [vmem:[%s4964_s21 + $0x1c38] sm:$0xff] }
 0x39a   : > { %4162 = vst [vmem:[%s4979_s28 + $0x1ae8] sm:$0xff] %v3138_v29  ;;  %v1114_v29 = vld [vmem:[%s4957_s7 + $0x1ba8] sm:$0xff]  ;;  %v3161_v34 = vadd.f32 %v2137_v27, %v1113_v26  ;;  %v2157_v23 = vld [vmem:[%s4964_s21 + $0x1c40] sm:$0xff] }
 0x39b   : > { %4163 = vst [vmem:[%s4979_s28 + $0x1af0] sm:$0xff] %v3139_v32  ;;  %v1115_v32 = vld [vmem:[%s4957_s7 + $0x1bb0] sm:$0xff]  ;;  %v3162_v37 = vadd.f32 %v2138_v30, %v1114_v29  ;;  %v2158_v26 = vld [vmem:[%s4964_s21 + $0x1c48] sm:$0xff] }
 0x39c   : > { %4164 = vst [vmem:[%s4979_s28 + $0x1af8] sm:$0xff] %v3140_v35  ;;  %v1116_v35 = vld [vmem:[%s4957_s7 + $0x1bb8] sm:$0xff]  ;;  %v3163_v40 = vadd.f32 %v2139_v33, %v1115_v32  ;;  %v2159_v29 = vld [vmem:[%s4964_s21 + $0x1c50] sm:$0xff] }
 0x39d   : > { %4165 = vst [vmem:[%s4979_s28 + $0x1b00] sm:$0xff] %v3141_v38  ;;  %v1117_v38 = vld [vmem:[%s4957_s7 + $0x1bc0] sm:$0xff]  ;;  %v3164_v43 = vadd.f32 %v2140_v36, %v1116_v35  ;;  %v2160_v32 = vld [vmem:[%s4964_s21 + $0x1c58] sm:$0xff] }
 0x39e   : > { %4166 = vst [vmem:[%s4979_s28 + $0x1b08] sm:$0xff] %v3142_v41  ;;  %v1118_v41 = vld [vmem:[%s4957_s7 + $0x1bc8] sm:$0xff]  ;;  %v3165_v46 = vadd.f32 %v2141_v39, %v1117_v38  ;;  %v2161_v35 = vld [vmem:[%s4964_s21 + $0x1c60] sm:$0xff] }
 0x39f   : > { %4167 = vst [vmem:[%s4979_s28 + $0x1b10] sm:$0xff] %v3143_v44  ;;  %v1119_v44 = vld [vmem:[%s4957_s7 + $0x1bd0] sm:$0xff]  ;;  %v3166_v49 = vadd.f32 %v2142_v42, %v1118_v41  ;;  %v2162_v38 = vld [vmem:[%s4964_s21 + $0x1c68] sm:$0xff] }
 0x3a0   : > { %4168 = vst [vmem:[%s4979_s28 + $0x1b18] sm:$0xff] %v3144_v47  ;;  %v1120_v47 = vld [vmem:[%s4957_s7 + $0x1bd8] sm:$0xff]  ;;  %v3167_v52 = vadd.f32 %v2143_v45, %v1119_v44  ;;  %v2163_v41 = vld [vmem:[%s4964_s21 + $0x1c70] sm:$0xff] }
 0x3a1   : > { %4169 = vst [vmem:[%s4979_s28 + $0x1b20] sm:$0xff] %v3145_v50  ;;  %v1121_v50 = vld [vmem:[%s4957_s7 + $0x1be0] sm:$0xff]  ;;  %v3168_v55 = vadd.f32 %v2144_v48, %v1120_v47  ;;  %v2164_v44 = vld [vmem:[%s4964_s21 + $0x1c78] sm:$0xff] }
 0x3a2   : > { %4170 = vst [vmem:[%s4979_s28 + $0x1b28] sm:$0xff] %v3146_v53  ;;  %v1122_v53 = vld [vmem:[%s4957_s7 + $0x1be8] sm:$0xff]  ;;  %v3169_v58 = vadd.f32 %v2145_v51, %v1121_v50  ;;  %v2165_v47 = vld [vmem:[%s4964_s21 + $0x1c80] sm:$0xff] }
 0x3a3   : > { %4171 = vst [vmem:[%s4979_s28 + $0x1b30] sm:$0xff] %v3147_v56  ;;  %v1123_v56 = vld [vmem:[%s4957_s7 + $0x1bf0] sm:$0xff]  ;;  %v3170_v61 = vadd.f32 %v2146_v54, %v1122_v53  ;;  %v2166_v50 = vld [vmem:[%s4964_s21 + $0x1c88] sm:$0xff] }
 0x3a4   : > { %4172 = vst [vmem:[%s4979_s28 + $0x1b38] sm:$0xff] %v3148_v59  ;;  %v1124_v59 = vld [vmem:[%s4957_s7 + $0x1bf8] sm:$0xff]  ;;  %v3171_v0 = vadd.f32 %v2147_v57, %v1123_v56  ;;  %v2167_v53 = vld [vmem:[%s4964_s21 + $0x1c90] sm:$0xff] }
 0x3a5   : > { %4173 = vst [vmem:[%s4979_s28 + $0x1b40] sm:$0xff] %v3149_v62  ;;  %v1125_v62 = vld [vmem:[%s4957_s7 + $0x1c00] sm:$0xff]  ;;  %v3172_v3 = vadd.f32 %v2148_v60, %v1124_v59  ;;  %v2168_v56 = vld [vmem:[%s4964_s21 + $0x1c98] sm:$0xff] }
 0x3a6   : > { %4174 = vst [vmem:[%s4979_s28 + $0x1b48] sm:$0xff] %v3150_v1  ;;  %v1126_v1 = vld [vmem:[%s4957_s7 + $0x1c08] sm:$0xff]  ;;  %v3173_v6 = vadd.f32 %v2149_v63, %v1125_v62  ;;  %v2169_v59 = vld [vmem:[%s4964_s21 + $0x1ca0] sm:$0xff] }
 0x3a7   : > { %4175 = vst [vmem:[%s4979_s28 + $0x1b50] sm:$0xff] %v3151_v4  ;;  %v1127_v4 = vld [vmem:[%s4957_s7 + $0x1c10] sm:$0xff]  ;;  %v3174_v9 = vadd.f32 %v2150_v2, %v1126_v1  ;;  %v2170_v62 = vld [vmem:[%s4964_s21 + $0x1ca8] sm:$0xff] }
 0x3a8   : > { %4176 = vst [vmem:[%s4979_s28 + $0x1b58] sm:$0xff] %v3152_v7  ;;  %v1128_v7 = vld [vmem:[%s4957_s7 + $0x1c18] sm:$0xff]  ;;  %v3175_v12 = vadd.f32 %v2151_v5, %v1127_v4  ;;  %v2171_v1 = vld [vmem:[%s4964_s21 + $0x1cb0] sm:$0xff] }
 0x3a9   : > { %4177 = vst [vmem:[%s4979_s28 + $0x1b60] sm:$0xff] %v3153_v10  ;;  %v1129_v10 = vld [vmem:[%s4957_s7 + $0x1c20] sm:$0xff]  ;;  %v3176_v15 = vadd.f32 %v2152_v8, %v1128_v7  ;;  %v2172_v4 = vld [vmem:[%s4964_s21 + $0x1cb8] sm:$0xff] }
 0x3aa   : > { %4178 = vst [vmem:[%s4979_s28 + $0x1b68] sm:$0xff] %v3154_v13  ;;  %v1130_v13 = vld [vmem:[%s4957_s7 + $0x1c28] sm:$0xff]  ;;  %v3177_v18 = vadd.f32 %v2153_v11, %v1129_v10  ;;  %v2173_v7 = vld [vmem:[%s4964_s21 + $0x1cc0] sm:$0xff] }
 0x3ab   : > { %4179 = vst [vmem:[%s4979_s28 + $0x1b70] sm:$0xff] %v3155_v16  ;;  %v1131_v16 = vld [vmem:[%s4957_s7 + $0x1c30] sm:$0xff]  ;;  %v3178_v21 = vadd.f32 %v2154_v14, %v1130_v13  ;;  %v2174_v10 = vld [vmem:[%s4964_s21 + $0x1cc8] sm:$0xff] }
 0x3ac   : > { %4180 = vst [vmem:[%s4979_s28 + $0x1b78] sm:$0xff] %v3156_v19  ;;  %v1132_v19 = vld [vmem:[%s4957_s7 + $0x1c38] sm:$0xff]  ;;  %v3179_v24 = vadd.f32 %v2155_v17, %v1131_v16  ;;  %v2175_v13 = vld [vmem:[%s4964_s21 + $0x1cd0] sm:$0xff] }
 0x3ad   : > { %4181 = vst [vmem:[%s4979_s28 + $0x1b80] sm:$0xff] %v3157_v22  ;;  %v1133_v22 = vld [vmem:[%s4957_s7 + $0x1c40] sm:$0xff]  ;;  %v3180_v27 = vadd.f32 %v2156_v20, %v1132_v19  ;;  %v2176_v16 = vld [vmem:[%s4964_s21 + $0x1cd8] sm:$0xff] }
 0x3ae   : > { %4182 = vst [vmem:[%s4979_s28 + $0x1b88] sm:$0xff] %v3158_v25  ;;  %v1134_v25 = vld [vmem:[%s4957_s7 + $0x1c48] sm:$0xff]  ;;  %v3181_v30 = vadd.f32 %v2157_v23, %v1133_v22  ;;  %v2177_v19 = vld [vmem:[%s4964_s21 + $0x1ce0] sm:$0xff] }
 0x3af   : > { %4183 = vst [vmem:[%s4979_s28 + $0x1b90] sm:$0xff] %v3159_v28  ;;  %v1135_v28 = vld [vmem:[%s4957_s7 + $0x1c50] sm:$0xff]  ;;  %v3182_v33 = vadd.f32 %v2158_v26, %v1134_v25  ;;  %v2178_v22 = vld [vmem:[%s4964_s21 + $0x1ce8] sm:$0xff] }
 0x3b0   : > { %4184 = vst [vmem:[%s4979_s28 + $0x1b98] sm:$0xff] %v3160_v31  ;;  %v1136_v31 = vld [vmem:[%s4957_s7 + $0x1c58] sm:$0xff]  ;;  %v3183_v36 = vadd.f32 %v2159_v29, %v1135_v28  ;;  %v2179_v25 = vld [vmem:[%s4964_s21 + $0x1cf0] sm:$0xff] }
 0x3b1   : > { %4185 = vst [vmem:[%s4979_s28 + $0x1ba0] sm:$0xff] %v3161_v34  ;;  %v1137_v34 = vld [vmem:[%s4957_s7 + $0x1c60] sm:$0xff]  ;;  %v3184_v39 = vadd.f32 %v2160_v32, %v1136_v31  ;;  %v2180_v28 = vld [vmem:[%s4964_s21 + $0x1cf8] sm:$0xff] }
 0x3b2   : > { %4186 = vst [vmem:[%s4979_s28 + $0x1ba8] sm:$0xff] %v3162_v37  ;;  %v1138_v37 = vld [vmem:[%s4957_s7 + $0x1c68] sm:$0xff]  ;;  %v3185_v42 = vadd.f32 %v2161_v35, %v1137_v34  ;;  %v2181_v31 = vld [vmem:[%s4964_s21 + $0x1d00] sm:$0xff] }
 0x3b3   : > { %4187 = vst [vmem:[%s4979_s28 + $0x1bb0] sm:$0xff] %v3163_v40  ;;  %v1139_v40 = vld [vmem:[%s4957_s7 + $0x1c70] sm:$0xff]  ;;  %v3186_v45 = vadd.f32 %v2162_v38, %v1138_v37  ;;  %v2182_v34 = vld [vmem:[%s4964_s21 + $0x1d08] sm:$0xff] }
 0x3b4   : > { %4188 = vst [vmem:[%s4979_s28 + $0x1bb8] sm:$0xff] %v3164_v43  ;;  %v1140_v43 = vld [vmem:[%s4957_s7 + $0x1c78] sm:$0xff]  ;;  %v3187_v48 = vadd.f32 %v2163_v41, %v1139_v40  ;;  %v2183_v37 = vld [vmem:[%s4964_s21 + $0x1d10] sm:$0xff] }
 0x3b5   : > { %4189 = vst [vmem:[%s4979_s28 + $0x1bc0] sm:$0xff] %v3165_v46  ;;  %v1141_v46 = vld [vmem:[%s4957_s7 + $0x1c80] sm:$0xff]  ;;  %v3188_v51 = vadd.f32 %v2164_v44, %v1140_v43  ;;  %v2184_v40 = vld [vmem:[%s4964_s21 + $0x1d18] sm:$0xff] }
 0x3b6   : > { %4190 = vst [vmem:[%s4979_s28 + $0x1bc8] sm:$0xff] %v3166_v49  ;;  %v1142_v49 = vld [vmem:[%s4957_s7 + $0x1c88] sm:$0xff]  ;;  %v3189_v54 = vadd.f32 %v2165_v47, %v1141_v46  ;;  %v2185_v43 = vld [vmem:[%s4964_s21 + $0x1d20] sm:$0xff] }
 0x3b7   : > { %4191 = vst [vmem:[%s4979_s28 + $0x1bd0] sm:$0xff] %v3167_v52  ;;  %v1143_v52 = vld [vmem:[%s4957_s7 + $0x1c90] sm:$0xff]  ;;  %v3190_v57 = vadd.f32 %v2166_v50, %v1142_v49  ;;  %v2186_v46 = vld [vmem:[%s4964_s21 + $0x1d28] sm:$0xff] }
 0x3b8   : > { %4192 = vst [vmem:[%s4979_s28 + $0x1bd8] sm:$0xff] %v3168_v55  ;;  %v1144_v55 = vld [vmem:[%s4957_s7 + $0x1c98] sm:$0xff]  ;;  %v3191_v60 = vadd.f32 %v2167_v53, %v1143_v52  ;;  %v2187_v49 = vld [vmem:[%s4964_s21 + $0x1d30] sm:$0xff] }
 0x3b9   : > { %4193 = vst [vmem:[%s4979_s28 + $0x1be0] sm:$0xff] %v3169_v58  ;;  %v1145_v58 = vld [vmem:[%s4957_s7 + $0x1ca0] sm:$0xff]  ;;  %v3192_v63 = vadd.f32 %v2168_v56, %v1144_v55  ;;  %v2188_v52 = vld [vmem:[%s4964_s21 + $0x1d38] sm:$0xff] }
 0x3ba   : > { %4194 = vst [vmem:[%s4979_s28 + $0x1be8] sm:$0xff] %v3170_v61  ;;  %v1146_v61 = vld [vmem:[%s4957_s7 + $0x1ca8] sm:$0xff]  ;;  %v3193_v2 = vadd.f32 %v2169_v59, %v1145_v58  ;;  %v2189_v55 = vld [vmem:[%s4964_s21 + $0x1d40] sm:$0xff] }
 0x3bb   : > { %4195 = vst [vmem:[%s4979_s28 + $0x1bf0] sm:$0xff] %v3171_v0  ;;  %v1147_v0 = vld [vmem:[%s4957_s7 + $0x1cb0] sm:$0xff]  ;;  %v3194_v5 = vadd.f32 %v2170_v62, %v1146_v61  ;;  %v2190_v58 = vld [vmem:[%s4964_s21 + $0x1d48] sm:$0xff] }
 0x3bc   : > { %4196 = vst [vmem:[%s4979_s28 + $0x1bf8] sm:$0xff] %v3172_v3  ;;  %v1148_v3 = vld [vmem:[%s4957_s7 + $0x1cb8] sm:$0xff]  ;;  %v3195_v8 = vadd.f32 %v2171_v1, %v1147_v0  ;;  %v2191_v61 = vld [vmem:[%s4964_s21 + $0x1d50] sm:$0xff] }
 0x3bd   : > { %4197 = vst [vmem:[%s4979_s28 + $0x1c00] sm:$0xff] %v3173_v6  ;;  %v1149_v6 = vld [vmem:[%s4957_s7 + $0x1cc0] sm:$0xff]  ;;  %v3196_v11 = vadd.f32 %v2172_v4, %v1148_v3  ;;  %v2192_v0 = vld [vmem:[%s4964_s21 + $0x1d58] sm:$0xff] }
 0x3be   : > { %4198 = vst [vmem:[%s4979_s28 + $0x1c08] sm:$0xff] %v3174_v9  ;;  %v1150_v9 = vld [vmem:[%s4957_s7 + $0x1cc8] sm:$0xff]  ;;  %v3197_v14 = vadd.f32 %v2173_v7, %v1149_v6  ;;  %v2193_v3 = vld [vmem:[%s4964_s21 + $0x1d60] sm:$0xff] }
 0x3bf   : > { %4199 = vst [vmem:[%s4979_s28 + $0x1c10] sm:$0xff] %v3175_v12  ;;  %v1151_v12 = vld [vmem:[%s4957_s7 + $0x1cd0] sm:$0xff]  ;;  %v3198_v17 = vadd.f32 %v2174_v10, %v1150_v9  ;;  %v2194_v6 = vld [vmem:[%s4964_s21 + $0x1d68] sm:$0xff] }
 0x3c0   : > { %4200 = vst [vmem:[%s4979_s28 + $0x1c18] sm:$0xff] %v3176_v15  ;;  %v1152_v15 = vld [vmem:[%s4957_s7 + $0x1cd8] sm:$0xff]  ;;  %v3199_v20 = vadd.f32 %v2175_v13, %v1151_v12  ;;  %v2195_v9 = vld [vmem:[%s4964_s21 + $0x1d70] sm:$0xff] }
 0x3c1   : > { %4201 = vst [vmem:[%s4979_s28 + $0x1c20] sm:$0xff] %v3177_v18  ;;  %v1153_v18 = vld [vmem:[%s4957_s7 + $0x1ce0] sm:$0xff]  ;;  %v3200_v23 = vadd.f32 %v2176_v16, %v1152_v15  ;;  %v2196_v12 = vld [vmem:[%s4964_s21 + $0x1d78] sm:$0xff] }
 0x3c2   : > { %4202 = vst [vmem:[%s4979_s28 + $0x1c28] sm:$0xff] %v3178_v21  ;;  %v1154_v21 = vld [vmem:[%s4957_s7 + $0x1ce8] sm:$0xff]  ;;  %v3201_v26 = vadd.f32 %v2177_v19, %v1153_v18  ;;  %v2197_v15 = vld [vmem:[%s4964_s21 + $0x1d80] sm:$0xff] }
 0x3c3   : > { %4203 = vst [vmem:[%s4979_s28 + $0x1c30] sm:$0xff] %v3179_v24  ;;  %v1155_v24 = vld [vmem:[%s4957_s7 + $0x1cf0] sm:$0xff]  ;;  %v3202_v29 = vadd.f32 %v2178_v22, %v1154_v21  ;;  %v2198_v18 = vld [vmem:[%s4964_s21 + $0x1d88] sm:$0xff] }
 0x3c4   : > { %4204 = vst [vmem:[%s4979_s28 + $0x1c38] sm:$0xff] %v3180_v27  ;;  %v1156_v27 = vld [vmem:[%s4957_s7 + $0x1cf8] sm:$0xff]  ;;  %v3203_v32 = vadd.f32 %v2179_v25, %v1155_v24  ;;  %v2199_v21 = vld [vmem:[%s4964_s21 + $0x1d90] sm:$0xff] }
 0x3c5   : > { %4205 = vst [vmem:[%s4979_s28 + $0x1c40] sm:$0xff] %v3181_v30  ;;  %v1157_v30 = vld [vmem:[%s4957_s7 + $0x1d00] sm:$0xff]  ;;  %v3204_v35 = vadd.f32 %v2180_v28, %v1156_v27  ;;  %v2200_v24 = vld [vmem:[%s4964_s21 + $0x1d98] sm:$0xff] }
 0x3c6   : > { %4206 = vst [vmem:[%s4979_s28 + $0x1c48] sm:$0xff] %v3182_v33  ;;  %v1158_v33 = vld [vmem:[%s4957_s7 + $0x1d08] sm:$0xff]  ;;  %v3205_v38 = vadd.f32 %v2181_v31, %v1157_v30  ;;  %v2201_v27 = vld [vmem:[%s4964_s21 + $0x1da0] sm:$0xff] }
 0x3c7   : > { %4207 = vst [vmem:[%s4979_s28 + $0x1c50] sm:$0xff] %v3183_v36  ;;  %v1159_v36 = vld [vmem:[%s4957_s7 + $0x1d10] sm:$0xff]  ;;  %v3206_v41 = vadd.f32 %v2182_v34, %v1158_v33  ;;  %v2202_v30 = vld [vmem:[%s4964_s21 + $0x1da8] sm:$0xff] }
 0x3c8   : > { %4208 = vst [vmem:[%s4979_s28 + $0x1c58] sm:$0xff] %v3184_v39  ;;  %v1160_v39 = vld [vmem:[%s4957_s7 + $0x1d18] sm:$0xff]  ;;  %v3207_v44 = vadd.f32 %v2183_v37, %v1159_v36  ;;  %v2203_v33 = vld [vmem:[%s4964_s21 + $0x1db0] sm:$0xff] }
 0x3c9   : > { %4209 = vst [vmem:[%s4979_s28 + $0x1c60] sm:$0xff] %v3185_v42  ;;  %v1161_v42 = vld [vmem:[%s4957_s7 + $0x1d20] sm:$0xff]  ;;  %v3208_v47 = vadd.f32 %v2184_v40, %v1160_v39  ;;  %v2204_v36 = vld [vmem:[%s4964_s21 + $0x1db8] sm:$0xff] }
 0x3ca   : > { %4210 = vst [vmem:[%s4979_s28 + $0x1c68] sm:$0xff] %v3186_v45  ;;  %v1162_v45 = vld [vmem:[%s4957_s7 + $0x1d28] sm:$0xff]  ;;  %v3209_v50 = vadd.f32 %v2185_v43, %v1161_v42  ;;  %v2205_v39 = vld [vmem:[%s4964_s21 + $0x1dc0] sm:$0xff] }
 0x3cb   : > { %4211 = vst [vmem:[%s4979_s28 + $0x1c70] sm:$0xff] %v3187_v48  ;;  %v1163_v48 = vld [vmem:[%s4957_s7 + $0x1d30] sm:$0xff]  ;;  %v3210_v53 = vadd.f32 %v2186_v46, %v1162_v45  ;;  %v2206_v42 = vld [vmem:[%s4964_s21 + $0x1dc8] sm:$0xff] }
 0x3cc   : > { %4212 = vst [vmem:[%s4979_s28 + $0x1c78] sm:$0xff] %v3188_v51  ;;  %v1164_v51 = vld [vmem:[%s4957_s7 + $0x1d38] sm:$0xff]  ;;  %v3211_v56 = vadd.f32 %v2187_v49, %v1163_v48  ;;  %v2207_v45 = vld [vmem:[%s4964_s21 + $0x1dd0] sm:$0xff] }
 0x3cd   : > { %4213 = vst [vmem:[%s4979_s28 + $0x1c80] sm:$0xff] %v3189_v54  ;;  %v1165_v54 = vld [vmem:[%s4957_s7 + $0x1d40] sm:$0xff]  ;;  %v3212_v59 = vadd.f32 %v2188_v52, %v1164_v51  ;;  %v2208_v48 = vld [vmem:[%s4964_s21 + $0x1dd8] sm:$0xff] }
 0x3ce   : > { %4214 = vst [vmem:[%s4979_s28 + $0x1c88] sm:$0xff] %v3190_v57  ;;  %v1166_v57 = vld [vmem:[%s4957_s7 + $0x1d48] sm:$0xff]  ;;  %v3213_v62 = vadd.f32 %v2189_v55, %v1165_v54  ;;  %v2209_v51 = vld [vmem:[%s4964_s21 + $0x1de0] sm:$0xff] }
 0x3cf   : > { %4215 = vst [vmem:[%s4979_s28 + $0x1c90] sm:$0xff] %v3191_v60  ;;  %v1167_v60 = vld [vmem:[%s4957_s7 + $0x1d50] sm:$0xff]  ;;  %v3214_v1 = vadd.f32 %v2190_v58, %v1166_v57  ;;  %v2210_v54 = vld [vmem:[%s4964_s21 + $0x1de8] sm:$0xff] }
 0x3d0   : > { %4216 = vst [vmem:[%s4979_s28 + $0x1c98] sm:$0xff] %v3192_v63  ;;  %v1168_v63 = vld [vmem:[%s4957_s7 + $0x1d58] sm:$0xff]  ;;  %v3215_v4 = vadd.f32 %v2191_v61, %v1167_v60  ;;  %v2211_v57 = vld [vmem:[%s4964_s21 + $0x1df0] sm:$0xff] }
 0x3d1   : > { %4217 = vst [vmem:[%s4979_s28 + $0x1ca0] sm:$0xff] %v3193_v2  ;;  %v1169_v2 = vld [vmem:[%s4957_s7 + $0x1d60] sm:$0xff]  ;;  %v3216_v7 = vadd.f32 %v2192_v0, %v1168_v63  ;;  %v2212_v60 = vld [vmem:[%s4964_s21 + $0x1df8] sm:$0xff] }
 0x3d2   : > { %4218 = vst [vmem:[%s4979_s28 + $0x1ca8] sm:$0xff] %v3194_v5  ;;  %v1170_v5 = vld [vmem:[%s4957_s7 + $0x1d68] sm:$0xff]  ;;  %v3217_v10 = vadd.f32 %v2193_v3, %v1169_v2  ;;  %v2213_v63 = vld [vmem:[%s4964_s21 + $0x1e00] sm:$0xff] }
 0x3d3   : > { %4219 = vst [vmem:[%s4979_s28 + $0x1cb0] sm:$0xff] %v3195_v8  ;;  %v1171_v8 = vld [vmem:[%s4957_s7 + $0x1d70] sm:$0xff]  ;;  %v3218_v13 = vadd.f32 %v2194_v6, %v1170_v5  ;;  %v2214_v2 = vld [vmem:[%s4964_s21 + $0x1e08] sm:$0xff] }
 0x3d4   : > { %4220 = vst [vmem:[%s4979_s28 + $0x1cb8] sm:$0xff] %v3196_v11  ;;  %v1172_v11 = vld [vmem:[%s4957_s7 + $0x1d78] sm:$0xff]  ;;  %v3219_v16 = vadd.f32 %v2195_v9, %v1171_v8  ;;  %v2215_v5 = vld [vmem:[%s4964_s21 + $0x1e10] sm:$0xff] }
 0x3d5   : > { %4221 = vst [vmem:[%s4979_s28 + $0x1cc0] sm:$0xff] %v3197_v14  ;;  %v1173_v14 = vld [vmem:[%s4957_s7 + $0x1d80] sm:$0xff]  ;;  %v3220_v19 = vadd.f32 %v2196_v12, %v1172_v11  ;;  %v2216_v8 = vld [vmem:[%s4964_s21 + $0x1e18] sm:$0xff] }
 0x3d6   : > { %4222 = vst [vmem:[%s4979_s28 + $0x1cc8] sm:$0xff] %v3198_v17  ;;  %v1174_v17 = vld [vmem:[%s4957_s7 + $0x1d88] sm:$0xff]  ;;  %v3221_v22 = vadd.f32 %v2197_v15, %v1173_v14  ;;  %v2217_v11 = vld [vmem:[%s4964_s21 + $0x1e20] sm:$0xff] }
 0x3d7   : > { %4223 = vst [vmem:[%s4979_s28 + $0x1cd0] sm:$0xff] %v3199_v20  ;;  %v1175_v20 = vld [vmem:[%s4957_s7 + $0x1d90] sm:$0xff]  ;;  %v3222_v25 = vadd.f32 %v2198_v18, %v1174_v17  ;;  %v2218_v14 = vld [vmem:[%s4964_s21 + $0x1e28] sm:$0xff] }
 0x3d8   : > { %4224 = vst [vmem:[%s4979_s28 + $0x1cd8] sm:$0xff] %v3200_v23  ;;  %v1176_v23 = vld [vmem:[%s4957_s7 + $0x1d98] sm:$0xff]  ;;  %v3223_v28 = vadd.f32 %v2199_v21, %v1175_v20  ;;  %v2219_v17 = vld [vmem:[%s4964_s21 + $0x1e30] sm:$0xff] }
 0x3d9   : > { %4225 = vst [vmem:[%s4979_s28 + $0x1ce0] sm:$0xff] %v3201_v26  ;;  %v1177_v26 = vld [vmem:[%s4957_s7 + $0x1da0] sm:$0xff]  ;;  %v3224_v31 = vadd.f32 %v2200_v24, %v1176_v23  ;;  %v2220_v20 = vld [vmem:[%s4964_s21 + $0x1e38] sm:$0xff] }
 0x3da   : > { %4226 = vst [vmem:[%s4979_s28 + $0x1ce8] sm:$0xff] %v3202_v29  ;;  %v1178_v29 = vld [vmem:[%s4957_s7 + $0x1da8] sm:$0xff]  ;;  %v3225_v34 = vadd.f32 %v2201_v27, %v1177_v26  ;;  %v2221_v23 = vld [vmem:[%s4964_s21 + $0x1e40] sm:$0xff] }
 0x3db   : > { %4227 = vst [vmem:[%s4979_s28 + $0x1cf0] sm:$0xff] %v3203_v32  ;;  %v1179_v32 = vld [vmem:[%s4957_s7 + $0x1db0] sm:$0xff]  ;;  %v3226_v37 = vadd.f32 %v2202_v30, %v1178_v29  ;;  %v2222_v26 = vld [vmem:[%s4964_s21 + $0x1e48] sm:$0xff] }
 0x3dc   : > { %4228 = vst [vmem:[%s4979_s28 + $0x1cf8] sm:$0xff] %v3204_v35  ;;  %v1180_v35 = vld [vmem:[%s4957_s7 + $0x1db8] sm:$0xff]  ;;  %v3227_v40 = vadd.f32 %v2203_v33, %v1179_v32  ;;  %v2223_v29 = vld [vmem:[%s4964_s21 + $0x1e50] sm:$0xff] }
 0x3dd   : > { %4229 = vst [vmem:[%s4979_s28 + $0x1d00] sm:$0xff] %v3205_v38  ;;  %v1181_v38 = vld [vmem:[%s4957_s7 + $0x1dc0] sm:$0xff]  ;;  %v3228_v43 = vadd.f32 %v2204_v36, %v1180_v35  ;;  %v2224_v32 = vld [vmem:[%s4964_s21 + $0x1e58] sm:$0xff] }
 0x3de   : > { %4230 = vst [vmem:[%s4979_s28 + $0x1d08] sm:$0xff] %v3206_v41  ;;  %v1182_v41 = vld [vmem:[%s4957_s7 + $0x1dc8] sm:$0xff]  ;;  %v3229_v46 = vadd.f32 %v2205_v39, %v1181_v38  ;;  %v2225_v35 = vld [vmem:[%s4964_s21 + $0x1e60] sm:$0xff] }
 0x3df   : > { %4231 = vst [vmem:[%s4979_s28 + $0x1d10] sm:$0xff] %v3207_v44  ;;  %v1183_v44 = vld [vmem:[%s4957_s7 + $0x1dd0] sm:$0xff]  ;;  %v3230_v49 = vadd.f32 %v2206_v42, %v1182_v41  ;;  %v2226_v38 = vld [vmem:[%s4964_s21 + $0x1e68] sm:$0xff] }
 0x3e0   : > { %4232 = vst [vmem:[%s4979_s28 + $0x1d18] sm:$0xff] %v3208_v47  ;;  %v1184_v47 = vld [vmem:[%s4957_s7 + $0x1dd8] sm:$0xff]  ;;  %v3231_v52 = vadd.f32 %v2207_v45, %v1183_v44  ;;  %v2227_v41 = vld [vmem:[%s4964_s21 + $0x1e70] sm:$0xff] }
 0x3e1   : > { %4233 = vst [vmem:[%s4979_s28 + $0x1d20] sm:$0xff] %v3209_v50  ;;  %v1185_v50 = vld [vmem:[%s4957_s7 + $0x1de0] sm:$0xff]  ;;  %v3232_v55 = vadd.f32 %v2208_v48, %v1184_v47  ;;  %v2228_v44 = vld [vmem:[%s4964_s21 + $0x1e78] sm:$0xff] }
 0x3e2   : > { %4234 = vst [vmem:[%s4979_s28 + $0x1d28] sm:$0xff] %v3210_v53  ;;  %v1186_v53 = vld [vmem:[%s4957_s7 + $0x1de8] sm:$0xff]  ;;  %v3233_v58 = vadd.f32 %v2209_v51, %v1185_v50  ;;  %v2229_v47 = vld [vmem:[%s4964_s21 + $0x1e80] sm:$0xff] }
 0x3e3   : > { %4235 = vst [vmem:[%s4979_s28 + $0x1d30] sm:$0xff] %v3211_v56  ;;  %v1187_v56 = vld [vmem:[%s4957_s7 + $0x1df0] sm:$0xff]  ;;  %v3234_v61 = vadd.f32 %v2210_v54, %v1186_v53  ;;  %v2230_v50 = vld [vmem:[%s4964_s21 + $0x1e88] sm:$0xff] }
 0x3e4   : > { %4236 = vst [vmem:[%s4979_s28 + $0x1d38] sm:$0xff] %v3212_v59  ;;  %v1188_v59 = vld [vmem:[%s4957_s7 + $0x1df8] sm:$0xff]  ;;  %v3235_v0 = vadd.f32 %v2211_v57, %v1187_v56  ;;  %v2231_v53 = vld [vmem:[%s4964_s21 + $0x1e90] sm:$0xff] }
 0x3e5   : > { %4237 = vst [vmem:[%s4979_s28 + $0x1d40] sm:$0xff] %v3213_v62  ;;  %v1189_v62 = vld [vmem:[%s4957_s7 + $0x1e00] sm:$0xff]  ;;  %v3236_v3 = vadd.f32 %v2212_v60, %v1188_v59  ;;  %v2232_v56 = vld [vmem:[%s4964_s21 + $0x1e98] sm:$0xff] }
 0x3e6   : > { %4238 = vst [vmem:[%s4979_s28 + $0x1d48] sm:$0xff] %v3214_v1  ;;  %v1190_v1 = vld [vmem:[%s4957_s7 + $0x1e08] sm:$0xff]  ;;  %v3237_v6 = vadd.f32 %v2213_v63, %v1189_v62  ;;  %v2233_v59 = vld [vmem:[%s4964_s21 + $0x1ea0] sm:$0xff] }
 0x3e7   : > { %4239 = vst [vmem:[%s4979_s28 + $0x1d50] sm:$0xff] %v3215_v4  ;;  %v1191_v4 = vld [vmem:[%s4957_s7 + $0x1e10] sm:$0xff]  ;;  %v3238_v9 = vadd.f32 %v2214_v2, %v1190_v1  ;;  %v2234_v62 = vld [vmem:[%s4964_s21 + $0x1ea8] sm:$0xff] }
 0x3e8   : > { %4240 = vst [vmem:[%s4979_s28 + $0x1d58] sm:$0xff] %v3216_v7  ;;  %v1192_v7 = vld [vmem:[%s4957_s7 + $0x1e18] sm:$0xff]  ;;  %v3239_v12 = vadd.f32 %v2215_v5, %v1191_v4  ;;  %v2235_v1 = vld [vmem:[%s4964_s21 + $0x1eb0] sm:$0xff] }
 0x3e9   : > { %4241 = vst [vmem:[%s4979_s28 + $0x1d60] sm:$0xff] %v3217_v10  ;;  %v1193_v10 = vld [vmem:[%s4957_s7 + $0x1e20] sm:$0xff]  ;;  %v3240_v15 = vadd.f32 %v2216_v8, %v1192_v7  ;;  %v2236_v4 = vld [vmem:[%s4964_s21 + $0x1eb8] sm:$0xff] }
 0x3ea   : > { %4242 = vst [vmem:[%s4979_s28 + $0x1d68] sm:$0xff] %v3218_v13  ;;  %v1194_v13 = vld [vmem:[%s4957_s7 + $0x1e28] sm:$0xff]  ;;  %v3241_v18 = vadd.f32 %v2217_v11, %v1193_v10  ;;  %v2237_v7 = vld [vmem:[%s4964_s21 + $0x1ec0] sm:$0xff] }
 0x3eb   : > { %4243 = vst [vmem:[%s4979_s28 + $0x1d70] sm:$0xff] %v3219_v16  ;;  %v1195_v16 = vld [vmem:[%s4957_s7 + $0x1e30] sm:$0xff]  ;;  %v3242_v21 = vadd.f32 %v2218_v14, %v1194_v13  ;;  %v2238_v10 = vld [vmem:[%s4964_s21 + $0x1ec8] sm:$0xff] }
 0x3ec   : > { %4244 = vst [vmem:[%s4979_s28 + $0x1d78] sm:$0xff] %v3220_v19  ;;  %v1196_v19 = vld [vmem:[%s4957_s7 + $0x1e38] sm:$0xff]  ;;  %v3243_v24 = vadd.f32 %v2219_v17, %v1195_v16  ;;  %v2239_v13 = vld [vmem:[%s4964_s21 + $0x1ed0] sm:$0xff] }
 0x3ed   : > { %4245 = vst [vmem:[%s4979_s28 + $0x1d80] sm:$0xff] %v3221_v22  ;;  %v1197_v22 = vld [vmem:[%s4957_s7 + $0x1e40] sm:$0xff]  ;;  %v3244_v27 = vadd.f32 %v2220_v20, %v1196_v19  ;;  %v2240_v16 = vld [vmem:[%s4964_s21 + $0x1ed8] sm:$0xff] }
 0x3ee   : > { %4246 = vst [vmem:[%s4979_s28 + $0x1d88] sm:$0xff] %v3222_v25  ;;  %v1198_v25 = vld [vmem:[%s4957_s7 + $0x1e48] sm:$0xff]  ;;  %v3245_v30 = vadd.f32 %v2221_v23, %v1197_v22  ;;  %v2241_v19 = vld [vmem:[%s4964_s21 + $0x1ee0] sm:$0xff] }
 0x3ef   : > { %4247 = vst [vmem:[%s4979_s28 + $0x1d90] sm:$0xff] %v3223_v28  ;;  %v1199_v28 = vld [vmem:[%s4957_s7 + $0x1e50] sm:$0xff]  ;;  %v3246_v33 = vadd.f32 %v2222_v26, %v1198_v25  ;;  %v2242_v22 = vld [vmem:[%s4964_s21 + $0x1ee8] sm:$0xff] }
 0x3f0   : > { %4248 = vst [vmem:[%s4979_s28 + $0x1d98] sm:$0xff] %v3224_v31  ;;  %v1200_v31 = vld [vmem:[%s4957_s7 + $0x1e58] sm:$0xff]  ;;  %v3247_v36 = vadd.f32 %v2223_v29, %v1199_v28  ;;  %v2243_v25 = vld [vmem:[%s4964_s21 + $0x1ef0] sm:$0xff] }
 0x3f1   : > { %4249 = vst [vmem:[%s4979_s28 + $0x1da0] sm:$0xff] %v3225_v34  ;;  %v1201_v34 = vld [vmem:[%s4957_s7 + $0x1e60] sm:$0xff]  ;;  %v3248_v39 = vadd.f32 %v2224_v32, %v1200_v31  ;;  %v2244_v28 = vld [vmem:[%s4964_s21 + $0x1ef8] sm:$0xff] }
 0x3f2   : > { %4250 = vst [vmem:[%s4979_s28 + $0x1da8] sm:$0xff] %v3226_v37  ;;  %v1202_v37 = vld [vmem:[%s4957_s7 + $0x1e68] sm:$0xff]  ;;  %v3249_v42 = vadd.f32 %v2225_v35, %v1201_v34  ;;  %v2245_v31 = vld [vmem:[%s4964_s21 + $0x1f00] sm:$0xff] }
 0x3f3   : > { %4251 = vst [vmem:[%s4979_s28 + $0x1db0] sm:$0xff] %v3227_v40  ;;  %v1203_v40 = vld [vmem:[%s4957_s7 + $0x1e70] sm:$0xff]  ;;  %v3250_v45 = vadd.f32 %v2226_v38, %v1202_v37  ;;  %v2246_v34 = vld [vmem:[%s4964_s21 + $0x1f08] sm:$0xff] }
 0x3f4   : > { %4252 = vst [vmem:[%s4979_s28 + $0x1db8] sm:$0xff] %v3228_v43  ;;  %v1204_v43 = vld [vmem:[%s4957_s7 + $0x1e78] sm:$0xff]  ;;  %v3251_v48 = vadd.f32 %v2227_v41, %v1203_v40  ;;  %v2247_v37 = vld [vmem:[%s4964_s21 + $0x1f10] sm:$0xff] }
 0x3f5   : > { %4253 = vst [vmem:[%s4979_s28 + $0x1dc0] sm:$0xff] %v3229_v46  ;;  %v1205_v46 = vld [vmem:[%s4957_s7 + $0x1e80] sm:$0xff]  ;;  %v3252_v51 = vadd.f32 %v2228_v44, %v1204_v43  ;;  %v2248_v40 = vld [vmem:[%s4964_s21 + $0x1f18] sm:$0xff] }
 0x3f6   : > { %4254 = vst [vmem:[%s4979_s28 + $0x1dc8] sm:$0xff] %v3230_v49  ;;  %v1206_v49 = vld [vmem:[%s4957_s7 + $0x1e88] sm:$0xff]  ;;  %v3253_v54 = vadd.f32 %v2229_v47, %v1205_v46  ;;  %v2249_v43 = vld [vmem:[%s4964_s21 + $0x1f20] sm:$0xff] }
 0x3f7   : > { %4255 = vst [vmem:[%s4979_s28 + $0x1dd0] sm:$0xff] %v3231_v52  ;;  %v1207_v52 = vld [vmem:[%s4957_s7 + $0x1e90] sm:$0xff]  ;;  %v3254_v57 = vadd.f32 %v2230_v50, %v1206_v49  ;;  %v2250_v46 = vld [vmem:[%s4964_s21 + $0x1f28] sm:$0xff] }
 0x3f8   : > { %4256 = vst [vmem:[%s4979_s28 + $0x1dd8] sm:$0xff] %v3232_v55  ;;  %v1208_v55 = vld [vmem:[%s4957_s7 + $0x1e98] sm:$0xff]  ;;  %v3255_v60 = vadd.f32 %v2231_v53, %v1207_v52  ;;  %v2251_v49 = vld [vmem:[%s4964_s21 + $0x1f30] sm:$0xff] }
 0x3f9   : > { %4257 = vst [vmem:[%s4979_s28 + $0x1de0] sm:$0xff] %v3233_v58  ;;  %v1209_v58 = vld [vmem:[%s4957_s7 + $0x1ea0] sm:$0xff]  ;;  %v3256_v63 = vadd.f32 %v2232_v56, %v1208_v55  ;;  %v2252_v52 = vld [vmem:[%s4964_s21 + $0x1f38] sm:$0xff] }
 0x3fa   : > { %4258 = vst [vmem:[%s4979_s28 + $0x1de8] sm:$0xff] %v3234_v61  ;;  %v1210_v61 = vld [vmem:[%s4957_s7 + $0x1ea8] sm:$0xff]  ;;  %v3257_v2 = vadd.f32 %v2233_v59, %v1209_v58  ;;  %v2253_v55 = vld [vmem:[%s4964_s21 + $0x1f40] sm:$0xff] }
 0x3fb   : > { %4259 = vst [vmem:[%s4979_s28 + $0x1df0] sm:$0xff] %v3235_v0  ;;  %v1211_v0 = vld [vmem:[%s4957_s7 + $0x1eb0] sm:$0xff]  ;;  %v3258_v5 = vadd.f32 %v2234_v62, %v1210_v61  ;;  %v2254_v58 = vld [vmem:[%s4964_s21 + $0x1f48] sm:$0xff] }
 0x3fc   : > { %4260 = vst [vmem:[%s4979_s28 + $0x1df8] sm:$0xff] %v3236_v3  ;;  %v1212_v3 = vld [vmem:[%s4957_s7 + $0x1eb8] sm:$0xff]  ;;  %v3259_v8 = vadd.f32 %v2235_v1, %v1211_v0  ;;  %v2255_v61 = vld [vmem:[%s4964_s21 + $0x1f50] sm:$0xff] }
 0x3fd   : > { %4261 = vst [vmem:[%s4979_s28 + $0x1e00] sm:$0xff] %v3237_v6  ;;  %v1213_v6 = vld [vmem:[%s4957_s7 + $0x1ec0] sm:$0xff]  ;;  %v3260_v11 = vadd.f32 %v2236_v4, %v1212_v3  ;;  %v2256_v0 = vld [vmem:[%s4964_s21 + $0x1f58] sm:$0xff] }
 0x3fe   : > { %4262 = vst [vmem:[%s4979_s28 + $0x1e08] sm:$0xff] %v3238_v9  ;;  %v1214_v9 = vld [vmem:[%s4957_s7 + $0x1ec8] sm:$0xff]  ;;  %v3261_v14 = vadd.f32 %v2237_v7, %v1213_v6  ;;  %v2257_v3 = vld [vmem:[%s4964_s21 + $0x1f60] sm:$0xff] }
 0x3ff   : > { %4263 = vst [vmem:[%s4979_s28 + $0x1e10] sm:$0xff] %v3239_v12  ;;  %v1215_v12 = vld [vmem:[%s4957_s7 + $0x1ed0] sm:$0xff]  ;;  %v3262_v17 = vadd.f32 %v2238_v10, %v1214_v9  ;;  %v2258_v6 = vld [vmem:[%s4964_s21 + $0x1f68] sm:$0xff] }
 0x400   : > { %4264 = vst [vmem:[%s4979_s28 + $0x1e18] sm:$0xff] %v3240_v15  ;;  %v1216_v15 = vld [vmem:[%s4957_s7 + $0x1ed8] sm:$0xff]  ;;  %v3263_v20 = vadd.f32 %v2239_v13, %v1215_v12  ;;  %v2259_v9 = vld [vmem:[%s4964_s21 + $0x1f70] sm:$0xff] }
 0x401   : > { %4265 = vst [vmem:[%s4979_s28 + $0x1e20] sm:$0xff] %v3241_v18  ;;  %v1217_v18 = vld [vmem:[%s4957_s7 + $0x1ee0] sm:$0xff]  ;;  %v3264_v23 = vadd.f32 %v2240_v16, %v1216_v15  ;;  %v2260_v12 = vld [vmem:[%s4964_s21 + $0x1f78] sm:$0xff] }
 0x402   : > { %4266 = vst [vmem:[%s4979_s28 + $0x1e28] sm:$0xff] %v3242_v21  ;;  %v1218_v21 = vld [vmem:[%s4957_s7 + $0x1ee8] sm:$0xff]  ;;  %v3265_v26 = vadd.f32 %v2241_v19, %v1217_v18  ;;  %v2261_v15 = vld [vmem:[%s4964_s21 + $0x1f80] sm:$0xff] }
 0x403   : > { %4267 = vst [vmem:[%s4979_s28 + $0x1e30] sm:$0xff] %v3243_v24  ;;  %v1219_v24 = vld [vmem:[%s4957_s7 + $0x1ef0] sm:$0xff]  ;;  %v3266_v29 = vadd.f32 %v2242_v22, %v1218_v21  ;;  %v2262_v18 = vld [vmem:[%s4964_s21 + $0x1f88] sm:$0xff] }
 0x404   : > { %4268 = vst [vmem:[%s4979_s28 + $0x1e38] sm:$0xff] %v3244_v27  ;;  %v1220_v27 = vld [vmem:[%s4957_s7 + $0x1ef8] sm:$0xff]  ;;  %v3267_v32 = vadd.f32 %v2243_v25, %v1219_v24  ;;  %v2263_v21 = vld [vmem:[%s4964_s21 + $0x1f90] sm:$0xff] }
 0x405   : > { %4269 = vst [vmem:[%s4979_s28 + $0x1e40] sm:$0xff] %v3245_v30  ;;  %v1221_v30 = vld [vmem:[%s4957_s7 + $0x1f00] sm:$0xff]  ;;  %v3268_v35 = vadd.f32 %v2244_v28, %v1220_v27  ;;  %v2264_v24 = vld [vmem:[%s4964_s21 + $0x1f98] sm:$0xff] }
 0x406   : > { %4270 = vst [vmem:[%s4979_s28 + $0x1e48] sm:$0xff] %v3246_v33  ;;  %v1222_v33 = vld [vmem:[%s4957_s7 + $0x1f08] sm:$0xff]  ;;  %v3269_v38 = vadd.f32 %v2245_v31, %v1221_v30  ;;  %v2265_v27 = vld [vmem:[%s4964_s21 + $0x1fa0] sm:$0xff] }
 0x407   : > { %4271 = vst [vmem:[%s4979_s28 + $0x1e50] sm:$0xff] %v3247_v36  ;;  %v1223_v36 = vld [vmem:[%s4957_s7 + $0x1f10] sm:$0xff]  ;;  %v3270_v41 = vadd.f32 %v2246_v34, %v1222_v33  ;;  %v2266_v30 = vld [vmem:[%s4964_s21 + $0x1fa8] sm:$0xff] }
 0x408   : > { %4272 = vst [vmem:[%s4979_s28 + $0x1e58] sm:$0xff] %v3248_v39  ;;  %v1224_v39 = vld [vmem:[%s4957_s7 + $0x1f18] sm:$0xff]  ;;  %v3271_v44 = vadd.f32 %v2247_v37, %v1223_v36  ;;  %v2267_v33 = vld [vmem:[%s4964_s21 + $0x1fb0] sm:$0xff] }
 0x409   : > { %4273 = vst [vmem:[%s4979_s28 + $0x1e60] sm:$0xff] %v3249_v42  ;;  %v1225_v42 = vld [vmem:[%s4957_s7 + $0x1f20] sm:$0xff]  ;;  %v3272_v47 = vadd.f32 %v2248_v40, %v1224_v39  ;;  %v2268_v36 = vld [vmem:[%s4964_s21 + $0x1fb8] sm:$0xff] }
 0x40a   : > { %4274 = vst [vmem:[%s4979_s28 + $0x1e68] sm:$0xff] %v3250_v45  ;;  %v1226_v45 = vld [vmem:[%s4957_s7 + $0x1f28] sm:$0xff]  ;;  %v3273_v50 = vadd.f32 %v2249_v43, %v1225_v42  ;;  %v2269_v39 = vld [vmem:[%s4964_s21 + $0x1fc0] sm:$0xff] }
 0x40b   : > { %4275 = vst [vmem:[%s4979_s28 + $0x1e70] sm:$0xff] %v3251_v48  ;;  %v1227_v48 = vld [vmem:[%s4957_s7 + $0x1f30] sm:$0xff]  ;;  %v3274_v53 = vadd.f32 %v2250_v46, %v1226_v45  ;;  %v2270_v42 = vld [vmem:[%s4964_s21 + $0x1fc8] sm:$0xff] }
 0x40c   : > { %4276 = vst [vmem:[%s4979_s28 + $0x1e78] sm:$0xff] %v3252_v51  ;;  %v1228_v51 = vld [vmem:[%s4957_s7 + $0x1f38] sm:$0xff]  ;;  %v3275_v56 = vadd.f32 %v2251_v49, %v1227_v48  ;;  %v2271_v45 = vld [vmem:[%s4964_s21 + $0x1fd0] sm:$0xff] }
 0x40d   : > { %4277 = vst [vmem:[%s4979_s28 + $0x1e80] sm:$0xff] %v3253_v54  ;;  %v1229_v54 = vld [vmem:[%s4957_s7 + $0x1f40] sm:$0xff]  ;;  %v3276_v59 = vadd.f32 %v2252_v52, %v1228_v51  ;;  %v2272_v48 = vld [vmem:[%s4964_s21 + $0x1fd8] sm:$0xff] }
 0x40e   : > { %4278 = vst [vmem:[%s4979_s28 + $0x1e88] sm:$0xff] %v3254_v57  ;;  %v1230_v57 = vld [vmem:[%s4957_s7 + $0x1f48] sm:$0xff]  ;;  %v3277_v62 = vadd.f32 %v2253_v55, %v1229_v54  ;;  %v2273_v51 = vld [vmem:[%s4964_s21 + $0x1fe0] sm:$0xff] }
 0x40f   : > { %4279 = vst [vmem:[%s4979_s28 + $0x1e90] sm:$0xff] %v3255_v60  ;;  %v1231_v60 = vld [vmem:[%s4957_s7 + $0x1f50] sm:$0xff]  ;;  %v3278_v1 = vadd.f32 %v2254_v58, %v1230_v57  ;;  %v2274_v54 = vld [vmem:[%s4964_s21 + $0x1fe8] sm:$0xff] }
 0x410   : > { %4280 = vst [vmem:[%s4979_s28 + $0x1e98] sm:$0xff] %v3256_v63  ;;  %v1232_v63 = vld [vmem:[%s4957_s7 + $0x1f58] sm:$0xff]  ;;  %v3279_v4 = vadd.f32 %v2255_v61, %v1231_v60  ;;  %v2275_v57 = vld [vmem:[%s4964_s21 + $0x1ff0] sm:$0xff] }
 0x411   : > { %4281 = vst [vmem:[%s4979_s28 + $0x1ea0] sm:$0xff] %v3257_v2  ;;  %v1233_v2 = vld [vmem:[%s4957_s7 + $0x1f60] sm:$0xff]  ;;  %v3280_v7 = vadd.f32 %v2256_v0, %v1232_v63  ;;  %v2276_v60 = vld [vmem:[%s4964_s21 + $0x1ff8] sm:$0xff] }
 0x412   : > { %4282 = vst [vmem:[%s4979_s28 + $0x1ea8] sm:$0xff] %v3258_v5  ;;  %v1234_v5 = vld [vmem:[%s4957_s7 + $0x1f68] sm:$0xff]  ;;  %v3281_v10 = vadd.f32 %v2257_v3, %v1233_v2 }
 0x413   : > { %4283 = vst [vmem:[%s4979_s28 + $0x1eb0] sm:$0xff] %v3259_v8  ;;  %v1235_v8 = vld [vmem:[%s4957_s7 + $0x1f70] sm:$0xff]  ;;  %v3282_v13 = vadd.f32 %v2258_v6, %v1234_v5 }
 0x414   : > { %4284 = vst [vmem:[%s4979_s28 + $0x1eb8] sm:$0xff] %v3260_v11  ;;  %v1236_v11 = vld [vmem:[%s4957_s7 + $0x1f78] sm:$0xff]  ;;  %v3283_v16 = vadd.f32 %v2259_v9, %v1235_v8 }
 0x415   : > { %4285 = vst [vmem:[%s4979_s28 + $0x1ec0] sm:$0xff] %v3261_v14  ;;  %v1237_v14 = vld [vmem:[%s4957_s7 + $0x1f80] sm:$0xff]  ;;  %v3284_v19 = vadd.f32 %v2260_v12, %v1236_v11 }
 0x416   : > { %4286 = vst [vmem:[%s4979_s28 + $0x1ec8] sm:$0xff] %v3262_v17  ;;  %v1238_v17 = vld [vmem:[%s4957_s7 + $0x1f88] sm:$0xff]  ;;  %v3285_v22 = vadd.f32 %v2261_v15, %v1237_v14 }
 0x417   : > { %4287 = vst [vmem:[%s4979_s28 + $0x1ed0] sm:$0xff] %v3263_v20  ;;  %v1239_v20 = vld [vmem:[%s4957_s7 + $0x1f90] sm:$0xff]  ;;  %v3286_v25 = vadd.f32 %v2262_v18, %v1238_v17 }
 0x418   : > { %4288 = vst [vmem:[%s4979_s28 + $0x1ed8] sm:$0xff] %v3264_v23  ;;  %v1240_v23 = vld [vmem:[%s4957_s7 + $0x1f98] sm:$0xff]  ;;  %v3287_v28 = vadd.f32 %v2263_v21, %v1239_v20 }
 0x419   : > { %4289 = vst [vmem:[%s4979_s28 + $0x1ee0] sm:$0xff] %v3265_v26  ;;  %v1241_v26 = vld [vmem:[%s4957_s7 + $0x1fa0] sm:$0xff]  ;;  %v3288_v31 = vadd.f32 %v2264_v24, %v1240_v23 }
 0x41a   : > { %4290 = vst [vmem:[%s4979_s28 + $0x1ee8] sm:$0xff] %v3266_v29  ;;  %v1242_v29 = vld [vmem:[%s4957_s7 + $0x1fa8] sm:$0xff]  ;;  %v3289_v34 = vadd.f32 %v2265_v27, %v1241_v26 }
 0x41b   : > { %4291 = vst [vmem:[%s4979_s28 + $0x1ef0] sm:$0xff] %v3267_v32  ;;  %v1243_v32 = vld [vmem:[%s4957_s7 + $0x1fb0] sm:$0xff]  ;;  %v3290_v37 = vadd.f32 %v2266_v30, %v1242_v29 }
 0x41c   : > { %4292 = vst [vmem:[%s4979_s28 + $0x1ef8] sm:$0xff] %v3268_v35  ;;  %v1244_v35 = vld [vmem:[%s4957_s7 + $0x1fb8] sm:$0xff]  ;;  %v3291_v40 = vadd.f32 %v2267_v33, %v1243_v32 }
 0x41d   : > { %4293 = vst [vmem:[%s4979_s28 + $0x1f00] sm:$0xff] %v3269_v38  ;;  %v1245_v38 = vld [vmem:[%s4957_s7 + $0x1fc0] sm:$0xff]  ;;  %v3292_v43 = vadd.f32 %v2268_v36, %v1244_v35 }
 0x41e   : > { %4294 = vst [vmem:[%s4979_s28 + $0x1f08] sm:$0xff] %v3270_v41  ;;  %v1246_v41 = vld [vmem:[%s4957_s7 + $0x1fc8] sm:$0xff]  ;;  %v3293_v46 = vadd.f32 %v2269_v39, %v1245_v38 }
 0x41f   : > { %4295 = vst [vmem:[%s4979_s28 + $0x1f10] sm:$0xff] %v3271_v44  ;;  %v1247_v44 = vld [vmem:[%s4957_s7 + $0x1fd0] sm:$0xff]  ;;  %v3294_v49 = vadd.f32 %v2270_v42, %v1246_v41 }
 0x420   : > { %4296 = vst [vmem:[%s4979_s28 + $0x1f18] sm:$0xff] %v3272_v47  ;;  %v1248_v47 = vld [vmem:[%s4957_s7 + $0x1fd8] sm:$0xff]  ;;  %v3295_v52 = vadd.f32 %v2271_v45, %v1247_v44 }
 0x421   : > { %4297 = vst [vmem:[%s4979_s28 + $0x1f20] sm:$0xff] %v3273_v50  ;;  %v1249_v50 = vld [vmem:[%s4957_s7 + $0x1fe0] sm:$0xff]  ;;  %v3296_v55 = vadd.f32 %v2272_v48, %v1248_v47 }
 0x422   : > { %4298 = vst [vmem:[%s4979_s28 + $0x1f28] sm:$0xff] %v3274_v53  ;;  %v1250_v53 = vld [vmem:[%s4957_s7 + $0x1fe8] sm:$0xff]  ;;  %v3297_v58 = vadd.f32 %v2273_v51, %v1249_v50 }
 0x423   : > { %4299 = vst [vmem:[%s4979_s28 + $0x1f30] sm:$0xff] %v3275_v56  ;;  %v1251_v56 = vld [vmem:[%s4957_s7 + $0x1ff0] sm:$0xff]  ;;  %v3298_v61 = vadd.f32 %v2274_v54, %v1250_v53 }
 0x424   : > { %4300 = vst [vmem:[%s4979_s28 + $0x1f38] sm:$0xff] %v3276_v59  ;;  %v1252_v59 = vld [vmem:[%s4957_s7 + $0x1ff8] sm:$0xff]  ;;  %s4672_s7 = scalar_lea.hbm %s4671_s3, 8192 }
 0x425   : > { %4301 = vst [vmem:[%s4979_s28 + $0x1f40] sm:$0xff] %v3277_v62  ;;  %v3299_v62 = vadd.f32 %v2275_v57, %v1251_v56  ;;  %v3300_v63 = vadd.f32 %v2276_v60, %v1252_v59  ;;  %p4673_p6 = scmp.ne.s32.totalorder %s4671_s3, %s4672_s7  ;;  %p4678_p4 = scmp.lt.s32.totalorder %s4676_s23, %s4672_s7 }
 0x426   : > { %4302 = vst [vmem:[%s4979_s28 + $0x1f48] sm:$0xff] %v3278_v1 }
 0x427   : > { %4303 = vst [vmem:[%s4979_s28 + $0x1f50] sm:$0xff] %v3279_v4  ;;  %p4674_p8 = pnand %p4673_p6, %p4891_p9  ;;  %p4679_p5 = por %p4678_p4, %p4677_p1 }
 0x428   : > { %4304 = vst [vmem:[%s4979_s28 + $0x1f58] sm:$0xff] %v3280_v7 }
 0x429   : > { %4305 = vst [vmem:[%s4979_s28 + $0x1f60] sm:$0xff] %v3281_v10  ;;  %p4675_p0 = pneg %p4674_p8 }
 0x42a   : > { %4306 = vst [vmem:[%s4979_s28 + $0x1f68] sm:$0xff] %v3282_v13 }
 0x42b   : > { %4307 = vst [vmem:[%s4979_s28 + $0x1f70] sm:$0xff] %v3283_v16  ;;  %p4680_p7 = pnand %p4679_p5, %p4675_p0 }
 0x42c   : > { %4308 = vst [vmem:[%s4979_s28 + $0x1f78] sm:$0xff] %v3284_v19 }
 0x42d   : > { %4309 = vst [vmem:[%s4979_s28 + $0x1f80] sm:$0xff] %v3285_v22 }
 0x42e   : > { %4310 = vst [vmem:[%s4979_s28 + $0x1f88] sm:$0xff] %v3286_v25 }
 0x42f   : > { %4311 = vst [vmem:[%s4979_s28 + $0x1f90] sm:$0xff] %v3287_v28 }
 0x430   : > { %4312 = vst [vmem:[%s4979_s28 + $0x1f98] sm:$0xff] %v3288_v31 }
 0x431   : > { %4313 = vst [vmem:[%s4979_s28 + $0x1fa0] sm:$0xff] %v3289_v34 }
 0x432   : > { %4314 = vst [vmem:[%s4979_s28 + $0x1fa8] sm:$0xff] %v3290_v37 }
 0x433   : > { %4315 = vst [vmem:[%s4979_s28 + $0x1fb0] sm:$0xff] %v3291_v40 }
 0x434   : > { %4316 = vst [vmem:[%s4979_s28 + $0x1fb8] sm:$0xff] %v3292_v43 }
 0x435   : > { %4317 = vst [vmem:[%s4979_s28 + $0x1fc0] sm:$0xff] %v3293_v46 }
 0x436   : > { %4318 = vst [vmem:[%s4979_s28 + $0x1fc8] sm:$0xff] %v3294_v49 }
 0x437   : > { %4319 = vst [vmem:[%s4979_s28 + $0x1fd0] sm:$0xff] %v3295_v52 }
 0x438   : > { %4320 = vst [vmem:[%s4979_s28 + $0x1fd8] sm:$0xff] %v3296_v55 }
 0x439   : > { %4321 = vst [vmem:[%s4979_s28 + $0x1fe0] sm:$0xff] %v3297_v58 }
 0x43a   : > { %4322 = vst [vmem:[%s4979_s28 + $0x1fe8] sm:$0xff] %v3298_v61 }
 0x43b   : > { %4323 = vst [vmem:[%s4979_s28 + $0x1ff0] sm:$0xff] %v3299_v62 }
 0x43c   : > { %4324 = vst [vmem:[%s4979_s28 + $0x1ff8] sm:$0xff] %v3300_v63 }
 0x43d   : > { %4683 = shalt.err (!%p4680_p7)
}
 0x43e   : > { %s4786_s27 = smov 2048   ;;  %s4787_s28 = smov 128  }
 0x43f   : > { %4489 = dma.vmem_to_hbm [thread:$0]  (%p4891_p9), %s4342_s22, 131072, %s4344_s9, %s4326_s24, %s4786_s27, %s4786_s27, %s4787_s28  }
 0x440 PF: > { %p4503_p10 = scmp.ge.s32.totalorder %s4782_s19, 2  ;;  %s4358_s15 = sand.u32 1, %s4754_s12  }
 0x441   : > { %s4359_s16 = scalar_lea.sflag [#allocation4], %s4358_s15 }
 0x442   : > { %p4499_p3 = pnand %p4503_p10, %p4901_p13 }
 0x444   : > { %p4500_p12 = pneg %p4499_p3 }
 0x446   : > { %4737 = dma.done.wait (%p4500_p12), %s4359_s16, 131072  }
 0x447   : > { %4739 = vsyncadd (%p4500_p12), %s4359_s16, 4294836224  ;;  %s21_s19 = sadd.s32 1, %s4782_s19   ;;  %s8119_s29 = sld [smem:[#allocation11_spill]] }
 0x448   : > { %p18_p11 = scmp.ge.s32.totalorder %s21_s19, 6   ;;  %s8120_s25 = sld [smem:[#allocation12_spill]] }
 0x449   : > { %s8121_s9 = smov %s4746_s10  ;;  %s8122_s10 = smov %s4750_s11 }
 0x44a   : > { %s8123_s11 = smov %s4931_s26  ;;  %s8124_s12 = smov %s4758_s13 }
 0x44b   : > { %s8125_s13 = smov %s4762_s14  ;;  %s8126_s14 = smov %s4907_s5 }
 0x44c   : > { %s8127_s15 = smov %s4774_s17  ;;  %s8128_s16 = smov %s4778_s18 }
 0x44d   : > { %s8129_s17 = smov %s8119_s29  ;;  %20 = sbr.rel (!%p18_p11) target bundleno = 13 (0xd), region = 86 }
 0x44e   : > { %s8130_s18 = smov %s8120_s25 }
 0x452   :  { %4365 = vsyncpa [#allocation3], 1 }
 0x453   :  { %4367 = vsyncpa [#allocation3 + $0x1], 1 }
 0x454   :  { %4368 = vsyncpa [#allocation6], 1 }
 0x455   :  { %4370 = vsyncpa [#allocation6 + $0x1], 1 }
 0x456   :  { %4371 = vsyncpa [#allocation4], 1 }
 0x457   :  { %4373 = vsyncpa [#allocation4 + $0x1], 1 }

</bundles_post_ra>
